<compile_context>
chip_gen: v7x
topology: tpu7x:2x2x1
jax: 0.10.0
libtpu: 0.0.40
codegen_flags: <defaults>
</compile_context>

<pallas_src>
import functools

import jax
import jax.numpy as jnp
from jax.experimental import pallas as pl
from jax.experimental.pallas import tpu as pltpu

_SINGLE_K_MAX = 4096            # whole-K-in-one-block path for K <= this
_TK = 512                       # K tile for the large-K fallback
_VMEM_LIMIT = 48 * 1024 * 1024  # < 64 MiB physical on v7x, > 32 MiB default


def _round_up(x, m):
    return x + (-x) % m


# --------------------------------------------------------------------------- #
# Pallas kernels                                                               #
# --------------------------------------------------------------------------- #
def _mm_act_kernel(x_ref, w_ref, o_ref, *, act):
    """Single-K-block matmul: o = act(x @ w).  bf16 operands, f32 accumulate."""
    r = jnp.dot(x_ref[...], w_ref[...], preferred_element_type=jnp.float32)
    if act == "relu":
        r = jnp.maximum(r, 0.0)
    o_ref[...] = r.astype(o_ref.dtype)


def _mm_act_kacc_kernel(x_ref, w_ref, o_ref, acc_ref, *, act, nsteps):
    """K-tiled fallback for very large K (kept for generality)."""
    k = pl.program_id(2)

    @pl.when(k == 0)
    def _():
        acc_ref[...] = jnp.zeros_like(acc_ref)

    acc_ref[...] += jnp.dot(x_ref[...], w_ref[...],
                            preferred_element_type=jnp.float32)

    @pl.when(k == nsteps - 1)
    def _():
        r = acc_ref[...]
        if act == "relu":
            r = jnp.maximum(r, 0.0)
        o_ref[...] = r.astype(o_ref.dtype)


# --------------------------------------------------------------------------- #
# Fused matmul + activation wrapper                                            #
# --------------------------------------------------------------------------- #
def matmul_act(x, w, act=None):
    """x: (M, K), w: (K, N) -> act(x @ w) in f32.  MXU runs in bf16."""
    M, K = x.shape
    N = w.shape[1]
    x = x.astype(jnp.bfloat16)
    w = w.astype(jnp.bfloat16)

    # ---- tile selection -----------------------------------------------------
    Mp = _round_up(M, 8)
    if Mp <= 512:
        TM = Mp
    else:
        for t in (512, 256, 128):
            if Mp % t == 0:
                TM = t
                break
        else:
            TM = 512
            Mp = _round_up(Mp, 512)

    Np = _round_up(N, 128)
    TN = 256 if Np % 256 == 0 else 128
    if (Mp // TM) * (Np // TN) == 1 and TN == 256:
        TN = 128          # keep >=2 parallel grid tiles (v7x megacore)

    if Mp != M:
        x = jnp.pad(x, ((0, Mp - M), (0, 0)))
    if Np != N:
        w = jnp.pad(w, ((0, 0), (0, Np - N)))

    if K <= _SINGLE_K_MAX:
        out = pl.pallas_call(
            functools.partial(_mm_act_kernel, act=act),
            out_shape=jax.ShapeDtypeStruct((Mp, Np), jnp.float32),
            grid_spec=pltpu.PrefetchScalarGridSpec(
                num_scalar_prefetch=0,
                grid=(Mp // TM, Np // TN),
                in_specs=[
                    pl.BlockSpec((TM, K), lambda i, j: (i, 0)),
                    pl.BlockSpec((K, TN), lambda i, j: (0, j)),
                ],
                out_specs=pl.BlockSpec((TM, TN), lambda i, j: (i, j)),
            ),
            compiler_params=pltpu.CompilerParams(
                dimension_semantics=("parallel", "parallel"),
                vmem_limit_bytes=_VMEM_LIMIT),
        )(x, w)
    else:
        Kp = _round_up(K, _TK)
        if Kp != K:
            x = jnp.pad(x, ((0, 0), (0, Kp - K)))
            w = jnp.pad(w, ((0, Kp - K), (0, 0)))
        kt = Kp // _TK
        out = pl.pallas_call(
            functools.partial(_mm_act_kacc_kernel, act=act, nsteps=kt),
            out_shape=jax.ShapeDtypeStruct((Mp, Np), jnp.float32),
            grid_spec=pltpu.PrefetchScalarGridSpec(
                num_scalar_prefetch=0,
                grid=(Mp // TM, Np // TN, kt),
                in_specs=[
                    pl.BlockSpec((TM, _TK), lambda i, j, k: (i, k)),
                    pl.BlockSpec((_TK, TN), lambda i, j, k: (k, j)),
                ],
                out_specs=pl.BlockSpec((TM, TN), lambda i, j, k: (i, j)),
                scratch_shapes=[pltpu.VMEM((TM, TN), jnp.float32)],
            ),
            compiler_params=pltpu.CompilerParams(
                dimension_semantics=("parallel", "parallel", "arbitrary"),
                vmem_limit_bytes=_VMEM_LIMIT),
        )(x, w)

    if Mp != M or Np != N:
        out = out[:M, :N]
    return out


# --------------------------------------------------------------------------- #
# Convolution helpers (NHWC activations, HWIO weights)                         #
# --------------------------------------------------------------------------- #
def conv2d_1x1(x, w2d, act=None):
    """x: (B,H,W,C), w2d: (C,Cout), stride 1, no bias."""
    B, H, W, C = x.shape
    cout = w2d.shape[1]
    out = matmul_act(x.reshape(B * H * W, C), w2d, act=act)
    return out.reshape(B, H, W, cout)


def conv2d_3x3_dilated(x, w, d, act=None):
    """3x3 conv, padding == dilation == d, stride 1, no bias ('same' output)."""
    B, H, W, C = x.shape
    cout = w.shape[-1]
    if d >= H and d >= W:
        # Off-center taps only ever read zero padding at this resolution:
        # the conv is exactly a 1x1 conv with the center weight slice.
        return conv2d_1x1(x, w[1, 1].reshape(C, cout), act=act)
    # im2col built directly in bf16 (half the materialized HBM of f32 im2col)
    xp = jnp.pad(x.astype(jnp.bfloat16), ((0, 0), (d, d), (d, d), (0, 0)))
    cols = [xp[:, ky * d:ky * d + H, kx * d:kx * d + W, :]
            for ky in range(3) for kx in range(3)]
    patches = jnp.concatenate(cols, axis=-1).reshape(B * H * W, 9 * C)
    out = matmul_act(patches, w.reshape(9 * C, cout), act=act)
    return out.reshape(B, H, W, cout)


# --------------------------------------------------------------------------- #
# ASPP parameters (deterministic He-normal init; all ASPP convs are bias-free) #
# --------------------------------------------------------------------------- #
def make_params(inplanes):
    base = jax.random.PRNGKey(0)
    ctr = [0]

    def nk():
        ctr[0] += 1
        return jax.random.fold_in(base, ctr[0])

    def conv(kh, kw, cin, cout):
        std = (2.0 / (kh * kw * cin)) ** 0.5
        w = jax.random.normal(nk(), (kh, kw, cin, cout), jnp.float32) * std
        return w.astype(jnp.bfloat16)   # stored bf16 once; no per-call cast

    return {
        "aspp1": conv(1, 1, inplanes, 256),
        "aspp2": conv(3, 3, inplanes, 256),
        "aspp3": conv(3, 3, inplanes, 256),
        "aspp4": conv(3, 3, inplanes, 256),
        "gap":   conv(1, 1, inplanes, 256),
        "conv1": conv(1, 1, 5 * 256, 256),
    }


# --------------------------------------------------------------------------- #
# ASPP forward                                                                 #
# --------------------------------------------------------------------------- #
def aspp_forward(P, x):
    B, H, W, C = x.shape
    x1 = conv2d_1x1(x, P["aspp1"].reshape(C, 256), act="relu")
    x2 = conv2d_3x3_dilated(x, P["aspp2"], 12, act="relu")
    x3 = conv2d_3x3_dilated(x, P["aspp3"], 24, act="relu")
    x4 = conv2d_3x3_dilated(x, P["aspp4"], 36, act="relu")
    gap = jnp.mean(x, axis=(1, 2), keepdims=True)             # AdaptiveAvgPool2d(1)
    x5 = conv2d_1x1(gap, P["gap"].reshape(C, 256), act="relu")
    # F.interpolate(1x1 -> HxW, bilinear, align_corners=True) == broadcast
    x5 = jnp.broadcast_to(x5, (B, H, W, 256))
    cat = jnp.concatenate([x1, x2, x3, x4, x5], axis=-1)
    out = conv2d_1x1(cat, P["conv1"].reshape(5 * 256, 256), act="relu")
    # TODO(synk): nn.Dropout(0.5) treated as identity (inference/eval semantics).
    return out


def aspp_apply(P, x_nchw):
    x = jnp.transpose(x_nchw, (0, 2, 3, 1))   # NCHW -> NHWC
    y = aspp_forward(P, x)
    return jnp.transpose(y, (0, 3, 1, 2))     # NHWC -> NCHW


if __name__ == "__main__":
    inplanes, B, H, W = 128, 2, 16, 16
    params = make_params(inplanes)
    x = jax.random.normal(jax.random.PRNGKey(0), (B, inplanes, H, W), jnp.float32)
    fwd = jax.jit(functools.partial(aspp_apply, params))
    out = jax.block_until_ready(fwd(x))
    assert out.shape == (B, 256, H, W), out.shape
    assert bool(jnp.all(jnp.isfinite(out)))
    print("KERNEL_OK")
</pallas_src>

<mosaic_0001>
module attributes {stable_mosaic.version = 11 : i64} {
  func.func @_mm_act_kernel(%arg0: i32, %arg1: i32, %arg2: memref<512x1152xbf16, #tpu.memory_space<vmem>>, %arg3: memref<1152x128xbf16, #tpu.memory_space<vmem>>, %arg4: memref<512x128xf32, #tpu.memory_space<vmem>>) attributes {dimension_semantics = [#tpu.dimension_semantics<parallel>, #tpu.dimension_semantics<parallel>], iteration_bounds = array<i64: 1, 2>, scalar_prefetch = 0 : i64, scratch_operands = 0 : i64, tpu.core_type = #tpu.core_type<tc>, window_params = [{transform_indices = @transform_0, window_bounds = array<i64: 512, 1152>}, {transform_indices = @transform_1, window_bounds = array<i64: 1152, 128>}, {transform_indices = @transform_2, window_bounds = array<i64: 512, 128>}]} {
    %c0 = arith.constant 0 : index
    %c0_0 = arith.constant 0 : index
    %0 = vector.load %arg2[%c0, %c0_0] : memref<512x1152xbf16, #tpu.memory_space<vmem>>, vector<512x1152xbf16>
    %c0_1 = arith.constant 0 : index
    %c0_2 = arith.constant 0 : index
    %1 = vector.load %arg3[%c0_1, %c0_2] : memref<1152x128xbf16, #tpu.memory_space<vmem>>, vector<1152x128xbf16>
    %cst = arith.constant dense<0.000000e+00> : vector<512x128xf32>
    %2 = tpu.matmul %0, %1, %cst {dimension_numbers = #tpu.dot_dimension_numbers<[1], [0], [0], [1], [0, 0, 1, 1], [], []>} : vector<512x1152xbf16>, vector<1152x128xbf16>, vector<512x128xf32> -> vector<512x128xf32>
    %cst_3 = arith.constant 0.000000e+00 : f32
    %3 = vector.broadcast %cst_3 : f32 to vector<512x128xf32>
    %4 = arith.maximumf %2, %3 : vector<512x128xf32>
    %c0_4 = arith.constant 0 : index
    %c0_5 = arith.constant 0 : index
    %5 = vector.load %arg4[%c0_4, %c0_5] : memref<512x128xf32, #tpu.memory_space<vmem>>, vector<512x128xf32>
    tpu.vector_store %arg4[%c0_4, %c0_5], %4 {strides = array<i32>} : memref<512x128xf32, #tpu.memory_space<vmem>>, vector<512x128xf32>,
    return
  }
  func.func @transform_0(%arg0: i32, %arg1: i32) -> (i32, i32) {
    %c0_i32 = arith.constant 0 : i32
    %c0_i32_0 = arith.constant 0 : i32
    return %arg0, %c0_i32 : i32, i32
  }
  func.func @transform_1(%arg0: i32, %arg1: i32) -> (i32, i32) {
    %c0_i32 = arith.constant 0 : i32
    %c0_i32_0 = arith.constant 0 : i32
    return %c0_i32, %arg1 : i32, i32
  }
  func.func @transform_2(%arg0: i32, %arg1: i32) -> (i32, i32) {
    %c0_i32 = arith.constant 0 : i32
    return %arg0, %arg1 : i32, i32
  }
}

module attributes {stable_mosaic.version = 11 : i64} {
  func.func @_mm_act_kernel(%arg0: i32, %arg1: i32, %arg2: memref<512x128xbf16, #tpu.memory_space<vmem>>, %arg3: memref<128x128xbf16, #tpu.memory_space<vmem>>, %arg4: memref<512x128xf32, #tpu.memory_space<vmem>>) attributes {dimension_semantics = [#tpu.dimension_semantics<parallel>, #tpu.dimension_semantics<parallel>], iteration_bounds = array<i64: 1, 2>, scalar_prefetch = 0 : i64, scratch_operands = 0 : i64, tpu.core_type = #tpu.core_type<tc>, window_params = [{transform_indices = @transform_0, window_bounds = array<i64: 512, 128>}, {transform_indices = @transform_1, window_bounds = array<i64: 128, 128>}, {transform_indices = @transform_2, window_bounds = array<i64: 512, 128>}]} {
    %c0 = arith.constant 0 : index
    %c0_0 = arith.constant 0 : index
    %0 = vector.load %arg2[%c0, %c0_0] : memref<512x128xbf16, #tpu.memory_space<vmem>>, vector<512x128xbf16>
    %c0_1 = arith.constant 0 : index
    %c0_2 = arith.constant 0 : index
    %1 = vector.load %arg3[%c0_1, %c0_2] : memref<128x128xbf16, #tpu.memory_space<vmem>>, vector<128x128xbf16>
    %cst = arith.constant dense<0.000000e+00> : vector<512x128xf32>
    %2 = tpu.matmul %0, %1, %cst {dimension_numbers = #tpu.dot_dimension_numbers<[1], [0], [0], [1], [0, 0, 1, 1], [], []>} : vector<512x128xbf16>, vector<128x128xbf16>, vector<512x128xf32> -> vector<512x128xf32>
    %cst_3 = arith.constant 0.000000e+00 : f32
    %3 = vector.broadcast %cst_3 : f32 to vector<512x128xf32>
    %4 = arith.maximumf %2, %3 : vector<512x128xf32>
    %c0_4 = arith.constant 0 : index
    %c0_5 = arith.constant 0 : index
    %5 = vector.load %arg4[%c0_4, %c0_5] : memref<512x128xf32, #tpu.memory_space<vmem>>, vector<512x128xf32>
    tpu.vector_store %arg4[%c0_4, %c0_5], %4 {strides = array<i32>} : memref<512x128xf32, #tpu.memory_space<vmem>>, vector<512x128xf32>,
    return
  }
  func.func @transform_0(%arg0: i32, %arg1: i32) -> (i32, i32) {
    %c0_i32 = arith.constant 0 : i32
    %c0_i32_0 = arith.constant 0 : i32
    return %arg0, %c0_i32 : i32, i32
  }
  func.func @transform_1(%arg0: i32, %arg1: i32) -> (i32, i32) {
    %c0_i32 = arith.constant 0 : i32
    %c0_i32_0 = arith.constant 0 : i32
    return %c0_i32, %arg1 : i32, i32
  }
  func.func @transform_2(%arg0: i32, %arg1: i32) -> (i32, i32) {
    %c0_i32 = arith.constant 0 : i32
    return %arg0, %arg1 : i32, i32
  }
}

module attributes {stable_mosaic.version = 11 : i64} {
  func.func @_mm_act_kernel(%arg0: i32, %arg1: i32, %arg2: memref<8x128xbf16, #tpu.memory_space<vmem>>, %arg3: memref<128x128xbf16, #tpu.memory_space<vmem>>, %arg4: memref<8x128xf32, #tpu.memory_space<vmem>>) attributes {dimension_semantics = [#tpu.dimension_semantics<parallel>, #tpu.dimension_semantics<parallel>], iteration_bounds = array<i64: 1, 2>, scalar_prefetch = 0 : i64, scratch_operands = 0 : i64, tpu.core_type = #tpu.core_type<tc>, window_params = [{transform_indices = @transform_0, window_bounds = array<i64: 8, 128>}, {transform_indices = @transform_1, window_bounds = array<i64: 128, 128>}, {transform_indices = @transform_2, window_bounds = array<i64: 8, 128>}]} {
    %c0 = arith.constant 0 : index
    %c0_0 = arith.constant 0 : index
    %0 = vector.load %arg2[%c0, %c0_0] : memref<8x128xbf16, #tpu.memory_space<vmem>>, vector<8x128xbf16>
    %c0_1 = arith.constant 0 : index
    %c0_2 = arith.constant 0 : index
    %1 = vector.load %arg3[%c0_1, %c0_2] : memref<128x128xbf16, #tpu.memory_space<vmem>>, vector<128x128xbf16>
    %cst = arith.constant dense<0.000000e+00> : vector<8x128xf32>
    %2 = tpu.matmul %0, %1, %cst {dimension_numbers = #tpu.dot_dimension_numbers<[1], [0], [0], [1], [0, 0, 1, 1], [], []>} : vector<8x128xbf16>, vector<128x128xbf16>, vector<8x128xf32> -> vector<8x128xf32>
    %cst_3 = arith.constant 0.000000e+00 : f32
    %3 = vector.broadcast %cst_3 : f32 to vector<8x128xf32>
    %4 = arith.maximumf %2, %3 : vector<8x128xf32>
    %c0_4 = arith.constant 0 : index
    %c0_5 = arith.constant 0 : index
    %5 = vector.load %arg4[%c0_4, %c0_5] : memref<8x128xf32, #tpu.memory_space<vmem>>, vector<8x128xf32>
    tpu.vector_store %arg4[%c0_4, %c0_5], %4 {strides = array<i32>} : memref<8x128xf32, #tpu.memory_space<vmem>>, vector<8x128xf32>,
    return
  }
  func.func @transform_0(%arg0: i32, %arg1: i32) -> (i32, i32) {
    %c0_i32 = arith.constant 0 : i32
    %c0_i32_0 = arith.constant 0 : i32
    return %arg0, %c0_i32 : i32, i32
  }
  func.func @transform_1(%arg0: i32, %arg1: i32) -> (i32, i32) {
    %c0_i32 = arith.constant 0 : i32
    %c0_i32_0 = arith.constant 0 : i32
    return %c0_i32, %arg1 : i32, i32
  }
  func.func @transform_2(%arg0: i32, %arg1: i32) -> (i32, i32) {
    %c0_i32 = arith.constant 0 : i32
    return %arg0, %arg1 : i32, i32
  }
}

module attributes {stable_mosaic.version = 11 : i64} {
  func.func @_mm_act_kernel(%arg0: i32, %arg1: i32, %arg2: memref<512x1280xbf16, #tpu.memory_space<vmem>>, %arg3: memref<1280x128xbf16, #tpu.memory_space<vmem>>, %arg4: memref<512x128xf32, #tpu.memory_space<vmem>>) attributes {dimension_semantics = [#tpu.dimension_semantics<parallel>, #tpu.dimension_semantics<parallel>], iteration_bounds = array<i64: 1, 2>, scalar_prefetch = 0 : i64, scratch_operands = 0 : i64, tpu.core_type = #tpu.core_type<tc>, window_params = [{transform_indices = @transform_0, window_bounds = array<i64: 512, 1280>}, {transform_indices = @transform_1, window_bounds = array<i64: 1280, 128>}, {transform_indices = @transform_2, window_bounds = array<i64: 512, 128>}]} {
    %c0 = arith.constant 0 : index
    %c0_0 = arith.constant 0 : index
    %0 = vector.load %arg2[%c0, %c0_0] : memref<512x1280xbf16, #tpu.memory_space<vmem>>, vector<512x1280xbf16>
    %c0_1 = arith.constant 0 : index
    %c0_2 = arith.constant 0 : index
    %1 = vector.load %arg3[%c0_1, %c0_2] : memref<1280x128xbf16, #tpu.memory_space<vmem>>, vector<1280x128xbf16>
    %cst = arith.constant dense<0.000000e+00> : vector<512x128xf32>
    %2 = tpu.matmul %0, %1, %cst {dimension_numbers = #tpu.dot_dimension_numbers<[1], [0], [0], [1], [0, 0, 1, 1], [], []>} : vector<512x1280xbf16>, vector<1280x128xbf16>, vector<512x128xf32> -> vector<512x128xf32>
    %cst_3 = arith.constant 0.000000e+00 : f32
    %3 = vector.broadcast %cst_3 : f32 to vector<512x128xf32>
    %4 = arith.maximumf %2, %3 : vector<512x128xf32>
    %c0_4 = arith.constant 0 : index
    %c0_5 = arith.constant 0 : index
    %5 = vector.load %arg4[%c0_4, %c0_5] : memref<512x128xf32, #tpu.memory_space<vmem>>, vector<512x128xf32>
    tpu.vector_store %arg4[%c0_4, %c0_5], %4 {strides = array<i32>} : memref<512x128xf32, #tpu.memory_space<vmem>>, vector<512x128xf32>,
    return
  }
  func.func @transform_0(%arg0: i32, %arg1: i32) -> (i32, i32) {
    %c0_i32 = arith.constant 0 : i32
    %c0_i32_0 = arith.constant 0 : i32
    return %arg0, %c0_i32 : i32, i32
  }
  func.func @transform_1(%arg0: i32, %arg1: i32) -> (i32, i32) {
    %c0_i32 = arith.constant 0 : i32
    %c0_i32_0 = arith.constant 0 : i32
    return %c0_i32, %arg1 : i32, i32
  }
  func.func @transform_2(%arg0: i32, %arg1: i32) -> (i32, i32) {
    %c0_i32 = arith.constant 0 : i32
    return %arg0, %arg1 : i32, i32
  }
}

</mosaic_0001>

<bundles_post_ra>
// kernel: aspp_apply.6
= control target key start
LH: loop header
LB: loop body
LE: loop exit
PB: predicated region body
PF: predicated region fallthrough
CT: control target
= control target key end

     0   :  { %s1717_s9 = smov 0   ;;  %s1719_s10 = smov 0   ;;  %s2113_s0 = inlined_call_operand.vmem [shape: bf16[512,128], index: 0, kind: input, shape index: {}]   ;;  %s2114_s1 = inlined_call_operand.vmem [shape: bf16[128,256], index: 1, kind: input, shape index: {}]   ;;  %s2115_s2 = inlined_call_operand.vmem [shape: f32[512,256], index: 2, kind: output, shape index: {}]  }
   0x1   :  { %s1721_s11 = smov 0   ;;  %s1723_s12 = smov 0  }
   0x2   :  { %s1725_s13 = smov 0  }
   0x3 LB: > { %s21_s14 = sadd.s32 1, %s1696_s12  ;;  %s1392_s15 = sadd.s32 4294967295, %s1700_s13   ;;  %s1700_s13 = sphi %s1725_s13, %s12_s13   ;;  %s1696_s12 = sphi %s1723_s12, %s2120_s12   ;;  %s1692_s11 = sphi %s1721_s11, %s2119_s11   ;;  %s1688_s10 = sphi %s1719_s10, %s2118_s10   ;;  %s1684_s9 = sphi %s1717_s9, %s2117_s9  }
   0x4   : > { %p22_p0 = scmp.ge.s32.totalorder %s21_s14, 2  ;;  %p64_p1 = scmp.ne.s32.totalorder %s1688_s10, %s1684_s9 }
   0x5   : > { %p65_p2 = scmp.eq.s32.totalorder %s1700_s13, 0  ;;  %p96_p4 = scmp.eq.s32.totalorder %s1392_s15, 1 }
   0x6   : > { %s2122_s14 = smov (%p22_p0, %s21_s14), 0  ;;  %s57_s17 = sadd.s32 1, %s1688_s10 }
   0x7   : > { %p66_p3 = por %p65_p2, %p64_p1  ;;  %s54_s16 = ssub.s32 %s1696_s12, %s2122_s14 }
   0x8   : > { %p55_p5 = scmp.eq.s32.totalorder %s54_s16, 0  ;;  %p1752_p6 = por %p96_p4, %p64_p1 }
   0x9   : > { %p1396_p7 = scmp.ge.s32.totalorder %s1700_s13, 2 }
   0xa   : > { %s1757_s19 = scalar_select %p55_p5, %s1688_s10, %s57_s17  }
   0xb   : > { %127 = sbr.rel (%p1396_p7) target bundleno = 32 (0x20), region = 20 }
  0x12   : > { %130 = sbr.rel (!%p66_p3) target bundleno = 32 (0x20), region = 24  ;;  %s132_s20 = sand.u32 (%p66_p3), 1, %s1688_s10  }
  0x13   : > { %s1398_s21 = sshll.u32 (%p66_p3), %s1696_s12, 2  ;;  %s1397_s22 = sshll.u32 (%p66_p3), %s132_s20, 6 }
  0x14   : > { %s1765_s25 = scalar_lea.vmem (%p66_p3), %s2114_s1, %s1398_s21  ;;  %s134_s26 = scalar_lea.vmem (%p66_p3), [#allocation2], %s1397_s22 }
  0x15   : > { %v152_v0 = vld [vmem:[%s1765_s25] sm:$0xf] (%p66_p3)  ;;  %v154_v1 = vld [vmem:[%s1765_s25 + $0x8] sm:$0xf] (%p66_p3)  ;;  %v156_v2 = vld [vmem:[%s1765_s25 + $0x10] sm:$0xf] (%p66_p3) }
  0x16   : > { %153 = vst [vmem:[%s134_s26] sm:$0xf] (%p66_p3), %v152_v0  ;;  %155 = vst [vmem:[%s134_s26 + $0x4] sm:$0xf] (%p66_p3), %v154_v1  ;;  %v158_v3 = vld [vmem:[%s1765_s25 + $0x18] sm:$0xf] (%p66_p3) }
  0x17   : > { %v160_v4 = vld [vmem:[%s1765_s25 + $0x20] sm:$0xf] (%p66_p3)  ;;  %157 = vst [vmem:[%s134_s26 + $0x8] sm:$0xf] (%p66_p3), %v156_v2  ;;  %159 = vst [vmem:[%s134_s26 + $0xc] sm:$0xf] (%p66_p3), %v158_v3 }
  0x18   : > { %161 = vst [vmem:[%s134_s26 + $0x10] sm:$0xf] (%p66_p3), %v160_v4  ;;  %v162_v5 = vld [vmem:[%s1765_s25 + $0x28] sm:$0xf] (%p66_p3)  ;;  %v164_v6 = vld [vmem:[%s1765_s25 + $0x30] sm:$0xf] (%p66_p3) }
  0x19   : > { %v166_v7 = vld [vmem:[%s1765_s25 + $0x38] sm:$0xf]  ;;  %163 = vst [vmem:[%s134_s26 + $0x14] sm:$0xf] %v162_v5  ;;  %165 = vst [vmem:[%s134_s26 + $0x18] sm:$0xf] %v164_v6 }
  0x1a   : > { %167 = vst [vmem:[%s134_s26 + $0x1c] sm:$0xf] %v166_v7  ;;  %v168_v8 = vld [vmem:[%s1765_s25 + $0x40] sm:$0xf]  ;;  %v170_v9 = vld [vmem:[%s1765_s25 + $0x48] sm:$0xf] }
  0x1b   : > { %v172_v10 = vld [vmem:[%s1765_s25 + $0x50] sm:$0xf]  ;;  %169 = vst [vmem:[%s134_s26 + $0x20] sm:$0xf] %v168_v8  ;;  %171 = vst [vmem:[%s134_s26 + $0x24] sm:$0xf] %v170_v9 }
  0x1c   : > { %173 = vst [vmem:[%s134_s26 + $0x28] sm:$0xf] %v172_v10  ;;  %v174_v11 = vld [vmem:[%s1765_s25 + $0x58] sm:$0xf]  ;;  %v176_v12 = vld [vmem:[%s1765_s25 + $0x60] sm:$0xf] }
  0x1d   : > { %v178_v13 = vld [vmem:[%s1765_s25 + $0x68] sm:$0xf]  ;;  %175 = vst [vmem:[%s134_s26 + $0x2c] sm:$0xf] %v174_v11  ;;  %177 = vst [vmem:[%s134_s26 + $0x30] sm:$0xf] %v176_v12 }
  0x1e   : > { %179 = vst [vmem:[%s134_s26 + $0x34] sm:$0xf] %v178_v13  ;;  %v180_v14 = vld [vmem:[%s1765_s25 + $0x70] sm:$0xf]  ;;  %v182_v15 = vld [vmem:[%s1765_s25 + $0x78] sm:$0xf] }
  0x1f   : > { %181 = vst [vmem:[%s134_s26 + $0x38] sm:$0xf] %v180_v14  ;;  %183 = vst [vmem:[%s134_s26 + $0x3c] sm:$0xf] %v182_v15 }
  0x20 PF: > { %p1399_p8 = scmp.ge.s32.totalorder %s1700_s13, 1  ;;  %p237_p9 = scmp.lt.s32.totalorder %s1700_s13, 3 }
  0x22   : > { %p238_p10 = pnand %p1399_p8, %p237_p9 }
  0x23   : > { %s244_s27 = sand.u32 (!%p238_p10), 1, %s1684_s9   ;;  %v1630_v16 = vld [vmem:[%s2113_s0] sm:$0xff] (!%p238_p10)   ;;  %v1632_v26 = vld [vmem:[%s2113_s0 + $0x8] sm:$0xff] (!%p238_p10)   ;;  %v1634_v28 = vld [vmem:[%s2113_s0 + $0x10] sm:$0xff] (!%p238_p10)  }
  0x24   : > { %241 = sbr.rel (%p238_p10) target bundleno = 365 (0x16d), region = 65  ;;  %s1400_s30 = sshll.u32 (!%p238_p10), %s244_s27, 6  ;;  %1502 = vmatprep.mubr.bf16.mxu0 (!%p238_p10), %v1630_v16  ;;  %v1631_v17 = vld [vmem:[%s2113_s0 + $0x80] sm:$0xff] (!%p238_p10)   ;;  %v1633_v27 = vld [vmem:[%s2113_s0 + $0x88] sm:$0xff] (!%p238_p10)   ;;  %v1635_v29 = vld [vmem:[%s2113_s0 + $0x90] sm:$0xff] (!%p238_p10)  }
  0x25   : > { %s1794_s5 = scalar_lea.vmem (!%p238_p10), [#allocation2], %s1400_s30  ;;  %1534 = vmatprep.mubr.bf16.mxu1 (!%p238_p10), %v1631_v17  ;;  %v1636_v30 = vld [vmem:[%s2113_s0 + $0x18] sm:$0xff] (!%p238_p10)   ;;  %v1638_v32 = vld [vmem:[%s2113_s0 + $0x20] sm:$0xff] (!%p238_p10)   ;;  %v1640_v34 = vld [vmem:[%s2113_s0 + $0x28] sm:$0xff] (!%p238_p10)   ;;  %s1401_s15 = sshll.u32 (!%p238_p10), %s244_s27, 9 }
  0x26   : > { %v1622_v18 = vld [vmem:[%s1794_s5] sm:$0xff] (!%p238_p10)   ;;  %v1623_v19 = vld [vmem:[%s1794_s5 + $0x8] sm:$0xff] (!%p238_p10)   ;;  %v1624_v20 = vld [vmem:[%s1794_s5 + $0x10] sm:$0xff] (!%p238_p10)   ;;  %s1896_s16 = scalar_lea.vmem (!%p238_p10), [#allocation3], %s1401_s15 }
  0x27   : > { %1486 = vmatprep.subr.bf16.mxu0 (!%p238_p10), %v1622_v18  ;;  %1566 = vmatprep.subr.bf16.mxu1 (!%p238_p10), %v1622_v18  ;;  %v1625_v21 = vld [vmem:[%s1794_s5 + $0x18] sm:$0xff] (!%p238_p10)   ;;  %v1626_v22 = vld [vmem:[%s1794_s5 + $0x20] sm:$0xff] (!%p238_p10)   ;;  %v1627_v23 = vld [vmem:[%s1794_s5 + $0x28] sm:$0xff] (!%p238_p10)  }
  0x28   : > { %1487 = vmatpush3.bf16.msra.mxu0 (!%p238_p10), %v1622_v18  ;;  %1574 = vmatpush3.bf16.msra.mxu1 (!%p238_p10), %v1622_v18  ;;  %v1628_v24 = vld [vmem:[%s1794_s5 + $0x30] sm:$0xff] (!%p238_p10)   ;;  %v1629_v25 = vld [vmem:[%s1794_s5 + $0x38] sm:$0xff] (!%p238_p10)   ;;  %v1639_v33 = vld [vmem:[%s2113_s0 + $0xa0] sm:$0xff] (!%p238_p10)  }
  0x29   : > { %1488 = vmatprep.subr.bf16.mxu0 (!%p238_p10), %v1623_v19  ;;  %1567 = vmatprep.subr.bf16.mxu1 (!%p238_p10), %v1623_v19  ;;  %v1637_v31 = vld [vmem:[%s2113_s0 + $0x98] sm:$0xff] (!%p238_p10)   ;;  %v1641_v35 = vld [vmem:[%s2113_s0 + $0xa8] sm:$0xff] (!%p238_p10)   ;;  %v1642_v36 = vld [vmem:[%s2113_s0 + $0x30] sm:$0xff] (!%p238_p10)  }
  0x2a   : > { %v1643_v37 = vld [vmem:[%s2113_s0 + $0xb0] sm:$0xff] (!%p238_p10)   ;;  %v1644_v38 = vld [vmem:[%s2113_s0 + $0x38] sm:$0xff] (!%p238_p10)   ;;  %v1646_v40 = vld [vmem:[%s2113_s0 + $0x40] sm:$0xff] (!%p238_p10)  }
  0x2b   : > { %v1645_v39 = vld [vmem:[%s2113_s0 + $0xb8] sm:$0xff]   ;;  %v1647_v41 = vld [vmem:[%s2113_s0 + $0xc0] sm:$0xff]   ;;  %v1648_v42 = vld [vmem:[%s2113_s0 + $0x48] sm:$0xff]   ;;  %s1443_s9 = sshll.u32 (%p1752_p6), %s1692_s11, 3 }
  0x2c   : > { %1489 = vmatpush3.bf16.msra.mxu0 %v1623_v19  ;;  %1575 = vmatpush3.bf16.msra.mxu1 %v1623_v19  ;;  %v1649_v43 = vld [vmem:[%s2113_s0 + $0xc8] sm:$0xff]   ;;  %v1650_v44 = vld [vmem:[%s2113_s0 + $0x50] sm:$0xff]   ;;  %v1652_v46 = vld [vmem:[%s2113_s0 + $0x58] sm:$0xff]   ;;  %s1971_s20 = scalar_lea.vmem (%p1752_p6), %s2115_s2, %s1443_s9 }
  0x2d   : > { %1490 = vmatprep.subr.bf16.mxu0 %v1624_v20  ;;  %1568 = vmatprep.subr.bf16.mxu1 %v1624_v20  ;;  %v1651_v45 = vld [vmem:[%s2113_s0 + $0xd0] sm:$0xff]   ;;  %v1653_v47 = vld [vmem:[%s2113_s0 + $0xd8] sm:$0xff]   ;;  %v1654_v48 = vld [vmem:[%s2113_s0 + $0x60] sm:$0xff]  }
  0x2e   : > { %v1655_v49 = vld [vmem:[%s2113_s0 + $0xe0] sm:$0xff]   ;;  %v1656_v50 = vld [vmem:[%s2113_s0 + $0x68] sm:$0xff]   ;;  %v1658_v52 = vld [vmem:[%s2113_s0 + $0x70] sm:$0xff]  }
  0x2f   : > { %v1657_v51 = vld [vmem:[%s2113_s0 + $0xe8] sm:$0xff]   ;;  %v1659_v53 = vld [vmem:[%s2113_s0 + $0xf0] sm:$0xff]   ;;  %v1660_v54 = vld [vmem:[%s2113_s0 + $0x78] sm:$0xff]  }
  0x30   : > { %1491 = vmatpush3.bf16.msra.mxu0 %v1624_v20  ;;  %1576 = vmatpush3.bf16.msra.mxu1 %v1624_v20  ;;  %v1661_v55 = vld [vmem:[%s2113_s0 + $0xf8] sm:$0xff]  }
  0x31   : > { %1492 = vmatprep.subr.bf16.mxu0 %v1625_v21  ;;  %1569 = vmatprep.subr.bf16.mxu1 %v1625_v21 }
  0x34   : > { %1493 = vmatpush3.bf16.msra.mxu0 %v1625_v21  ;;  %1577 = vmatpush3.bf16.msra.mxu1 %v1625_v21 }
  0x35   : > { %1494 = vmatprep.subr.bf16.mxu0 %v1626_v22  ;;  %1570 = vmatprep.subr.bf16.mxu1 %v1626_v22 }
  0x38   : > { %1495 = vmatpush3.bf16.msra.mxu0 %v1626_v22  ;;  %1578 = vmatpush3.bf16.msra.mxu1 %v1626_v22 }
  0x39   : > { %1496 = vmatprep.subr.bf16.mxu0 %v1627_v23  ;;  %1571 = vmatprep.subr.bf16.mxu1 %v1627_v23 }
  0x3c   : > { %1497 = vmatpush3.bf16.msra.mxu0 %v1627_v23  ;;  %1579 = vmatpush3.bf16.msra.mxu1 %v1627_v23 }
  0x3d   : > { %1498 = vmatprep.subr.bf16.mxu0 %v1628_v24  ;;  %1572 = vmatprep.subr.bf16.mxu1 %v1628_v24 }
  0x40   : > { %1499 = vmatpush3.bf16.msra.mxu0 %v1628_v24  ;;  %1580 = vmatpush3.bf16.msra.mxu1 %v1628_v24 }
  0x41   : > { %1500 = vmatprep.subr.bf16.mxu0 %v1629_v25  ;;  %1573 = vmatprep.subr.bf16.mxu1 %v1629_v25 }
  0x44   : > { %1501 = vmatpush3.bf16.msra.mxu0 %v1629_v25  ;;  %1581 = vmatpush3.bf16.msra.mxu1 %v1629_v25 }
  0x47   : > { %1503 = vmatmul.mubr.bf16.vlgmr.msra.gmra.mrb[0].mxu0 %v1632_v26  ;;  %1535 = vmatmul.mubr.bf16.vlgmr.msra.gmra.mrb[0].mxu1 %v1633_v27 }
  0x48   : > { %1506 = vmatprep.mubr.bf16.mxu0 %v1634_v28  ;;  %1538 = vmatprep.mubr.bf16.mxu1 %v1635_v29 }
  0x4f   : > { %1507 = vmatmul.mubr.bf16.gmra.mrb[4].mxu0 %v1636_v30  ;;  %1539 = vmatmul.mubr.bf16.gmra.mrb[4].mxu1 %v1637_v31 }
  0x50   : > { %1510 = vmatprep.mubr.bf16.mxu0 %v1638_v32  ;;  %1542 = vmatprep.mubr.bf16.mxu1 %v1639_v33 }
  0x57   : > { %1511 = vmatmul.mubr.bf16.gmra.mrb[8].mxu0 %v1640_v34  ;;  %1543 = vmatmul.mubr.bf16.gmra.mrb[8].mxu1 %v1641_v35 }
  0x58   : > { %1514 = vmatprep.mubr.bf16.mxu0 %v1642_v36  ;;  %1546 = vmatprep.mubr.bf16.mxu1 %v1643_v37 }
  0x5f   : > { %1515 = vmatmul.mubr.bf16.gmra.mrb[12].mxu0 %v1644_v38  ;;  %1547 = vmatmul.mubr.bf16.gmra.mrb[12].mxu1 %v1645_v39 }
  0x60   : > { %1518 = vmatprep.mubr.bf16.mxu0 %v1646_v40  ;;  %1550 = vmatprep.mubr.bf16.mxu1 %v1647_v41 }
  0x67   : > { %1519 = vmatmul.mubr.bf16.gmra.mrb[16].mxu0 %v1648_v42  ;;  %1551 = vmatmul.mubr.bf16.gmra.mrb[16].mxu1 %v1649_v43 }
  0x68   : > { %1522 = vmatprep.mubr.bf16.mxu0 %v1650_v44  ;;  %1554 = vmatprep.mubr.bf16.mxu1 %v1651_v45 }
  0x6f   : > { %1523 = vmatmul.mubr.bf16.gmra.mrb[20].mxu0 %v1652_v46  ;;  %1555 = vmatmul.mubr.bf16.gmra.mrb[20].mxu1 %v1653_v47 }
  0x70   : > { %1526 = vmatprep.mubr.bf16.mxu0 %v1654_v48  ;;  %1558 = vmatprep.mubr.bf16.mxu1 %v1655_v49 }
  0x77   : > { %1527 = vmatmul.mubr.bf16.gmra.mrb[24].mxu0 %v1656_v50  ;;  %1559 = vmatmul.mubr.bf16.gmra.mrb[24].mxu1 %v1657_v51 }
  0x78   : > { %1530 = vmatprep.mubr.bf16.mxu0 %v1658_v52  ;;  %1562 = vmatprep.mubr.bf16.mxu1 %v1659_v53 }
  0x7f   : > { %1531 = vmatmul.mubr.bf16.gmra.mrb[28].mxu0 %v1660_v54  ;;  %1563 = vmatmul.mubr.bf16.gmra.mrb[28].mxu1 %v1661_v55 }
 0x11a   : > { %v1504_v56 = vpop.f32.mrb[0].mxu0  ;;  %v1536_v57 = vpop.f32.mrb[0].mxu1 }
 0x11b   : > { %v888_v58 = vmax.f32 %v1504_v56, 0.0  ;;  %v920_v59 = vmax.f32 %v1536_v57, 0.0  ;;  %v631_v60 = vpop.f32.mrb[1].mxu0  ;;  %v759_v61 = vpop.f32.mrb[1].mxu1 }
 0x11c   : > { %v886_v62 = vmax.f32 %v631_v60, 0.0  ;;  %v918_v63 = vmax.f32 %v759_v61, 0.0  ;;  %v1505_v0 = vpop.f32.mrb[2].mxu0  ;;  %v1537_v1 = vpop.f32.mrb[2].mxu1 }
 0x11d   : > { %952 = vst [vmem:[%s1896_s16 + $0x10] sm:$0xff] %v888_v58  ;;  %984 = vst [vmem:[%s1896_s16 + $0x110] sm:$0xff] %v920_v59  ;;  %v889_v2 = vmax.f32 %v1505_v0, 0.0  ;;  %v921_v3 = vmax.f32 %v1537_v1, 0.0  ;;  %v634_v4 = vpop.f32.mrb[3].mxu0  ;;  %v762_v5 = vpop.f32.mrb[3].mxu1 }
 0x11e   : > { %950 = vst [vmem:[%s1896_s16] sm:$0xff] %v886_v62  ;;  %982 = vst [vmem:[%s1896_s16 + $0x100] sm:$0xff] %v918_v63  ;;  %v887_v6 = vmax.f32 %v634_v4, 0.0  ;;  %v919_v7 = vmax.f32 %v762_v5, 0.0 }
 0x11f   : > { %953 = vst [vmem:[%s1896_s16 + $0x18] sm:$0xff] %v889_v2  ;;  %985 = vst [vmem:[%s1896_s16 + $0x118] sm:$0xff] %v921_v3 }
 0x120   : > { %951 = vst [vmem:[%s1896_s16 + $0x8] sm:$0xff] %v887_v6  ;;  %983 = vst [vmem:[%s1896_s16 + $0x108] sm:$0xff] %v919_v7 }
 0x122   : > { %v1508_v8 = vpop.f32.mrb[4].mxu0  ;;  %v1540_v9 = vpop.f32.mrb[4].mxu1 }
 0x123   : > { %v892_v10 = vmax.f32 %v1508_v8, 0.0  ;;  %v924_v11 = vmax.f32 %v1540_v9, 0.0  ;;  %v647_v12 = vpop.f32.mrb[5].mxu0  ;;  %v775_v13 = vpop.f32.mrb[5].mxu1 }
 0x124   : > { %v890_v14 = vmax.f32 %v647_v12, 0.0  ;;  %v922_v15 = vmax.f32 %v775_v13, 0.0  ;;  %v1509_v16 = vpop.f32.mrb[6].mxu0  ;;  %v1541_v17 = vpop.f32.mrb[6].mxu1 }
 0x125   : > { %956 = vst [vmem:[%s1896_s16 + $0x30] sm:$0xff] %v892_v10  ;;  %988 = vst [vmem:[%s1896_s16 + $0x130] sm:$0xff] %v924_v11  ;;  %v893_v18 = vmax.f32 %v1509_v16, 0.0  ;;  %v925_v19 = vmax.f32 %v1541_v17, 0.0  ;;  %v650_v20 = vpop.f32.mrb[7].mxu0  ;;  %v778_v21 = vpop.f32.mrb[7].mxu1 }
 0x126   : > { %954 = vst [vmem:[%s1896_s16 + $0x20] sm:$0xff] %v890_v14  ;;  %986 = vst [vmem:[%s1896_s16 + $0x120] sm:$0xff] %v922_v15  ;;  %v891_v22 = vmax.f32 %v650_v20, 0.0  ;;  %v923_v23 = vmax.f32 %v778_v21, 0.0 }
 0x127   : > { %957 = vst [vmem:[%s1896_s16 + $0x38] sm:$0xff] %v893_v18  ;;  %989 = vst [vmem:[%s1896_s16 + $0x138] sm:$0xff] %v925_v19 }
 0x128   : > { %955 = vst [vmem:[%s1896_s16 + $0x28] sm:$0xff] %v891_v22  ;;  %987 = vst [vmem:[%s1896_s16 + $0x128] sm:$0xff] %v923_v23 }
 0x12a   : > { %v1512_v24 = vpop.f32.mrb[8].mxu0  ;;  %v1544_v25 = vpop.f32.mrb[8].mxu1 }
 0x12b   : > { %v896_v26 = vmax.f32 %v1512_v24, 0.0  ;;  %v928_v27 = vmax.f32 %v1544_v25, 0.0  ;;  %v663_v28 = vpop.f32.mrb[9].mxu0  ;;  %v791_v29 = vpop.f32.mrb[9].mxu1 }
 0x12c   : > { %v894_v30 = vmax.f32 %v663_v28, 0.0  ;;  %v926_v31 = vmax.f32 %v791_v29, 0.0  ;;  %v1513_v32 = vpop.f32.mrb[10].mxu0  ;;  %v1545_v33 = vpop.f32.mrb[10].mxu1 }
 0x12d   : > { %960 = vst [vmem:[%s1896_s16 + $0x50] sm:$0xff] %v896_v26  ;;  %992 = vst [vmem:[%s1896_s16 + $0x150] sm:$0xff] %v928_v27  ;;  %v897_v34 = vmax.f32 %v1513_v32, 0.0  ;;  %v929_v35 = vmax.f32 %v1545_v33, 0.0  ;;  %v666_v36 = vpop.f32.mrb[11].mxu0  ;;  %v794_v37 = vpop.f32.mrb[11].mxu1 }
 0x12e   : > { %958 = vst [vmem:[%s1896_s16 + $0x40] sm:$0xff] %v894_v30  ;;  %990 = vst [vmem:[%s1896_s16 + $0x140] sm:$0xff] %v926_v31  ;;  %v895_v38 = vmax.f32 %v666_v36, 0.0  ;;  %v927_v39 = vmax.f32 %v794_v37, 0.0 }
 0x12f   : > { %961 = vst [vmem:[%s1896_s16 + $0x58] sm:$0xff] %v897_v34  ;;  %993 = vst [vmem:[%s1896_s16 + $0x158] sm:$0xff] %v929_v35 }
 0x130   : > { %959 = vst [vmem:[%s1896_s16 + $0x48] sm:$0xff] %v895_v38  ;;  %991 = vst [vmem:[%s1896_s16 + $0x148] sm:$0xff] %v927_v39 }
 0x132   : > { %v1516_v40 = vpop.f32.mrb[12].mxu0  ;;  %v1548_v41 = vpop.f32.mrb[12].mxu1 }
 0x133   : > { %v900_v42 = vmax.f32 %v1516_v40, 0.0  ;;  %v932_v43 = vmax.f32 %v1548_v41, 0.0  ;;  %v679_v44 = vpop.f32.mrb[13].mxu0  ;;  %v807_v45 = vpop.f32.mrb[13].mxu1 }
 0x134   : > { %v898_v46 = vmax.f32 %v679_v44, 0.0  ;;  %v930_v47 = vmax.f32 %v807_v45, 0.0  ;;  %v1517_v48 = vpop.f32.mrb[14].mxu0  ;;  %v1549_v49 = vpop.f32.mrb[14].mxu1 }
 0x135   : > { %964 = vst [vmem:[%s1896_s16 + $0x70] sm:$0xff] %v900_v42  ;;  %996 = vst [vmem:[%s1896_s16 + $0x170] sm:$0xff] %v932_v43  ;;  %v901_v50 = vmax.f32 %v1517_v48, 0.0  ;;  %v933_v51 = vmax.f32 %v1549_v49, 0.0  ;;  %v682_v52 = vpop.f32.mrb[15].mxu0  ;;  %v810_v53 = vpop.f32.mrb[15].mxu1 }
 0x136   : > { %962 = vst [vmem:[%s1896_s16 + $0x60] sm:$0xff] %v898_v46  ;;  %994 = vst [vmem:[%s1896_s16 + $0x160] sm:$0xff] %v930_v47  ;;  %v899_v54 = vmax.f32 %v682_v52, 0.0  ;;  %v931_v55 = vmax.f32 %v810_v53, 0.0 }
 0x137   : > { %965 = vst [vmem:[%s1896_s16 + $0x78] sm:$0xff] %v901_v50  ;;  %997 = vst [vmem:[%s1896_s16 + $0x178] sm:$0xff] %v933_v51 }
 0x138   : > { %963 = vst [vmem:[%s1896_s16 + $0x68] sm:$0xff] %v899_v54  ;;  %995 = vst [vmem:[%s1896_s16 + $0x168] sm:$0xff] %v931_v55 }
 0x13a   : > { %v1520_v56 = vpop.f32.mrb[16].mxu0  ;;  %v1552_v57 = vpop.f32.mrb[16].mxu1 }
 0x13b   : > { %v904_v58 = vmax.f32 %v1520_v56, 0.0  ;;  %v936_v59 = vmax.f32 %v1552_v57, 0.0  ;;  %v695_v60 = vpop.f32.mrb[17].mxu0  ;;  %v823_v61 = vpop.f32.mrb[17].mxu1  ;;  %v1179_v56 = vld [vmem:[%s1896_s16] sm:$0xff] (%p1752_p6)  ;;  %v1181_v57 = vld [vmem:[%s1896_s16 + $0x8] sm:$0xff] (%p1752_p6) }
 0x13c   : > { %v902_v62 = vmax.f32 %v695_v60, 0.0  ;;  %v934_v63 = vmax.f32 %v823_v61, 0.0  ;;  %v1521_v0 = vpop.f32.mrb[18].mxu0  ;;  %v1553_v1 = vpop.f32.mrb[18].mxu1  ;;  %v1187_v60 = vld [vmem:[%s1896_s16 + $0x20] sm:$0xff] (%p1752_p6)  ;;  %v1189_v61 = vld [vmem:[%s1896_s16 + $0x28] sm:$0xff] (%p1752_p6)  ;;  %1180 = vst [vmem:[%s1971_s20] sm:$0xff] (%p1752_p6), %v1179_v56 }
 0x13d   : > { %968 = vst [vmem:[%s1896_s16 + $0x90] sm:$0xff] %v904_v58  ;;  %1000 = vst [vmem:[%s1896_s16 + $0x190] sm:$0xff] %v936_v59  ;;  %v905_v2 = vmax.f32 %v1521_v0, 0.0  ;;  %v937_v3 = vmax.f32 %v1553_v1, 0.0  ;;  %v698_v4 = vpop.f32.mrb[19].mxu0  ;;  %v826_v5 = vpop.f32.mrb[19].mxu1 }
 0x13e   : > { %966 = vst [vmem:[%s1896_s16 + $0x80] sm:$0xff] %v902_v62  ;;  %998 = vst [vmem:[%s1896_s16 + $0x180] sm:$0xff] %v934_v63  ;;  %v903_v6 = vmax.f32 %v698_v4, 0.0  ;;  %v935_v7 = vmax.f32 %v826_v5, 0.0  ;;  %v1183_v58 = vld [vmem:[%s1896_s16 + $0x10] sm:$0xff] (%p1752_p6)  ;;  %v1185_v59 = vld [vmem:[%s1896_s16 + $0x18] sm:$0xff] (%p1752_p6) }
 0x13f   : > { %969 = vst [vmem:[%s1896_s16 + $0x98] sm:$0xff] %v905_v2  ;;  %1001 = vst [vmem:[%s1896_s16 + $0x198] sm:$0xff] %v937_v3  ;;  %v1191_v62 = vld [vmem:[%s1896_s16 + $0x30] sm:$0xff] (%p1752_p6)  ;;  %v1193_v63 = vld [vmem:[%s1896_s16 + $0x38] sm:$0xff] (%p1752_p6) }
 0x140   : > { %967 = vst [vmem:[%s1896_s16 + $0x88] sm:$0xff] %v903_v6  ;;  %999 = vst [vmem:[%s1896_s16 + $0x188] sm:$0xff] %v935_v7  ;;  %v1195_v0 = vld [vmem:[%s1896_s16 + $0x40] sm:$0xff] (%p1752_p6)  ;;  %v1197_v1 = vld [vmem:[%s1896_s16 + $0x48] sm:$0xff] (%p1752_p6) }
 0x141   : > { %1182 = vst [vmem:[%s1971_s20 + $0x10] sm:$0xff] (%p1752_p6), %v1181_v57  ;;  %1184 = vst [vmem:[%s1971_s20 + $0x20] sm:$0xff] (%p1752_p6), %v1183_v58  ;;  %v1199_v2 = vld [vmem:[%s1896_s16 + $0x50] sm:$0xff] (%p1752_p6)  ;;  %v1201_v3 = vld [vmem:[%s1896_s16 + $0x58] sm:$0xff] (%p1752_p6) }
 0x142   : > { %v1524_v8 = vpop.f32.mrb[20].mxu0  ;;  %v1556_v9 = vpop.f32.mrb[20].mxu1  ;;  %1186 = vst [vmem:[%s1971_s20 + $0x30] sm:$0xff] (%p1752_p6), %v1185_v59  ;;  %1188 = vst [vmem:[%s1971_s20 + $0x40] sm:$0xff] (%p1752_p6), %v1187_v60  ;;  %v1203_v4 = vld [vmem:[%s1896_s16 + $0x60] sm:$0xff] (%p1752_p6)  ;;  %v1205_v5 = vld [vmem:[%s1896_s16 + $0x68] sm:$0xff] (%p1752_p6) }
 0x143   : > { %v908_v10 = vmax.f32 %v1524_v8, 0.0  ;;  %v940_v11 = vmax.f32 %v1556_v9, 0.0  ;;  %v711_v12 = vpop.f32.mrb[21].mxu0  ;;  %v839_v13 = vpop.f32.mrb[21].mxu1  ;;  %1190 = vst [vmem:[%s1971_s20 + $0x50] sm:$0xff] (%p1752_p6), %v1189_v61  ;;  %1192 = vst [vmem:[%s1971_s20 + $0x60] sm:$0xff] (%p1752_p6), %v1191_v62 }
 0x144   : > { %v906_v14 = vmax.f32 %v711_v12, 0.0  ;;  %v938_v15 = vmax.f32 %v839_v13, 0.0  ;;  %v1525_v16 = vpop.f32.mrb[22].mxu0  ;;  %v1557_v17 = vpop.f32.mrb[22].mxu1  ;;  %1194 = vst [vmem:[%s1971_s20 + $0x70] sm:$0xff] (%p1752_p6), %v1193_v63  ;;  %1196 = vst [vmem:[%s1971_s20 + $0x80] sm:$0xff] (%p1752_p6), %v1195_v0 }
 0x145   : > { %972 = vst [vmem:[%s1896_s16 + $0xb0] sm:$0xff] %v908_v10  ;;  %1004 = vst [vmem:[%s1896_s16 + $0x1b0] sm:$0xff] %v940_v11  ;;  %v909_v18 = vmax.f32 %v1525_v16, 0.0  ;;  %v941_v19 = vmax.f32 %v1557_v17, 0.0  ;;  %v714_v20 = vpop.f32.mrb[23].mxu0  ;;  %v842_v21 = vpop.f32.mrb[23].mxu1 }
 0x146   : > { %970 = vst [vmem:[%s1896_s16 + $0xa0] sm:$0xff] %v906_v14  ;;  %1002 = vst [vmem:[%s1896_s16 + $0x1a0] sm:$0xff] %v938_v15  ;;  %v907_v22 = vmax.f32 %v714_v20, 0.0  ;;  %v939_v23 = vmax.f32 %v842_v21, 0.0  ;;  %v1207_v6 = vld [vmem:[%s1896_s16 + $0x70] sm:$0xff] (%p1752_p6)  ;;  %v1209_v7 = vld [vmem:[%s1896_s16 + $0x78] sm:$0xff] (%p1752_p6) }
 0x147   : > { %973 = vst [vmem:[%s1896_s16 + $0xb8] sm:$0xff] %v909_v18  ;;  %1005 = vst [vmem:[%s1896_s16 + $0x1b8] sm:$0xff] %v941_v19  ;;  %v1211_v8 = vld [vmem:[%s1896_s16 + $0x80] sm:$0xff] (%p1752_p6)  ;;  %v1213_v9 = vld [vmem:[%s1896_s16 + $0x88] sm:$0xff] (%p1752_p6) }
 0x148   : > { %971 = vst [vmem:[%s1896_s16 + $0xa8] sm:$0xff] %v907_v22  ;;  %1003 = vst [vmem:[%s1896_s16 + $0x1a8] sm:$0xff] %v939_v23  ;;  %v1215_v10 = vld [vmem:[%s1896_s16 + $0x90] sm:$0xff] (%p1752_p6)  ;;  %v1217_v11 = vld [vmem:[%s1896_s16 + $0x98] sm:$0xff] (%p1752_p6) }
 0x149   : > { %1198 = vst [vmem:[%s1971_s20 + $0x90] sm:$0xff] (%p1752_p6), %v1197_v1  ;;  %1200 = vst [vmem:[%s1971_s20 + $0xa0] sm:$0xff] (%p1752_p6), %v1199_v2 }
 0x14a   : > { %v1528_v24 = vpop.f32.mrb[24].mxu0  ;;  %v1560_v25 = vpop.f32.mrb[24].mxu1  ;;  %1202 = vst [vmem:[%s1971_s20 + $0xb0] sm:$0xff] (%p1752_p6), %v1201_v3  ;;  %1204 = vst [vmem:[%s1971_s20 + $0xc0] sm:$0xff] (%p1752_p6), %v1203_v4 }
 0x14b   : > { %v912_v26 = vmax.f32 %v1528_v24, 0.0  ;;  %v944_v27 = vmax.f32 %v1560_v25, 0.0  ;;  %v727_v28 = vpop.f32.mrb[25].mxu0  ;;  %v855_v29 = vpop.f32.mrb[25].mxu1  ;;  %1206 = vst [vmem:[%s1971_s20 + $0xd0] sm:$0xff] (%p1752_p6), %v1205_v5  ;;  %1208 = vst [vmem:[%s1971_s20 + $0xe0] sm:$0xff] (%p1752_p6), %v1207_v6 }
 0x14c   : > { %v910_v30 = vmax.f32 %v727_v28, 0.0  ;;  %v942_v31 = vmax.f32 %v855_v29, 0.0  ;;  %v1529_v32 = vpop.f32.mrb[26].mxu0  ;;  %v1561_v33 = vpop.f32.mrb[26].mxu1  ;;  %1210 = vst [vmem:[%s1971_s20 + $0xf0] sm:$0xff] (%p1752_p6), %v1209_v7  ;;  %1212 = vst [vmem:[%s1971_s20 + $0x100] sm:$0xff] (%p1752_p6), %v1211_v8 }
 0x14d   : > { %976 = vst [vmem:[%s1896_s16 + $0xd0] sm:$0xff] %v912_v26  ;;  %1008 = vst [vmem:[%s1896_s16 + $0x1d0] sm:$0xff] %v944_v27  ;;  %v913_v34 = vmax.f32 %v1529_v32, 0.0  ;;  %v945_v35 = vmax.f32 %v1561_v33, 0.0  ;;  %v730_v36 = vpop.f32.mrb[27].mxu0  ;;  %v858_v37 = vpop.f32.mrb[27].mxu1 }
 0x14e   : > { %974 = vst [vmem:[%s1896_s16 + $0xc0] sm:$0xff] %v910_v30  ;;  %1006 = vst [vmem:[%s1896_s16 + $0x1c0] sm:$0xff] %v942_v31  ;;  %v911_v38 = vmax.f32 %v730_v36, 0.0  ;;  %v943_v39 = vmax.f32 %v858_v37, 0.0  ;;  %v1219_v12 = vld [vmem:[%s1896_s16 + $0xa0] sm:$0xff] (%p1752_p6)  ;;  %v1223_v14 = vld [vmem:[%s1896_s16 + $0xb0] sm:$0xff] (%p1752_p6) }
 0x14f   : > { %977 = vst [vmem:[%s1896_s16 + $0xd8] sm:$0xff] %v913_v34  ;;  %1009 = vst [vmem:[%s1896_s16 + $0x1d8] sm:$0xff] %v945_v35  ;;  %v1221_v13 = vld [vmem:[%s1896_s16 + $0xa8] sm:$0xff] (%p1752_p6)  ;;  %v1225_v15 = vld [vmem:[%s1896_s16 + $0xb8] sm:$0xff] (%p1752_p6) }
 0x150   : > { %975 = vst [vmem:[%s1896_s16 + $0xc8] sm:$0xff] %v911_v38  ;;  %1007 = vst [vmem:[%s1896_s16 + $0x1c8] sm:$0xff] %v943_v39  ;;  %v1243_v24 = vld [vmem:[%s1896_s16 + $0x100] sm:$0xff] (%p1752_p6)  ;;  %v1245_v25 = vld [vmem:[%s1896_s16 + $0x108] sm:$0xff] (%p1752_p6) }
 0x151   : > { %1214 = vst [vmem:[%s1971_s20 + $0x110] sm:$0xff] (%p1752_p6), %v1213_v9  ;;  %1216 = vst [vmem:[%s1971_s20 + $0x120] sm:$0xff] (%p1752_p6), %v1215_v10  ;;  %v1247_v26 = vld [vmem:[%s1896_s16 + $0x110] sm:$0xff] (%p1752_p6)  ;;  %v1249_v27 = vld [vmem:[%s1896_s16 + $0x118] sm:$0xff] (%p1752_p6) }
 0x152   : > { %v1532_v40 = vpop.f32.mrb[28].mxu0  ;;  %v1564_v41 = vpop.f32.mrb[28].mxu1  ;;  %1020 = sbr.rel (!%p1752_p6) target bundleno = 365 (0x16d), region = 73  ;;  %1218 = vst [vmem:[%s1971_s20 + $0x130] sm:$0xff] (%p1752_p6), %v1217_v11  ;;  %1220 = vst [vmem:[%s1971_s20 + $0x140] sm:$0xff] (%p1752_p6), %v1219_v12  ;;  %v1251_v28 = vld [vmem:[%s1896_s16 + $0x120] sm:$0xff] (%p1752_p6) }
 0x153   : > { %v916_v42 = vmax.f32 %v1532_v40, 0.0  ;;  %v948_v43 = vmax.f32 %v1564_v41, 0.0  ;;  %v743_v44 = vpop.f32.mrb[29].mxu0  ;;  %v871_v45 = vpop.f32.mrb[29].mxu1  ;;  %1222 = vst [vmem:[%s1971_s20 + $0x150] sm:$0xff] (%p1752_p6), %v1221_v13  ;;  %1224 = vst [vmem:[%s1971_s20 + $0x160] sm:$0xff] (%p1752_p6), %v1223_v14 }
 0x154   : > { %v914_v46 = vmax.f32 %v743_v44, 0.0  ;;  %v946_v47 = vmax.f32 %v871_v45, 0.0  ;;  %v1533_v48 = vpop.f32.mrb[30].mxu0  ;;  %v1565_v49 = vpop.f32.mrb[30].mxu1  ;;  %1226 = vst [vmem:[%s1971_s20 + $0x170] sm:$0xff] (%p1752_p6), %v1225_v15  ;;  %v1231_v18 = vld [vmem:[%s1896_s16 + $0xd0] sm:$0xff] (%p1752_p6) }
 0x155   : > { %980 = vst [vmem:[%s1896_s16 + $0xf0] sm:$0xff] %v916_v42  ;;  %1012 = vst [vmem:[%s1896_s16 + $0x1f0] sm:$0xff] %v948_v43  ;;  %v917_v50 = vmax.f32 %v1533_v48, 0.0  ;;  %v949_v51 = vmax.f32 %v1565_v49, 0.0  ;;  %v746_v52 = vpop.f32.mrb[31].mxu0  ;;  %v874_v53 = vpop.f32.mrb[31].mxu1 }
 0x156   : > { %978 = vst [vmem:[%s1896_s16 + $0xe0] sm:$0xff] %v914_v46  ;;  %1010 = vst [vmem:[%s1896_s16 + $0x1e0] sm:$0xff] %v946_v47  ;;  %v915_v54 = vmax.f32 %v746_v52, 0.0  ;;  %v947_v55 = vmax.f32 %v874_v53, 0.0  ;;  %v1227_v16 = vld [vmem:[%s1896_s16 + $0xc0] sm:$0xff] (%p1752_p6)  ;;  %v1233_v19 = vld [vmem:[%s1896_s16 + $0xd8] sm:$0xff] (%p1752_p6) }
 0x157   : > { %981 = vst [vmem:[%s1896_s16 + $0xf8] sm:$0xff] %v917_v50  ;;  %1013 = vst [vmem:[%s1896_s16 + $0x1f8] sm:$0xff] %v949_v51  ;;  %v1229_v17 = vld [vmem:[%s1896_s16 + $0xc8] sm:$0xff] (%p1752_p6)  ;;  %v1255_v30 = vld [vmem:[%s1896_s16 + $0x130] sm:$0xff] (%p1752_p6) }
 0x158   : > { %979 = vst [vmem:[%s1896_s16 + $0xe8] sm:$0xff] %v915_v54  ;;  %1011 = vst [vmem:[%s1896_s16 + $0x1e8] sm:$0xff] %v947_v55  ;;  %v1253_v29 = vld [vmem:[%s1896_s16 + $0x128] sm:$0xff] (%p1752_p6)  ;;  %v1257_v31 = vld [vmem:[%s1896_s16 + $0x138] sm:$0xff] (%p1752_p6) }
 0x159   : > { %1228 = vst [vmem:[%s1971_s20 + $0x180] sm:$0xff] %v1227_v16  ;;  %1230 = vst [vmem:[%s1971_s20 + $0x190] sm:$0xff] %v1229_v17  ;;  %v1259_v32 = vld [vmem:[%s1896_s16 + $0x140] sm:$0xff]  ;;  %v1261_v33 = vld [vmem:[%s1896_s16 + $0x148] sm:$0xff] }
 0x15a   : > { %1232 = vst [vmem:[%s1971_s20 + $0x1a0] sm:$0xff] %v1231_v18  ;;  %1234 = vst [vmem:[%s1971_s20 + $0x1b0] sm:$0xff] %v1233_v19  ;;  %v1263_v34 = vld [vmem:[%s1896_s16 + $0x150] sm:$0xff]  ;;  %v1265_v35 = vld [vmem:[%s1896_s16 + $0x158] sm:$0xff] }
 0x15b   : > { %1244 = vst [vmem:[%s1971_s20 + $0x200] sm:$0xff] %v1243_v24  ;;  %1246 = vst [vmem:[%s1971_s20 + $0x210] sm:$0xff] %v1245_v25  ;;  %v1267_v36 = vld [vmem:[%s1896_s16 + $0x160] sm:$0xff]  ;;  %v1269_v37 = vld [vmem:[%s1896_s16 + $0x168] sm:$0xff] }
 0x15c   : > { %v1239_v22 = vld [vmem:[%s1896_s16 + $0xf0] sm:$0xff]  ;;  %1248 = vst [vmem:[%s1971_s20 + $0x220] sm:$0xff] %v1247_v26  ;;  %1250 = vst [vmem:[%s1971_s20 + $0x230] sm:$0xff] %v1249_v27  ;;  %v1273_v39 = vld [vmem:[%s1896_s16 + $0x178] sm:$0xff] }
 0x15d   : > { %v1235_v20 = vld [vmem:[%s1896_s16 + $0xe0] sm:$0xff]  ;;  %1240 = vst [vmem:[%s1971_s20 + $0x1e0] sm:$0xff] %v1239_v22  ;;  %1252 = vst [vmem:[%s1971_s20 + $0x240] sm:$0xff] %v1251_v28  ;;  %v1271_v38 = vld [vmem:[%s1896_s16 + $0x170] sm:$0xff] }
 0x15e   : > { %1236 = vst [vmem:[%s1971_s20 + $0x1c0] sm:$0xff] %v1235_v20  ;;  %v1241_v23 = vld [vmem:[%s1896_s16 + $0xf8] sm:$0xff]  ;;  %1254 = vst [vmem:[%s1971_s20 + $0x250] sm:$0xff] %v1253_v29  ;;  %v1275_v40 = vld [vmem:[%s1896_s16 + $0x180] sm:$0xff] }
 0x15f   : > { %v1237_v21 = vld [vmem:[%s1896_s16 + $0xe8] sm:$0xff]  ;;  %1242 = vst [vmem:[%s1971_s20 + $0x1f0] sm:$0xff] %v1241_v23  ;;  %1256 = vst [vmem:[%s1971_s20 + $0x260] sm:$0xff] %v1255_v30  ;;  %v1279_v42 = vld [vmem:[%s1896_s16 + $0x190] sm:$0xff] }
 0x160   : > { %1238 = vst [vmem:[%s1971_s20 + $0x1d0] sm:$0xff] %v1237_v21  ;;  %1258 = vst [vmem:[%s1971_s20 + $0x270] sm:$0xff] %v1257_v31  ;;  %v1277_v41 = vld [vmem:[%s1896_s16 + $0x188] sm:$0xff]  ;;  %v1281_v43 = vld [vmem:[%s1896_s16 + $0x198] sm:$0xff] }
 0x161   : > { %1260 = vst [vmem:[%s1971_s20 + $0x280] sm:$0xff] %v1259_v32  ;;  %1262 = vst [vmem:[%s1971_s20 + $0x290] sm:$0xff] %v1261_v33  ;;  %v1283_v44 = vld [vmem:[%s1896_s16 + $0x1a0] sm:$0xff]  ;;  %v1285_v45 = vld [vmem:[%s1896_s16 + $0x1a8] sm:$0xff] }
 0x162   : > { %1264 = vst [vmem:[%s1971_s20 + $0x2a0] sm:$0xff] %v1263_v34  ;;  %1266 = vst [vmem:[%s1971_s20 + $0x2b0] sm:$0xff] %v1265_v35  ;;  %v1287_v46 = vld [vmem:[%s1896_s16 + $0x1b0] sm:$0xff]  ;;  %v1289_v47 = vld [vmem:[%s1896_s16 + $0x1b8] sm:$0xff] }
 0x163   : > { %1268 = vst [vmem:[%s1971_s20 + $0x2c0] sm:$0xff] %v1267_v36  ;;  %1270 = vst [vmem:[%s1971_s20 + $0x2d0] sm:$0xff] %v1269_v37  ;;  %v1291_v48 = vld [vmem:[%s1896_s16 + $0x1c0] sm:$0xff]  ;;  %v1293_v49 = vld [vmem:[%s1896_s16 + $0x1c8] sm:$0xff] }
 0x164   : > { %1272 = vst [vmem:[%s1971_s20 + $0x2e0] sm:$0xff] %v1271_v38  ;;  %1274 = vst [vmem:[%s1971_s20 + $0x2f0] sm:$0xff] %v1273_v39  ;;  %v1295_v50 = vld [vmem:[%s1896_s16 + $0x1d0] sm:$0xff]  ;;  %v1297_v51 = vld [vmem:[%s1896_s16 + $0x1d8] sm:$0xff] }
 0x165   : > { %1276 = vst [vmem:[%s1971_s20 + $0x300] sm:$0xff] %v1275_v40  ;;  %1278 = vst [vmem:[%s1971_s20 + $0x310] sm:$0xff] %v1277_v41  ;;  %v1299_v52 = vld [vmem:[%s1896_s16 + $0x1e0] sm:$0xff]  ;;  %v1301_v53 = vld [vmem:[%s1896_s16 + $0x1e8] sm:$0xff] }
 0x166   : > { %1280 = vst [vmem:[%s1971_s20 + $0x320] sm:$0xff] %v1279_v42  ;;  %1282 = vst [vmem:[%s1971_s20 + $0x330] sm:$0xff] %v1281_v43  ;;  %v1303_v54 = vld [vmem:[%s1896_s16 + $0x1f0] sm:$0xff]  ;;  %v1305_v55 = vld [vmem:[%s1896_s16 + $0x1f8] sm:$0xff] }
 0x167   : > { %1284 = vst [vmem:[%s1971_s20 + $0x340] sm:$0xff] %v1283_v44  ;;  %1286 = vst [vmem:[%s1971_s20 + $0x350] sm:$0xff] %v1285_v45 }
 0x168   : > { %1288 = vst [vmem:[%s1971_s20 + $0x360] sm:$0xff] %v1287_v46  ;;  %1290 = vst [vmem:[%s1971_s20 + $0x370] sm:$0xff] %v1289_v47 }
 0x169   : > { %1292 = vst [vmem:[%s1971_s20 + $0x380] sm:$0xff] %v1291_v48  ;;  %1294 = vst [vmem:[%s1971_s20 + $0x390] sm:$0xff] %v1293_v49 }
 0x16a   : > { %1296 = vst [vmem:[%s1971_s20 + $0x3a0] sm:$0xff] %v1295_v50  ;;  %1298 = vst [vmem:[%s1971_s20 + $0x3b0] sm:$0xff] %v1297_v51 }
 0x16b   : > { %1300 = vst [vmem:[%s1971_s20 + $0x3c0] sm:$0xff] %v1299_v52  ;;  %1302 = vst [vmem:[%s1971_s20 + $0x3d0] sm:$0xff] %v1301_v53 }
 0x16c   : > { %1304 = vst [vmem:[%s1971_s20 + $0x3e0] sm:$0xff] %v1303_v54  ;;  %1306 = vst [vmem:[%s1971_s20 + $0x3f0] sm:$0xff] %v1305_v55 }
 0x16d PF: > { %s12_s13 = sadd.s32 1, %s1700_s13   ;;  %s2117_s9 = smov %s1688_s10 }
 0x16e   : > { %p9_p11 = scmp.ge.s32.totalorder %s12_s13, 4   ;;  %s2118_s10 = smov %s1757_s19 }
 0x16f   : > { %s2119_s11 = smov %s1696_s12  ;;  %s2120_s12 = smov %s2122_s14 }
 0x170   :  { %11 = sbr.rel (!%p9_p11) target bundleno = 3 (0x3), region = 145 }

// kernel: aspp_apply.10
= control target key start
LH: loop header
LB: loop body
LE: loop exit
PB: predicated region body
PF: predicated region fallthrough
CT: control target
= control target key end

     0   :  { %s645_s9 = smov 0   ;;  %s647_s10 = smov 0   ;;  %s732_s0 = inlined_call_operand.vmem [shape: bf16[8,128], index: 0, kind: input, shape index: {}]   ;;  %s733_s1 = inlined_call_operand.vmem [shape: bf16[128,256], index: 1, kind: input, shape index: {}]   ;;  %s734_s2 = inlined_call_operand.vmem [shape: f32[8,256], index: 2, kind: output, shape index: {}]  }
   0x1   :  { %s649_s11 = smov 0   ;;  %s651_s12 = smov 0  }
   0x2   :  { %s653_s13 = smov 0  }
   0x3 LB: > { %s21_s14 = sadd.s32 1, %s622_s12  ;;  %p64_p1 = scmp.ne.s32.totalorder %s614_s10, %s610_s9  ;;  %s626_s13 = sphi %s653_s13, %s12_s13   ;;  %s622_s12 = sphi %s651_s12, %s738_s12   ;;  %s618_s11 = sphi %s649_s11, %s737_s11   ;;  %s614_s10 = sphi %s647_s10, %s736_s10   ;;  %s610_s9 = sphi %s645_s9, %s735_s9  }
   0x4   : > { %p22_p0 = scmp.ge.s32.totalorder %s21_s14, 2  ;;  %p65_p2 = scmp.eq.s32.totalorder %s626_s13, 0 }
   0x5   : > { %s57_s16 = sadd.s32 1, %s614_s10  ;;  %p493_p5 = scmp.ge.s32.totalorder %s626_s13, 2 }
   0x6   : > { %s740_s14 = smov (%p22_p0, %s21_s14), 0  ;;  %p66_p3 = por %p65_p2, %p64_p1 }
   0x7   : > { %s54_s15 = ssub.s32 %s622_s12, %s740_s14  ;;  %125 = sbr.rel (%p493_p5) target bundleno = 28 (0x1c), region = 20 }
   0x8   : > { %p55_p4 = scmp.eq.s32.totalorder %s54_s15, 0 }
   0xa   : > { %s680_s17 = scalar_select %p55_p4, %s614_s10, %s57_s16  }
   0xe   : > { %128 = sbr.rel (!%p66_p3) target bundleno = 28 (0x1c), region = 24  ;;  %s130_s18 = sand.u32 (%p66_p3), 1, %s614_s10  }
   0xf   : > { %s495_s19 = sshll.u32 (%p66_p3), %s622_s12, 2  ;;  %s494_s20 = sshll.u32 (%p66_p3), %s130_s18, 6 }
  0x10   : > { %s688_s23 = scalar_lea.vmem (%p66_p3), %s733_s1, %s495_s19  ;;  %s132_s24 = scalar_lea.vmem (%p66_p3), [#allocation2], %s494_s20 }
  0x11   : > { %v150_v0 = vld [vmem:[%s688_s23] sm:$0xf] (%p66_p3)  ;;  %v152_v1 = vld [vmem:[%s688_s23 + $0x8] sm:$0xf] (%p66_p3)  ;;  %v154_v2 = vld [vmem:[%s688_s23 + $0x10] sm:$0xf] (%p66_p3) }
  0x12   : > { %151 = vst [vmem:[%s132_s24] sm:$0xf] (%p66_p3), %v150_v0  ;;  %153 = vst [vmem:[%s132_s24 + $0x4] sm:$0xf] (%p66_p3), %v152_v1  ;;  %v156_v3 = vld [vmem:[%s688_s23 + $0x18] sm:$0xf] (%p66_p3) }
  0x13   : > { %v158_v4 = vld [vmem:[%s688_s23 + $0x20] sm:$0xf] (%p66_p3)  ;;  %155 = vst [vmem:[%s132_s24 + $0x8] sm:$0xf] (%p66_p3), %v154_v2  ;;  %157 = vst [vmem:[%s132_s24 + $0xc] sm:$0xf] (%p66_p3), %v156_v3 }
  0x14   : > { %159 = vst [vmem:[%s132_s24 + $0x10] sm:$0xf] (%p66_p3), %v158_v4  ;;  %v160_v5 = vld [vmem:[%s688_s23 + $0x28] sm:$0xf] (%p66_p3)  ;;  %v162_v6 = vld [vmem:[%s688_s23 + $0x30] sm:$0xf] (%p66_p3) }
  0x15   : > { %v164_v7 = vld [vmem:[%s688_s23 + $0x38] sm:$0xf]  ;;  %161 = vst [vmem:[%s132_s24 + $0x14] sm:$0xf] %v160_v5  ;;  %163 = vst [vmem:[%s132_s24 + $0x18] sm:$0xf] %v162_v6 }
  0x16   : > { %165 = vst [vmem:[%s132_s24 + $0x1c] sm:$0xf] %v164_v7  ;;  %v166_v8 = vld [vmem:[%s688_s23 + $0x40] sm:$0xf]  ;;  %v168_v9 = vld [vmem:[%s688_s23 + $0x48] sm:$0xf] }
  0x17   : > { %v170_v10 = vld [vmem:[%s688_s23 + $0x50] sm:$0xf]  ;;  %167 = vst [vmem:[%s132_s24 + $0x20] sm:$0xf] %v166_v8  ;;  %169 = vst [vmem:[%s132_s24 + $0x24] sm:$0xf] %v168_v9 }
  0x18   : > { %171 = vst [vmem:[%s132_s24 + $0x28] sm:$0xf] %v170_v10  ;;  %v172_v11 = vld [vmem:[%s688_s23 + $0x58] sm:$0xf]  ;;  %v174_v12 = vld [vmem:[%s688_s23 + $0x60] sm:$0xf] }
  0x19   : > { %v176_v13 = vld [vmem:[%s688_s23 + $0x68] sm:$0xf]  ;;  %173 = vst [vmem:[%s132_s24 + $0x2c] sm:$0xf] %v172_v11  ;;  %175 = vst [vmem:[%s132_s24 + $0x30] sm:$0xf] %v174_v12 }
  0x1a   : > { %177 = vst [vmem:[%s132_s24 + $0x34] sm:$0xf] %v176_v13  ;;  %v178_v14 = vld [vmem:[%s688_s23 + $0x70] sm:$0xf]  ;;  %v180_v15 = vld [vmem:[%s688_s23 + $0x78] sm:$0xf] }
  0x1b   : > { %179 = vst [vmem:[%s132_s24 + $0x38] sm:$0xf] %v178_v14  ;;  %181 = vst [vmem:[%s132_s24 + $0x3c] sm:$0xf] %v180_v15 }
  0x1c PF: > { %p496_p6 = scmp.ge.s32.totalorder %s626_s13, 1  ;;  %p235_p7 = scmp.lt.s32.totalorder %s626_s13, 3 }
  0x1e   : > { %p236_p8 = pnand %p496_p6, %p235_p7 }
  0x1f   : > { %s242_s25 = sand.u32 (!%p236_p8), 1, %s610_s9   ;;  %v628_v16 = vmov (!%p236_p8), 0.0   ;;  %vm629_vm0 = vmmov (!%p236_p8), 0   ;;  %v283_v25 = vld [vmem:[%s732_s0] sm:$0xf] (!%p236_p8)  ;;  %p276_p9 = scmp.lt.s32.totalorder (!%p236_p8), %s618_s11, 1 }
  0x20   : > { %239 = sbr.rel (%p236_p8) target bundleno = 281 (0x119), region = 65  ;;  %518 = vmatprep.subr.bf16.mxu0 (!%p236_p8), %v628_v16  ;;  %s497_s26 = sshll.u32 (!%p236_p8), %s242_s25, 6  ;;  %534 = vmatprep.mubr.msk.bf16.mxu0 (!%p236_p8), %vm629_vm0, %v628_v16 }
  0x21   : > { %s244_s27 = scalar_lea.vmem (!%p236_p8), [#allocation2], %s497_s26 }
  0x22   : > { %v580_v17 = vld [vmem:[%s244_s27] sm:$0xff] (!%p236_p8)   ;;  %v581_v18 = vld [vmem:[%s244_s27 + $0x8] sm:$0xff] (!%p236_p8)   ;;  %v582_v19 = vld [vmem:[%s244_s27 + $0x10] sm:$0xff] (!%p236_p8)  }
  0x23   : > { %519 = vmatpush3.bf16.msra.mxu0 (!%p236_p8), %v580_v17  ;;  %v583_v20 = vld [vmem:[%s244_s27 + $0x18] sm:$0xff] (!%p236_p8)   ;;  %v584_v21 = vld [vmem:[%s244_s27 + $0x20] sm:$0xff] (!%p236_p8)   ;;  %v585_v22 = vld [vmem:[%s244_s27 + $0x28] sm:$0xff] (!%p236_p8)  }
  0x24   : > { %520 = vmatprep.subr.bf16.mxu0 (!%p236_p8), %v628_v16  ;;  %v586_v23 = vld [vmem:[%s244_s27 + $0x30] sm:$0xff] (!%p236_p8)   ;;  %v587_v24 = vld [vmem:[%s244_s27 + $0x38] sm:$0xff] (!%p236_p8)  }
  0x27   : > { %521 = vmatpush3.bf16.msra.mxu0 %v581_v18  ;;  %s742_s11 = smov (!%p276_p9, %s618_s11), 1 }
  0x28   : > { %522 = vmatprep.subr.bf16.mxu0 %v628_v16  ;;  %s498_s30 = sshll.u32 %s742_s11, 3 }
  0x29   : > { %s281_s5 = scalar_lea.vmem %s734_s2, %s498_s30 }
  0x2b   : > { %523 = vmatpush3.bf16.msra.mxu0 %v582_v19 }
  0x2c   : > { %524 = vmatprep.subr.bf16.mxu0 %v628_v16 }
  0x2f   : > { %525 = vmatpush3.bf16.msra.mxu0 %v583_v20 }
  0x30   : > { %526 = vmatprep.subr.bf16.mxu0 %v628_v16 }
  0x33   : > { %527 = vmatpush3.bf16.msra.mxu0 %v584_v21 }
  0x34   : > { %528 = vmatprep.subr.bf16.mxu0 %v628_v16 }
  0x37   : > { %529 = vmatpush3.bf16.msra.mxu0 %v585_v22 }
  0x38   : > { %530 = vmatprep.subr.bf16.mxu0 %v628_v16 }
  0x3b   : > { %531 = vmatpush3.bf16.msra.mxu0 %v586_v23 }
  0x3c   : > { %532 = vmatprep.subr.bf16.mxu0 %v628_v16 }
  0x3f   : > { %533 = vmatpush3.bf16.msra.mxu0 %v587_v24 }
  0x42   : > { %535 = vmatmul.mubr.bf16.vlgmr.msra.gmra.mrb[0].mxu0 %v283_v25 }
 0x115   : > { %v382_v26 = vpop.f32.mrb[0].mxu0 }
 0x116   : > { %v388_v27 = vmax.f32 %v382_v26, 0.0  ;;  %v536_v28 = vpop.f32.mrb[1].mxu0 }
 0x117   : > { %v385_v29 = vpop.f32.mrb[2].mxu0 }
 0x118   : > { %389 = vst [vmem:[%s281_s5] sm:$0xff] %v388_v27  ;;  %v537_v30 = vpop.f32.mrb[3].mxu0 }
 0x119 PF: > { %s12_s13 = sadd.s32 1, %s626_s13   ;;  %s735_s9 = smov %s614_s10 }
 0x11a   : > { %p9_p10 = scmp.ge.s32.totalorder %s12_s13, 4   ;;  %s736_s10 = smov %s680_s17 }
 0x11b   : > { %s737_s11 = smov %s622_s12  ;;  %s738_s12 = smov %s740_s14 }
 0x11c   :  { %11 = sbr.rel (!%p9_p10) target bundleno = 3 (0x3), region = 107 }

// kernel: aspp_apply.7
= control target key start
LH: loop header
LB: loop body
LE: loop exit
PB: predicated region body
PF: predicated region fallthrough
CT: control target
= control target key end

     0   :  { %s6542_s9 = smov 0   ;;  %s6544_s10 = smov 0   ;;  %s8546_s0 = inlined_call_operand.vmem [shape: bf16[512,1152], index: 0, kind: input, shape index: {}]   ;;  %s8547_s1 = inlined_call_operand.vmem [shape: bf16[1152,256], index: 1, kind: input, shape index: {}]   ;;  %s8548_s2 = inlined_call_operand.vmem [shape: f32[512,256], index: 2, kind: output, shape index: {}]  }
   0x1   :  { %s6546_s11 = smov 0   ;;  %s6548_s12 = smov 0  }
   0x2   :  { %s6550_s13 = smov 0  }
   0x3 LB: > { %s21_s14 = sadd.s32 1, %s6520_s12  ;;  %s5111_s15 = sadd.s32 4294967295, %s6524_s13   ;;  %s6524_s13 = sphi %s6550_s13, %s12_s13   ;;  %s6520_s12 = sphi %s6548_s12, %s8583_s12   ;;  %s6516_s11 = sphi %s6546_s11, %s8582_s11   ;;  %s6512_s10 = sphi %s6544_s10, %s8581_s10   ;;  %s6508_s9 = sphi %s6542_s9, %s8580_s9  }
   0x4   : > { %p22_p0 = scmp.ge.s32.totalorder %s21_s14, 2  ;;  %p64_p1 = scmp.ne.s32.totalorder %s6512_s10, %s6508_s9 }
   0x5   : > { %p65_p2 = scmp.eq.s32.totalorder %s6524_s13, 0  ;;  %p96_p4 = scmp.eq.s32.totalorder %s5111_s15, 1 }
   0x6   : > { %s8585_s14 = smov (%p22_p0, %s21_s14), 0  ;;  %s57_s17 = sadd.s32 1, %s6512_s10 }
   0x7   : > { %p66_p3 = por %p65_p2, %p64_p1  ;;  %s54_s16 = ssub.s32 %s6520_s12, %s8585_s14 }
   0x8   : > { %p55_p5 = scmp.eq.s32.totalorder %s54_s16, 0  ;;  %p6577_p6 = por %p96_p4, %p64_p1 }
   0x9   : > { %p5115_p7 = scmp.ge.s32.totalorder %s6524_s13, 2 }
   0xa   : > { %s6582_s19 = scalar_select %p55_p5, %s6512_s10, %s57_s17  }
   0xb   : > { %128 = sbr.rel (%p5115_p7) target bundleno = 118 (0x76), region = 20 }
  0x12   : > { %131 = sbr.rel (!%p66_p3) target bundleno = 118 (0x76), region = 24  ;;  %s133_s20 = sand.u32 (%p66_p3), 1, %s6512_s10  }
  0x13   : > { %s5116_s21 = sshll.u32 (%p66_p3), %s6520_s12, 2  ;;  %s5955_s22 = smul.u32 (%p66_p3), 576, %s133_s20 }
  0x14   : > { %s6590_s25 = scalar_lea.vmem (%p66_p3), %s8547_s1, %s5116_s21 }
  0x15   : > { %v153_v0 = vld [vmem:[%s6590_s25] sm:$0xf] (%p66_p3)  ;;  %v155_v1 = vld [vmem:[%s6590_s25 + $0x8] sm:$0xf] (%p66_p3)  ;;  %v157_v2 = vld [vmem:[%s6590_s25 + $0x10] sm:$0xf] (%p66_p3) }
  0x16   : > { %v159_v3 = vld [vmem:[%s6590_s25 + $0x18] sm:$0xf] (%p66_p3)  ;;  %v161_v4 = vld [vmem:[%s6590_s25 + $0x20] sm:$0xf] (%p66_p3)  ;;  %s6597_s26 = scalar_lea.vmem (%p66_p3), [#allocation2], %s5955_s22 }
  0x17   : > { %154 = vst [vmem:[%s6597_s26] sm:$0xf] (%p66_p3), %v153_v0  ;;  %156 = vst [vmem:[%s6597_s26 + $0x4] sm:$0xf] (%p66_p3), %v155_v1  ;;  %v163_v5 = vld [vmem:[%s6590_s25 + $0x28] sm:$0xf] (%p66_p3) }
  0x18   : > { %158 = vst [vmem:[%s6597_s26 + $0x8] sm:$0xf] (%p66_p3), %v157_v2  ;;  %160 = vst [vmem:[%s6597_s26 + $0xc] sm:$0xf] (%p66_p3), %v159_v3  ;;  %v165_v6 = vld [vmem:[%s6590_s25 + $0x30] sm:$0xf] (%p66_p3) }
  0x19   : > { %162 = vst [vmem:[%s6597_s26 + $0x10] sm:$0xf] %v161_v4  ;;  %v167_v7 = vld [vmem:[%s6590_s25 + $0x38] sm:$0xf]  ;;  %164 = vst [vmem:[%s6597_s26 + $0x14] sm:$0xf] %v163_v5 }
  0x1a   : > { %166 = vst [vmem:[%s6597_s26 + $0x18] sm:$0xf] %v165_v6  ;;  %168 = vst [vmem:[%s6597_s26 + $0x1c] sm:$0xf] %v167_v7  ;;  %v169_v8 = vld [vmem:[%s6590_s25 + $0x40] sm:$0xf] }
  0x1b   : > { %v171_v9 = vld [vmem:[%s6590_s25 + $0x48] sm:$0xf]  ;;  %v173_v10 = vld [vmem:[%s6590_s25 + $0x50] sm:$0xf]  ;;  %170 = vst [vmem:[%s6597_s26 + $0x20] sm:$0xf] %v169_v8 }
  0x1c   : > { %172 = vst [vmem:[%s6597_s26 + $0x24] sm:$0xf] %v171_v9  ;;  %174 = vst [vmem:[%s6597_s26 + $0x28] sm:$0xf] %v173_v10  ;;  %v175_v11 = vld [vmem:[%s6590_s25 + $0x58] sm:$0xf] }
  0x1d   : > { %v177_v12 = vld [vmem:[%s6590_s25 + $0x60] sm:$0xf]  ;;  %v179_v13 = vld [vmem:[%s6590_s25 + $0x68] sm:$0xf]  ;;  %176 = vst [vmem:[%s6597_s26 + $0x2c] sm:$0xf] %v175_v11 }
  0x1e   : > { %178 = vst [vmem:[%s6597_s26 + $0x30] sm:$0xf] %v177_v12  ;;  %180 = vst [vmem:[%s6597_s26 + $0x34] sm:$0xf] %v179_v13  ;;  %v181_v14 = vld [vmem:[%s6590_s25 + $0x70] sm:$0xf] }
  0x1f   : > { %v183_v15 = vld [vmem:[%s6590_s25 + $0x78] sm:$0xf]  ;;  %v185_v16 = vld [vmem:[%s6590_s25 + $0x80] sm:$0xf]  ;;  %182 = vst [vmem:[%s6597_s26 + $0x38] sm:$0xf] %v181_v14 }
  0x20   : > { %184 = vst [vmem:[%s6597_s26 + $0x3c] sm:$0xf] %v183_v15  ;;  %186 = vst [vmem:[%s6597_s26 + $0x40] sm:$0xf] %v185_v16  ;;  %v187_v17 = vld [vmem:[%s6590_s25 + $0x88] sm:$0xf] }
  0x21   : > { %v189_v18 = vld [vmem:[%s6590_s25 + $0x90] sm:$0xf]  ;;  %v191_v19 = vld [vmem:[%s6590_s25 + $0x98] sm:$0xf]  ;;  %188 = vst [vmem:[%s6597_s26 + $0x44] sm:$0xf] %v187_v17 }
  0x22   : > { %190 = vst [vmem:[%s6597_s26 + $0x48] sm:$0xf] %v189_v18  ;;  %192 = vst [vmem:[%s6597_s26 + $0x4c] sm:$0xf] %v191_v19  ;;  %v193_v20 = vld [vmem:[%s6590_s25 + $0xa0] sm:$0xf] }
  0x23   : > { %v195_v21 = vld [vmem:[%s6590_s25 + $0xa8] sm:$0xf]  ;;  %v197_v22 = vld [vmem:[%s6590_s25 + $0xb0] sm:$0xf]  ;;  %194 = vst [vmem:[%s6597_s26 + $0x50] sm:$0xf] %v193_v20 }
  0x24   : > { %196 = vst [vmem:[%s6597_s26 + $0x54] sm:$0xf] %v195_v21  ;;  %198 = vst [vmem:[%s6597_s26 + $0x58] sm:$0xf] %v197_v22  ;;  %v199_v23 = vld [vmem:[%s6590_s25 + $0xb8] sm:$0xf] }
  0x25   : > { %v201_v24 = vld [vmem:[%s6590_s25 + $0xc0] sm:$0xf]  ;;  %v203_v25 = vld [vmem:[%s6590_s25 + $0xc8] sm:$0xf]  ;;  %200 = vst [vmem:[%s6597_s26 + $0x5c] sm:$0xf] %v199_v23 }
  0x26   : > { %202 = vst [vmem:[%s6597_s26 + $0x60] sm:$0xf] %v201_v24  ;;  %204 = vst [vmem:[%s6597_s26 + $0x64] sm:$0xf] %v203_v25  ;;  %v205_v26 = vld [vmem:[%s6590_s25 + $0xd0] sm:$0xf] }
  0x27   : > { %v207_v27 = vld [vmem:[%s6590_s25 + $0xd8] sm:$0xf]  ;;  %v209_v28 = vld [vmem:[%s6590_s25 + $0xe0] sm:$0xf]  ;;  %206 = vst [vmem:[%s6597_s26 + $0x68] sm:$0xf] %v205_v26 }
  0x28   : > { %208 = vst [vmem:[%s6597_s26 + $0x6c] sm:$0xf] %v207_v27  ;;  %210 = vst [vmem:[%s6597_s26 + $0x70] sm:$0xf] %v209_v28  ;;  %v211_v29 = vld [vmem:[%s6590_s25 + $0xe8] sm:$0xf] }
  0x29   : > { %v213_v30 = vld [vmem:[%s6590_s25 + $0xf0] sm:$0xf]  ;;  %v215_v31 = vld [vmem:[%s6590_s25 + $0xf8] sm:$0xf]  ;;  %212 = vst [vmem:[%s6597_s26 + $0x74] sm:$0xf] %v211_v29 }
  0x2a   : > { %214 = vst [vmem:[%s6597_s26 + $0x78] sm:$0xf] %v213_v30  ;;  %216 = vst [vmem:[%s6597_s26 + $0x7c] sm:$0xf] %v215_v31  ;;  %v217_v32 = vld [vmem:[%s6590_s25 + $0x100] sm:$0xf] }
  0x2b   : > { %v219_v33 = vld [vmem:[%s6590_s25 + $0x108] sm:$0xf]  ;;  %v221_v34 = vld [vmem:[%s6590_s25 + $0x110] sm:$0xf]  ;;  %218 = vst [vmem:[%s6597_s26 + $0x80] sm:$0xf] %v217_v32 }
  0x2c   : > { %220 = vst [vmem:[%s6597_s26 + $0x84] sm:$0xf] %v219_v33  ;;  %222 = vst [vmem:[%s6597_s26 + $0x88] sm:$0xf] %v221_v34  ;;  %v223_v35 = vld [vmem:[%s6590_s25 + $0x118] sm:$0xf] }
  0x2d   : > { %v225_v36 = vld [vmem:[%s6590_s25 + $0x120] sm:$0xf]  ;;  %v227_v37 = vld [vmem:[%s6590_s25 + $0x128] sm:$0xf]  ;;  %224 = vst [vmem:[%s6597_s26 + $0x8c] sm:$0xf] %v223_v35 }
  0x2e   : > { %226 = vst [vmem:[%s6597_s26 + $0x90] sm:$0xf] %v225_v36  ;;  %228 = vst [vmem:[%s6597_s26 + $0x94] sm:$0xf] %v227_v37  ;;  %v229_v38 = vld [vmem:[%s6590_s25 + $0x130] sm:$0xf] }
  0x2f   : > { %v231_v39 = vld [vmem:[%s6590_s25 + $0x138] sm:$0xf]  ;;  %v233_v40 = vld [vmem:[%s6590_s25 + $0x140] sm:$0xf]  ;;  %230 = vst [vmem:[%s6597_s26 + $0x98] sm:$0xf] %v229_v38 }
  0x30   : > { %232 = vst [vmem:[%s6597_s26 + $0x9c] sm:$0xf] %v231_v39  ;;  %234 = vst [vmem:[%s6597_s26 + $0xa0] sm:$0xf] %v233_v40  ;;  %v235_v41 = vld [vmem:[%s6590_s25 + $0x148] sm:$0xf] }
  0x31   : > { %v237_v42 = vld [vmem:[%s6590_s25 + $0x150] sm:$0xf]  ;;  %v239_v43 = vld [vmem:[%s6590_s25 + $0x158] sm:$0xf]  ;;  %236 = vst [vmem:[%s6597_s26 + $0xa4] sm:$0xf] %v235_v41 }
  0x32   : > { %238 = vst [vmem:[%s6597_s26 + $0xa8] sm:$0xf] %v237_v42  ;;  %240 = vst [vmem:[%s6597_s26 + $0xac] sm:$0xf] %v239_v43  ;;  %v241_v44 = vld [vmem:[%s6590_s25 + $0x160] sm:$0xf] }
  0x33   : > { %v243_v45 = vld [vmem:[%s6590_s25 + $0x168] sm:$0xf]  ;;  %v245_v46 = vld [vmem:[%s6590_s25 + $0x170] sm:$0xf]  ;;  %242 = vst [vmem:[%s6597_s26 + $0xb0] sm:$0xf] %v241_v44 }
  0x34   : > { %244 = vst [vmem:[%s6597_s26 + $0xb4] sm:$0xf] %v243_v45  ;;  %246 = vst [vmem:[%s6597_s26 + $0xb8] sm:$0xf] %v245_v46  ;;  %v247_v47 = vld [vmem:[%s6590_s25 + $0x178] sm:$0xf] }
  0x35   : > { %v249_v48 = vld [vmem:[%s6590_s25 + $0x180] sm:$0xf]  ;;  %v251_v49 = vld [vmem:[%s6590_s25 + $0x188] sm:$0xf]  ;;  %248 = vst [vmem:[%s6597_s26 + $0xbc] sm:$0xf] %v247_v47 }
  0x36   : > { %250 = vst [vmem:[%s6597_s26 + $0xc0] sm:$0xf] %v249_v48  ;;  %252 = vst [vmem:[%s6597_s26 + $0xc4] sm:$0xf] %v251_v49  ;;  %v253_v50 = vld [vmem:[%s6590_s25 + $0x190] sm:$0xf] }
  0x37   : > { %v255_v51 = vld [vmem:[%s6590_s25 + $0x198] sm:$0xf]  ;;  %v257_v52 = vld [vmem:[%s6590_s25 + $0x1a0] sm:$0xf]  ;;  %254 = vst [vmem:[%s6597_s26 + $0xc8] sm:$0xf] %v253_v50 }
  0x38   : > { %256 = vst [vmem:[%s6597_s26 + $0xcc] sm:$0xf] %v255_v51  ;;  %258 = vst [vmem:[%s6597_s26 + $0xd0] sm:$0xf] %v257_v52  ;;  %v259_v53 = vld [vmem:[%s6590_s25 + $0x1a8] sm:$0xf] }
  0x39   : > { %v261_v54 = vld [vmem:[%s6590_s25 + $0x1b0] sm:$0xf]  ;;  %v263_v55 = vld [vmem:[%s6590_s25 + $0x1b8] sm:$0xf]  ;;  %260 = vst [vmem:[%s6597_s26 + $0xd4] sm:$0xf] %v259_v53 }
  0x3a   : > { %262 = vst [vmem:[%s6597_s26 + $0xd8] sm:$0xf] %v261_v54  ;;  %264 = vst [vmem:[%s6597_s26 + $0xdc] sm:$0xf] %v263_v55  ;;  %v265_v56 = vld [vmem:[%s6590_s25 + $0x1c0] sm:$0xf] }
  0x3b   : > { %v267_v57 = vld [vmem:[%s6590_s25 + $0x1c8] sm:$0xf]  ;;  %v269_v58 = vld [vmem:[%s6590_s25 + $0x1d0] sm:$0xf]  ;;  %266 = vst [vmem:[%s6597_s26 + $0xe0] sm:$0xf] %v265_v56 }
  0x3c   : > { %268 = vst [vmem:[%s6597_s26 + $0xe4] sm:$0xf] %v267_v57  ;;  %270 = vst [vmem:[%s6597_s26 + $0xe8] sm:$0xf] %v269_v58  ;;  %v271_v59 = vld [vmem:[%s6590_s25 + $0x1d8] sm:$0xf] }
  0x3d   : > { %v273_v60 = vld [vmem:[%s6590_s25 + $0x1e0] sm:$0xf]  ;;  %v275_v61 = vld [vmem:[%s6590_s25 + $0x1e8] sm:$0xf]  ;;  %272 = vst [vmem:[%s6597_s26 + $0xec] sm:$0xf] %v271_v59 }
  0x3e   : > { %274 = vst [vmem:[%s6597_s26 + $0xf0] sm:$0xf] %v273_v60  ;;  %276 = vst [vmem:[%s6597_s26 + $0xf4] sm:$0xf] %v275_v61  ;;  %v277_v62 = vld [vmem:[%s6590_s25 + $0x1f0] sm:$0xf] }
  0x3f   : > { %v279_v63 = vld [vmem:[%s6590_s25 + $0x1f8] sm:$0xf]  ;;  %v281_v0 = vld [vmem:[%s6590_s25 + $0x200] sm:$0xf]  ;;  %278 = vst [vmem:[%s6597_s26 + $0xf8] sm:$0xf] %v277_v62 }
  0x40   : > { %280 = vst [vmem:[%s6597_s26 + $0xfc] sm:$0xf] %v279_v63  ;;  %282 = vst [vmem:[%s6597_s26 + $0x100] sm:$0xf] %v281_v0  ;;  %v283_v1 = vld [vmem:[%s6590_s25 + $0x208] sm:$0xf] }
  0x41   : > { %v285_v2 = vld [vmem:[%s6590_s25 + $0x210] sm:$0xf]  ;;  %v287_v3 = vld [vmem:[%s6590_s25 + $0x218] sm:$0xf]  ;;  %284 = vst [vmem:[%s6597_s26 + $0x104] sm:$0xf] %v283_v1 }
  0x42   : > { %286 = vst [vmem:[%s6597_s26 + $0x108] sm:$0xf] %v285_v2  ;;  %288 = vst [vmem:[%s6597_s26 + $0x10c] sm:$0xf] %v287_v3  ;;  %v289_v4 = vld [vmem:[%s6590_s25 + $0x220] sm:$0xf] }
  0x43   : > { %v291_v5 = vld [vmem:[%s6590_s25 + $0x228] sm:$0xf]  ;;  %v293_v6 = vld [vmem:[%s6590_s25 + $0x230] sm:$0xf]  ;;  %290 = vst [vmem:[%s6597_s26 + $0x110] sm:$0xf] %v289_v4 }
  0x44   : > { %292 = vst [vmem:[%s6597_s26 + $0x114] sm:$0xf] %v291_v5  ;;  %294 = vst [vmem:[%s6597_s26 + $0x118] sm:$0xf] %v293_v6  ;;  %v295_v7 = vld [vmem:[%s6590_s25 + $0x238] sm:$0xf] }
  0x45   : > { %v297_v8 = vld [vmem:[%s6590_s25 + $0x240] sm:$0xf]  ;;  %v299_v9 = vld [vmem:[%s6590_s25 + $0x248] sm:$0xf]  ;;  %296 = vst [vmem:[%s6597_s26 + $0x11c] sm:$0xf] %v295_v7 }
  0x46   : > { %298 = vst [vmem:[%s6597_s26 + $0x120] sm:$0xf] %v297_v8  ;;  %300 = vst [vmem:[%s6597_s26 + $0x124] sm:$0xf] %v299_v9  ;;  %v301_v10 = vld [vmem:[%s6590_s25 + $0x250] sm:$0xf] }
  0x47   : > { %v303_v11 = vld [vmem:[%s6590_s25 + $0x258] sm:$0xf]  ;;  %v305_v12 = vld [vmem:[%s6590_s25 + $0x260] sm:$0xf]  ;;  %302 = vst [vmem:[%s6597_s26 + $0x128] sm:$0xf] %v301_v10 }
  0x48   : > { %304 = vst [vmem:[%s6597_s26 + $0x12c] sm:$0xf] %v303_v11  ;;  %306 = vst [vmem:[%s6597_s26 + $0x130] sm:$0xf] %v305_v12  ;;  %v307_v13 = vld [vmem:[%s6590_s25 + $0x268] sm:$0xf] }
  0x49   : > { %v309_v14 = vld [vmem:[%s6590_s25 + $0x270] sm:$0xf]  ;;  %v311_v15 = vld [vmem:[%s6590_s25 + $0x278] sm:$0xf]  ;;  %308 = vst [vmem:[%s6597_s26 + $0x134] sm:$0xf] %v307_v13 }
  0x4a   : > { %310 = vst [vmem:[%s6597_s26 + $0x138] sm:$0xf] %v309_v14  ;;  %312 = vst [vmem:[%s6597_s26 + $0x13c] sm:$0xf] %v311_v15  ;;  %v313_v16 = vld [vmem:[%s6590_s25 + $0x280] sm:$0xf] }
  0x4b   : > { %v315_v17 = vld [vmem:[%s6590_s25 + $0x288] sm:$0xf]  ;;  %v317_v18 = vld [vmem:[%s6590_s25 + $0x290] sm:$0xf]  ;;  %314 = vst [vmem:[%s6597_s26 + $0x140] sm:$0xf] %v313_v16 }
  0x4c   : > { %316 = vst [vmem:[%s6597_s26 + $0x144] sm:$0xf] %v315_v17  ;;  %318 = vst [vmem:[%s6597_s26 + $0x148] sm:$0xf] %v317_v18  ;;  %v319_v19 = vld [vmem:[%s6590_s25 + $0x298] sm:$0xf] }
  0x4d   : > { %v321_v20 = vld [vmem:[%s6590_s25 + $0x2a0] sm:$0xf]  ;;  %v323_v21 = vld [vmem:[%s6590_s25 + $0x2a8] sm:$0xf]  ;;  %320 = vst [vmem:[%s6597_s26 + $0x14c] sm:$0xf] %v319_v19 }
  0x4e   : > { %322 = vst [vmem:[%s6597_s26 + $0x150] sm:$0xf] %v321_v20  ;;  %324 = vst [vmem:[%s6597_s26 + $0x154] sm:$0xf] %v323_v21  ;;  %v325_v22 = vld [vmem:[%s6590_s25 + $0x2b0] sm:$0xf] }
  0x4f   : > { %v327_v23 = vld [vmem:[%s6590_s25 + $0x2b8] sm:$0xf]  ;;  %v329_v24 = vld [vmem:[%s6590_s25 + $0x2c0] sm:$0xf]  ;;  %326 = vst [vmem:[%s6597_s26 + $0x158] sm:$0xf] %v325_v22 }
  0x50   : > { %328 = vst [vmem:[%s6597_s26 + $0x15c] sm:$0xf] %v327_v23  ;;  %330 = vst [vmem:[%s6597_s26 + $0x160] sm:$0xf] %v329_v24  ;;  %v331_v25 = vld [vmem:[%s6590_s25 + $0x2c8] sm:$0xf] }
  0x51   : > { %v333_v26 = vld [vmem:[%s6590_s25 + $0x2d0] sm:$0xf]  ;;  %v335_v27 = vld [vmem:[%s6590_s25 + $0x2d8] sm:$0xf]  ;;  %332 = vst [vmem:[%s6597_s26 + $0x164] sm:$0xf] %v331_v25 }
  0x52   : > { %334 = vst [vmem:[%s6597_s26 + $0x168] sm:$0xf] %v333_v26  ;;  %336 = vst [vmem:[%s6597_s26 + $0x16c] sm:$0xf] %v335_v27  ;;  %v337_v28 = vld [vmem:[%s6590_s25 + $0x2e0] sm:$0xf] }
  0x53   : > { %v339_v29 = vld [vmem:[%s6590_s25 + $0x2e8] sm:$0xf]  ;;  %v341_v30 = vld [vmem:[%s6590_s25 + $0x2f0] sm:$0xf]  ;;  %338 = vst [vmem:[%s6597_s26 + $0x170] sm:$0xf] %v337_v28 }
  0x54   : > { %340 = vst [vmem:[%s6597_s26 + $0x174] sm:$0xf] %v339_v29  ;;  %342 = vst [vmem:[%s6597_s26 + $0x178] sm:$0xf] %v341_v30  ;;  %v343_v31 = vld [vmem:[%s6590_s25 + $0x2f8] sm:$0xf] }
  0x55   : > { %v345_v32 = vld [vmem:[%s6590_s25 + $0x300] sm:$0xf]  ;;  %v347_v33 = vld [vmem:[%s6590_s25 + $0x308] sm:$0xf]  ;;  %344 = vst [vmem:[%s6597_s26 + $0x17c] sm:$0xf] %v343_v31 }
  0x56   : > { %346 = vst [vmem:[%s6597_s26 + $0x180] sm:$0xf] %v345_v32  ;;  %348 = vst [vmem:[%s6597_s26 + $0x184] sm:$0xf] %v347_v33  ;;  %v349_v34 = vld [vmem:[%s6590_s25 + $0x310] sm:$0xf] }
  0x57   : > { %v351_v35 = vld [vmem:[%s6590_s25 + $0x318] sm:$0xf]  ;;  %v353_v36 = vld [vmem:[%s6590_s25 + $0x320] sm:$0xf]  ;;  %350 = vst [vmem:[%s6597_s26 + $0x188] sm:$0xf] %v349_v34 }
  0x58   : > { %352 = vst [vmem:[%s6597_s26 + $0x18c] sm:$0xf] %v351_v35  ;;  %354 = vst [vmem:[%s6597_s26 + $0x190] sm:$0xf] %v353_v36  ;;  %v355_v37 = vld [vmem:[%s6590_s25 + $0x328] sm:$0xf] }
  0x59   : > { %v357_v38 = vld [vmem:[%s6590_s25 + $0x330] sm:$0xf]  ;;  %v359_v39 = vld [vmem:[%s6590_s25 + $0x338] sm:$0xf]  ;;  %356 = vst [vmem:[%s6597_s26 + $0x194] sm:$0xf] %v355_v37 }
  0x5a   : > { %358 = vst [vmem:[%s6597_s26 + $0x198] sm:$0xf] %v357_v38  ;;  %360 = vst [vmem:[%s6597_s26 + $0x19c] sm:$0xf] %v359_v39  ;;  %v361_v40 = vld [vmem:[%s6590_s25 + $0x340] sm:$0xf] }
  0x5b   : > { %v363_v41 = vld [vmem:[%s6590_s25 + $0x348] sm:$0xf]  ;;  %v365_v42 = vld [vmem:[%s6590_s25 + $0x350] sm:$0xf]  ;;  %362 = vst [vmem:[%s6597_s26 + $0x1a0] sm:$0xf] %v361_v40 }
  0x5c   : > { %364 = vst [vmem:[%s6597_s26 + $0x1a4] sm:$0xf] %v363_v41  ;;  %366 = vst [vmem:[%s6597_s26 + $0x1a8] sm:$0xf] %v365_v42  ;;  %v367_v43 = vld [vmem:[%s6590_s25 + $0x358] sm:$0xf] }
  0x5d   : > { %v369_v44 = vld [vmem:[%s6590_s25 + $0x360] sm:$0xf]  ;;  %v371_v45 = vld [vmem:[%s6590_s25 + $0x368] sm:$0xf]  ;;  %368 = vst [vmem:[%s6597_s26 + $0x1ac] sm:$0xf] %v367_v43 }
  0x5e   : > { %370 = vst [vmem:[%s6597_s26 + $0x1b0] sm:$0xf] %v369_v44  ;;  %372 = vst [vmem:[%s6597_s26 + $0x1b4] sm:$0xf] %v371_v45  ;;  %v373_v46 = vld [vmem:[%s6590_s25 + $0x370] sm:$0xf] }
  0x5f   : > { %v375_v47 = vld [vmem:[%s6590_s25 + $0x378] sm:$0xf]  ;;  %v377_v48 = vld [vmem:[%s6590_s25 + $0x380] sm:$0xf]  ;;  %374 = vst [vmem:[%s6597_s26 + $0x1b8] sm:$0xf] %v373_v46 }
  0x60   : > { %376 = vst [vmem:[%s6597_s26 + $0x1bc] sm:$0xf] %v375_v47  ;;  %378 = vst [vmem:[%s6597_s26 + $0x1c0] sm:$0xf] %v377_v48  ;;  %v379_v49 = vld [vmem:[%s6590_s25 + $0x388] sm:$0xf] }
  0x61   : > { %v381_v50 = vld [vmem:[%s6590_s25 + $0x390] sm:$0xf]  ;;  %v383_v51 = vld [vmem:[%s6590_s25 + $0x398] sm:$0xf]  ;;  %380 = vst [vmem:[%s6597_s26 + $0x1c4] sm:$0xf] %v379_v49 }
  0x62   : > { %382 = vst [vmem:[%s6597_s26 + $0x1c8] sm:$0xf] %v381_v50  ;;  %384 = vst [vmem:[%s6597_s26 + $0x1cc] sm:$0xf] %v383_v51  ;;  %v385_v52 = vld [vmem:[%s6590_s25 + $0x3a0] sm:$0xf] }
  0x63   : > { %v387_v53 = vld [vmem:[%s6590_s25 + $0x3a8] sm:$0xf]  ;;  %v389_v54 = vld [vmem:[%s6590_s25 + $0x3b0] sm:$0xf]  ;;  %386 = vst [vmem:[%s6597_s26 + $0x1d0] sm:$0xf] %v385_v52 }
  0x64   : > { %388 = vst [vmem:[%s6597_s26 + $0x1d4] sm:$0xf] %v387_v53  ;;  %390 = vst [vmem:[%s6597_s26 + $0x1d8] sm:$0xf] %v389_v54  ;;  %v391_v55 = vld [vmem:[%s6590_s25 + $0x3b8] sm:$0xf] }
  0x65   : > { %v393_v56 = vld [vmem:[%s6590_s25 + $0x3c0] sm:$0xf]  ;;  %v395_v57 = vld [vmem:[%s6590_s25 + $0x3c8] sm:$0xf]  ;;  %392 = vst [vmem:[%s6597_s26 + $0x1dc] sm:$0xf] %v391_v55 }
  0x66   : > { %394 = vst [vmem:[%s6597_s26 + $0x1e0] sm:$0xf] %v393_v56  ;;  %396 = vst [vmem:[%s6597_s26 + $0x1e4] sm:$0xf] %v395_v57  ;;  %v397_v58 = vld [vmem:[%s6590_s25 + $0x3d0] sm:$0xf] }
  0x67   : > { %v399_v59 = vld [vmem:[%s6590_s25 + $0x3d8] sm:$0xf]  ;;  %v401_v60 = vld [vmem:[%s6590_s25 + $0x3e0] sm:$0xf]  ;;  %398 = vst [vmem:[%s6597_s26 + $0x1e8] sm:$0xf] %v397_v58 }
  0x68   : > { %400 = vst [vmem:[%s6597_s26 + $0x1ec] sm:$0xf] %v399_v59  ;;  %402 = vst [vmem:[%s6597_s26 + $0x1f0] sm:$0xf] %v401_v60  ;;  %v403_v61 = vld [vmem:[%s6590_s25 + $0x3e8] sm:$0xf] }
  0x69   : > { %v405_v62 = vld [vmem:[%s6590_s25 + $0x3f0] sm:$0xf]  ;;  %v407_v63 = vld [vmem:[%s6590_s25 + $0x3f8] sm:$0xf]  ;;  %404 = vst [vmem:[%s6597_s26 + $0x1f4] sm:$0xf] %v403_v61 }
  0x6a   : > { %406 = vst [vmem:[%s6597_s26 + $0x1f8] sm:$0xf] %v405_v62  ;;  %408 = vst [vmem:[%s6597_s26 + $0x1fc] sm:$0xf] %v407_v63  ;;  %v409_v0 = vld [vmem:[%s6590_s25 + $0x400] sm:$0xf] }
  0x6b   : > { %v411_v1 = vld [vmem:[%s6590_s25 + $0x408] sm:$0xf]  ;;  %v413_v2 = vld [vmem:[%s6590_s25 + $0x410] sm:$0xf]  ;;  %410 = vst [vmem:[%s6597_s26 + $0x200] sm:$0xf] %v409_v0 }
  0x6c   : > { %412 = vst [vmem:[%s6597_s26 + $0x204] sm:$0xf] %v411_v1  ;;  %414 = vst [vmem:[%s6597_s26 + $0x208] sm:$0xf] %v413_v2  ;;  %v415_v3 = vld [vmem:[%s6590_s25 + $0x418] sm:$0xf] }
  0x6d   : > { %v417_v4 = vld [vmem:[%s6590_s25 + $0x420] sm:$0xf]  ;;  %v419_v5 = vld [vmem:[%s6590_s25 + $0x428] sm:$0xf]  ;;  %416 = vst [vmem:[%s6597_s26 + $0x20c] sm:$0xf] %v415_v3 }
  0x6e   : > { %418 = vst [vmem:[%s6597_s26 + $0x210] sm:$0xf] %v417_v4  ;;  %420 = vst [vmem:[%s6597_s26 + $0x214] sm:$0xf] %v419_v5  ;;  %v421_v6 = vld [vmem:[%s6590_s25 + $0x430] sm:$0xf] }
  0x6f   : > { %v423_v7 = vld [vmem:[%s6590_s25 + $0x438] sm:$0xf]  ;;  %v425_v8 = vld [vmem:[%s6590_s25 + $0x440] sm:$0xf]  ;;  %422 = vst [vmem:[%s6597_s26 + $0x218] sm:$0xf] %v421_v6 }
  0x70   : > { %424 = vst [vmem:[%s6597_s26 + $0x21c] sm:$0xf] %v423_v7  ;;  %426 = vst [vmem:[%s6597_s26 + $0x220] sm:$0xf] %v425_v8  ;;  %v427_v9 = vld [vmem:[%s6590_s25 + $0x448] sm:$0xf] }
  0x71   : > { %v429_v10 = vld [vmem:[%s6590_s25 + $0x450] sm:$0xf]  ;;  %v431_v11 = vld [vmem:[%s6590_s25 + $0x458] sm:$0xf]  ;;  %428 = vst [vmem:[%s6597_s26 + $0x224] sm:$0xf] %v427_v9 }
  0x72   : > { %430 = vst [vmem:[%s6597_s26 + $0x228] sm:$0xf] %v429_v10  ;;  %432 = vst [vmem:[%s6597_s26 + $0x22c] sm:$0xf] %v431_v11  ;;  %v433_v12 = vld [vmem:[%s6590_s25 + $0x460] sm:$0xf] }
  0x73   : > { %v435_v13 = vld [vmem:[%s6590_s25 + $0x468] sm:$0xf]  ;;  %v437_v14 = vld [vmem:[%s6590_s25 + $0x470] sm:$0xf]  ;;  %434 = vst [vmem:[%s6597_s26 + $0x230] sm:$0xf] %v433_v12 }
  0x74   : > { %436 = vst [vmem:[%s6597_s26 + $0x234] sm:$0xf] %v435_v13  ;;  %438 = vst [vmem:[%s6597_s26 + $0x238] sm:$0xf] %v437_v14  ;;  %v439_v15 = vld [vmem:[%s6590_s25 + $0x478] sm:$0xf] }
  0x75   : > { %440 = vst [vmem:[%s6597_s26 + $0x23c] sm:$0xf] %v439_v15 }
  0x76 PF: > { %p5117_p8 = scmp.ge.s32.totalorder %s6524_s13, 1  ;;  %p750_p9 = scmp.lt.s32.totalorder %s6524_s13, 3 }
  0x78   : > { %p751_p10 = pnand %p5117_p8, %p750_p9 }
  0x7a   : > { %754 = sbr.rel (%p751_p10) target bundleno = 999 (0x3e7), region = 65 }
  0x81   : > { %s757_s27 = sand.u32 1, %s6508_s9   ;;  %v6526_v16 = vmov 0   ;;  %v6032_v17 = vld [vmem:[%s8546_s0 + $0x4] ss:$36 sps:$4 sm:$0xff]   ;;  %v6035_v18 = vld [vmem:[%s8546_s0 + $0xc] ss:$36 sps:$4 sm:$0xff]  }
  0x82   : > { %3160 = vmatprep.subr.bf16.mxu1 %v6526_v16  ;;  %3449 = vmatprep.subr.bf16.mxu0 %v6526_v16  ;;  %s5956_s28 = smul.u32 576, %s757_s27  ;;  %v6030_v51 = vld [vmem:[%s8546_s0] ss:$36 sps:$4 sm:$0xff]   ;;  %v6033_v52 = vld [vmem:[%s8546_s0 + $0x8] ss:$36 sps:$4 sm:$0xff]   ;;  %s5118_s6 = sshll.u32 %s757_s27, 9 }
  0x83   : > { %3192 = vmatprep.mubr.bf16.mxu1 %v6032_v17  ;;  %3481 = vmatprep.mubr.bf16.mxu0 %v6035_v18  ;;  %v6038_v53 = vld [vmem:[%s8546_s0 + $0x4c] ss:$36 sps:$4 sm:$0xff]   ;;  %v6040_v55 = vld [vmem:[%s8546_s0 + $0x54] ss:$36 sps:$4 sm:$0xff]   ;;  %v6048_v61 = vld [vmem:[%s8546_s0 + $0x9c] ss:$36 sps:$4 sm:$0xff]  }
  0x84   : > { %s6895_s5 = scalar_lea.vmem [#allocation2], %s5956_s28  ;;  %v6042_v57 = vld [vmem:[%s8546_s0 + $0x48] ss:$36 sps:$4 sm:$0xff]   ;;  %v6043_v58 = vld [vmem:[%s8546_s0 + $0x50] ss:$36 sps:$4 sm:$0xff]   ;;  %s8209_s9 = scalar_lea.vmem [#allocation3], %s5118_s6 }
  0x85   : > { %v5998_v19 = vld [vmem:[%s6895_s5] sm:$0xff]   ;;  %v6000_v21 = vld [vmem:[%s6895_s5 + $0x8] sm:$0xff]   ;;  %v6002_v23 = vld [vmem:[%s6895_s5 + $0x10] sm:$0xff]   ;;  %s5480_s27 = sshll.u32 (%p6577_p6), %s6516_s11, 3 }
  0x86   : > { %v6899_v20 = vld [vmem:[%s6895_s5 + $0x80] sm:$0xff]   ;;  %3161 = vmatpush1.bf16.msra.mxu1 %v5998_v19  ;;  %v6905_v22 = vld [vmem:[%s6895_s5 + $0x88] sm:$0xff]   ;;  %v6912_v24 = vld [vmem:[%s6895_s5 + $0x90] sm:$0xff]   ;;  %s8404_s15 = scalar_lea.vmem (%p6577_p6), %s8548_s2, %s5480_s27 }
  0x87   : > { %3450 = vmatpush1.bf16.msra.mxu0 %v6899_v20  ;;  %3162 = vmatprep.subr.bf16.mxu1 %v6526_v16  ;;  %v6004_v25 = vld [vmem:[%s6895_s5 + $0x18] sm:$0xff]   ;;  %v6006_v27 = vld [vmem:[%s6895_s5 + $0x20] sm:$0xff]   ;;  %v6008_v29 = vld [vmem:[%s6895_s5 + $0x28] sm:$0xff]  }
  0x88   : > { %3451 = vmatprep.subr.bf16.mxu0 %v6526_v16  ;;  %v6919_v26 = vld [vmem:[%s6895_s5 + $0x98] sm:$0xff]   ;;  %v6926_v28 = vld [vmem:[%s6895_s5 + $0xa0] sm:$0xff]   ;;  %v6933_v30 = vld [vmem:[%s6895_s5 + $0xa8] sm:$0xff]  }
  0x89   : > { %v6010_v31 = vld [vmem:[%s6895_s5 + $0x30] sm:$0xff]   ;;  %v6012_v33 = vld [vmem:[%s6895_s5 + $0x38] sm:$0xff]   ;;  %v6014_v35 = vld [vmem:[%s6895_s5 + $0x40] sm:$0xff]  }
  0x8a   : > { %3163 = vmatpush1.bf16.msra.mxu1 %v6000_v21  ;;  %v6940_v32 = vld [vmem:[%s6895_s5 + $0xb0] sm:$0xff]   ;;  %v6947_v34 = vld [vmem:[%s6895_s5 + $0xb8] sm:$0xff]   ;;  %v6954_v36 = vld [vmem:[%s6895_s5 + $0xc0] sm:$0xff]  }
  0x8b   : > { %3452 = vmatpush1.bf16.msra.mxu0 %v6905_v22  ;;  %3164 = vmatprep.subr.bf16.mxu1 %v6526_v16  ;;  %v6016_v37 = vld [vmem:[%s6895_s5 + $0x48] sm:$0xff]   ;;  %v6018_v39 = vld [vmem:[%s6895_s5 + $0x50] sm:$0xff]   ;;  %v6020_v41 = vld [vmem:[%s6895_s5 + $0x58] sm:$0xff]  }
  0x8c   : > { %3453 = vmatprep.subr.bf16.mxu0 %v6526_v16  ;;  %v6961_v38 = vld [vmem:[%s6895_s5 + $0xc8] sm:$0xff]   ;;  %v6968_v40 = vld [vmem:[%s6895_s5 + $0xd0] sm:$0xff]   ;;  %v6975_v42 = vld [vmem:[%s6895_s5 + $0xd8] sm:$0xff]  }
  0x8d   : > { %v6022_v43 = vld [vmem:[%s6895_s5 + $0x60] sm:$0xff]   ;;  %v6024_v45 = vld [vmem:[%s6895_s5 + $0x68] sm:$0xff]   ;;  %v6026_v47 = vld [vmem:[%s6895_s5 + $0x70] sm:$0xff]  }
  0x8e   : > { %3165 = vmatpush1.bf16.msra.mxu1 %v6002_v23  ;;  %v6982_v44 = vld [vmem:[%s6895_s5 + $0xe0] sm:$0xff]   ;;  %v6989_v46 = vld [vmem:[%s6895_s5 + $0xe8] sm:$0xff]   ;;  %v6996_v48 = vld [vmem:[%s6895_s5 + $0xf0] sm:$0xff]  }
  0x8f   : > { %3454 = vmatpush1.bf16.msra.mxu0 %v6912_v24  ;;  %3166 = vmatprep.subr.bf16.mxu1 %v6526_v16  ;;  %v6028_v49 = vld [vmem:[%s6895_s5 + $0x78] sm:$0xff]   ;;  %v6036_v54 = vld [vmem:[%s6895_s5 + $0x100] sm:$0xff]   ;;  %v6037_v56 = vld [vmem:[%s6895_s5 + $0x108] sm:$0xff]  }
  0x90   : > { %3455 = vmatprep.subr.bf16.mxu0 %v6526_v16  ;;  %v7003_v50 = vld [vmem:[%s6895_s5 + $0xf8] sm:$0xff]   ;;  %v6044_v60 = vld [vmem:[%s6895_s5 + $0x110] sm:$0xff]   ;;  %v6052_v1 = vld [vmem:[%s6895_s5 + $0x120] sm:$0xff]  }
  0x91   : > { %v6046_v59 = vld [vmem:[%s8546_s0 + $0x94] ss:$36 sps:$4 sm:$0xff]   ;;  %v6054_v2 = vld [vmem:[%s8546_s0 + $0xdc] ss:$36 sps:$4 sm:$0xff]   ;;  %v6056_v3 = vld [vmem:[%s8546_s0 + $0xe4] ss:$36 sps:$4 sm:$0xff]  }
  0x92   : > { %3167 = vmatpush1.bf16.msra.mxu1 %v6004_v25  ;;  %v6045_v62 = vld [vmem:[%s6895_s5 + $0x118] sm:$0xff]   ;;  %v6050_v63 = vld [vmem:[%s8546_s0 + $0x90] ss:$36 sps:$4 sm:$0xff]   ;;  %v6053_v4 = vld [vmem:[%s6895_s5 + $0x128] sm:$0xff]  }
  0x93   : > { %3456 = vmatpush1.bf16.msra.mxu0 %v6919_v26  ;;  %3168 = vmatprep.subr.bf16.mxu1 %v6526_v16  ;;  %v6051_v0 = vld [vmem:[%s8546_s0 + $0x98] ss:$36 sps:$4 sm:$0xff]   ;;  %v6059_v6 = vld [vmem:[%s8546_s0 + $0xe0] ss:$36 sps:$4 sm:$0xff]   ;;  %v6060_v7 = vld [vmem:[%s6895_s5 + $0x130] sm:$0xff]  }
  0x94   : > { %3457 = vmatprep.subr.bf16.mxu0 %v6526_v16  ;;  %v6058_v5 = vld [vmem:[%s8546_s0 + $0xd8] ss:$36 sps:$4 sm:$0xff]   ;;  %v6062_v8 = vld [vmem:[%s8546_s0 + $0x124] ss:$36 sps:$4 sm:$0xff]   ;;  %v6064_v9 = vld [vmem:[%s8546_s0 + $0x12c] ss:$36 sps:$4 sm:$0xff]  }
  0x95   : > { %v6061_v10 = vld [vmem:[%s6895_s5 + $0x138] sm:$0xff]   ;;  %v6066_v11 = vld [vmem:[%s8546_s0 + $0x120] ss:$36 sps:$4 sm:$0xff]   ;;  %v6067_v12 = vld [vmem:[%s8546_s0 + $0x128] ss:$36 sps:$4 sm:$0xff]  }
  0x96   : > { %3169 = vmatpush1.bf16.msra.mxu1 %v6006_v27  ;;  %v6068_v13 = vld [vmem:[%s6895_s5 + $0x140] sm:$0xff]   ;;  %v6070_v14 = vld [vmem:[%s8546_s0 + $0x16c] ss:$36 sps:$4 sm:$0xff]   ;;  %v6072_v15 = vld [vmem:[%s8546_s0 + $0x174] ss:$36 sps:$4 sm:$0xff]  }
  0x97   : > { %3458 = vmatpush1.bf16.msra.mxu0 %v6926_v28  ;;  %3170 = vmatprep.subr.bf16.mxu1 %v6526_v16  ;;  %v6069_v17 = vld [vmem:[%s6895_s5 + $0x148] sm:$0xff]   ;;  %v6075_v19 = vld [vmem:[%s8546_s0 + $0x170] ss:$36 sps:$4 sm:$0xff]   ;;  %v6077_v23 = vld [vmem:[%s6895_s5 + $0x158] sm:$0xff]  }
  0x98   : > { %3459 = vmatprep.subr.bf16.mxu0 %v6526_v16  ;;  %v6074_v18 = vld [vmem:[%s8546_s0 + $0x168] ss:$36 sps:$4 sm:$0xff]   ;;  %v6078_v21 = vld [vmem:[%s8546_s0 + $0x1b4] ss:$36 sps:$4 sm:$0xff]   ;;  %v6084_v27 = vld [vmem:[%s6895_s5 + $0x160] sm:$0xff]  }
  0x99   : > { %v6083_v25 = vld [vmem:[%s8546_s0 + $0x1b8] ss:$36 sps:$4 sm:$0xff]  }
  0x9a   : > { %3171 = vmatpush1.bf16.msra.mxu1 %v6008_v29  ;;  %v6085_v29 = vld [vmem:[%s6895_s5 + $0x168] sm:$0xff]  }
  0x9b   : > { %3460 = vmatpush1.bf16.msra.mxu0 %v6933_v30  ;;  %3172 = vmatprep.subr.bf16.mxu1 %v6526_v16 }
  0x9c   : > { %3461 = vmatprep.subr.bf16.mxu0 %v6526_v16 }
  0x9e   : > { %3173 = vmatpush1.bf16.msra.mxu1 %v6010_v31  ;;  %v6091_v31 = vld [vmem:[%s8546_s0 + $0x200] ss:$36 sps:$4 sm:$0xff]  }
  0x9f   : > { %3462 = vmatpush1.bf16.msra.mxu0 %v6940_v32  ;;  %3174 = vmatprep.subr.bf16.mxu1 %v6526_v16 }
  0xa0   : > { %3463 = vmatprep.subr.bf16.mxu0 %v6526_v16 }
  0xa2   : > { %3175 = vmatpush1.bf16.msra.mxu1 %v6012_v33  ;;  %v6092_v33 = vld [vmem:[%s6895_s5 + $0x170] sm:$0xff]  }
  0xa3   : > { %3464 = vmatpush1.bf16.msra.mxu0 %v6947_v34  ;;  %3176 = vmatprep.subr.bf16.mxu1 %v6526_v16 }
  0xa4   : > { %3465 = vmatprep.subr.bf16.mxu0 %v6526_v16 }
  0xa6   : > { %3177 = vmatpush1.bf16.msra.mxu1 %v6014_v35  ;;  %v6093_v35 = vld [vmem:[%s6895_s5 + $0x178] sm:$0xff]  }
  0xa7   : > { %3466 = vmatpush1.bf16.msra.mxu0 %v6954_v36  ;;  %3178 = vmatprep.subr.bf16.mxu1 %v6526_v16 }
  0xa8   : > { %3467 = vmatprep.subr.bf16.mxu0 %v6526_v16 }
  0xaa   : > { %3179 = vmatpush1.bf16.msra.mxu1 %v6016_v37  ;;  %v6096_v37 = vld [vmem:[%s8546_s0 + $0x10] ss:$36 sps:$4 sm:$0xff]  }
  0xab   : > { %3468 = vmatpush1.bf16.msra.mxu0 %v6961_v38  ;;  %3180 = vmatprep.subr.bf16.mxu1 %v6526_v16 }
  0xac   : > { %3469 = vmatprep.subr.bf16.mxu0 %v6526_v16 }
  0xae   : > { %3181 = vmatpush1.bf16.msra.mxu1 %v6018_v39  ;;  %v6100_v39 = vld [vmem:[%s6895_s5 + $0x180] sm:$0xff]  }
  0xaf   : > { %3470 = vmatpush1.bf16.msra.mxu0 %v6968_v40  ;;  %3182 = vmatprep.subr.bf16.mxu1 %v6526_v16 }
  0xb0   : > { %3471 = vmatprep.subr.bf16.mxu0 %v6526_v16 }
  0xb2   : > { %3183 = vmatpush1.bf16.msra.mxu1 %v6020_v41  ;;  %v6105_v41 = vld [vmem:[%s8546_s0 + $0x288] ss:$36 sps:$4 sm:$0xff]  }
  0xb3   : > { %3472 = vmatpush1.bf16.msra.mxu0 %v6975_v42  ;;  %3184 = vmatprep.subr.bf16.mxu1 %v6526_v16 }
  0xb4   : > { %3473 = vmatprep.subr.bf16.mxu0 %v6526_v16 }
  0xb6   : > { %3185 = vmatpush1.bf16.msra.mxu1 %v6022_v43  ;;  %v6106_v43 = vld [vmem:[%s8546_s0 + $0x58] ss:$36 sps:$4 sm:$0xff]  }
  0xb7   : > { %3474 = vmatpush1.bf16.msra.mxu0 %v6982_v44  ;;  %3186 = vmatprep.subr.bf16.mxu1 %v6526_v16 }
  0xb8   : > { %3475 = vmatprep.subr.bf16.mxu0 %v6526_v16 }
  0xba   : > { %3187 = vmatpush1.bf16.msra.mxu1 %v6024_v45  ;;  %v6109_v45 = vld [vmem:[%s8546_s0 + $0xa4] ss:$36 sps:$4 sm:$0xff]  }
  0xbb   : > { %3476 = vmatpush1.bf16.msra.mxu0 %v6989_v46  ;;  %3188 = vmatprep.subr.bf16.mxu1 %v6526_v16 }
  0xbc   : > { %3477 = vmatprep.subr.bf16.mxu0 %v6526_v16 }
  0xbe   : > { %3189 = vmatpush1.bf16.msra.mxu1 %v6026_v47  ;;  %v6111_v47 = vld [vmem:[%s8546_s0 + $0x2d0] ss:$36 sps:$4 sm:$0xff]  }
  0xbf   : > { %3478 = vmatpush1.bf16.msra.mxu0 %v6996_v48  ;;  %3190 = vmatprep.subr.bf16.mxu1 %v6526_v16 }
  0xc0   : > { %3479 = vmatprep.subr.bf16.mxu0 %v6526_v16 }
  0xc2   : > { %3191 = vmatpush1.bf16.msra.mxu1 %v6028_v49  ;;  %v6112_v49 = vld [vmem:[%s8546_s0 + $0xa0] ss:$36 sps:$4 sm:$0xff]  }
  0xc3   : > { %3480 = vmatpush1.bf16.msra.mxu0 %v7003_v50  ;;  %5603 = vmatprep.subr.bf16.mxu1 %v6526_v16 }
  0xc4   : > { %3738 = vmatprep.subr.bf16.mxu0 %v6526_v16 }
  0xc5   : > { %3193 = vmatmul.mubr.bf16.vlgmr.msra.gmra.mrb[0].mxu1 %v6030_v51  ;;  %v6116_v51 = vld [vmem:[%s8546_s0 + $0xec] ss:$36 sps:$4 sm:$0xff]  }
  0xc6   : > { %3482 = vmatmul.mubr.bf16.vlgmr.msra.gmra.mrb[0].mxu0 %v6033_v52  ;;  %5619 = vmatpush1.bf16.msra.mxu1 %v6899_v20  ;;  %v6076_v20 = vld [vmem:[%s6895_s5 + $0x150] sm:$0xff]   ;;  %v6152_v52 = vld [vmem:[%s6895_s5 + $0x1a0] sm:$0xff]  }
  0xc7   : > { %3739 = vmatpush1.bf16.msra.mxu0 %v6036_v54  ;;  %3200 = vmatprep.mubr.bf16.mxu1 %v6038_v53  ;;  %v6165_v53 = vld [vmem:[%s6895_s5 + $0x1a8] sm:$0xff]   ;;  %v6118_v54 = vld [vmem:[%s8546_s0 + $0x318] ss:$36 sps:$4 sm:$0xff]  }
  0xc8   : > { %3740 = vmatprep.subr.bf16.mxu0 %v6526_v16  ;;  %3489 = vmatprep.mubr.bf16.mxu0 %v6040_v55  ;;  %v6119_v55 = vld [vmem:[%s8546_s0 + $0xe8] ss:$36 sps:$4 sm:$0xff]  }
  0xc9   : > { %5604 = vmatprep.subr.bf16.mxu1 %v6526_v16 }
  0xca   : > { %5620 = vmatpush1.bf16.msra.mxu1 %v6905_v22  ;;  %v6080_v22 = vld [vmem:[%s8546_s0 + $0x1bc] ss:$36 sps:$4 sm:$0xff]  }
  0xcb   : > { %3741 = vmatpush1.bf16.msra.mxu0 %v6037_v56  ;;  %5605 = vmatprep.subr.bf16.mxu1 %v6526_v16  ;;  %v6120_v56 = vld [vmem:[%s8546_s0 + $0x364] ss:$36 sps:$4 sm:$0xff]  }
  0xcc   : > { %3742 = vmatprep.subr.bf16.mxu0 %v6526_v16 }
  0xcd   : > { %3201 = vmatmul.mubr.bf16.gmra.mrb[4].mxu1 %v6042_v57  ;;  %v6122_v57 = vld [vmem:[%s8546_s0 + $0x134] ss:$36 sps:$4 sm:$0xff]  }
  0xce   : > { %3490 = vmatmul.mubr.bf16.gmra.mrb[4].mxu0 %v6043_v58  ;;  %3208 = vmatprep.mubr.bf16.mxu1 %v6046_v59  ;;  %v6178_v58 = vld [vmem:[%s6895_s5 + $0x1b0] sm:$0xff]   ;;  %v6191_v59 = vld [vmem:[%s6895_s5 + $0x1b8] sm:$0xff]  }
  0xcf   : > { %3743 = vmatpush1.bf16.msra.mxu0 %v6044_v60  ;;  %3497 = vmatprep.mubr.bf16.mxu0 %v6048_v61  ;;  %v6124_v60 = vld [vmem:[%s8546_s0 + $0x360] ss:$36 sps:$4 sm:$0xff]   ;;  %v6125_v61 = vld [vmem:[%s8546_s0 + $0x130] ss:$36 sps:$4 sm:$0xff]  }
  0xd0   : > { %3744 = vmatprep.subr.bf16.mxu0 %v6526_v16  ;;  %5621 = vmatpush1.bf16.msra.mxu1 %v6912_v24  ;;  %v6082_v24 = vld [vmem:[%s8546_s0 + $0x1b0] ss:$36 sps:$4 sm:$0xff]  }
  0xd1   : > { %5606 = vmatprep.subr.bf16.mxu1 %v6526_v16 }
  0xd3   : > { %3745 = vmatpush1.bf16.msra.mxu0 %v6045_v62  ;;  %v6127_v62 = vld [vmem:[%s8546_s0 + $0x3ac] ss:$36 sps:$4 sm:$0xff]  }
  0xd4   : > { %3746 = vmatprep.subr.bf16.mxu0 %v6526_v16  ;;  %5622 = vmatpush1.bf16.msra.mxu1 %v6919_v26  ;;  %v6086_v26 = vld [vmem:[%s8546_s0 + $0x1fc] ss:$36 sps:$4 sm:$0xff]  }
  0xd5   : > { %3209 = vmatmul.mubr.bf16.gmra.mrb[8].mxu1 %v6050_v63  ;;  %5607 = vmatprep.subr.bf16.mxu1 %v6526_v16  ;;  %v6129_v63 = vld [vmem:[%s8546_s0 + $0x17c] ss:$36 sps:$4 sm:$0xff]  }
  0xd6   : > { %3498 = vmatmul.mubr.bf16.gmra.mrb[8].mxu0 %v6051_v0  ;;  %3216 = vmatprep.mubr.bf16.mxu1 %v6054_v2  ;;  %v6204_v0 = vld [vmem:[%s6895_s5 + $0x1c0] sm:$0xff]   ;;  %v6131_v2 = vld [vmem:[%s8546_s0 + $0x3a8] ss:$36 sps:$4 sm:$0xff]  }
  0xd7   : > { %3747 = vmatpush1.bf16.msra.mxu0 %v6052_v1  ;;  %3505 = vmatprep.mubr.bf16.mxu0 %v6056_v3  ;;  %v6217_v1 = vld [vmem:[%s6895_s5 + $0x1c8] sm:$0xff]   ;;  %v6132_v3 = vld [vmem:[%s8546_s0 + $0x178] ss:$36 sps:$4 sm:$0xff]  }
  0xd8   : > { %3748 = vmatprep.subr.bf16.mxu0 %v6526_v16  ;;  %5623 = vmatpush1.bf16.msra.mxu1 %v6926_v28  ;;  %v6088_v28 = vld [vmem:[%s8546_s0 + $0x204] ss:$36 sps:$4 sm:$0xff]  }
  0xd9   : > { %5608 = vmatprep.subr.bf16.mxu1 %v6526_v16 }
  0xdb   : > { %3749 = vmatpush1.bf16.msra.mxu0 %v6053_v4  ;;  %v6133_v4 = vld [vmem:[%s8546_s0 + $0x3f4] ss:$36 sps:$4 sm:$0xff]  }
  0xdc   : > { %3750 = vmatprep.subr.bf16.mxu0 %v6526_v16  ;;  %5624 = vmatpush1.bf16.msra.mxu1 %v6933_v30  ;;  %v6090_v30 = vld [vmem:[%s8546_s0 + $0x1f8] ss:$36 sps:$4 sm:$0xff]  }
  0xdd   : > { %3217 = vmatmul.mubr.bf16.gmra.mrb[12].mxu1 %v6058_v5  ;;  %5609 = vmatprep.subr.bf16.mxu1 %v6526_v16  ;;  %v6135_v5 = vld [vmem:[%s8546_s0 + $0x1c4] ss:$36 sps:$4 sm:$0xff]  }
  0xde   : > { %3506 = vmatmul.mubr.bf16.gmra.mrb[12].mxu0 %v6059_v6  ;;  %3224 = vmatprep.mubr.bf16.mxu1 %v6062_v8  ;;  %v6230_v6 = vld [vmem:[%s6895_s5 + $0x1d0] sm:$0xff]   ;;  %v6138_v8 = vld [vmem:[%s8546_s0 + $0x1c0] ss:$36 sps:$4 sm:$0xff]  }
  0xdf   : > { %3751 = vmatpush1.bf16.msra.mxu0 %v6060_v7  ;;  %3513 = vmatprep.mubr.bf16.mxu0 %v6064_v9  ;;  %v6137_v7 = vld [vmem:[%s8546_s0 + $0x3f0] ss:$36 sps:$4 sm:$0xff]   ;;  %v6140_v9 = vld [vmem:[%s8546_s0 + $0x43c] ss:$36 sps:$4 sm:$0xff]  }
  0xe0   : > { %3752 = vmatprep.subr.bf16.mxu0 %v6526_v16  ;;  %5625 = vmatpush1.bf16.msra.mxu1 %v6940_v32  ;;  %v6094_v32 = vld [vmem:[%s8546_s0 + $0x244] ss:$36 sps:$4 sm:$0xff]  }
  0xe1   : > { %5610 = vmatprep.subr.bf16.mxu1 %v6526_v16 }
  0xe3   : > { %3753 = vmatpush1.bf16.msra.mxu0 %v6061_v10  ;;  %v6142_v10 = vld [vmem:[%s8546_s0 + $0x20c] ss:$36 sps:$4 sm:$0xff]  }
  0xe4   : > { %3754 = vmatprep.subr.bf16.mxu0 %v6526_v16  ;;  %5626 = vmatpush1.bf16.msra.mxu1 %v6947_v34  ;;  %v6098_v34 = vld [vmem:[%s8546_s0 + $0x14] ss:$36 sps:$4 sm:$0xff]  }
  0xe5   : > { %3225 = vmatmul.mubr.bf16.gmra.mrb[16].mxu1 %v6066_v11  ;;  %5611 = vmatprep.subr.bf16.mxu1 %v6526_v16  ;;  %v6243_v11 = vld [vmem:[%s6895_s5 + $0x1d8] sm:$0xff]  }
  0xe6   : > { %3514 = vmatmul.mubr.bf16.gmra.mrb[16].mxu0 %v6067_v12  ;;  %3232 = vmatprep.mubr.bf16.mxu1 %v6070_v14  ;;  %v6144_v12 = vld [vmem:[%s8546_s0 + $0x438] ss:$36 sps:$4 sm:$0xff]   ;;  %v6146_v14 = vld [vmem:[%s8546_s0 + $0x484] ss:$36 sps:$4 sm:$0xff]  }
  0xe7   : > { %3755 = vmatpush1.bf16.msra.mxu0 %v6068_v13  ;;  %3521 = vmatprep.mubr.bf16.mxu0 %v6072_v15  ;;  %v6145_v13 = vld [vmem:[%s8546_s0 + $0x208] ss:$36 sps:$4 sm:$0xff]   ;;  %v6148_v15 = vld [vmem:[%s8546_s0 + $0x254] ss:$36 sps:$4 sm:$0xff]  }
  0xe8   : > { %3756 = vmatprep.subr.bf16.mxu0 %v6526_v16  ;;  %5627 = vmatpush1.bf16.msra.mxu1 %v6954_v36  ;;  %v6099_v36 = vld [vmem:[%s8546_s0 + $0x240] ss:$36 sps:$4 sm:$0xff]  }
  0xe9   : > { %5612 = vmatprep.subr.bf16.mxu1 %v6526_v16 }
  0xeb   : > { %3757 = vmatpush1.bf16.msra.mxu0 %v6069_v17  ;;  %v6150_v17 = vld [vmem:[%s8546_s0 + $0x480] ss:$36 sps:$4 sm:$0xff]  }
  0xec   : > { %3758 = vmatprep.subr.bf16.mxu0 %v6526_v16  ;;  %5628 = vmatpush1.bf16.msra.mxu1 %v6961_v38  ;;  %v6101_v38 = vld [vmem:[%s8546_s0 + $0x28c] ss:$36 sps:$4 sm:$0xff]  }
  0xed   : > { %3233 = vmatmul.mubr.bf16.gmra.mrb[20].mxu1 %v6074_v18  ;;  %5613 = vmatprep.subr.bf16.mxu1 %v6526_v16  ;;  %v6151_v18 = vld [vmem:[%s8546_s0 + $0x250] ss:$36 sps:$4 sm:$0xff]  }
  0xee   : > { %3522 = vmatmul.mubr.bf16.gmra.mrb[20].mxu0 %v6075_v19  ;;  %3240 = vmatprep.mubr.bf16.mxu1 %v6078_v21  ;;  %v6153_v19 = vld [vmem:[%s8546_s0 + $0x4cc] ss:$36 sps:$4 sm:$0xff]   ;;  %v6256_v21 = vld [vmem:[%s6895_s5 + $0x1e0] sm:$0xff]  }
  0xef   : > { %3759 = vmatpush1.bf16.msra.mxu0 %v6076_v20  ;;  %3529 = vmatprep.mubr.bf16.mxu0 %v6080_v22  ;;  %v6155_v20 = vld [vmem:[%s8546_s0 + $0x29c] ss:$36 sps:$4 sm:$0xff]  }
  0xf0   : > { %3760 = vmatprep.subr.bf16.mxu0 %v6526_v16  ;;  %5629 = vmatpush1.bf16.msra.mxu1 %v6968_v40  ;;  %v6103_v40 = vld [vmem:[%s8546_s0 + $0x5c] ss:$36 sps:$4 sm:$0xff]  }
  0xf1   : > { %5614 = vmatprep.subr.bf16.mxu1 %v6526_v16  ;;  %v7302_v22 = vld [vmem:[%s6895_s5 + $0x200] sm:$0xff]  }
  0xf3   : > { %3761 = vmatpush1.bf16.msra.mxu0 %v6077_v23  ;;  %v6157_v23 = vld [vmem:[%s8546_s0 + $0x4c8] ss:$36 sps:$4 sm:$0xff]  }
  0xf4   : > { %3762 = vmatprep.subr.bf16.mxu0 %v6526_v16  ;;  %5630 = vmatpush1.bf16.msra.mxu1 %v6975_v42  ;;  %v6113_v42 = vld [vmem:[%s6895_s5 + $0x188] sm:$0xff]  }
  0xf5   : > { %3241 = vmatmul.mubr.bf16.gmra.mrb[24].mxu1 %v6082_v24  ;;  %5615 = vmatprep.subr.bf16.mxu1 %v6526_v16  ;;  %v6158_v24 = vld [vmem:[%s8546_s0 + $0x298] ss:$36 sps:$4 sm:$0xff]  }
  0xf6   : > { %3530 = vmatmul.mubr.bf16.gmra.mrb[24].mxu0 %v6083_v25  ;;  %3248 = vmatprep.mubr.bf16.mxu1 %v6086_v26  ;;  %v6159_v25 = vld [vmem:[%s8546_s0 + $0x514] ss:$36 sps:$4 sm:$0xff]   ;;  %v6161_v26 = vld [vmem:[%s8546_s0 + $0x2e4] ss:$36 sps:$4 sm:$0xff]  }
  0xf7   : > { %3763 = vmatpush1.bf16.msra.mxu0 %v6084_v27  ;;  %3537 = vmatprep.mubr.bf16.mxu0 %v6088_v28  ;;  %v6163_v27 = vld [vmem:[%s8546_s0 + $0x510] ss:$36 sps:$4 sm:$0xff]   ;;  %v6164_v28 = vld [vmem:[%s8546_s0 + $0x2e0] ss:$36 sps:$4 sm:$0xff]  }
  0xf8   : > { %3764 = vmatprep.subr.bf16.mxu0 %v6526_v16  ;;  %5631 = vmatpush1.bf16.msra.mxu1 %v6982_v44  ;;  %v6107_v44 = vld [vmem:[%s8546_s0 + $0x2d4] ss:$36 sps:$4 sm:$0xff]  }
  0xf9   : > { %5616 = vmatprep.subr.bf16.mxu1 %v6526_v16 }
  0xfb   : > { %3765 = vmatpush1.bf16.msra.mxu0 %v6085_v29  ;;  %v6166_v29 = vld [vmem:[%s8546_s0 + $0x55c] ss:$36 sps:$4 sm:$0xff]  }
  0xfc   : > { %3766 = vmatprep.subr.bf16.mxu0 %v6526_v16  ;;  %5632 = vmatpush1.bf16.msra.mxu1 %v6989_v46  ;;  %v6126_v46 = vld [vmem:[%s6895_s5 + $0x190] sm:$0xff]  }
  0xfd   : > { %3249 = vmatmul.mubr.bf16.gmra.mrb[28].mxu1 %v6090_v30  ;;  %5617 = vmatprep.subr.bf16.mxu1 %v6526_v16  ;;  %v6168_v30 = vld [vmem:[%s8546_s0 + $0x32c] ss:$36 sps:$4 sm:$0xff]  }
  0xfe   : > { %3538 = vmatmul.mubr.bf16.gmra.mrb[28].mxu0 %v6091_v31  ;;  %3256 = vmatprep.mubr.bf16.mxu1 %v6094_v32  ;;  %v6270_v31 = vld [vmem:[%s6895_s5 + $0x1e8] sm:$0xff]   ;;  %v6170_v32 = vld [vmem:[%s8546_s0 + $0x558] ss:$36 sps:$4 sm:$0xff]  }
  0xff   : > { %3767 = vmatpush1.bf16.msra.mxu0 %v6092_v33  ;;  %3770 = vmatprep.mubr.bf16.mxu0 %v6098_v34  ;;  %v6171_v33 = vld [vmem:[%s8546_s0 + $0x328] ss:$36 sps:$4 sm:$0xff]  }
 0x100   : > { %3768 = vmatprep.subr.bf16.mxu0 %v6526_v16  ;;  %5633 = vmatpush1.bf16.msra.mxu1 %v6996_v48  ;;  %v6139_v48 = vld [vmem:[%s6895_s5 + $0x198] sm:$0xff]   ;;  %v6172_v34 = vld [vmem:[%s8546_s0 + $0x5a4] ss:$36 sps:$4 sm:$0xff]  }
 0x101   : > { %5618 = vmatprep.subr.bf16.mxu1 %v6526_v16 }
 0x103   : > { %3769 = vmatpush1.bf16.msra.mxu0 %v6093_v35  ;;  %v6174_v35 = vld [vmem:[%s8546_s0 + $0x374] ss:$36 sps:$4 sm:$0xff]  }
 0x104   : > { %4027 = vmatprep.subr.bf16.mxu0 %v6526_v16  ;;  %5634 = vmatpush1.bf16.msra.mxu1 %v7003_v50  ;;  %v6114_v50 = vld [vmem:[%s8546_s0 + $0x31c] ss:$36 sps:$4 sm:$0xff]  }
 0x105   : > { %3257 = vmatmul.mubr.bf16.gmra.mrb[32].mxu1 %v6099_v36  ;;  %5523 = vmatprep.subr.bf16.mxu1 %v7302_v22  ;;  %v6176_v36 = vld [vmem:[%s8546_s0 + $0x5a0] ss:$36 sps:$4 sm:$0xff]  }
 0x106   : > { %3771 = vmatmul.mubr.bf16.vlgmr.msra.gmra.mrb[0].mxu0 %v6096_v37  ;;  %3264 = vmatprep.mubr.bf16.mxu1 %v6101_v38  ;;  %v6177_v37 = vld [vmem:[%s8546_s0 + $0x370] ss:$36 sps:$4 sm:$0xff]  }
 0x107   : > { %4028 = vmatpush1.bf16.msra.mxu0 %v6100_v39  ;;  %3778 = vmatprep.mubr.bf16.mxu0 %v6103_v40  ;;  %v6179_v38 = vld [vmem:[%s8546_s0 + $0x5ec] ss:$36 sps:$4 sm:$0xff]   ;;  %v6181_v39 = vld [vmem:[%s8546_s0 + $0x3bc] ss:$36 sps:$4 sm:$0xff]  }
 0x108   : > { %4029 = vmatprep.subr.bf16.mxu0 %v6526_v16  ;;  %v6284_v40 = vld [vmem:[%s6895_s5 + $0x1f0] sm:$0xff]  }
 0x10b   : > { %4030 = vmatpush1.bf16.msra.mxu0 %v6113_v42  ;;  %v6184_v42 = vld [vmem:[%s8546_s0 + $0x3b8] ss:$36 sps:$4 sm:$0xff]  }
 0x10c   : > { %4031 = vmatprep.subr.bf16.mxu0 %v6526_v16 }
 0x10d   : > { %3265 = vmatmul.mubr.bf16.gmra.mrb[36].mxu1 %v6105_v41  ;;  %v6183_v41 = vld [vmem:[%s8546_s0 + $0x5e8] ss:$36 sps:$4 sm:$0xff]  }
 0x10e   : > { %3779 = vmatmul.mubr.bf16.gmra.mrb[4].mxu0 %v6106_v43  ;;  %3272 = vmatprep.mubr.bf16.mxu1 %v6107_v44  ;;  %v6185_v43 = vld [vmem:[%s8546_s0 + $0x634] ss:$36 sps:$4 sm:$0xff]   ;;  %v6187_v44 = vld [vmem:[%s8546_s0 + $0x404] ss:$36 sps:$4 sm:$0xff]  }
 0x10f   : > { %3786 = vmatprep.mubr.bf16.mxu0 %v6109_v45  ;;  %4032 = vmatpush1.bf16.msra.mxu0 %v6126_v46  ;;  %v6190_v45 = vld [vmem:[%s8546_s0 + $0x400] ss:$36 sps:$4 sm:$0xff]  }
 0x110   : > { %4033 = vmatprep.subr.bf16.mxu0 %v6526_v16  ;;  %v6192_v46 = vld [vmem:[%s8546_s0 + $0x67c] ss:$36 sps:$4 sm:$0xff]  }
 0x113   : > { %4034 = vmatpush1.bf16.msra.mxu0 %v6139_v48  ;;  %v6297_v48 = vld [vmem:[%s6895_s5 + $0x1f8] sm:$0xff]  }
 0x114   : > { %4035 = vmatprep.subr.bf16.mxu0 %v6526_v16 }
 0x115   : > { %3273 = vmatmul.mubr.bf16.gmra.mrb[40].mxu1 %v6111_v47  ;;  %v6194_v47 = vld [vmem:[%s8546_s0 + $0x44c] ss:$36 sps:$4 sm:$0xff]  }
 0x116   : > { %3787 = vmatmul.mubr.bf16.gmra.mrb[8].mxu0 %v6112_v49  ;;  %3280 = vmatprep.mubr.bf16.mxu1 %v6114_v50  ;;  %v6196_v49 = vld [vmem:[%s8546_s0 + $0x678] ss:$36 sps:$4 sm:$0xff]   ;;  %v6197_v50 = vld [vmem:[%s8546_s0 + $0x448] ss:$36 sps:$4 sm:$0xff]  }
 0x117   : > { %3794 = vmatprep.mubr.bf16.mxu0 %v6116_v51  ;;  %4036 = vmatpush1.bf16.msra.mxu0 %v6152_v52  ;;  %v6198_v51 = vld [vmem:[%s8546_s0 + $0x6c4] ss:$36 sps:$4 sm:$0xff]   ;;  %v6200_v52 = vld [vmem:[%s8546_s0 + $0x494] ss:$36 sps:$4 sm:$0xff]  }
 0x118   : > { %4037 = vmatprep.subr.bf16.mxu0 %v6526_v16 }
 0x11b   : > { %4038 = vmatpush1.bf16.msra.mxu0 %v6165_v53  ;;  %v6202_v53 = vld [vmem:[%s8546_s0 + $0x6c0] ss:$36 sps:$4 sm:$0xff]  }
 0x11c   : > { %4039 = vmatprep.subr.bf16.mxu0 %v6526_v16 }
 0x11d   : > { %3281 = vmatmul.mubr.bf16.gmra.mrb[44].mxu1 %v6118_v54  ;;  %v6203_v54 = vld [vmem:[%s8546_s0 + $0x490] ss:$36 sps:$4 sm:$0xff]  }
 0x11e   : > { %3795 = vmatmul.mubr.bf16.gmra.mrb[12].mxu0 %v6119_v55  ;;  %3288 = vmatprep.mubr.bf16.mxu1 %v6120_v56  ;;  %v6205_v55 = vld [vmem:[%s8546_s0 + $0x70c] ss:$36 sps:$4 sm:$0xff]   ;;  %v6207_v56 = vld [vmem:[%s8546_s0 + $0x4dc] ss:$36 sps:$4 sm:$0xff]  }
 0x11f   : > { %3802 = vmatprep.mubr.bf16.mxu0 %v6122_v57  ;;  %4040 = vmatpush1.bf16.msra.mxu0 %v6178_v58  ;;  %v6209_v57 = vld [vmem:[%s8546_s0 + $0x708] ss:$36 sps:$4 sm:$0xff]   ;;  %v6210_v58 = vld [vmem:[%s8546_s0 + $0x4d8] ss:$36 sps:$4 sm:$0xff]  }
 0x120   : > { %4041 = vmatprep.subr.bf16.mxu0 %v6526_v16 }
 0x123   : > { %4042 = vmatpush1.bf16.msra.mxu0 %v6191_v59  ;;  %v6211_v59 = vld [vmem:[%s8546_s0 + $0x754] ss:$36 sps:$4 sm:$0xff]  }
 0x124   : > { %4043 = vmatprep.subr.bf16.mxu0 %v6526_v16 }
 0x125   : > { %3289 = vmatmul.mubr.bf16.gmra.mrb[48].mxu1 %v6124_v60  ;;  %v6213_v60 = vld [vmem:[%s8546_s0 + $0x524] ss:$36 sps:$4 sm:$0xff]  }
 0x126   : > { %3803 = vmatmul.mubr.bf16.gmra.mrb[16].mxu0 %v6125_v61  ;;  %3296 = vmatprep.mubr.bf16.mxu1 %v6127_v62  ;;  %v6215_v61 = vld [vmem:[%s8546_s0 + $0x750] ss:$36 sps:$4 sm:$0xff]   ;;  %v6216_v62 = vld [vmem:[%s8546_s0 + $0x520] ss:$36 sps:$4 sm:$0xff]  }
 0x127   : > { %3810 = vmatprep.mubr.bf16.mxu0 %v6129_v63  ;;  %4044 = vmatpush1.bf16.msra.mxu0 %v6204_v0  ;;  %v6218_v63 = vld [vmem:[%s8546_s0 + $0x79c] ss:$36 sps:$4 sm:$0xff]   ;;  %v6220_v0 = vld [vmem:[%s8546_s0 + $0x56c] ss:$36 sps:$4 sm:$0xff]  }
 0x128   : > { %4045 = vmatprep.subr.bf16.mxu0 %v6526_v16 }
 0x12b   : > { %4046 = vmatpush1.bf16.msra.mxu0 %v6217_v1 }
 0x12c   : > { %4047 = vmatprep.subr.bf16.mxu0 %v6526_v16 }
 0x12d   : > { %3297 = vmatmul.mubr.bf16.gmra.mrb[52].mxu1 %v6131_v2 }
 0x12e   : > { %3811 = vmatmul.mubr.bf16.gmra.mrb[20].mxu0 %v6132_v3  ;;  %3304 = vmatprep.mubr.bf16.mxu1 %v6133_v4  ;;  %v6222_v3 = vld [vmem:[%s8546_s0 + $0x798] ss:$36 sps:$4 sm:$0xff]  }
 0x12f   : > { %3818 = vmatprep.mubr.bf16.mxu0 %v6135_v5  ;;  %4048 = vmatpush1.bf16.msra.mxu0 %v6230_v6  ;;  %v6223_v5 = vld [vmem:[%s8546_s0 + $0x568] ss:$36 sps:$4 sm:$0xff]  }
 0x130   : > { %4049 = vmatprep.subr.bf16.mxu0 %v6526_v16  ;;  %v6224_v6 = vld [vmem:[%s8546_s0 + $0x7e4] ss:$36 sps:$4 sm:$0xff]  }
 0x133   : > { %4050 = vmatpush1.bf16.msra.mxu0 %v6243_v11  ;;  %v6228_v11 = vld [vmem:[%s8546_s0 + $0x7e0] ss:$36 sps:$4 sm:$0xff]  }
 0x134   : > { %4051 = vmatprep.subr.bf16.mxu0 %v6526_v16 }
 0x135   : > { %3305 = vmatmul.mubr.bf16.gmra.mrb[56].mxu1 %v6137_v7 }
 0x136   : > { %3819 = vmatmul.mubr.bf16.gmra.mrb[24].mxu0 %v6138_v8  ;;  %3312 = vmatprep.mubr.bf16.mxu1 %v6140_v9  ;;  %v6226_v8 = vld [vmem:[%s8546_s0 + $0x5b4] ss:$36 sps:$4 sm:$0xff]  }
 0x137   : > { %3826 = vmatprep.mubr.bf16.mxu0 %v6142_v10  ;;  %4052 = vmatpush1.bf16.msra.mxu0 %v6256_v21 }
 0x138   : > { %4053 = vmatprep.subr.bf16.mxu0 %v6526_v16 }
 0x13b   : > { %4054 = vmatpush1.bf16.msra.mxu0 %v6270_v31  ;;  %v6242_v31 = vld [vmem:[%s8546_s0 + $0x640] ss:$36 sps:$4 sm:$0xff]  }
 0x13c   : > { %4055 = vmatprep.subr.bf16.mxu0 %v6526_v16 }
 0x13d   : > { %3313 = vmatmul.mubr.bf16.gmra.mrb[60].mxu1 %v6144_v12 }
 0x13e   : > { %3827 = vmatmul.mubr.bf16.gmra.mrb[28].mxu0 %v6145_v13  ;;  %3320 = vmatprep.mubr.bf16.mxu1 %v6146_v14  ;;  %v6229_v13 = vld [vmem:[%s8546_s0 + $0x5b0] ss:$36 sps:$4 sm:$0xff]  }
 0x13f   : > { %3834 = vmatprep.mubr.bf16.mxu0 %v6148_v15  ;;  %4056 = vmatpush1.bf16.msra.mxu0 %v6284_v40  ;;  %v6231_v14 = vld [vmem:[%s8546_s0 + $0x82c] ss:$36 sps:$4 sm:$0xff]  }
 0x140   : > { %4057 = vmatprep.subr.bf16.mxu0 %v6526_v16  ;;  %v6189_v16 = vld [vmem:[%s8546_s0 + $0x630] ss:$36 sps:$4 sm:$0xff]  }
 0x141   : > { %v6252_v40 = vld [vmem:[%s8546_s0 + $0x24c] ss:$36 sps:$4 sm:$0xff]  }
 0x143   : > { %4058 = vmatpush1.bf16.msra.mxu0 %v6297_v48  ;;  %v6258_v48 = vld [vmem:[%s8546_s0 + $0x294] ss:$36 sps:$4 sm:$0xff]  }
 0x145   : > { %3321 = vmatmul.mubr.bf16.gmra.mrb[64].mxu1 %v6150_v17  ;;  %v6233_v17 = vld [vmem:[%s8546_s0 + $0x5fc] ss:$36 sps:$4 sm:$0xff]  }
 0x146   : > { %3835 = vmatmul.mubr.bf16.gmra.mrb[32].mxu0 %v6151_v18  ;;  %3328 = vmatprep.mubr.bf16.mxu1 %v6153_v19 }
 0x147   : > { %3842 = vmatprep.mubr.bf16.mxu0 %v6155_v20  ;;  %v6235_v20 = vld [vmem:[%s8546_s0 + $0x828] ss:$36 sps:$4 sm:$0xff]  }
 0x14d   : > { %3329 = vmatmul.mubr.bf16.gmra.mrb[68].mxu1 %v6157_v23  ;;  %v6236_v23 = vld [vmem:[%s8546_s0 + $0x5f8] ss:$36 sps:$4 sm:$0xff]  }
 0x14e   : > { %3843 = vmatmul.mubr.bf16.gmra.mrb[36].mxu0 %v6158_v24  ;;  %3336 = vmatprep.mubr.bf16.mxu1 %v6159_v25  ;;  %v6237_v24 = vld [vmem:[%s8546_s0 + $0x874] ss:$36 sps:$4 sm:$0xff]  }
 0x14f   : > { %3850 = vmatprep.mubr.bf16.mxu0 %v6161_v26  ;;  %v6239_v26 = vld [vmem:[%s8546_s0 + $0x644] ss:$36 sps:$4 sm:$0xff]  }
 0x155   : > { %3337 = vmatmul.mubr.bf16.gmra.mrb[72].mxu1 %v6163_v27 }
 0x156   : > { %3851 = vmatmul.mubr.bf16.gmra.mrb[40].mxu0 %v6164_v28  ;;  %3344 = vmatprep.mubr.bf16.mxu1 %v6166_v29  ;;  %v6241_v29 = vld [vmem:[%s8546_s0 + $0x870] ss:$36 sps:$4 sm:$0xff]  }
 0x157   : > { %3858 = vmatprep.mubr.bf16.mxu0 %v6168_v30 }
 0x15d   : > { %3345 = vmatmul.mubr.bf16.gmra.mrb[76].mxu1 %v6170_v32  ;;  %v6244_v32 = vld [vmem:[%s8546_s0 + $0x8bc] ss:$36 sps:$4 sm:$0xff]  }
 0x15e   : > { %3859 = vmatmul.mubr.bf16.gmra.mrb[44].mxu0 %v6171_v33  ;;  %3352 = vmatprep.mubr.bf16.mxu1 %v6172_v34  ;;  %v6246_v34 = vld [vmem:[%s8546_s0 + $0x68c] ss:$36 sps:$4 sm:$0xff]  }
 0x15f   : > { %3866 = vmatprep.mubr.bf16.mxu0 %v6174_v35 }
 0x165   : > { %3353 = vmatmul.mubr.bf16.gmra.mrb[80].mxu1 %v6176_v36 }
 0x166   : > { %3867 = vmatmul.mubr.bf16.gmra.mrb[48].mxu0 %v6177_v37  ;;  %3360 = vmatprep.mubr.bf16.mxu1 %v6179_v38  ;;  %v6248_v37 = vld [vmem:[%s8546_s0 + $0x8b8] ss:$36 sps:$4 sm:$0xff]  }
 0x167   : > { %3874 = vmatprep.mubr.bf16.mxu0 %v6181_v39  ;;  %v6249_v39 = vld [vmem:[%s8546_s0 + $0x688] ss:$36 sps:$4 sm:$0xff]  }
 0x16d   : > { %3361 = vmatmul.mubr.bf16.gmra.mrb[84].mxu1 %v6183_v41 }
 0x16e   : > { %3875 = vmatmul.mubr.bf16.gmra.mrb[52].mxu0 %v6184_v42  ;;  %3368 = vmatprep.mubr.bf16.mxu1 %v6185_v43  ;;  %v6253_v42 = vld [vmem:[%s8546_s0 + $0x6d4] ss:$36 sps:$4 sm:$0xff]  }
 0x16f   : > { %3882 = vmatprep.mubr.bf16.mxu0 %v6187_v44 }
 0x175   : > { %3369 = vmatmul.mubr.bf16.gmra.mrb[88].mxu1 %v6189_v16  ;;  %v6250_v16 = vld [vmem:[%s8546_s0 + $0x248] ss:$36 sps:$4 sm:$0xff]  }
 0x176   : > { %3883 = vmatmul.mubr.bf16.gmra.mrb[56].mxu0 %v6190_v45  ;;  %3376 = vmatprep.mubr.bf16.mxu1 %v6192_v46  ;;  %v6255_v46 = vld [vmem:[%s8546_s0 + $0x6d0] ss:$36 sps:$4 sm:$0xff]  }
 0x177   : > { %3890 = vmatprep.mubr.bf16.mxu0 %v6194_v47 }
 0x17d   : > { %3377 = vmatmul.mubr.bf16.gmra.mrb[92].mxu1 %v6196_v49  ;;  %v6260_v49 = vld [vmem:[%s8546_s0 + $0x71c] ss:$36 sps:$4 sm:$0xff]  }
 0x17e   : > { %3891 = vmatmul.mubr.bf16.gmra.mrb[60].mxu0 %v6197_v50  ;;  %3384 = vmatprep.mubr.bf16.mxu1 %v6198_v51  ;;  %v6277_v50 = vld [vmem:[%s6895_s5 + $0x208] sm:$0xff]   ;;  %v6298_v51 = vld [vmem:[%s6895_s5 + $0x210] sm:$0xff]  }
 0x17f   : > { %3898 = vmatprep.mubr.bf16.mxu0 %v6200_v52 }
 0x185   : > { %3385 = vmatmul.mubr.bf16.gmra.mrb[96].mxu1 %v6202_v53 }
 0x186   : > { %3899 = vmatmul.mubr.bf16.gmra.mrb[64].mxu0 %v6203_v54  ;;  %3392 = vmatprep.mubr.bf16.mxu1 %v6205_v55  ;;  %v6262_v54 = vld [vmem:[%s8546_s0 + $0x290] ss:$36 sps:$4 sm:$0xff]  }
 0x187   : > { %3906 = vmatprep.mubr.bf16.mxu0 %v6207_v56  ;;  %v6263_v56 = vld [vmem:[%s8546_s0 + $0x718] ss:$36 sps:$4 sm:$0xff]  }
 0x18d   : > { %3393 = vmatmul.mubr.bf16.gmra.mrb[100].mxu1 %v6209_v57 }
 0x18e   : > { %3907 = vmatmul.mubr.bf16.gmra.mrb[68].mxu0 %v6210_v58  ;;  %3400 = vmatprep.mubr.bf16.mxu1 %v6211_v59  ;;  %v6266_v58 = vld [vmem:[%s8546_s0 + $0x764] ss:$36 sps:$4 sm:$0xff]   ;;  %v6317_v59 = vld [vmem:[%s6895_s5 + $0x218] sm:$0xff]  }
 0x18f   : > { %3914 = vmatprep.mubr.bf16.mxu0 %v6213_v60 }
 0x195   : > { %3401 = vmatmul.mubr.bf16.gmra.mrb[104].mxu1 %v6215_v61  ;;  %v6336_v61 = vld [vmem:[%s6895_s5 + $0x220] sm:$0xff]  }
 0x196   : > { %3915 = vmatmul.mubr.bf16.gmra.mrb[72].mxu0 %v6216_v62  ;;  %3408 = vmatprep.mubr.bf16.mxu1 %v6218_v63  ;;  %v6268_v63 = vld [vmem:[%s8546_s0 + $0x2d8] ss:$36 sps:$4 sm:$0xff]  }
 0x197   : > { %3922 = vmatprep.mubr.bf16.mxu0 %v6220_v0 }
 0x198   : > { %v7431_v1 = vpop.f32.mrb[0].mxu1 }
 0x199   : > { %v3196_v2 = vpop.f32.mrb[1].mxu1 }
 0x19a   : > { %v7436_v4 = vpop.f32.mrb[2].mxu1  ;;  %v6269_v2 = vld [vmem:[%s8546_s0 + $0x760] ss:$36 sps:$4 sm:$0xff]  }
 0x19b   : > { %v3199_v7 = vpop.f32.mrb[3].mxu1 }
 0x19c   : > { %v6355_v7 = vld [vmem:[%s6895_s5 + $0x228] sm:$0xff]  }
 0x19d   : > { %3409 = vmatmul.mubr.bf16.gmra.mrb[108].mxu1 %v6222_v3  ;;  %v6271_v3 = vld [vmem:[%s8546_s0 + $0x324] ss:$36 sps:$4 sm:$0xff]  }
 0x19e   : > { %3923 = vmatmul.mubr.bf16.gmra.mrb[76].mxu0 %v6223_v5  ;;  %3416 = vmatprep.mubr.bf16.mxu1 %v6224_v6  ;;  %v6273_v6 = vld [vmem:[%s8546_s0 + $0x7ac] ss:$36 sps:$4 sm:$0xff]  }
 0x19f   : > { %3930 = vmatprep.mubr.bf16.mxu0 %v6226_v8  ;;  %v6374_v8 = vld [vmem:[%s6895_s5 + $0x230] sm:$0xff]  }
 0x1a0   : > { %v7447_v9 = vpop.f32.mrb[4].mxu1 }
 0x1a1   : > { %v3204_v10 = vpop.f32.mrb[5].mxu1 }
 0x1a2   : > { %v7452_v12 = vpop.f32.mrb[6].mxu1  ;;  %v6275_v10 = vld [vmem:[%s8546_s0 + $0x320] ss:$36 sps:$4 sm:$0xff]  }
 0x1a3   : > { %v3207_v15 = vpop.f32.mrb[7].mxu1 }
 0x1a4   : > { %v6282_v15 = vld [vmem:[%s8546_s0 + $0x368] ss:$36 sps:$4 sm:$0xff]  }
 0x1a5   : > { %3417 = vmatmul.mubr.bf16.gmra.mrb[112].mxu1 %v6228_v11  ;;  %v6276_v11 = vld [vmem:[%s8546_s0 + $0x7a8] ss:$36 sps:$4 sm:$0xff]  }
 0x1a6   : > { %3931 = vmatmul.mubr.bf16.gmra.mrb[80].mxu0 %v6229_v13  ;;  %3424 = vmatprep.mubr.bf16.mxu1 %v6231_v14  ;;  %v6278_v13 = vld [vmem:[%s8546_s0 + $0x36c] ss:$36 sps:$4 sm:$0xff]   ;;  %v6280_v14 = vld [vmem:[%s8546_s0 + $0x7f4] ss:$36 sps:$4 sm:$0xff]  }
 0x1a7   : > { %3938 = vmatprep.mubr.bf16.mxu0 %v6233_v17  ;;  %v6283_v17 = vld [vmem:[%s8546_s0 + $0x7f0] ss:$36 sps:$4 sm:$0xff]  }
 0x1a8   : > { %v7463_v18 = vpop.f32.mrb[8].mxu1 }
 0x1a9   : > { %v3212_v19 = vpop.f32.mrb[9].mxu1 }
 0x1aa   : > { %v7468_v21 = vpop.f32.mrb[10].mxu1  ;;  %v6285_v19 = vld [vmem:[%s8546_s0 + $0x3b4] ss:$36 sps:$4 sm:$0xff]  }
 0x1ab   : > { %v3215_v25 = vpop.f32.mrb[11].mxu1 }
 0x1ac   : > { %v6291_v25 = vld [vmem:[%s8546_s0 + $0x3fc] ss:$36 sps:$4 sm:$0xff]  }
 0x1ad   : > { %3425 = vmatmul.mubr.bf16.gmra.mrb[116].mxu1 %v6235_v20  ;;  %v6287_v20 = vld [vmem:[%s8546_s0 + $0x83c] ss:$36 sps:$4 sm:$0xff]  }
 0x1ae   : > { %3939 = vmatmul.mubr.bf16.gmra.mrb[84].mxu0 %v6236_v23  ;;  %3432 = vmatprep.mubr.bf16.mxu1 %v6237_v24  ;;  %v6289_v23 = vld [vmem:[%s8546_s0 + $0x3b0] ss:$36 sps:$4 sm:$0xff]   ;;  %v6290_v24 = vld [vmem:[%s8546_s0 + $0x838] ss:$36 sps:$4 sm:$0xff]  }
 0x1af   : > { %3946 = vmatprep.mubr.bf16.mxu0 %v6239_v26  ;;  %v6293_v26 = vld [vmem:[%s8546_s0 + $0x884] ss:$36 sps:$4 sm:$0xff]  }
 0x1b0   : > { %v7479_v27 = vpop.f32.mrb[12].mxu1 }
 0x1b1   : > { %v3220_v28 = vpop.f32.mrb[13].mxu1 }
 0x1b2   : > { %v7484_v30 = vpop.f32.mrb[14].mxu1  ;;  %v6393_v28 = vld [vmem:[%s6895_s5 + $0x238] sm:$0xff]  }
 0x1b3   : > { %v3223_v33 = vpop.f32.mrb[15].mxu1 }
 0x1b4   : > { %v6301_v33 = vld [vmem:[%s8546_s0 + $0x8cc] ss:$36 sps:$4 sm:$0xff]  }
 0x1b5   : > { %3433 = vmatmul.mubr.bf16.gmra.mrb[120].mxu1 %v6241_v29  ;;  %v6295_v29 = vld [vmem:[%s8546_s0 + $0x3f8] ss:$36 sps:$4 sm:$0xff]  }
 0x1b6   : > { %3947 = vmatmul.mubr.bf16.gmra.mrb[88].mxu0 %v6242_v31  ;;  %3440 = vmatprep.mubr.bf16.mxu1 %v6244_v32  ;;  %v6296_v31 = vld [vmem:[%s8546_s0 + $0x880] ss:$36 sps:$4 sm:$0xff]  }
 0x1b7   : > { %3954 = vmatprep.mubr.bf16.mxu0 %v6246_v34  ;;  %v6299_v32 = vld [vmem:[%s8546_s0 + $0x444] ss:$36 sps:$4 sm:$0xff]  }
 0x1b8   : > { %v7495_v35 = vpop.f32.mrb[16].mxu1  ;;  %v6303_v34 = vld [vmem:[%s8546_s0 + $0x440] ss:$36 sps:$4 sm:$0xff]  }
 0x1b9   : > { %v3228_v36 = vpop.f32.mrb[17].mxu1 }
 0x1ba   : > { %v7500_v38 = vpop.f32.mrb[18].mxu1  ;;  %v6304_v36 = vld [vmem:[%s8546_s0 + $0x8c8] ss:$36 sps:$4 sm:$0xff]  }
 0x1bb   : > { %v3231_v41 = vpop.f32.mrb[19].mxu1 }
 0x1bc   : > { %v6307_v41 = vld [vmem:[%s8546_s0 + $0x18] ss:$36 sps:$4 sm:$0xff]  }
 0x1bd   : > { %3441 = vmatmul.mubr.bf16.gmra.mrb[124].mxu1 %v6248_v37  ;;  %v6305_v37 = vld [vmem:[%s8546_s0 + $0x48c] ss:$36 sps:$4 sm:$0xff]  }
 0x1be   : > { %3955 = vmatmul.mubr.bf16.gmra.mrb[92].mxu0 %v6249_v39  ;;  %3545 = vmatprep.mubr.bf16.mxu1 %v6252_v40  ;;  %v6309_v39 = vld [vmem:[%s8546_s0 + $0x1c] ss:$36 sps:$4 sm:$0xff]   ;;  %v6310_v40 = vld [vmem:[%s8546_s0 + $0x488] ss:$36 sps:$4 sm:$0xff]  }
 0x1bf   : > { %3962 = vmatprep.mubr.bf16.mxu0 %v6253_v42  ;;  %v6311_v42 = vld [vmem:[%s8546_s0 + $0x4d4] ss:$36 sps:$4 sm:$0xff]  }
 0x1c0   : > { %v7511_v43 = vpop.f32.mrb[20].mxu1 }
 0x1c1   : > { %v3236_v44 = vpop.f32.mrb[21].mxu1 }
 0x1c2   : > { %v7516_v45 = vpop.f32.mrb[22].mxu1  ;;  %v6313_v44 = vld [vmem:[%s8546_s0 + $0x64] ss:$36 sps:$4 sm:$0xff]  }
 0x1c3   : > { %v3239_v47 = vpop.f32.mrb[23].mxu1 }
 0x1c4   : > { %v6318_v47 = vld [vmem:[%s8546_s0 + $0x51c] ss:$36 sps:$4 sm:$0xff]  }
 0x1c5   : > { %3546 = vmatmul.mubr.bf16.vlgmr.msra.gmra.mrb[32].mxu1 %v6250_v16  ;;  %v6315_v16 = vld [vmem:[%s8546_s0 + $0x4d0] ss:$36 sps:$4 sm:$0xff]  }
 0x1c6   : > { %3963 = vmatmul.mubr.bf16.gmra.mrb[96].mxu0 %v6255_v46  ;;  %5524 = vmatpush3.bf16.msra.mxu1 %v7302_v22  ;;  %v6264_v22 = vld [vmem:[%s8546_s0 + $0x2dc] ss:$36 sps:$4 sm:$0xff]  }
 0x1c7   : > { %3553 = vmatprep.mubr.bf16.mxu1 %v6258_v48  ;;  %3970 = vmatprep.mubr.bf16.mxu0 %v6260_v49  ;;  %v6316_v46 = vld [vmem:[%s8546_s0 + $0x60] ss:$36 sps:$4 sm:$0xff]   ;;  %v6320_v48 = vld [vmem:[%s8546_s0 + $0xac] ss:$36 sps:$4 sm:$0xff]   ;;  %v6322_v49 = vld [vmem:[%s8546_s0 + $0x518] ss:$36 sps:$4 sm:$0xff]  }
 0x1c8   : > { %v7530_v52 = vpop.f32.mrb[24].mxu1  ;;  %5525 = vmatprep.subr.bf16.mxu1 %v6277_v50 }
 0x1c9   : > { %v3244_v53 = vpop.f32.mrb[25].mxu1 }
 0x1ca   : > { %v7535_v55 = vpop.f32.mrb[26].mxu1  ;;  %5526 = vmatpush3.bf16.msra.mxu1 %v6277_v50  ;;  %v6323_v50 = vld [vmem:[%s8546_s0 + $0xa8] ss:$36 sps:$4 sm:$0xff]   ;;  %v6326_v53 = vld [vmem:[%s8546_s0 + $0xf4] ss:$36 sps:$4 sm:$0xff]  }
 0x1cb   : > { %v3247_v57 = vpop.f32.mrb[27].mxu1  ;;  %5527 = vmatprep.subr.bf16.mxu1 %v6298_v51 }
 0x1cc   : > { %v6332_v57 = vld [vmem:[%s8546_s0 + $0x13c] ss:$36 sps:$4 sm:$0xff]  }
 0x1cd   : > { %3554 = vmatmul.mubr.bf16.gmra.mrb[36].mxu1 %v6262_v54  ;;  %v6328_v54 = vld [vmem:[%s8546_s0 + $0x560] ss:$36 sps:$4 sm:$0xff]  }
 0x1ce   : > { %3971 = vmatmul.mubr.bf16.gmra.mrb[100].mxu0 %v6263_v56  ;;  %3561 = vmatprep.mubr.bf16.mxu1 %v6264_v22  ;;  %v6329_v56 = vld [vmem:[%s8546_s0 + $0xf0] ss:$36 sps:$4 sm:$0xff]  }
 0x1cf   : > { %3978 = vmatprep.mubr.bf16.mxu0 %v6266_v58  ;;  %5528 = vmatpush3.bf16.msra.mxu1 %v6298_v51  ;;  %v6324_v51 = vld [vmem:[%s8546_s0 + $0x564] ss:$36 sps:$4 sm:$0xff]   ;;  %v6330_v22 = vld [vmem:[%s8546_s0 + $0x5ac] ss:$36 sps:$4 sm:$0xff]  }
 0x1d0   : > { %v7547_v60 = vpop.f32.mrb[28].mxu1  ;;  %5529 = vmatprep.subr.bf16.mxu1 %v6317_v59  ;;  %v6334_v58 = vld [vmem:[%s8546_s0 + $0x5a8] ss:$36 sps:$4 sm:$0xff]  }
 0x1d1   : > { %v3252_v62 = vpop.f32.mrb[29].mxu1 }
 0x1d2   : > { %v7553_v0 = vpop.f32.mrb[30].mxu1  ;;  %v6339_v62 = vld [vmem:[%s8546_s0 + $0x184] ss:$36 sps:$4 sm:$0xff]  }
 0x1d3   : > { %v3255_v5 = vpop.f32.mrb[31].mxu1  ;;  %5530 = vmatpush3.bf16.msra.mxu1 %v6317_v59  ;;  %v6335_v59 = vld [vmem:[%s8546_s0 + $0x138] ss:$36 sps:$4 sm:$0xff]  }
 0x1d4   : > { %5531 = vmatprep.subr.bf16.mxu1 %v6336_v61  ;;  %v6345_v5 = vld [vmem:[%s8546_s0 + $0x1cc] ss:$36 sps:$4 sm:$0xff]  }
 0x1d5   : > { %3562 = vmatmul.mubr.bf16.gmra.mrb[40].mxu1 %v6268_v63  ;;  %v6341_v63 = vld [vmem:[%s8546_s0 + $0x5f0] ss:$36 sps:$4 sm:$0xff]  }
 0x1d6   : > { %3979 = vmatmul.mubr.bf16.gmra.mrb[104].mxu0 %v6269_v2  ;;  %3569 = vmatprep.mubr.bf16.mxu1 %v6271_v3  ;;  %v6342_v2 = vld [vmem:[%s8546_s0 + $0x180] ss:$36 sps:$4 sm:$0xff]  }
 0x1d7   : > { %3986 = vmatprep.mubr.bf16.mxu0 %v6273_v6  ;;  %5532 = vmatpush3.bf16.msra.mxu1 %v6336_v61  ;;  %v6337_v61 = vld [vmem:[%s8546_s0 + $0x5f4] ss:$36 sps:$4 sm:$0xff]   ;;  %v6343_v3 = vld [vmem:[%s8546_s0 + $0x63c] ss:$36 sps:$4 sm:$0xff]  }
 0x1d8   : > { %5533 = vmatprep.subr.bf16.mxu1 %v6355_v7  ;;  %v6347_v6 = vld [vmem:[%s8546_s0 + $0x638] ss:$36 sps:$4 sm:$0xff]  }
 0x1db   : > { %5534 = vmatpush3.bf16.msra.mxu1 %v6355_v7  ;;  %v6348_v7 = vld [vmem:[%s8546_s0 + $0x1c8] ss:$36 sps:$4 sm:$0xff]  }
 0x1dc   : > { %5535 = vmatprep.subr.bf16.mxu1 %v6374_v8 }
 0x1dd   : > { %3570 = vmatmul.mubr.bf16.gmra.mrb[44].mxu1 %v6275_v10  ;;  %v6351_v10 = vld [vmem:[%s8546_s0 + $0x214] ss:$36 sps:$4 sm:$0xff]  }
 0x1de   : > { %3987 = vmatmul.mubr.bf16.gmra.mrb[108].mxu0 %v6276_v11  ;;  %3577 = vmatprep.mubr.bf16.mxu1 %v6278_v13  ;;  %v6353_v11 = vld [vmem:[%s8546_s0 + $0x680] ss:$36 sps:$4 sm:$0xff]   ;;  %v6354_v13 = vld [vmem:[%s8546_s0 + $0x210] ss:$36 sps:$4 sm:$0xff]  }
 0x1df   : > { %3994 = vmatprep.mubr.bf16.mxu0 %v6280_v14  ;;  %5536 = vmatpush3.bf16.msra.mxu1 %v6374_v8  ;;  %v6349_v8 = vld [vmem:[%s8546_s0 + $0x684] ss:$36 sps:$4 sm:$0xff]   ;;  %v6356_v14 = vld [vmem:[%s8546_s0 + $0x6cc] ss:$36 sps:$4 sm:$0xff]  }
 0x1e0   : > { %5537 = vmatprep.subr.bf16.mxu1 %v6393_v28 }
 0x1e3   : > { %5538 = vmatpush3.bf16.msra.mxu1 %v6393_v28  ;;  %v6370_v28 = vld [vmem:[%s8546_s0 + $0x2ec] ss:$36 sps:$4 sm:$0xff]  }
 0x1e5   : > { %3578 = vmatmul.mubr.bf16.gmra.mrb[48].mxu1 %v6282_v15  ;;  %v6358_v15 = vld [vmem:[%s8546_s0 + $0x25c] ss:$36 sps:$4 sm:$0xff]  }
 0x1e6   : > { %3995 = vmatmul.mubr.bf16.gmra.mrb[112].mxu0 %v6283_v17  ;;  %3585 = vmatprep.mubr.bf16.mxu1 %v6285_v19  ;;  %v6360_v17 = vld [vmem:[%s8546_s0 + $0x6c8] ss:$36 sps:$4 sm:$0xff]   ;;  %v6361_v19 = vld [vmem:[%s8546_s0 + $0x258] ss:$36 sps:$4 sm:$0xff]  }
 0x1e7   : > { %4002 = vmatprep.mubr.bf16.mxu0 %v6287_v20  ;;  %v6362_v20 = vld [vmem:[%s8546_s0 + $0x714] ss:$36 sps:$4 sm:$0xff]  }
 0x1ed   : > { %3586 = vmatmul.mubr.bf16.gmra.mrb[52].mxu1 %v6289_v23  ;;  %v6364_v23 = vld [vmem:[%s8546_s0 + $0x2a4] ss:$36 sps:$4 sm:$0xff]  }
 0x1ee   : > { %4003 = vmatmul.mubr.bf16.gmra.mrb[116].mxu0 %v6290_v24  ;;  %3593 = vmatprep.mubr.bf16.mxu1 %v6291_v25  ;;  %v6366_v24 = vld [vmem:[%s8546_s0 + $0x710] ss:$36 sps:$4 sm:$0xff]   ;;  %v6367_v25 = vld [vmem:[%s8546_s0 + $0x2a0] ss:$36 sps:$4 sm:$0xff]  }
 0x1ef   : > { %4010 = vmatprep.mubr.bf16.mxu0 %v6293_v26  ;;  %v6368_v26 = vld [vmem:[%s8546_s0 + $0x75c] ss:$36 sps:$4 sm:$0xff]  }
 0x1f5   : > { %3594 = vmatmul.mubr.bf16.gmra.mrb[56].mxu1 %v6295_v29  ;;  %v6372_v29 = vld [vmem:[%s8546_s0 + $0x758] ss:$36 sps:$4 sm:$0xff]  }
 0x1f6   : > { %4011 = vmatmul.mubr.bf16.gmra.mrb[120].mxu0 %v6296_v31  ;;  %3601 = vmatprep.mubr.bf16.mxu1 %v6299_v32  ;;  %v6373_v31 = vld [vmem:[%s8546_s0 + $0x2e8] ss:$36 sps:$4 sm:$0xff]  }
 0x1f7   : > { %4018 = vmatprep.mubr.bf16.mxu0 %v6301_v33  ;;  %v6375_v32 = vld [vmem:[%s8546_s0 + $0x7a4] ss:$36 sps:$4 sm:$0xff]   ;;  %v6377_v33 = vld [vmem:[%s8546_s0 + $0x334] ss:$36 sps:$4 sm:$0xff]  }
 0x1fd   : > { %3602 = vmatmul.mubr.bf16.gmra.mrb[60].mxu1 %v6303_v34  ;;  %v6379_v34 = vld [vmem:[%s8546_s0 + $0x7a0] ss:$36 sps:$4 sm:$0xff]  }
 0x1fe   : > { %4019 = vmatmul.mubr.bf16.gmra.mrb[124].mxu0 %v6304_v36  ;;  %3609 = vmatprep.mubr.bf16.mxu1 %v6305_v37  ;;  %v6380_v36 = vld [vmem:[%s8546_s0 + $0x330] ss:$36 sps:$4 sm:$0xff]  }
 0x1ff   : > { %4059 = vmatprep.mubr.bf16.mxu0 %v6309_v39  ;;  %v6381_v37 = vld [vmem:[%s8546_s0 + $0x7ec] ss:$36 sps:$4 sm:$0xff]   ;;  %v6383_v39 = vld [vmem:[%s8546_s0 + $0x37c] ss:$36 sps:$4 sm:$0xff]  }
 0x205   : > { %3610 = vmatmul.mubr.bf16.gmra.mrb[64].mxu1 %v6310_v40  ;;  %v6385_v40 = vld [vmem:[%s8546_s0 + $0x7e8] ss:$36 sps:$4 sm:$0xff]  }
 0x206   : > { %4060 = vmatmul.mubr.bf16.vlgmr.msra.gmra.mrb[0].mxu0 %v6307_v41  ;;  %3617 = vmatprep.mubr.bf16.mxu1 %v6311_v42  ;;  %v6386_v41 = vld [vmem:[%s8546_s0 + $0x378] ss:$36 sps:$4 sm:$0xff]  }
 0x207   : > { %4067 = vmatprep.mubr.bf16.mxu0 %v6313_v44  ;;  %v6387_v42 = vld [vmem:[%s8546_s0 + $0x834] ss:$36 sps:$4 sm:$0xff]   ;;  %v6389_v44 = vld [vmem:[%s8546_s0 + $0x3c4] ss:$36 sps:$4 sm:$0xff]  }
 0x20d   : > { %3618 = vmatmul.mubr.bf16.gmra.mrb[68].mxu1 %v6315_v16  ;;  %v6391_v16 = vld [vmem:[%s8546_s0 + $0x830] ss:$36 sps:$4 sm:$0xff]  }
 0x20e   : > { %4068 = vmatmul.mubr.bf16.gmra.mrb[4].mxu0 %v6316_v46  ;;  %3625 = vmatprep.mubr.bf16.mxu1 %v6318_v47  ;;  %v6392_v46 = vld [vmem:[%s8546_s0 + $0x3c0] ss:$36 sps:$4 sm:$0xff]  }
 0x20f   : > { %4075 = vmatprep.mubr.bf16.mxu0 %v6320_v48  ;;  %v6394_v47 = vld [vmem:[%s8546_s0 + $0x87c] ss:$36 sps:$4 sm:$0xff]   ;;  %v6396_v48 = vld [vmem:[%s8546_s0 + $0x40c] ss:$36 sps:$4 sm:$0xff]  }
 0x215   : > { %3626 = vmatmul.mubr.bf16.gmra.mrb[72].mxu1 %v6322_v49  ;;  %v6398_v49 = vld [vmem:[%s8546_s0 + $0x878] ss:$36 sps:$4 sm:$0xff]  }
 0x216   : > { %4076 = vmatmul.mubr.bf16.gmra.mrb[8].mxu0 %v6323_v50  ;;  %3633 = vmatprep.mubr.bf16.mxu1 %v6324_v51  ;;  %v6399_v50 = vld [vmem:[%s8546_s0 + $0x408] ss:$36 sps:$4 sm:$0xff]  }
 0x217   : > { %4083 = vmatprep.mubr.bf16.mxu0 %v6326_v53  ;;  %v6400_v51 = vld [vmem:[%s8546_s0 + $0x8c4] ss:$36 sps:$4 sm:$0xff]   ;;  %v6402_v53 = vld [vmem:[%s8546_s0 + $0x454] ss:$36 sps:$4 sm:$0xff]  }
 0x21d   : > { %3634 = vmatmul.mubr.bf16.gmra.mrb[76].mxu1 %v6328_v54  ;;  %v6404_v54 = vld [vmem:[%s8546_s0 + $0x8c0] ss:$36 sps:$4 sm:$0xff]  }
 0x21e   : > { %4084 = vmatmul.mubr.bf16.gmra.mrb[12].mxu0 %v6329_v56  ;;  %3641 = vmatprep.mubr.bf16.mxu1 %v6330_v22  ;;  %v6405_v56 = vld [vmem:[%s8546_s0 + $0x450] ss:$36 sps:$4 sm:$0xff]   ;;  %v6408_v22 = vld [vmem:[%s8546_s0 + $0x20] ss:$36 sps:$4 sm:$0xff]  }
 0x21f   : > { %4091 = vmatprep.mubr.bf16.mxu0 %v6332_v57  ;;  %v6406_v57 = vld [vmem:[%s8546_s0 + $0x49c] ss:$36 sps:$4 sm:$0xff]  }
 0x225   : > { %3642 = vmatmul.mubr.bf16.gmra.mrb[80].mxu1 %v6334_v58  ;;  %v6410_v58 = vld [vmem:[%s8546_s0 + $0x68] ss:$36 sps:$4 sm:$0xff]  }
 0x226   : > { %4092 = vmatmul.mubr.bf16.gmra.mrb[16].mxu0 %v6335_v59  ;;  %3649 = vmatprep.mubr.bf16.mxu1 %v6337_v61  ;;  %v6409_v59 = vld [vmem:[%s8546_s0 + $0x498] ss:$36 sps:$4 sm:$0xff]   ;;  %v6413_v61 = vld [vmem:[%s8546_s0 + $0xb0] ss:$36 sps:$4 sm:$0xff]  }
 0x227   : > { %4099 = vmatprep.mubr.bf16.mxu0 %v6339_v62  ;;  %v6411_v62 = vld [vmem:[%s8546_s0 + $0x4e4] ss:$36 sps:$4 sm:$0xff]  }
 0x22d   : > { %3650 = vmatmul.mubr.bf16.gmra.mrb[84].mxu1 %v6341_v63  ;;  %v6415_v63 = vld [vmem:[%s8546_s0 + $0xf8] ss:$36 sps:$4 sm:$0xff]  }
 0x22e   : > { %4100 = vmatmul.mubr.bf16.gmra.mrb[20].mxu0 %v6342_v2  ;;  %3657 = vmatprep.mubr.bf16.mxu1 %v6343_v3  ;;  %v6414_v2 = vld [vmem:[%s8546_s0 + $0x4e0] ss:$36 sps:$4 sm:$0xff]  }
 0x22f   : > { %4107 = vmatprep.mubr.bf16.mxu0 %v6345_v5  ;;  %v6418_v3 = vld [vmem:[%s8546_s0 + $0x140] ss:$36 sps:$4 sm:$0xff]   ;;  %v6416_v5 = vld [vmem:[%s8546_s0 + $0x52c] ss:$36 sps:$4 sm:$0xff]  }
 0x235   : > { %3658 = vmatmul.mubr.bf16.gmra.mrb[88].mxu1 %v6347_v6  ;;  %v6420_v6 = vld [vmem:[%s8546_s0 + $0x188] ss:$36 sps:$4 sm:$0xff]  }
 0x236   : > { %4108 = vmatmul.mubr.bf16.gmra.mrb[24].mxu0 %v6348_v7  ;;  %3665 = vmatprep.mubr.bf16.mxu1 %v6349_v8  ;;  %v6419_v7 = vld [vmem:[%s8546_s0 + $0x528] ss:$36 sps:$4 sm:$0xff]   ;;  %v6423_v8 = vld [vmem:[%s8546_s0 + $0x1d0] ss:$36 sps:$4 sm:$0xff]  }
 0x237   : > { %4115 = vmatprep.mubr.bf16.mxu0 %v6351_v10  ;;  %v6421_v10 = vld [vmem:[%s8546_s0 + $0x574] ss:$36 sps:$4 sm:$0xff]  }
 0x23d   : > { %3666 = vmatmul.mubr.bf16.gmra.mrb[92].mxu1 %v6353_v11 }
 0x23e   : > { %4116 = vmatmul.mubr.bf16.gmra.mrb[28].mxu0 %v6354_v13  ;;  %3673 = vmatprep.mubr.bf16.mxu1 %v6356_v14  ;;  %v6425_v14 = vld [vmem:[%s8546_s0 + $0x218] ss:$36 sps:$4 sm:$0xff]  }
 0x23f   : > { %4123 = vmatprep.mubr.bf16.mxu0 %v6358_v15 }
 0x245   : > { %3674 = vmatmul.mubr.bf16.gmra.mrb[96].mxu1 %v6360_v17  ;;  %v6424_v17 = vld [vmem:[%s8546_s0 + $0x570] ss:$36 sps:$4 sm:$0xff]  }
 0x246   : > { %4124 = vmatmul.mubr.bf16.gmra.mrb[32].mxu0 %v6361_v19  ;;  %3681 = vmatprep.mubr.bf16.mxu1 %v6362_v20  ;;  %v6428_v19 = vld [vmem:[%s8546_s0 + $0x260] ss:$36 sps:$4 sm:$0xff]  }
 0x247   : > { %4131 = vmatprep.mubr.bf16.mxu0 %v6364_v23  ;;  %v6426_v23 = vld [vmem:[%s8546_s0 + $0x5bc] ss:$36 sps:$4 sm:$0xff]  }
 0x24d   : > { %3682 = vmatmul.mubr.bf16.gmra.mrb[100].mxu1 %v6366_v24 }
 0x24e   : > { %4132 = vmatmul.mubr.bf16.gmra.mrb[36].mxu0 %v6367_v25  ;;  %3689 = vmatprep.mubr.bf16.mxu1 %v6368_v26  ;;  %v6430_v26 = vld [vmem:[%s8546_s0 + $0x2a8] ss:$36 sps:$4 sm:$0xff]  }
 0x24f   : > { %4139 = vmatprep.mubr.bf16.mxu0 %v6370_v28 }
 0x255   : > { %3690 = vmatmul.mubr.bf16.gmra.mrb[104].mxu1 %v6372_v29  ;;  %v6429_v29 = vld [vmem:[%s8546_s0 + $0x5b8] ss:$36 sps:$4 sm:$0xff]  }
 0x256   : > { %4140 = vmatmul.mubr.bf16.gmra.mrb[40].mxu0 %v6373_v31  ;;  %3697 = vmatprep.mubr.bf16.mxu1 %v6375_v32  ;;  %v6433_v31 = vld [vmem:[%s8546_s0 + $0x2f0] ss:$36 sps:$4 sm:$0xff]  }
 0x257   : > { %4147 = vmatprep.mubr.bf16.mxu0 %v6377_v33  ;;  %v6431_v33 = vld [vmem:[%s8546_s0 + $0x604] ss:$36 sps:$4 sm:$0xff]  }
 0x25d   : > { %3698 = vmatmul.mubr.bf16.gmra.mrb[108].mxu1 %v6379_v34 }
 0x25e   : > { %4148 = vmatmul.mubr.bf16.gmra.mrb[44].mxu0 %v6380_v36  ;;  %3705 = vmatprep.mubr.bf16.mxu1 %v6381_v37  ;;  %v6435_v37 = vld [vmem:[%s8546_s0 + $0x338] ss:$36 sps:$4 sm:$0xff]  }
 0x25f   : > { %4155 = vmatprep.mubr.bf16.mxu0 %v6383_v39 }
 0x265   : > { %3706 = vmatmul.mubr.bf16.gmra.mrb[112].mxu1 %v6385_v40  ;;  %v6434_v40 = vld [vmem:[%s8546_s0 + $0x600] ss:$36 sps:$4 sm:$0xff]  }
 0x266   : > { %4156 = vmatmul.mubr.bf16.gmra.mrb[48].mxu0 %v6386_v41  ;;  %3713 = vmatprep.mubr.bf16.mxu1 %v6387_v42  ;;  %v6438_v41 = vld [vmem:[%s8546_s0 + $0x380] ss:$36 sps:$4 sm:$0xff]  }
 0x267   : > { %4163 = vmatprep.mubr.bf16.mxu0 %v6389_v44  ;;  %v6436_v44 = vld [vmem:[%s8546_s0 + $0x64c] ss:$36 sps:$4 sm:$0xff]  }
 0x26d   : > { %3714 = vmatmul.mubr.bf16.gmra.mrb[116].mxu1 %v6391_v16 }
 0x26e   : > { %4164 = vmatmul.mubr.bf16.gmra.mrb[52].mxu0 %v6392_v46  ;;  %3721 = vmatprep.mubr.bf16.mxu1 %v6394_v47  ;;  %v6440_v47 = vld [vmem:[%s8546_s0 + $0x3c8] ss:$36 sps:$4 sm:$0xff]  }
 0x26f   : > { %4171 = vmatprep.mubr.bf16.mxu0 %v6396_v48 }
 0x275   : > { %3722 = vmatmul.mubr.bf16.gmra.mrb[120].mxu1 %v6398_v49  ;;  %v6439_v49 = vld [vmem:[%s8546_s0 + $0x648] ss:$36 sps:$4 sm:$0xff]  }
 0x276   : > { %4172 = vmatmul.mubr.bf16.gmra.mrb[56].mxu0 %v6399_v50  ;;  %3729 = vmatprep.mubr.bf16.mxu1 %v6400_v51  ;;  %v6443_v50 = vld [vmem:[%s8546_s0 + $0x410] ss:$36 sps:$4 sm:$0xff]  }
 0x277   : > { %4179 = vmatprep.mubr.bf16.mxu0 %v6402_v53  ;;  %v6441_v53 = vld [vmem:[%s8546_s0 + $0x694] ss:$36 sps:$4 sm:$0xff]  }
 0x27d   : > { %3730 = vmatmul.mubr.bf16.gmra.mrb[124].mxu1 %v6404_v54 }
 0x27e   : > { %4180 = vmatmul.mubr.bf16.gmra.mrb[60].mxu0 %v6405_v56  ;;  %5539 = vmatprep.mubr.bf16.mxu1 %v6408_v22  ;;  %v6445_v22 = vld [vmem:[%s8546_s0 + $0x458] ss:$36 sps:$4 sm:$0xff]  }
 0x27f   : > { %4187 = vmatprep.mubr.bf16.mxu0 %v6406_v57 }
 0x285   : > { %5540 = vmatmul.mubr.bf16.vlgmr.msra.gmra.mrb[128].mxu1 %v6410_v58  ;;  %v6444_v58 = vld [vmem:[%s8546_s0 + $0x690] ss:$36 sps:$4 sm:$0xff]  }
 0x286   : > { %4188 = vmatmul.mubr.bf16.gmra.mrb[64].mxu0 %v6409_v59  ;;  %5543 = vmatprep.mubr.bf16.mxu1 %v6413_v61  ;;  %v6448_v59 = vld [vmem:[%s8546_s0 + $0x4a0] ss:$36 sps:$4 sm:$0xff]  }
 0x287   : > { %4195 = vmatprep.mubr.bf16.mxu0 %v6411_v62  ;;  %v6446_v62 = vld [vmem:[%s8546_s0 + $0x6dc] ss:$36 sps:$4 sm:$0xff]  }
 0x28d   : > { %5544 = vmatmul.mubr.bf16.gmra.mrb[132].mxu1 %v6415_v63 }
 0x28e   : > { %4196 = vmatmul.mubr.bf16.gmra.mrb[68].mxu0 %v6414_v2  ;;  %5547 = vmatprep.mubr.bf16.mxu1 %v6418_v3  ;;  %v6450_v3 = vld [vmem:[%s8546_s0 + $0x4e8] ss:$36 sps:$4 sm:$0xff]  }
 0x28f   : > { %4203 = vmatprep.mubr.bf16.mxu0 %v6416_v5 }
 0x295   : > { %5548 = vmatmul.mubr.bf16.gmra.mrb[136].mxu1 %v6420_v6  ;;  %v6449_v6 = vld [vmem:[%s8546_s0 + $0x6d8] ss:$36 sps:$4 sm:$0xff]  }
 0x296   : > { %4204 = vmatmul.mubr.bf16.gmra.mrb[72].mxu0 %v6419_v7  ;;  %5551 = vmatprep.mubr.bf16.mxu1 %v6423_v8  ;;  %v6453_v7 = vld [vmem:[%s8546_s0 + $0x530] ss:$36 sps:$4 sm:$0xff]  }
 0x297   : > { %4211 = vmatprep.mubr.bf16.mxu0 %v6421_v10  ;;  %v6451_v10 = vld [vmem:[%s8546_s0 + $0x724] ss:$36 sps:$4 sm:$0xff]  }
 0x298   : > { %v7855_v11 = vpop.f32.mrb[32].mxu1 }
 0x299   : > { %v3549_v13 = vpop.f32.mrb[33].mxu1 }
 0x29a   : > { %v7860_v15 = vpop.f32.mrb[34].mxu1 }
 0x29b   : > { %v3552_v20 = vpop.f32.mrb[35].mxu1 }
 0x29c   : > { %v6454_v20 = vld [vmem:[%s8546_s0 + $0x720] ss:$36 sps:$4 sm:$0xff]  }
 0x29d   : > { %5552 = vmatmul.mubr.bf16.gmra.mrb[140].mxu1 %v6425_v14 }
 0x29e   : > { %4212 = vmatmul.mubr.bf16.gmra.mrb[76].mxu0 %v6424_v17  ;;  %5555 = vmatprep.mubr.bf16.mxu1 %v6428_v19  ;;  %v6455_v17 = vld [vmem:[%s8546_s0 + $0x578] ss:$36 sps:$4 sm:$0xff]  }
 0x29f   : > { %4219 = vmatprep.mubr.bf16.mxu0 %v6426_v23  ;;  %v6458_v23 = vld [vmem:[%s8546_s0 + $0x5c0] ss:$36 sps:$4 sm:$0xff]  }
 0x2a0   : > { %v7871_v24 = vpop.f32.mrb[36].mxu1 }
 0x2a1   : > { %v3557_v25 = vpop.f32.mrb[37].mxu1 }
 0x2a2   : > { %v7876_v28 = vpop.f32.mrb[38].mxu1 }
 0x2a3   : > { %v3560_v32 = vpop.f32.mrb[39].mxu1 }
 0x2a4   : > { %v6460_v32 = vld [vmem:[%s8546_s0 + $0x608] ss:$36 sps:$4 sm:$0xff]  }
 0x2a5   : > { %5556 = vmatmul.mubr.bf16.gmra.mrb[144].mxu1 %v6430_v26  ;;  %v6456_v26 = vld [vmem:[%s8546_s0 + $0x76c] ss:$36 sps:$4 sm:$0xff]  }
 0x2a6   : > { %4220 = vmatmul.mubr.bf16.gmra.mrb[80].mxu0 %v6429_v29  ;;  %5559 = vmatprep.mubr.bf16.mxu1 %v6433_v31 }
 0x2a7   : > { %4227 = vmatprep.mubr.bf16.mxu0 %v6431_v33 }
 0x2a8   : > { %v7887_v34 = vpop.f32.mrb[40].mxu1 }
 0x2a9   : > { %v3565_v36 = vpop.f32.mrb[41].mxu1 }
 0x2aa   : > { %v7892_v39 = vpop.f32.mrb[42].mxu1  ;;  %v6459_v36 = vld [vmem:[%s8546_s0 + $0x768] ss:$36 sps:$4 sm:$0xff]  }
 0x2ab   : > { %v3568_v42 = vpop.f32.mrb[43].mxu1 }
 0x2ad   : > { %5560 = vmatmul.mubr.bf16.gmra.mrb[148].mxu1 %v6435_v37  ;;  %v6463_v37 = vld [vmem:[%s8546_s0 + $0x650] ss:$36 sps:$4 sm:$0xff]  }
 0x2ae   : > { %4228 = vmatmul.mubr.bf16.gmra.mrb[84].mxu0 %v6434_v40  ;;  %5563 = vmatprep.mubr.bf16.mxu1 %v6438_v41  ;;  %v6461_v41 = vld [vmem:[%s8546_s0 + $0x7b4] ss:$36 sps:$4 sm:$0xff]  }
 0x2af   : > { %4235 = vmatprep.mubr.bf16.mxu0 %v6436_v44 }
 0x2b0   : > { %v7903_v16 = vpop.f32.mrb[44].mxu1 }
 0x2b1   : > { %v3573_v46 = vpop.f32.mrb[45].mxu1 }
 0x2b2   : > { %v7908_v48 = vpop.f32.mrb[46].mxu1 }
 0x2b3   : > { %v3576_v51 = vpop.f32.mrb[47].mxu1 }
 0x2b5   : > { %5564 = vmatmul.mubr.bf16.gmra.mrb[152].mxu1 %v6440_v47  ;;  %v6465_v47 = vld [vmem:[%s8546_s0 + $0x698] ss:$36 sps:$4 sm:$0xff]  }
 0x2b6   : > { %4236 = vmatmul.mubr.bf16.gmra.mrb[88].mxu0 %v6439_v49  ;;  %5567 = vmatprep.mubr.bf16.mxu1 %v6443_v50 }
 0x2b7   : > { %4243 = vmatprep.mubr.bf16.mxu0 %v6441_v53  ;;  %v6464_v53 = vld [vmem:[%s8546_s0 + $0x7b0] ss:$36 sps:$4 sm:$0xff]  }
 0x2b8   : > { %v7919_v54 = vpop.f32.mrb[48].mxu1 }
 0x2b9   : > { %v3581_v56 = vpop.f32.mrb[49].mxu1 }
 0x2ba   : > { %v7924_v57 = vpop.f32.mrb[50].mxu1  ;;  %v6468_v56 = vld [vmem:[%s8546_s0 + $0x6e0] ss:$36 sps:$4 sm:$0xff]  }
 0x2bb   : > { %v3584_v61 = vpop.f32.mrb[51].mxu1 }
 0x2bd   : > { %5568 = vmatmul.mubr.bf16.gmra.mrb[156].mxu1 %v6445_v22 }
 0x2be   : > { %4244 = vmatmul.mubr.bf16.gmra.mrb[92].mxu0 %v6444_v58  ;;  %5571 = vmatprep.mubr.bf16.mxu1 %v6448_v59  ;;  %v6466_v59 = vld [vmem:[%s8546_s0 + $0x7fc] ss:$36 sps:$4 sm:$0xff]  }
 0x2bf   : > { %4251 = vmatprep.mubr.bf16.mxu0 %v6446_v62 }
 0x2c0   : > { %v7935_v63 = vpop.f32.mrb[52].mxu1 }
 0x2c1   : > { %v3589_v2 = vpop.f32.mrb[53].mxu1 }
 0x2c2   : > { %v7940_v5 = vpop.f32.mrb[54].mxu1 }
 0x2c3   : > { %v3592_v8 = vpop.f32.mrb[55].mxu1 }
 0x2c5   : > { %5572 = vmatmul.mubr.bf16.gmra.mrb[160].mxu1 %v6450_v3 }
 0x2c6   : > { %4252 = vmatmul.mubr.bf16.gmra.mrb[96].mxu0 %v6449_v6  ;;  %5575 = vmatprep.mubr.bf16.mxu1 %v6453_v7  ;;  %v6470_v6 = vld [vmem:[%s8546_s0 + $0x728] ss:$36 sps:$4 sm:$0xff]  }
 0x2c7   : > { %4259 = vmatprep.mubr.bf16.mxu0 %v6451_v10 }
 0x2c8   : > { %v7951_v13 = vpop.f32.mrb[56].mxu1 }
 0x2c9   : > { %v3597_v14 = vpop.f32.mrb[57].mxu1 }
 0x2ca   : > { %v7956_v19 = vpop.f32.mrb[58].mxu1  ;;  %v6473_v14 = vld [vmem:[%s8546_s0 + $0x770] ss:$36 sps:$4 sm:$0xff]  }
 0x2cb   : > { %v3600_v25 = vpop.f32.mrb[59].mxu1 }
 0x2cd   : > { %5576 = vmatmul.mubr.bf16.gmra.mrb[164].mxu1 %v6455_v17 }
 0x2ce   : > { %4260 = vmatmul.mubr.bf16.gmra.mrb[100].mxu0 %v6454_v20  ;;  %5579 = vmatprep.mubr.bf16.mxu1 %v6458_v23  ;;  %v6471_v23 = vld [vmem:[%s8546_s0 + $0x844] ss:$36 sps:$4 sm:$0xff]  }
 0x2cf   : > { %4267 = vmatprep.mubr.bf16.mxu0 %v6456_v26 }
 0x2d0   : > { %v7967_v29 = vpop.f32.mrb[60].mxu1 }
 0x2d1   : > { %v3605_v31 = vpop.f32.mrb[61].mxu1 }
 0x2d2   : > { %v7972_v33 = vpop.f32.mrb[62].mxu1 }
 0x2d3   : > { %v3608_v40 = vpop.f32.mrb[63].mxu1 }
 0x2d5   : > { %5580 = vmatmul.mubr.bf16.gmra.mrb[168].mxu1 %v6460_v32 }
 0x2d6   : > { %4268 = vmatmul.mubr.bf16.gmra.mrb[104].mxu0 %v6459_v36  ;;  %5583 = vmatprep.mubr.bf16.mxu1 %v6463_v37  ;;  %v6475_v36 = vld [vmem:[%s8546_s0 + $0x7b8] ss:$36 sps:$4 sm:$0xff]  }
 0x2d7   : > { %4275 = vmatprep.mubr.bf16.mxu0 %v6461_v41 }
 0x2d8   : > { %v7983_v42 = vpop.f32.mrb[64].mxu1 }
 0x2d9   : > { %v4061_v44 = vpop.f32.mrb[0].mxu0  ;;  %v3613_v46 = vpop.f32.mrb[65].mxu1 }
 0x2da   : > { %v7989_v49 = vadd.f32 %v4061_v44, %v7431_v1  ;;  %v4063_v50 = vpop.f32.mrb[1].mxu0  ;;  %v7991_v51 = vpop.f32.mrb[66].mxu1  ;;  %v6478_v44 = vld [vmem:[%s8546_s0 + $0x800] ss:$36 sps:$4 sm:$0xff]  }
 0x2db   : > { %v4064_v22 = vpop.f32.mrb[2].mxu0  ;;  %v3616_v58 = vpop.f32.mrb[67].mxu1  ;;  %v6476_v50 = vld [vmem:[%s8546_s0 + $0x88c] ss:$36 sps:$4 sm:$0xff]  }
 0x2dc   : > { %v8003_v1 = vadd.f32 %v4064_v22, %v7436_v4  ;;  %v4066_v61 = vpop.f32.mrb[3].mxu0  ;;  %v6469_v4 = vld [vmem:[%s8546_s0 + $0x7f8] ss:$36 sps:$4 sm:$0xff]  }
 0x2dd   : > { %5584 = vmatmul.mubr.bf16.gmra.mrb[172].mxu1 %v6465_v47 }
 0x2de   : > { %4276 = vmatmul.mubr.bf16.gmra.mrb[108].mxu0 %v6464_v53  ;;  %5587 = vmatprep.mubr.bf16.mxu1 %v6468_v56 }
 0x2df   : > { %4283 = vmatprep.mubr.bf16.mxu0 %v6466_v59  ;;  %v6480_v59 = vld [vmem:[%s8546_s0 + $0x848] ss:$36 sps:$4 sm:$0xff]  }
 0x2e0   : > { %v8005_v62 = vpop.f32.mrb[68].mxu1 }
 0x2e1   : > { %v4069_v2 = vpop.f32.mrb[4].mxu0  ;;  %v3621_v3 = vpop.f32.mrb[69].mxu1 }
 0x2e2   : > { %v8011_v7 = vadd.f32 %v4069_v2, %v7447_v9  ;;  %v4071_v8 = vpop.f32.mrb[5].mxu0  ;;  %v8013_v10 = vpop.f32.mrb[70].mxu1 }
 0x2e3   : > { %v4072_v17 = vpop.f32.mrb[6].mxu0  ;;  %v3624_v20 = vpop.f32.mrb[71].mxu1 }
 0x2e4   : > { %v8025_v9 = vadd.f32 %v4072_v17, %v7452_v12  ;;  %v4074_v25 = vpop.f32.mrb[7].mxu0  ;;  %v6474_v12 = vld [vmem:[%s8546_s0 + $0x840] ss:$36 sps:$4 sm:$0xff]  }
 0x2e5   : > { %5588 = vmatmul.mubr.bf16.gmra.mrb[176].mxu1 %v6470_v6  ;;  %v6483_v6 = vld [vmem:[%s8546_s0 + $0x890] ss:$36 sps:$4 sm:$0xff]  }
 0x2e6   : > { %4284 = vmatmul.mubr.bf16.gmra.mrb[112].mxu0 %v6469_v4  ;;  %5591 = vmatprep.mubr.bf16.mxu1 %v6473_v14  ;;  %v6481_v14 = vld [vmem:[%s8546_s0 + $0x8d4] ss:$36 sps:$4 sm:$0xff]  }
 0x2e7   : > { %4291 = vmatprep.mubr.bf16.mxu0 %v6471_v23 }
 0x2e8   : > { %v8027_v26 = vpop.f32.mrb[72].mxu1 }
 0x2e9   : > { %v4077_v31 = vpop.f32.mrb[8].mxu0  ;;  %v3629_v32 = vpop.f32.mrb[73].mxu1 }
 0x2ea   : > { %v8033_v37 = vadd.f32 %v4077_v31, %v7463_v18  ;;  %v4079_v40 = vpop.f32.mrb[9].mxu0  ;;  %v8035_v41 = vpop.f32.mrb[74].mxu1  ;;  %v6485_v31 = vld [vmem:[%s8546_s0 + $0x8d8] ss:$36 sps:$4 sm:$0xff]  }
 0x2eb   : > { %v4080_v46 = vpop.f32.mrb[10].mxu0  ;;  %v3632_v47 = vpop.f32.mrb[75].mxu1 }
 0x2ec   : > { %v8047_v18 = vadd.f32 %v4080_v46, %v7468_v21  ;;  %v4082_v53 = vpop.f32.mrb[11].mxu0  ;;  %v6479_v21 = vld [vmem:[%s8546_s0 + $0x888] ss:$36 sps:$4 sm:$0xff]  }
 0x2ed   : > { %5592 = vmatmul.mubr.bf16.gmra.mrb[180].mxu1 %v6475_v36 }
 0x2ee   : > { %4292 = vmatmul.mubr.bf16.gmra.mrb[116].mxu0 %v6474_v12  ;;  %5595 = vmatprep.mubr.bf16.mxu1 %v6478_v44 }
 0x2ef   : > { %4299 = vmatprep.mubr.bf16.mxu0 %v6476_v50 }
 0x2f0   : > { %v8049_v56 = vpop.f32.mrb[76].mxu1 }
 0x2f1   : > { %v4085_v22 = vpop.f32.mrb[12].mxu0  ;;  %v3637_v58 = vpop.f32.mrb[77].mxu1 }
 0x2f2   : > { %v8055_v61 = vadd.f32 %v4085_v22, %v7479_v27  ;;  %v4087_v2 = vpop.f32.mrb[13].mxu0  ;;  %v8057_v3 = vpop.f32.mrb[78].mxu1 }
 0x2f3   : > { %v4088_v8 = vpop.f32.mrb[14].mxu0  ;;  %v3640_v4 = vpop.f32.mrb[79].mxu1 }
 0x2f4   : > { %v8069_v27 = vadd.f32 %v4088_v8, %v7484_v30  ;;  %v4090_v17 = vpop.f32.mrb[15].mxu0  ;;  %v6484_v30 = vld [vmem:[%s8546_s0 + $0x8d0] ss:$36 sps:$4 sm:$0xff]  }
 0x2f5   : > { %5596 = vmatmul.mubr.bf16.gmra.mrb[184].mxu1 %v6480_v59 }
 0x2f6   : > { %4300 = vmatmul.mubr.bf16.gmra.mrb[120].mxu0 %v6479_v21  ;;  %5599 = vmatprep.mubr.bf16.mxu1 %v6483_v6 }
 0x2f7   : > { %4307 = vmatprep.mubr.bf16.mxu0 %v6481_v14 }
 0x2f8   : > { %v8071_v20 = vpop.f32.mrb[80].mxu1 }
 0x2f9   : > { %v4093_v23 = vpop.f32.mrb[16].mxu0  ;;  %v3645_v25 = vpop.f32.mrb[81].mxu1 }
 0x2fa   : > { %v8077_v32 = vadd.f32 %v4093_v23, %v7495_v35  ;;  %v4095_v36 = vpop.f32.mrb[17].mxu0  ;;  %v8079_v40 = vpop.f32.mrb[82].mxu1 }
 0x2fb   : > { %v4096_v12 = vpop.f32.mrb[18].mxu0  ;;  %v3648_v44 = vpop.f32.mrb[83].mxu1 }
 0x2fc   : > { %v8085_v46 = vadd.f32 %v4096_v12, %v7500_v38  ;;  %v4098_v47 = vpop.f32.mrb[19].mxu0 }
 0x2fd   : > { %5600 = vmatmul.mubr.bf16.gmra.mrb[188].mxu1 %v6485_v31 }
 0x2fe   : > { %4308 = vmatmul.mubr.bf16.gmra.mrb[124].mxu0 %v6484_v30 }
 0x300   : > { %v8087_v50 = vpop.f32.mrb[84].mxu1 }
 0x301   : > { %v4101_v53 = vpop.f32.mrb[20].mxu0  ;;  %v3653_v35 = vpop.f32.mrb[85].mxu1 }
 0x302   : > { %v8090_v22 = vadd.f32 %v4101_v53, %v7511_v43  ;;  %v4103_v58 = vpop.f32.mrb[21].mxu0  ;;  %v8092_v59 = vpop.f32.mrb[86].mxu1 }
 0x303   : > { %v4104_v2 = vpop.f32.mrb[22].mxu0  ;;  %v3656_v21 = vpop.f32.mrb[87].mxu1 }
 0x304   : > { %v8095_v6 = vadd.f32 %v4104_v2, %v7516_v45  ;;  %v4106_v38 = vpop.f32.mrb[23].mxu0 }
 0x308   : > { %v8097_v8 = vpop.f32.mrb[88].mxu1 }
 0x309   : > { %v4109_v4 = vpop.f32.mrb[24].mxu0  ;;  %v3661_v14 = vpop.f32.mrb[89].mxu1 }
 0x30a   : > { %v8100_v17 = vadd.f32 %v4109_v4, %v7530_v52  ;;  %v4111_v23 = vpop.f32.mrb[25].mxu0  ;;  %v8102_v25 = vpop.f32.mrb[90].mxu1 }
 0x30b   : > { %v4112_v43 = vpop.f32.mrb[26].mxu0  ;;  %v3664_v31 = vpop.f32.mrb[91].mxu1 }
 0x30c   : > { %v8105_v36 = vadd.f32 %v4112_v43, %v7535_v55  ;;  %v4114_v30 = vpop.f32.mrb[27].mxu0 }
 0x310   : > { %v8107_v12 = vpop.f32.mrb[92].mxu1 }
 0x311   : > { %v4117_v45 = vpop.f32.mrb[28].mxu0  ;;  %v3669_v44 = vpop.f32.mrb[93].mxu1 }
 0x312   : > { %v8110_v47 = vadd.f32 %v4117_v45, %v7547_v60  ;;  %v4119_v53 = vpop.f32.mrb[29].mxu0  ;;  %v8112_v35 = vpop.f32.mrb[94].mxu1 }
 0x313   : > { %v4120_v52 = vpop.f32.mrb[30].mxu0  ;;  %v3672_v58 = vpop.f32.mrb[95].mxu1 }
 0x314   : > { %v8115_v2 = vadd.f32 %v4120_v52, %v7553_v0  ;;  %v4122_v21 = vpop.f32.mrb[31].mxu0 }
 0x318   : > { %v8117_v38 = vpop.f32.mrb[96].mxu1 }
 0x319   : > { %v4125_v55 = vpop.f32.mrb[32].mxu0  ;;  %v3677_v4 = vpop.f32.mrb[97].mxu1 }
 0x31a   : > { %v8120_v14 = vadd.f32 %v4125_v55, %v7855_v11  ;;  %v4127_v23 = vpop.f32.mrb[33].mxu0  ;;  %v8122_v43 = vpop.f32.mrb[98].mxu1 }
 0x31b   : > { %8550 = vst [vmem:[#allocation4_spill] sm:$0xff] %v8122_v43  ;;  %v4128_v60 = vpop.f32.mrb[34].mxu0  ;;  %v3680_v31 = vpop.f32.mrb[99].mxu1 }
 0x31c   : > { %v8125_v30 = vadd.f32 %v4128_v60, %v7860_v15  ;;  %v4130_v45 = vpop.f32.mrb[35].mxu0 }
 0x320   : > { %v8127_v44 = vpop.f32.mrb[100].mxu1 }
 0x321   : > { %8551 = vst [vmem:[#allocation5_spill] sm:$0xff] %v8127_v44  ;;  %v4133_v0 = vpop.f32.mrb[36].mxu0  ;;  %v3685_v53 = vpop.f32.mrb[101].mxu1 }
 0x322   : > { %v8130_v52 = vadd.f32 %v4133_v0, %v7871_v24  ;;  %v4135_v58 = vpop.f32.mrb[37].mxu0  ;;  %v8132_v21 = vpop.f32.mrb[102].mxu1 }
 0x323   : > { %8552 = vst [vmem:[#allocation6_spill] sm:$0xff] %v8132_v21  ;;  %v4136_v11 = vpop.f32.mrb[38].mxu0  ;;  %v3688_v55 = vpop.f32.mrb[103].mxu1 }
 0x324   : > { %v8135_v4 = vadd.f32 %v4136_v11, %v7876_v28  ;;  %v4138_v23 = vpop.f32.mrb[39].mxu0 }
 0x328   : > { %v8137_v31 = vpop.f32.mrb[104].mxu1 }
 0x329   : > { %8553 = vst [vmem:[#allocation7_spill] sm:$0xff] %v8137_v31  ;;  %v4141_v15 = vpop.f32.mrb[40].mxu0  ;;  %v3693_v60 = vpop.f32.mrb[105].mxu1 }
 0x32a   : > { %v8140_v45 = vadd.f32 %v4141_v15, %v7887_v34  ;;  %v4143_v53 = vpop.f32.mrb[41].mxu0  ;;  %v8142_v44 = vpop.f32.mrb[106].mxu1 }
 0x32b   : > { %8554 = vst [vmem:[#allocation8_spill] sm:$0xff] %v8142_v44  ;;  %v4144_v24 = vpop.f32.mrb[42].mxu0  ;;  %v3696_v0 = vpop.f32.mrb[107].mxu1 }
 0x32c   : > { %v8145_v58 = vadd.f32 %v4144_v24, %v7892_v39  ;;  %v4146_v55 = vpop.f32.mrb[43].mxu0 }
 0x330   : > { %v8147_v21 = vpop.f32.mrb[108].mxu1 }
 0x331   : > { %8555 = vst [vmem:[#allocation9_spill] sm:$0xff] %v8147_v21  ;;  %v4149_v28 = vpop.f32.mrb[44].mxu0  ;;  %v3701_v11 = vpop.f32.mrb[109].mxu1 }
 0x332   : > { %v8150_v23 = vadd.f32 %v4149_v28, %v7903_v16  ;;  %v4151_v60 = vpop.f32.mrb[45].mxu0  ;;  %v8152_v31 = vpop.f32.mrb[110].mxu1 }
 0x333   : > { %8556 = vst [vmem:[#allocation10_spill] sm:$0xff] %v8152_v31  ;;  %v4152_v34 = vpop.f32.mrb[46].mxu0  ;;  %v3704_v15 = vpop.f32.mrb[111].mxu1 }
 0x334   : > { %v8155_v53 = vadd.f32 %v4152_v34, %v7908_v48  ;;  %v4154_v0 = vpop.f32.mrb[47].mxu0 }
 0x338   : > { %v8157_v44 = vpop.f32.mrb[112].mxu1 }
 0x339   : > { %8557 = vst [vmem:[#allocation11_spill] sm:$0xff] %v8157_v44  ;;  %v4157_v39 = vpop.f32.mrb[48].mxu0  ;;  %v3709_v24 = vpop.f32.mrb[113].mxu1 }
 0x33a   : > { %v8160_v55 = vadd.f32 %v4157_v39, %v7919_v54  ;;  %v4159_v11 = vpop.f32.mrb[49].mxu0  ;;  %v8162_v21 = vpop.f32.mrb[114].mxu1 }
 0x33b   : > { %8558 = vst [vmem:[#allocation12_spill] sm:$0xff] %v8162_v21  ;;  %v4160_v16 = vpop.f32.mrb[50].mxu0  ;;  %v3712_v28 = vpop.f32.mrb[115].mxu1 }
 0x33c   : > { %v8165_v60 = vadd.f32 %v4160_v16, %v7924_v57  ;;  %v4162_v15 = vpop.f32.mrb[51].mxu0 }
 0x340   : > { %v8167_v31 = vpop.f32.mrb[116].mxu1 }
 0x341   : > { %8559 = vst [vmem:[#allocation13_spill] sm:$0xff] %v8167_v31  ;;  %v4165_v48 = vpop.f32.mrb[52].mxu0  ;;  %v3717_v34 = vpop.f32.mrb[117].mxu1 }
 0x342   : > { %v8170_v0 = vadd.f32 %v4165_v48, %v7935_v63  ;;  %v4167_v24 = vpop.f32.mrb[53].mxu0  ;;  %v8172_v44 = vpop.f32.mrb[118].mxu1 }
 0x343   : > { %8560 = vst [vmem:[#allocation14_spill] sm:$0xff] %v8172_v44  ;;  %v4168_v54 = vpop.f32.mrb[54].mxu0  ;;  %v3720_v39 = vpop.f32.mrb[119].mxu1 }
 0x344   : > { %v8175_v11 = vadd.f32 %v4168_v54, %v7940_v5  ;;  %v4170_v28 = vpop.f32.mrb[55].mxu0 }
 0x348   : > { %v8177_v21 = vpop.f32.mrb[120].mxu1 }
 0x349   : > { %8561 = vst [vmem:[#allocation15_spill] sm:$0xff] %v8177_v21  ;;  %v4173_v57 = vpop.f32.mrb[56].mxu0  ;;  %v3725_v16 = vpop.f32.mrb[121].mxu1 }
 0x34a   : > { %v8180_v15 = vadd.f32 %v4173_v57, %v7951_v13  ;;  %v4175_v34 = vpop.f32.mrb[57].mxu0  ;;  %v8182_v63 = vpop.f32.mrb[122].mxu1 }
 0x34b   : > { %8562 = vst [vmem:[#allocation16_spill] sm:$0xff] %v8182_v63  ;;  %v4176_v48 = vpop.f32.mrb[58].mxu0  ;;  %v3728_v24 = vpop.f32.mrb[123].mxu1 }
 0x34c   : > { %v8185_v44 = vadd.f32 %v4176_v48, %v7956_v19  ;;  %v4178_v39 = vpop.f32.mrb[59].mxu0 }
 0x350   : > { %v8187_v5 = vpop.f32.mrb[124].mxu1 }
 0x351   : > { %8563 = vst [vmem:[#allocation17_spill] sm:$0xff] %v8187_v5  ;;  %v4181_v54 = vpop.f32.mrb[60].mxu0  ;;  %v3733_v28 = vpop.f32.mrb[125].mxu1 }
 0x352   : > { %v8190_v21 = vadd.f32 %v4181_v54, %v7967_v29  ;;  %v4183_v16 = vpop.f32.mrb[61].mxu0  ;;  %v8192_v13 = vpop.f32.mrb[126].mxu1 }
 0x353   : > { %8564 = vst [vmem:[#allocation18_spill] sm:$0xff] %v8192_v13  ;;  %v4184_v57 = vpop.f32.mrb[62].mxu0  ;;  %v3736_v34 = vpop.f32.mrb[127].mxu1 }
 0x354   : > { %v8195_v63 = vadd.f32 %v4184_v57, %v7972_v33  ;;  %v4186_v24 = vpop.f32.mrb[63].mxu0 }
 0x358   : > { %v5541_v19 = vpop.f32.mrb[128].mxu1 }
 0x359   : > { %v4189_v48 = vpop.f32.mrb[64].mxu0  ;;  %v4359_v39 = vadd.f32 %v8011_v7, %v5541_v19  ;;  %v4350_v5 = vpop.f32.mrb[129].mxu1 }
 0x35a   : > { %v8201_v28 = vadd.f32 %v4189_v48, %v7983_v42  ;;  %v4191_v29 = vpop.f32.mrb[65].mxu0  ;;  %v4351_v54 = vadd.f32 %v7989_v49, %v4350_v5  ;;  %v5542_v16 = vpop.f32.mrb[130].mxu1 }
 0x35b   : > { %v4607_v13 = vmax.f32 %v4359_v39, 0.0  ;;  %v4192_v34 = vpop.f32.mrb[66].mxu0  ;;  %v4362_v33 = vadd.f32 %v8025_v9, %v5542_v16  ;;  %v4353_v57 = vpop.f32.mrb[131].mxu1 }
 0x35c   : > { %v4605_v24 = vmax.f32 %v4351_v54, 0.0  ;;  %v8206_v31 = vadd.f32 %v4192_v34, %v7991_v51  ;;  %v4194_v43 = vpop.f32.mrb[67].mxu0  ;;  %v4354_v7 = vadd.f32 %v8003_v1, %v4353_v57 }
 0x35d   : > { %4671 = vst [vmem:[%s8209_s9 + $0x10] sm:$0xff] %v4607_v13  ;;  %v4608_v42 = vmax.f32 %v4362_v33, 0.0 }
 0x35e   : > { %4669 = vst [vmem:[%s8209_s9] sm:$0xff] %v4605_v24  ;;  %v4606_v49 = vmax.f32 %v4354_v7, 0.0 }
 0x35f   : > { %4672 = vst [vmem:[%s8209_s9 + $0x18] sm:$0xff] %v4608_v42 }
 0x360   : > { %4670 = vst [vmem:[%s8209_s9 + $0x8] sm:$0xff] %v4606_v49  ;;  %v5545_v9 = vpop.f32.mrb[132].mxu1 }
 0x361   : > { %v4197_v5 = vpop.f32.mrb[68].mxu0  ;;  %v4375_v51 = vadd.f32 %v8055_v61, %v5545_v9  ;;  %v4366_v43 = vpop.f32.mrb[133].mxu1 }
 0x362   : > { %v8217_v1 = vadd.f32 %v4197_v5, %v8005_v62  ;;  %v4199_v19 = vpop.f32.mrb[69].mxu0  ;;  %v4367_v13 = vadd.f32 %v8033_v37, %v4366_v43  ;;  %v5546_v48 = vpop.f32.mrb[134].mxu1 }
 0x363   : > { %v4611_v39 = vmax.f32 %v4375_v51, 0.0  ;;  %v4200_v29 = vpop.f32.mrb[70].mxu0  ;;  %v4378_v54 = vadd.f32 %v8069_v27, %v5546_v48  ;;  %v4369_v16 = vpop.f32.mrb[135].mxu1 }
 0x364   : > { %v4609_v34 = vmax.f32 %v4367_v13, 0.0  ;;  %v8222_v33 = vadd.f32 %v4200_v29, %v8013_v10  ;;  %v4202_v61 = vpop.f32.mrb[71].mxu0  ;;  %v4370_v57 = vadd.f32 %v8047_v18, %v4369_v16 }
 0x365   : > { %4675 = vst [vmem:[%s8209_s9 + $0x30] sm:$0xff] %v4611_v39  ;;  %v4612_v62 = vmax.f32 %v4378_v54, 0.0 }
 0x366   : > { %4673 = vst [vmem:[%s8209_s9 + $0x20] sm:$0xff] %v4609_v34  ;;  %v4610_v24 = vmax.f32 %v4370_v57, 0.0 }
 0x367   : > { %4676 = vst [vmem:[%s8209_s9 + $0x38] sm:$0xff] %v4612_v62 }
 0x368   : > { %4674 = vst [vmem:[%s8209_s9 + $0x28] sm:$0xff] %v4610_v24  ;;  %v5549_v37 = vpop.f32.mrb[136].mxu1 }
 0x369   : > { %v4205_v7 = vpop.f32.mrb[72].mxu0  ;;  %v4391_v42 = vadd.f32 %v8090_v22, %v5549_v37  ;;  %v4382_v27 = vpop.f32.mrb[137].mxu1 }
 0x36a   : > { %v8231_v49 = vadd.f32 %v4205_v7, %v8027_v26  ;;  %v4207_v10 = vpop.f32.mrb[73].mxu0  ;;  %v4383_v18 = vadd.f32 %v8077_v32, %v4382_v27  ;;  %v5550_v9 = vpop.f32.mrb[138].mxu1 }
 0x36b   : > { %v4615_v5 = vmax.f32 %v4391_v42, 0.0  ;;  %v4208_v51 = vpop.f32.mrb[74].mxu0  ;;  %v4394_v43 = vadd.f32 %v8095_v6, %v5550_v9  ;;  %v4385_v19 = vpop.f32.mrb[139].mxu1 }
 0x36c   : > { %v4613_v13 = vmax.f32 %v4383_v18, 0.0  ;;  %v8236_v48 = vadd.f32 %v4208_v51, %v8035_v41  ;;  %v4210_v22 = vpop.f32.mrb[75].mxu0  ;;  %v4386_v39 = vadd.f32 %v8085_v46, %v4385_v19 }
 0x36d   : > { %4679 = vst [vmem:[%s8209_s9 + $0x50] sm:$0xff] %v4615_v5  ;;  %v4616_v26 = vmax.f32 %v4394_v43, 0.0 }
 0x36e   : > { %4677 = vst [vmem:[%s8209_s9 + $0x40] sm:$0xff] %v4613_v13  ;;  %v4614_v29 = vmax.f32 %v4386_v39, 0.0 }
 0x36f   : > { %4680 = vst [vmem:[%s8209_s9 + $0x58] sm:$0xff] %v4616_v26 }
 0x370   : > { %4678 = vst [vmem:[%s8209_s9 + $0x48] sm:$0xff] %v4614_v29  ;;  %v5553_v32 = vpop.f32.mrb[140].mxu1 }
 0x371   : > { %v4213_v54 = vpop.f32.mrb[76].mxu0  ;;  %v4407_v16 = vadd.f32 %v8110_v47, %v5553_v32  ;;  %v4398_v6 = vpop.f32.mrb[141].mxu1 }
 0x372   : > { %v8245_v34 = vadd.f32 %v4213_v54, %v8049_v56  ;;  %v4215_v41 = vpop.f32.mrb[77].mxu0  ;;  %v4399_v46 = vadd.f32 %v8100_v17, %v4398_v6  ;;  %v5554_v61 = vpop.f32.mrb[142].mxu1 }
 0x373   : > { %v4619_v57 = vmax.f32 %v4407_v16, 0.0  ;;  %v4216_v62 = vpop.f32.mrb[78].mxu0  ;;  %v4410_v24 = vadd.f32 %v8115_v2, %v5554_v61  ;;  %v4401_v37 = vpop.f32.mrb[143].mxu1 }
 0x374   : > { %v4617_v7 = vmax.f32 %v4399_v46, 0.0  ;;  %v8250_v42 = vadd.f32 %v4216_v62, %v8057_v3  ;;  %v4218_v47 = vpop.f32.mrb[79].mxu0  ;;  %v4402_v27 = vadd.f32 %v8105_v36, %v4401_v37 }
 0x375   : > { %4683 = vst [vmem:[%s8209_s9 + $0x70] sm:$0xff] %v4619_v57  ;;  %v4620_v56 = vmax.f32 %v4410_v24, 0.0 }
 0x376   : > { %4681 = vst [vmem:[%s8209_s9 + $0x60] sm:$0xff] %v4617_v7  ;;  %v4618_v10 = vmax.f32 %v4402_v27, 0.0 }
 0x377   : > { %4684 = vst [vmem:[%s8209_s9 + $0x78] sm:$0xff] %v4620_v56 }
 0x378   : > { %4682 = vst [vmem:[%s8209_s9 + $0x68] sm:$0xff] %v4618_v10  ;;  %v5557_v17 = vpop.f32.mrb[144].mxu1 }
 0x379   : > { %v4221_v18 = vpop.f32.mrb[80].mxu0  ;;  %v4423_v9 = vadd.f32 %v8130_v52, %v5557_v17  ;;  %v4414_v2 = vpop.f32.mrb[145].mxu1 }
 0x37a   : > { %v8259_v5 = vadd.f32 %v4221_v18, %v8071_v20  ;;  %v4223_v3 = vpop.f32.mrb[81].mxu0  ;;  %v4415_v36 = vadd.f32 %v8120_v14, %v4414_v2  ;;  %v5558_v51 = vpop.f32.mrb[146].mxu1 }
 0x37b   : > { %v4623_v43 = vmax.f32 %v4423_v9, 0.0  ;;  %v4224_v19 = vpop.f32.mrb[82].mxu0  ;;  %v4426_v13 = vadd.f32 %v8135_v4, %v5558_v51  ;;  %v4417_v22 = vpop.f32.mrb[147].mxu1 }
 0x37c   : > { %v4621_v39 = vmax.f32 %v4415_v36, 0.0  ;;  %v8264_v26 = vadd.f32 %v4224_v19, %v8079_v40  ;;  %v4226_v52 = vpop.f32.mrb[83].mxu0  ;;  %v4418_v29 = vadd.f32 %v8125_v30, %v4417_v22 }
 0x37d   : > { %4687 = vst [vmem:[%s8209_s9 + $0x90] sm:$0xff] %v4623_v43  ;;  %v4624_v20 = vmax.f32 %v4426_v13, 0.0 }
 0x37e   : > { %4685 = vst [vmem:[%s8209_s9 + $0x80] sm:$0xff] %v4621_v39  ;;  %v4622_v32 = vmax.f32 %v4418_v29, 0.0 }
 0x37f   : > { %4688 = vst [vmem:[%s8209_s9 + $0x98] sm:$0xff] %v4624_v20 }
 0x380   : > { %4686 = vst [vmem:[%s8209_s9 + $0x88] sm:$0xff] %v4622_v32  ;;  %v5561_v14 = vpop.f32.mrb[148].mxu1 }
 0x381   : > { %v4229_v54 = vpop.f32.mrb[84].mxu0  ;;  %v4439_v16 = vadd.f32 %v8150_v23, %v5561_v14  ;;  %v4430_v4 = vpop.f32.mrb[149].mxu1 }
 0x382   : > { %v8273_v6 = vadd.f32 %v4229_v54, %v8087_v50  ;;  %v4231_v40 = vpop.f32.mrb[85].mxu0  ;;  %v4431_v30 = vadd.f32 %v8140_v45, %v4430_v4  ;;  %v5562_v41 = vpop.f32.mrb[150].mxu1 }
 0x383   : > { %v4627_v46 = vmax.f32 %v4439_v16, 0.0  ;;  %v4232_v61 = vpop.f32.mrb[86].mxu0  ;;  %v4442_v57 = vadd.f32 %v8155_v53, %v5562_v41  ;;  %v4433_v62 = vpop.f32.mrb[151].mxu1 }
 0x384   : > { %v4625_v24 = vmax.f32 %v4431_v30, 0.0  ;;  %v8278_v37 = vadd.f32 %v4232_v61, %v8092_v59  ;;  %v4234_v23 = vpop.f32.mrb[87].mxu0  ;;  %v4434_v7 = vadd.f32 %v8145_v58, %v4433_v62 }
 0x385   : > { %4691 = vst [vmem:[%s8209_s9 + $0xb0] sm:$0xff] %v4627_v46  ;;  %v4628_v50 = vmax.f32 %v4442_v57, 0.0 }
 0x386   : > { %4689 = vst [vmem:[%s8209_s9 + $0xa0] sm:$0xff] %v4625_v24  ;;  %v4626_v47 = vmax.f32 %v4434_v7, 0.0 }
 0x387   : > { %4692 = vst [vmem:[%s8209_s9 + $0xb8] sm:$0xff] %v4628_v50  ;;  %v8565_v50 = vld [vmem:[#allocation4_spill] sm:$0xff] }
 0x388   : > { %4690 = vst [vmem:[%s8209_s9 + $0xa8] sm:$0xff] %v4626_v47  ;;  %v5565_v45 = vpop.f32.mrb[152].mxu1 }
 0x389   : > { %v4237_v27 = vpop.f32.mrb[88].mxu0  ;;  %v4455_v56 = vadd.f32 %v8170_v0, %v5565_v45  ;;  %v4446_v53 = vpop.f32.mrb[153].mxu1 }
 0x38a   : > { %v8287_v10 = vadd.f32 %v4237_v27, %v8097_v8  ;;  %v4239_v59 = vpop.f32.mrb[89].mxu0  ;;  %v4447_v58 = vadd.f32 %v8160_v55, %v4446_v53  ;;  %v5566_v17 = vpop.f32.mrb[154].mxu1 }
 0x38b   : > { %v4631_v18 = vmax.f32 %v4455_v56, 0.0  ;;  %v4240_v9 = vpop.f32.mrb[90].mxu0  ;;  %v4458_v2 = vadd.f32 %v8175_v11, %v5566_v17  ;;  %v4449_v3 = vpop.f32.mrb[155].mxu1  ;;  %v8566_v59 = vld [vmem:[#allocation5_spill] sm:$0xff] }
 0x38c   : > { %v4629_v36 = vmax.f32 %v4447_v58, 0.0  ;;  %v8292_v51 = vadd.f32 %v4240_v9, %v8102_v25  ;;  %v4242_v0 = vpop.f32.mrb[91].mxu0  ;;  %v4450_v43 = vadd.f32 %v8165_v60, %v4449_v3 }
 0x38d   : > { %4695 = vst [vmem:[%s8209_s9 + $0xd0] sm:$0xff] %v4631_v18  ;;  %v4632_v8 = vmax.f32 %v4458_v2, 0.0 }
 0x38e   : > { %4693 = vst [vmem:[%s8209_s9 + $0xc0] sm:$0xff] %v4629_v36  ;;  %v4630_v19 = vmax.f32 %v4450_v43, 0.0  ;;  %v8567_v43 = vld [vmem:[#allocation6_spill] sm:$0xff] }
 0x38f   : > { %4696 = vst [vmem:[%s8209_s9 + $0xd8] sm:$0xff] %v4632_v8 }
 0x390   : > { %4694 = vst [vmem:[%s8209_s9 + $0xc8] sm:$0xff] %v4630_v19  ;;  %v5569_v55 = vpop.f32.mrb[156].mxu1 }
 0x391   : > { %v4245_v13 = vpop.f32.mrb[92].mxu0  ;;  %v4471_v22 = vadd.f32 %v8190_v21, %v5569_v55  ;;  %v4462_v11 = vpop.f32.mrb[157].mxu1 }
 0x392   : > { %v8301_v39 = vadd.f32 %v4245_v13, %v8107_v12  ;;  %v4247_v25 = vpop.f32.mrb[93].mxu0  ;;  %v4463_v60 = vadd.f32 %v8180_v15, %v4462_v11  ;;  %v5570_v52 = vpop.f32.mrb[158].mxu1 }
 0x393   : > { %v4635_v29 = vmax.f32 %v4471_v22, 0.0  ;;  %v4248_v20 = vpop.f32.mrb[94].mxu0  ;;  %v4474_v32 = vadd.f32 %v8195_v63, %v5570_v52  ;;  %v4465_v14 = vpop.f32.mrb[159].mxu1  ;;  %v8568_v25 = vld [vmem:[#allocation7_spill] sm:$0xff] }
 0x394   : > { %v4633_v54 = vmax.f32 %v4463_v60, 0.0  ;;  %v8306_v16 = vadd.f32 %v4248_v20, %v8112_v35  ;;  %v4250_v21 = vpop.f32.mrb[95].mxu0  ;;  %v4466_v4 = vadd.f32 %v8185_v44, %v4465_v14 }
 0x395   : > { %4699 = vst [vmem:[%s8209_s9 + $0xf0] sm:$0xff] %v4635_v29  ;;  %v4636_v12 = vmax.f32 %v4474_v32, 0.0 }
 0x396   : > { %4697 = vst [vmem:[%s8209_s9 + $0xe0] sm:$0xff] %v4633_v54  ;;  %v4634_v40 = vmax.f32 %v4466_v4, 0.0  ;;  %v8569_v4 = vld [vmem:[#allocation8_spill] sm:$0xff] }
 0x397   : > { %4700 = vst [vmem:[%s8209_s9 + $0xf8] sm:$0xff] %v4636_v12 }
 0x398   : > { %4698 = vst [vmem:[%s8209_s9 + $0xe8] sm:$0xff] %v4634_v40  ;;  %v5573_v15 = vpop.f32.mrb[160].mxu1 }
 0x399   : > { %v4253_v30 = vpop.f32.mrb[96].mxu0  ;;  %v4487_v41 = vadd.f32 %v8217_v1, %v5573_v15  ;;  %v4478_v63 = vpop.f32.mrb[161].mxu1 }
 0x39a   : > { %v8315_v46 = vadd.f32 %v4253_v30, %v8117_v38  ;;  %v4255_v35 = vpop.f32.mrb[97].mxu0  ;;  %v4479_v44 = vadd.f32 %v8201_v28, %v4478_v63  ;;  %v5574_v61 = vpop.f32.mrb[162].mxu1 }
 0x39b   : > { %v4639_v57 = vmax.f32 %v4487_v41, 0.0  ;;  %v4256_v62 = vpop.f32.mrb[98].mxu0  ;;  %v4490_v24 = vadd.f32 %v8222_v33, %v5574_v61  ;;  %v4481_v23 = vpop.f32.mrb[163].mxu1  ;;  %v8570_v35 = vld [vmem:[#allocation9_spill] sm:$0xff] }
 0x39c   : > { %v4637_v7 = vmax.f32 %v4479_v44, 0.0  ;;  %v8320_v47 = vadd.f32 %v4256_v62, %v8565_v50  ;;  %v4258_v1 = vpop.f32.mrb[99].mxu0  ;;  %v4482_v45 = vadd.f32 %v8206_v31, %v4481_v23 }
 0x39d   : > { %4703 = vst [vmem:[%s8209_s9 + $0x110] sm:$0xff] %v4639_v57  ;;  %v4640_v38 = vmax.f32 %v4490_v24, 0.0  ;;  %v8571_v1 = vld [vmem:[#allocation10_spill] sm:$0xff] }
 0x39e   : > { %4701 = vst [vmem:[%s8209_s9 + $0x100] sm:$0xff] %v4637_v7  ;;  %v4638_v27 = vmax.f32 %v4482_v45, 0.0 }
 0x39f   : > { %4704 = vst [vmem:[%s8209_s9 + $0x118] sm:$0xff] %v4640_v38 }
 0x3a0   : > { %4702 = vst [vmem:[%s8209_s9 + $0x108] sm:$0xff] %v4638_v27  ;;  %v5577_v28 = vpop.f32.mrb[164].mxu1 }
 0x3a1   : > { %v4261_v56 = vpop.f32.mrb[100].mxu0  ;;  %v4503_v53 = vadd.f32 %v8245_v34, %v5577_v28  ;;  %v4494_v33 = vpop.f32.mrb[165].mxu1 }
 0x3a2   : > { %v8329_v58 = vadd.f32 %v4261_v56, %v8566_v59  ;;  %v4263_v17 = vpop.f32.mrb[101].mxu0  ;;  %v4495_v31 = vadd.f32 %v8231_v49, %v4494_v33  ;;  %v5578_v18 = vpop.f32.mrb[166].mxu1  ;;  %v8572_v33 = vld [vmem:[#allocation11_spill] sm:$0xff] }
 0x3a3   : > { %v4643_v9 = vmax.f32 %v4503_v53, 0.0  ;;  %v4264_v2 = vpop.f32.mrb[102].mxu0  ;;  %v4506_v3 = vadd.f32 %v8250_v42, %v5578_v18  ;;  %v4497_v36 = vpop.f32.mrb[167].mxu1 }
 0x3a4   : > { %v4641_v0 = vmax.f32 %v4495_v31, 0.0  ;;  %v8334_v8 = vadd.f32 %v4264_v2, %v8567_v43  ;;  %v4266_v34 = vpop.f32.mrb[103].mxu0  ;;  %v4498_v19 = vadd.f32 %v8236_v48, %v4497_v36 }
 0x3a5   : > { %4707 = vst [vmem:[%s8209_s9 + $0x130] sm:$0xff] %v4643_v9  ;;  %v4644_v55 = vmax.f32 %v4506_v3, 0.0 }
 0x3a6   : > { %4705 = vst [vmem:[%s8209_s9 + $0x120] sm:$0xff] %v4641_v0  ;;  %v4642_v13 = vmax.f32 %v4498_v19, 0.0  ;;  %v8573_v0 = vld [vmem:[#allocation12_spill] sm:$0xff] }
 0x3a7   : > { %4708 = vst [vmem:[%s8209_s9 + $0x138] sm:$0xff] %v4644_v55 }
 0x3a8   : > { %4706 = vst [vmem:[%s8209_s9 + $0x128] sm:$0xff] %v4642_v13  ;;  %v5581_v49 = vpop.f32.mrb[168].mxu1 }
 0x3a9   : > { %v4269_v22 = vpop.f32.mrb[104].mxu0  ;;  %v4519_v11 = vadd.f32 %v8273_v6, %v5581_v49  ;;  %v4510_v42 = vpop.f32.mrb[169].mxu1 }
 0x3aa   : > { %v8343_v60 = vadd.f32 %v4269_v22, %v8568_v25  ;;  %v4271_v52 = vpop.f32.mrb[105].mxu0  ;;  %v4511_v48 = vadd.f32 %v8259_v5, %v4510_v42  ;;  %v5582_v29 = vpop.f32.mrb[170].mxu1 }
 0x3ab   : > { %v4647_v20 = vmax.f32 %v4519_v11, 0.0  ;;  %v4272_v32 = vpop.f32.mrb[106].mxu0  ;;  %v4522_v14 = vadd.f32 %v8278_v37, %v5582_v29  ;;  %v4513_v54 = vpop.f32.mrb[171].mxu1 }
 0x3ac   : > { %v4645_v21 = vmax.f32 %v4511_v48, 0.0  ;;  %v8348_v12 = vadd.f32 %v4272_v32, %v8569_v4  ;;  %v4274_v6 = vpop.f32.mrb[107].mxu0  ;;  %v4514_v40 = vadd.f32 %v8264_v26, %v4513_v54 }
 0x3ad   : > { %4711 = vst [vmem:[%s8209_s9 + $0x150] sm:$0xff] %v4647_v20  ;;  %v4648_v15 = vmax.f32 %v4522_v14, 0.0  ;;  %v8575_v14 = vld [vmem:[#allocation14_spill] sm:$0xff] }
 0x3ae   : > { %4709 = vst [vmem:[%s8209_s9 + $0x140] sm:$0xff] %v4645_v21  ;;  %v4646_v30 = vmax.f32 %v4514_v40, 0.0 }
 0x3af   : > { %4712 = vst [vmem:[%s8209_s9 + $0x158] sm:$0xff] %v4648_v15 }
 0x3b0   : > { %4710 = vst [vmem:[%s8209_s9 + $0x148] sm:$0xff] %v4646_v30  ;;  %v5585_v5 = vpop.f32.mrb[172].mxu1 }
 0x3b1   : > { %v4277_v41 = vpop.f32.mrb[108].mxu0  ;;  %v4535_v63 = vadd.f32 %v8301_v39, %v5585_v5  ;;  %v4526_v37 = vpop.f32.mrb[173].mxu1 }
 0x3b2   : > { %v5689_v44 = vadd.f32 %v4277_v41, %v8570_v35  ;;  %v4279_v61 = vpop.f32.mrb[109].mxu0  ;;  %v4527_v26 = vadd.f32 %v8287_v10, %v4526_v37  ;;  %v5586_v57 = vpop.f32.mrb[174].mxu1  ;;  %v8576_v41 = vld [vmem:[#allocation15_spill] sm:$0xff] }
 0x3b3   : > { %v4651_v62 = vmax.f32 %v4535_v63, 0.0  ;;  %v4280_v24 = vpop.f32.mrb[110].mxu0  ;;  %v4538_v23 = vadd.f32 %v8306_v16, %v5586_v57  ;;  %v4529_v7 = vpop.f32.mrb[175].mxu1 }
 0x3b4   : > { %v4649_v50 = vmax.f32 %v4527_v26, 0.0  ;;  %v5690_v45 = vadd.f32 %v4280_v24, %v8571_v1  ;;  %v4282_v38 = vpop.f32.mrb[111].mxu0  ;;  %v4530_v39 = vadd.f32 %v8292_v51, %v4529_v7  ;;  %v8577_v24 = vld [vmem:[#allocation16_spill] sm:$0xff] }
 0x3b5   : > { %4715 = vst [vmem:[%s8209_s9 + $0x170] sm:$0xff] %v4651_v62  ;;  %v4652_v27 = vmax.f32 %v4538_v23, 0.0 }
 0x3b6   : > { %4713 = vst [vmem:[%s8209_s9 + $0x160] sm:$0xff] %v4649_v50  ;;  %v4650_v28 = vmax.f32 %v4530_v39, 0.0 }
 0x3b7   : > { %4716 = vst [vmem:[%s8209_s9 + $0x178] sm:$0xff] %v4652_v27 }
 0x3b8   : > { %4714 = vst [vmem:[%s8209_s9 + $0x168] sm:$0xff] %v4650_v28  ;;  %v5589_v56 = vpop.f32.mrb[176].mxu1  ;;  %v8578_v28 = vld [vmem:[#allocation17_spill] sm:$0xff] }
 0x3b9   : > { %v4285_v10 = vpop.f32.mrb[112].mxu0  ;;  %v4551_v53 = vadd.f32 %v8329_v58, %v5589_v56  ;;  %v4542_v16 = vpop.f32.mrb[177].mxu1 }
 0x3ba   : > { %v5691_v59 = vadd.f32 %v4285_v10, %v8572_v33  ;;  %v4287_v17 = vpop.f32.mrb[113].mxu0  ;;  %v4543_v51 = vadd.f32 %v8315_v46, %v4542_v16  ;;  %v5590_v31 = vpop.f32.mrb[178].mxu1 }
 0x3bb   : > { %v4655_v18 = vmax.f32 %v4551_v53, 0.0  ;;  %v4288_v9 = vpop.f32.mrb[114].mxu0  ;;  %v4554_v2 = vadd.f32 %v8334_v8, %v5590_v31  ;;  %v4545_v3 = vpop.f32.mrb[179].mxu1  ;;  %v8574_v8 = vld [vmem:[#allocation13_spill] sm:$0xff]  ;;  %v8579_v31 = vld [vmem:[#allocation18_spill] sm:$0xff] }
 0x3bc   : > { %v4653_v36 = vmax.f32 %v4543_v51, 0.0  ;;  %v5692_v43 = vadd.f32 %v4288_v9, %v8573_v0  ;;  %v4290_v34 = vpop.f32.mrb[115].mxu0  ;;  %v4546_v58 = vadd.f32 %v8320_v47, %v4545_v3 }
 0x3bd   : > { %4719 = vst [vmem:[%s8209_s9 + $0x190] sm:$0xff] %v4655_v18  ;;  %v4656_v19 = vmax.f32 %v4554_v2, 0.0  ;;  %v4898_v34 = vld [vmem:[%s8209_s9] sm:$0xff] (%p6577_p6) }
 0x3be   : > { %4717 = vst [vmem:[%s8209_s9 + $0x180] sm:$0xff] %v4653_v36  ;;  %v4654_v55 = vmax.f32 %v4546_v58, 0.0  ;;  %v4900_v58 = vld [vmem:[%s8209_s9 + $0x8] sm:$0xff] (%p6577_p6)  ;;  %4899 = vst [vmem:[%s8404_s15] sm:$0xff] (%p6577_p6), %v4898_v34 }
 0x3bf   : > { %4720 = vst [vmem:[%s8209_s9 + $0x198] sm:$0xff] %v4656_v19  ;;  %v4902_v19 = vld [vmem:[%s8209_s9 + $0x10] sm:$0xff] (%p6577_p6)  ;;  %4901 = vst [vmem:[%s8404_s15 + $0x10] sm:$0xff] (%p6577_p6), %v4900_v58 }
 0x3c0   : > { %4718 = vst [vmem:[%s8209_s9 + $0x188] sm:$0xff] %v4654_v55  ;;  %v5593_v13 = vpop.f32.mrb[180].mxu1  ;;  %v4904_v55 = vld [vmem:[%s8209_s9 + $0x18] sm:$0xff] (%p6577_p6)  ;;  %4903 = vst [vmem:[%s8404_s15 + $0x20] sm:$0xff] (%p6577_p6), %v4902_v19 }
 0x3c1   : > { %v4293_v46 = vpop.f32.mrb[116].mxu0  ;;  %v4567_v49 = vadd.f32 %v5689_v44, %v5593_v13  ;;  %v4558_v22 = vpop.f32.mrb[181].mxu1  ;;  %v4906_v13 = vld [vmem:[%s8209_s9 + $0x20] sm:$0xff] (%p6577_p6)  ;;  %4905 = vst [vmem:[%s8404_s15 + $0x30] sm:$0xff] (%p6577_p6), %v4904_v55 }
 0x3c2   : > { %v5693_v11 = vadd.f32 %v4293_v46, %v8574_v8  ;;  %v4295_v42 = vpop.f32.mrb[117].mxu0  ;;  %v4559_v25 = vadd.f32 %v8343_v60, %v4558_v22  ;;  %v5594_v47 = vpop.f32.mrb[182].mxu1  ;;  %v4908_v46 = vld [vmem:[%s8209_s9 + $0x28] sm:$0xff] (%p6577_p6)  ;;  %4907 = vst [vmem:[%s8404_s15 + $0x40] sm:$0xff] (%p6577_p6), %v4906_v13  ;;  %v4912_v22 = vld [vmem:[%s8209_s9 + $0x38] sm:$0xff] (%p6577_p6)  ;;  %v4914_v8 = vld [vmem:[%s8209_s9 + $0x40] sm:$0xff] (%p6577_p6) }
 0x3c3   : > { %v4659_v52 = vmax.f32 %v4567_v49, 0.0  ;;  %v4296_v48 = vpop.f32.mrb[118].mxu0  ;;  %v4570_v29 = vadd.f32 %v5690_v45, %v5594_v47  ;;  %v4561_v20 = vpop.f32.mrb[183].mxu1  ;;  %4909 = vst [vmem:[%s8404_s15 + $0x50] sm:$0xff] (%p6577_p6), %v4908_v46  ;;  %v4910_v49 = vld [vmem:[%s8209_s9 + $0x30] sm:$0xff] (%p6577_p6)  ;;  %4913 = vst [vmem:[%s8404_s15 + $0x70] sm:$0xff] (%p6577_p6), %v4912_v22 }
 0x3c4   : > { %v4657_v32 = vmax.f32 %v4559_v25, 0.0  ;;  %v5694_v54 = vadd.f32 %v4296_v48, %v8575_v14  ;;  %v4298_v21 = vpop.f32.mrb[119].mxu0  ;;  %v4562_v4 = vadd.f32 %v8348_v12, %v4561_v20  ;;  %4911 = vst [vmem:[%s8404_s15 + $0x60] sm:$0xff] (%p6577_p6), %v4910_v49  ;;  %4915 = vst [vmem:[%s8404_s15 + $0x80] sm:$0xff] (%p6577_p6), %v4914_v8  ;;  %v4918_v42 = vld [vmem:[%s8209_s9 + $0x50] sm:$0xff] (%p6577_p6)  ;;  %v4920_v25 = vld [vmem:[%s8209_s9 + $0x58] sm:$0xff] (%p6577_p6) }
 0x3c5   : > { %4723 = vst [vmem:[%s8209_s9 + $0x1b0] sm:$0xff] %v4659_v52  ;;  %v4660_v6 = vmax.f32 %v4570_v29, 0.0  ;;  %4919 = vst [vmem:[%s8404_s15 + $0xa0] sm:$0xff] (%p6577_p6), %v4918_v42  ;;  %v4922_v47 = vld [vmem:[%s8209_s9 + $0x60] sm:$0xff] (%p6577_p6)  ;;  %v4924_v52 = vld [vmem:[%s8209_s9 + $0x68] sm:$0xff] (%p6577_p6) }
 0x3c6   : > { %4721 = vst [vmem:[%s8209_s9 + $0x1a0] sm:$0xff] %v4657_v32  ;;  %v4658_v40 = vmax.f32 %v4562_v4, 0.0  ;;  %4921 = vst [vmem:[%s8404_s15 + $0xb0] sm:$0xff] (%p6577_p6), %v4920_v25  ;;  %v4926_v48 = vld [vmem:[%s8209_s9 + $0x70] sm:$0xff] (%p6577_p6)  ;;  %v4928_v29 = vld [vmem:[%s8209_s9 + $0x78] sm:$0xff] (%p6577_p6) }
 0x3c7   : > { %4724 = vst [vmem:[%s8209_s9 + $0x1b8] sm:$0xff] %v4660_v6  ;;  %4923 = vst [vmem:[%s8404_s15 + $0xc0] sm:$0xff] (%p6577_p6), %v4922_v47  ;;  %v4930_v20 = vld [vmem:[%s8209_s9 + $0x80] sm:$0xff] (%p6577_p6)  ;;  %v4932_v32 = vld [vmem:[%s8209_s9 + $0x88] sm:$0xff] (%p6577_p6) }
 0x3c8   : > { %4722 = vst [vmem:[%s8209_s9 + $0x1a8] sm:$0xff] %v4658_v40  ;;  %v5597_v15 = vpop.f32.mrb[184].mxu1  ;;  %4925 = vst [vmem:[%s8404_s15 + $0xd0] sm:$0xff] (%p6577_p6), %v4924_v52  ;;  %v4934_v14 = vld [vmem:[%s8209_s9 + $0x90] sm:$0xff] (%p6577_p6)  ;;  %v4938_v21 = vld [vmem:[%s8209_s9 + $0xa0] sm:$0xff] (%p6577_p6) }
 0x3c9   : > { %v4301_v60 = vpop.f32.mrb[120].mxu0  ;;  %v4583_v30 = vadd.f32 %v5693_v11, %v5597_v15  ;;  %v4574_v5 = vpop.f32.mrb[185].mxu1  ;;  %v4916_v11 = vld [vmem:[%s8209_s9 + $0x48] sm:$0xff] (%p6577_p6)  ;;  %4927 = vst [vmem:[%s8404_s15 + $0xe0] sm:$0xff] (%p6577_p6), %v4926_v48  ;;  %4929 = vst [vmem:[%s8404_s15 + $0xf0] sm:$0xff] (%p6577_p6), %v4928_v29  ;;  %v4942_v6 = vld [vmem:[%s8209_s9 + $0xb0] sm:$0xff] (%p6577_p6) }
 0x3ca   : > { %v5695_v63 = vadd.f32 %v4301_v60, %v8576_v41  ;;  %v4303_v37 = vpop.f32.mrb[121].mxu0  ;;  %v4575_v35 = vadd.f32 %v5691_v59, %v4574_v5  ;;  %v5598_v44 = vpop.f32.mrb[186].mxu1  ;;  %4917 = vst [vmem:[%s8404_s15 + $0x90] sm:$0xff] (%p6577_p6), %v4916_v11  ;;  %4931 = vst [vmem:[%s8404_s15 + $0x100] sm:$0xff] (%p6577_p6), %v4930_v20  ;;  %v4940_v4 = vld [vmem:[%s8209_s9 + $0xa8] sm:$0xff] (%p6577_p6)  ;;  %v4944_v40 = vld [vmem:[%s8209_s9 + $0xb8] sm:$0xff] (%p6577_p6) }
 0x3cb   : > { %v4663_v12 = vmax.f32 %v4583_v30, 0.0  ;;  %v4304_v61 = vpop.f32.mrb[122].mxu0  ;;  %v4586_v26 = vadd.f32 %v5694_v54, %v5598_v44  ;;  %v4577_v57 = vpop.f32.mrb[187].mxu1  ;;  %4933 = vst [vmem:[%s8404_s15 + $0x110] sm:$0xff] (%p6577_p6), %v4932_v32  ;;  %v4936_v54 = vld [vmem:[%s8209_s9 + $0x98] sm:$0xff] (%p6577_p6)  ;;  %4935 = vst [vmem:[%s8404_s15 + $0x120] sm:$0xff] (%p6577_p6), %v4934_v14 }
 0x3cc   : > { %v4661_v62 = vmax.f32 %v4575_v35, 0.0  ;;  %v5696_v23 = vadd.f32 %v4304_v61, %v8577_v24  ;;  %v4306_v7 = vpop.f32.mrb[123].mxu0  ;;  %v4578_v50 = vadd.f32 %v5692_v43, %v4577_v57  ;;  %4937 = vst [vmem:[%s8404_s15 + $0x130] sm:$0xff] (%p6577_p6), %v4936_v54  ;;  %4939 = vst [vmem:[%s8404_s15 + $0x140] sm:$0xff] (%p6577_p6), %v4938_v21  ;;  %v4946_v15 = vld [vmem:[%s8209_s9 + $0xc0] sm:$0xff] (%p6577_p6)  ;;  %v4948_v60 = vld [vmem:[%s8209_s9 + $0xc8] sm:$0xff] (%p6577_p6) }
 0x3cd   : > { %4727 = vst [vmem:[%s8209_s9 + $0x1d0] sm:$0xff] %v4663_v12  ;;  %v4664_v1 = vmax.f32 %v4586_v26, 0.0  ;;  %4941 = vst [vmem:[%s8404_s15 + $0x150] sm:$0xff] (%p6577_p6), %v4940_v4  ;;  %v4950_v30 = vld [vmem:[%s8209_s9 + $0xd0] sm:$0xff] (%p6577_p6)  ;;  %v4952_v5 = vld [vmem:[%s8209_s9 + $0xd8] sm:$0xff] (%p6577_p6) }
 0x3ce   : > { %4725 = vst [vmem:[%s8209_s9 + $0x1c0] sm:$0xff] %v4661_v62  ;;  %v4662_v45 = vmax.f32 %v4578_v50, 0.0  ;;  %4943 = vst [vmem:[%s8404_s15 + $0x160] sm:$0xff] (%p6577_p6), %v4942_v6  ;;  %v4954_v41 = vld [vmem:[%s8209_s9 + $0xe0] sm:$0xff] (%p6577_p6)  ;;  %v4958_v37 = vld [vmem:[%s8209_s9 + $0xf0] sm:$0xff] (%p6577_p6) }
 0x3cf   : > { %4728 = vst [vmem:[%s8209_s9 + $0x1d8] sm:$0xff] %v4664_v1  ;;  %4945 = vst [vmem:[%s8404_s15 + $0x170] sm:$0xff] (%p6577_p6), %v4944_v40  ;;  %v4960_v35 = vld [vmem:[%s8209_s9 + $0xf8] sm:$0xff] (%p6577_p6)  ;;  %v4962_v44 = vld [vmem:[%s8209_s9 + $0x100] sm:$0xff] (%p6577_p6) }
 0x3d0   : > { %4726 = vst [vmem:[%s8209_s9 + $0x1c8] sm:$0xff] %v4662_v45  ;;  %v5601_v38 = vpop.f32.mrb[188].mxu1  ;;  %4947 = vst [vmem:[%s8404_s15 + $0x180] sm:$0xff] (%p6577_p6), %v4946_v15  ;;  %v4964_v12 = vld [vmem:[%s8209_s9 + $0x108] sm:$0xff] (%p6577_p6)  ;;  %v4966_v61 = vld [vmem:[%s8209_s9 + $0x110] sm:$0xff] (%p6577_p6) }
 0x3d1   : > { %v4309_v39 = vpop.f32.mrb[124].mxu0  ;;  %v4590_v27 = vpop.f32.mrb[189].mxu1  ;;  %4949 = vst [vmem:[%s8404_s15 + $0x190] sm:$0xff] (%p6577_p6), %v4948_v60  ;;  %4951 = vst [vmem:[%s8404_s15 + $0x1a0] sm:$0xff] (%p6577_p6), %v4950_v30  ;;  %v4968_v26 = vld [vmem:[%s8209_s9 + $0x118] sm:$0xff] (%p6577_p6)  ;;  %v4970_v57 = vld [vmem:[%s8209_s9 + $0x120] sm:$0xff] (%p6577_p6) }
 0x3d2   : > { %v5697_v56 = vadd.f32 %v4309_v39, %v8578_v28  ;;  %v4311_v10 = vpop.f32.mrb[125].mxu0  ;;  %v4591_v53 = vadd.f32 %v5695_v63, %v4590_v27  ;;  %v5602_v16 = vpop.f32.mrb[190].mxu1  ;;  %v4956_v63 = vld [vmem:[%s8209_s9 + $0xe8] sm:$0xff] (%p6577_p6)  ;;  %4953 = vst [vmem:[%s8404_s15 + $0x1b0] sm:$0xff] (%p6577_p6), %v4952_v5  ;;  %4955 = vst [vmem:[%s8404_s15 + $0x1c0] sm:$0xff] (%p6577_p6), %v4954_v41  ;;  %v4974_v24 = vld [vmem:[%s8209_s9 + $0x130] sm:$0xff] (%p6577_p6) }
 0x3d3   : > { %v4312_v33 = vpop.f32.mrb[126].mxu0  ;;  %v4593_v59 = vpop.f32.mrb[191].mxu1  ;;  %4957 = vst [vmem:[%s8404_s15 + $0x1d0] sm:$0xff] (%p6577_p6), %v4956_v63  ;;  %4959 = vst [vmem:[%s8404_s15 + $0x1e0] sm:$0xff] (%p6577_p6), %v4958_v37  ;;  %v4972_v62 = vld [vmem:[%s8209_s9 + $0x128] sm:$0xff] (%p6577_p6)  ;;  %v4978_v7 = vld [vmem:[%s8209_s9 + $0x140] sm:$0xff] (%p6577_p6) }
 0x3d4   : > { %v4599_v17 = vadd.f32 %v5697_v56, %v5601_v38  ;;  %v4665_v51 = vmax.f32 %v4591_v53, 0.0  ;;  %v5698_v18 = vadd.f32 %v4312_v33, %v8579_v31  ;;  %v4314_v9 = vpop.f32.mrb[127].mxu0  ;;  %v4594_v2 = vadd.f32 %v5696_v23, %v4593_v59  ;;  %4739 = sbr.rel (!%p6577_p6) target bundleno = 999 (0x3e7), region = 73  ;;  %4961 = vst [vmem:[%s8404_s15 + $0x1f0] sm:$0xff] (%p6577_p6), %v4960_v35  ;;  %4963 = vst [vmem:[%s8404_s15 + $0x200] sm:$0xff] (%p6577_p6), %v4962_v44  ;;  %v4976_v23 = vld [vmem:[%s8209_s9 + $0x138] sm:$0xff] (%p6577_p6) }
 0x3d5   : > { %4965 = vst [vmem:[%s8404_s15 + $0x210] sm:$0xff] (%p6577_p6), %v4964_v12  ;;  %4967 = vst [vmem:[%s8404_s15 + $0x220] sm:$0xff] (%p6577_p6), %v4966_v61  ;;  %v4980_v50 = vld [vmem:[%s8209_s9 + $0x148] sm:$0xff] (%p6577_p6)  ;;  %v4982_v1 = vld [vmem:[%s8209_s9 + $0x150] sm:$0xff] (%p6577_p6) }
 0x3d6   : > { %v4667_v3 = vmax.f32 %v4599_v17, 0.0  ;;  %4729 = vst [vmem:[%s8209_s9 + $0x1e0] sm:$0xff] %v4665_v51  ;;  %v4602_v36 = vadd.f32 %v5698_v18, %v5602_v16  ;;  %v4666_v0 = vmax.f32 %v4594_v2, 0.0  ;;  %4969 = vst [vmem:[%s8404_s15 + $0x230] sm:$0xff] (%p6577_p6), %v4968_v26  ;;  %v4984_v45 = vld [vmem:[%s8209_s9 + $0x158] sm:$0xff] (%p6577_p6)  ;;  %v4986_v38 = vld [vmem:[%s8209_s9 + $0x160] sm:$0xff] (%p6577_p6) }
 0x3d7   : > { %4971 = vst [vmem:[%s8404_s15 + $0x240] sm:$0xff] (%p6577_p6), %v4970_v57  ;;  %4973 = vst [vmem:[%s8404_s15 + $0x250] sm:$0xff] (%p6577_p6), %v4972_v62  ;;  %v4988_v39 = vld [vmem:[%s8209_s9 + $0x168] sm:$0xff] (%p6577_p6)  ;;  %v4990_v27 = vld [vmem:[%s8209_s9 + $0x170] sm:$0xff] (%p6577_p6) }
 0x3d8   : > { %4731 = vst [vmem:[%s8209_s9 + $0x1f0] sm:$0xff] %v4667_v3  ;;  %v4668_v43 = vmax.f32 %v4602_v36, 0.0  ;;  %4730 = vst [vmem:[%s8209_s9 + $0x1e8] sm:$0xff] %v4666_v0  ;;  %v4992_v28 = vld [vmem:[%s8209_s9 + $0x178] sm:$0xff] (%p6577_p6)  ;;  %v4994_v56 = vld [vmem:[%s8209_s9 + $0x180] sm:$0xff] (%p6577_p6) }
 0x3d9   : > { %4975 = vst [vmem:[%s8404_s15 + $0x260] sm:$0xff] (%p6577_p6), %v4974_v24  ;;  %4977 = vst [vmem:[%s8404_s15 + $0x270] sm:$0xff] (%p6577_p6), %v4976_v23  ;;  %v4996_v10 = vld [vmem:[%s8209_s9 + $0x188] sm:$0xff] (%p6577_p6)  ;;  %v4998_v53 = vld [vmem:[%s8209_s9 + $0x190] sm:$0xff] (%p6577_p6) }
 0x3da   : > { %4732 = vst [vmem:[%s8209_s9 + $0x1f8] sm:$0xff] %v4668_v43  ;;  %4979 = vst [vmem:[%s8404_s15 + $0x280] sm:$0xff] (%p6577_p6), %v4978_v7  ;;  %v5000_v16 = vld [vmem:[%s8209_s9 + $0x198] sm:$0xff] (%p6577_p6)  ;;  %v5002_v33 = vld [vmem:[%s8209_s9 + $0x1a0] sm:$0xff] (%p6577_p6) }
 0x3db   : > { %4981 = vst [vmem:[%s8404_s15 + $0x290] sm:$0xff] %v4980_v50  ;;  %4983 = vst [vmem:[%s8404_s15 + $0x2a0] sm:$0xff] %v4982_v1  ;;  %v5004_v59 = vld [vmem:[%s8209_s9 + $0x1a8] sm:$0xff]  ;;  %v5006_v17 = vld [vmem:[%s8209_s9 + $0x1b0] sm:$0xff] }
 0x3dc   : > { %4985 = vst [vmem:[%s8404_s15 + $0x2b0] sm:$0xff] %v4984_v45  ;;  %4987 = vst [vmem:[%s8404_s15 + $0x2c0] sm:$0xff] %v4986_v38  ;;  %v5008_v51 = vld [vmem:[%s8209_s9 + $0x1b8] sm:$0xff]  ;;  %v5010_v31 = vld [vmem:[%s8209_s9 + $0x1c0] sm:$0xff] }
 0x3dd   : > { %4989 = vst [vmem:[%s8404_s15 + $0x2d0] sm:$0xff] %v4988_v39  ;;  %4991 = vst [vmem:[%s8404_s15 + $0x2e0] sm:$0xff] %v4990_v27  ;;  %v5012_v18 = vld [vmem:[%s8209_s9 + $0x1c8] sm:$0xff]  ;;  %v5014_v9 = vld [vmem:[%s8209_s9 + $0x1d0] sm:$0xff] }
 0x3de   : > { %4993 = vst [vmem:[%s8404_s15 + $0x2f0] sm:$0xff] %v4992_v28  ;;  %4995 = vst [vmem:[%s8404_s15 + $0x300] sm:$0xff] %v4994_v56  ;;  %v5016_v2 = vld [vmem:[%s8209_s9 + $0x1d8] sm:$0xff]  ;;  %v5018_v3 = vld [vmem:[%s8209_s9 + $0x1e0] sm:$0xff] }
 0x3df   : > { %4997 = vst [vmem:[%s8404_s15 + $0x310] sm:$0xff] %v4996_v10  ;;  %4999 = vst [vmem:[%s8404_s15 + $0x320] sm:$0xff] %v4998_v53  ;;  %v5020_v36 = vld [vmem:[%s8209_s9 + $0x1e8] sm:$0xff]  ;;  %v5022_v0 = vld [vmem:[%s8209_s9 + $0x1f0] sm:$0xff] }
 0x3e0   : > { %5001 = vst [vmem:[%s8404_s15 + $0x330] sm:$0xff] %v5000_v16  ;;  %5003 = vst [vmem:[%s8404_s15 + $0x340] sm:$0xff] %v5002_v33 }
 0x3e1   : > { %5005 = vst [vmem:[%s8404_s15 + $0x350] sm:$0xff] %v5004_v59  ;;  %5007 = vst [vmem:[%s8404_s15 + $0x360] sm:$0xff] %v5006_v17  ;;  %v5024_v43 = vld [vmem:[%s8209_s9 + $0x1f8] sm:$0xff] }
 0x3e2   : > { %5009 = vst [vmem:[%s8404_s15 + $0x370] sm:$0xff] %v5008_v51  ;;  %5011 = vst [vmem:[%s8404_s15 + $0x380] sm:$0xff] %v5010_v31 }
 0x3e3   : > { %5013 = vst [vmem:[%s8404_s15 + $0x390] sm:$0xff] %v5012_v18  ;;  %5015 = vst [vmem:[%s8404_s15 + $0x3a0] sm:$0xff] %v5014_v9 }
 0x3e4   : > { %5017 = vst [vmem:[%s8404_s15 + $0x3b0] sm:$0xff] %v5016_v2  ;;  %5019 = vst [vmem:[%s8404_s15 + $0x3c0] sm:$0xff] %v5018_v3 }
 0x3e5   : > { %5021 = vst [vmem:[%s8404_s15 + $0x3d0] sm:$0xff] %v5020_v36  ;;  %5023 = vst [vmem:[%s8404_s15 + $0x3e0] sm:$0xff] %v5022_v0 }
 0x3e6   : > { %5025 = vst [vmem:[%s8404_s15 + $0x3f0] sm:$0xff] %v5024_v43 }
 0x3e7 PF: > { %s12_s13 = sadd.s32 1, %s6524_s13   ;;  %s8580_s9 = smov %s6512_s10 }
 0x3e8   : > { %p9_p11 = scmp.ge.s32.totalorder %s12_s13, 4   ;;  %s8581_s10 = smov %s6582_s19 }
 0x3e9   : > { %s8582_s11 = smov %s6520_s12  ;;  %s8583_s12 = smov %s8585_s14 }
 0x3ea   :  { %11 = sbr.rel (!%p9_p11) target bundleno = 3 (0x3), region = 145 }

// kernel: aspp_apply.11
= control target key start
LH: loop header
LB: loop body
LE: loop exit
PB: predicated region body
PF: predicated region fallthrough
CT: control target
= control target key end

     0   :  { %7 = vsyncpa [#allocation4], 0  ;;  %s8496_s0 = inlined_call_operand.vmem [shape: bf16[512,1280], index: 0, kind: input, shape index: {}]   ;;  %s8497_s1 = inlined_call_operand.vmem [shape: bf16[1280,256], index: 1, kind: input, shape index: {}]   ;;  %s8498_s2 = inlined_call_operand.hbm [shape: f32[512,256], index: 2, kind: output, shape index: {}]  }
   0x1   :  { %9 = vsyncpa [#allocation4 + $0x1], 0  ;;  %s6731_s9 = smov 0   ;;  %s6733_s10 = smov 0  }
   0x2   :  { %s6735_s11 = smov 0   ;;  %s6737_s12 = smov 0  }
   0x3   :  { %s6739_s13 = smov 0   ;;  %s6741_s14 = smov 0  }
   0x4 LB: > { %s5102_s15 = sadd.s32 4294967295, %s6709_s14   ;;  %s5103_s16 = sadd.s32 4294967294, %s6709_s14   ;;  %s6709_s14 = sphi %s6741_s14, %s15_s14   ;;  %s6705_s13 = sphi %s6739_s13, %s8505_s13   ;;  %s6701_s12 = sphi %s6737_s12, %s8504_s12   ;;  %s6697_s11 = sphi %s6735_s11, %s8503_s11   ;;  %s6693_s10 = sphi %s6733_s10, %s8502_s10   ;;  %s6689_s9 = sphi %s6731_s9, %s8501_s9  }
   0x5   : > { %s24_s17 = sadd.s32 1, %s6705_s13  ;;  %s60_s18 = sadd.s32 1, %s6697_s11 }
   0x6   : > { %p25_p0 = scmp.ge.s32.totalorder %s24_s17, 2  ;;  %p67_p1 = scmp.ne.s32.totalorder %s6697_s11, %s6693_s10 }
   0x7   : > { %p68_p2 = scmp.eq.s32.totalorder %s6709_s14, 0  ;;  %p99_p3 = scmp.eq.s32.totalorder %s5102_s15, 1 }
   0x8   : > { %s8507_s17 = smov (%p25_p0, %s24_s17), 0  ;;  %p104_p6 = scmp.ne.s32.totalorder %s6693_s10, %s6689_s9 }
   0x9   : > { %p69_p4 = por %p68_p2, %p67_p1  ;;  %p6770_p5 = por %p99_p3, %p67_p1 }
   0xa   : > { %s57_s20 = ssub.s32 %s6705_s13, %s8507_s17  ;;  %p105_p8 = scmp.eq.s32.totalorder %s5103_s16, 1 }
   0xb   : > { %p58_p7 = scmp.eq.s32.totalorder %s57_s20, 0  ;;  %p5106_p10 = scmp.ge.s32.totalorder %s6709_s14, 2 }
   0xc   : > { %p6781_p9 = por %p105_p8, %p104_p6 }
   0xd   : > { %s6779_s21 = scalar_select %p58_p7, %s6697_s11, %s60_s18  }
   0xe   : > { %131 = sbr.rel (%p5106_p10) target bundleno = 132 (0x84), region = 20 }
  0x15   : > { %134 = sbr.rel (!%p69_p4) target bundleno = 132 (0x84), region = 24  ;;  %s136_s23 = sand.u32 (%p69_p4), 1, %s6697_s11  }
  0x16   : > { %s5107_s24 = sshll.u32 (%p69_p4), %s6705_s13, 2  ;;  %s5994_s25 = smul.u32 (%p69_p4), 640, %s136_s23 }
  0x17   : > { %s6793_s28 = scalar_lea.vmem (%p69_p4), %s8497_s1, %s5107_s24 }
  0x18   : > { %v156_v0 = vld [vmem:[%s6793_s28] sm:$0xf] (%p69_p4)  ;;  %v158_v1 = vld [vmem:[%s6793_s28 + $0x8] sm:$0xf] (%p69_p4)  ;;  %v160_v2 = vld [vmem:[%s6793_s28 + $0x10] sm:$0xf] (%p69_p4) }
  0x19   : > { %v162_v3 = vld [vmem:[%s6793_s28 + $0x18] sm:$0xf] (%p69_p4)  ;;  %v164_v4 = vld [vmem:[%s6793_s28 + $0x20] sm:$0xf] (%p69_p4)  ;;  %s6800_s29 = scalar_lea.vmem (%p69_p4), [#allocation2], %s5994_s25 }
  0x1a   : > { %157 = vst [vmem:[%s6800_s29] sm:$0xf] (%p69_p4), %v156_v0  ;;  %159 = vst [vmem:[%s6800_s29 + $0x4] sm:$0xf] (%p69_p4), %v158_v1  ;;  %v166_v5 = vld [vmem:[%s6793_s28 + $0x28] sm:$0xf] (%p69_p4) }
  0x1b   : > { %161 = vst [vmem:[%s6800_s29 + $0x8] sm:$0xf] (%p69_p4), %v160_v2  ;;  %163 = vst [vmem:[%s6800_s29 + $0xc] sm:$0xf] (%p69_p4), %v162_v3  ;;  %v168_v6 = vld [vmem:[%s6793_s28 + $0x30] sm:$0xf] (%p69_p4) }
  0x1c   : > { %165 = vst [vmem:[%s6800_s29 + $0x10] sm:$0xf] %v164_v4  ;;  %v170_v7 = vld [vmem:[%s6793_s28 + $0x38] sm:$0xf]  ;;  %167 = vst [vmem:[%s6800_s29 + $0x14] sm:$0xf] %v166_v5 }
  0x1d   : > { %169 = vst [vmem:[%s6800_s29 + $0x18] sm:$0xf] %v168_v6  ;;  %171 = vst [vmem:[%s6800_s29 + $0x1c] sm:$0xf] %v170_v7  ;;  %v172_v8 = vld [vmem:[%s6793_s28 + $0x40] sm:$0xf] }
  0x1e   : > { %v174_v9 = vld [vmem:[%s6793_s28 + $0x48] sm:$0xf]  ;;  %v176_v10 = vld [vmem:[%s6793_s28 + $0x50] sm:$0xf]  ;;  %173 = vst [vmem:[%s6800_s29 + $0x20] sm:$0xf] %v172_v8 }
  0x1f   : > { %175 = vst [vmem:[%s6800_s29 + $0x24] sm:$0xf] %v174_v9  ;;  %177 = vst [vmem:[%s6800_s29 + $0x28] sm:$0xf] %v176_v10  ;;  %v178_v11 = vld [vmem:[%s6793_s28 + $0x58] sm:$0xf] }
  0x20   : > { %v180_v12 = vld [vmem:[%s6793_s28 + $0x60] sm:$0xf]  ;;  %v182_v13 = vld [vmem:[%s6793_s28 + $0x68] sm:$0xf]  ;;  %179 = vst [vmem:[%s6800_s29 + $0x2c] sm:$0xf] %v178_v11 }
  0x21   : > { %181 = vst [vmem:[%s6800_s29 + $0x30] sm:$0xf] %v180_v12  ;;  %183 = vst [vmem:[%s6800_s29 + $0x34] sm:$0xf] %v182_v13  ;;  %v184_v14 = vld [vmem:[%s6793_s28 + $0x70] sm:$0xf] }
  0x22   : > { %v186_v15 = vld [vmem:[%s6793_s28 + $0x78] sm:$0xf]  ;;  %v188_v16 = vld [vmem:[%s6793_s28 + $0x80] sm:$0xf]  ;;  %185 = vst [vmem:[%s6800_s29 + $0x38] sm:$0xf] %v184_v14 }
  0x23   : > { %187 = vst [vmem:[%s6800_s29 + $0x3c] sm:$0xf] %v186_v15  ;;  %189 = vst [vmem:[%s6800_s29 + $0x40] sm:$0xf] %v188_v16  ;;  %v190_v17 = vld [vmem:[%s6793_s28 + $0x88] sm:$0xf] }
  0x24   : > { %v192_v18 = vld [vmem:[%s6793_s28 + $0x90] sm:$0xf]  ;;  %v194_v19 = vld [vmem:[%s6793_s28 + $0x98] sm:$0xf]  ;;  %191 = vst [vmem:[%s6800_s29 + $0x44] sm:$0xf] %v190_v17 }
  0x25   : > { %193 = vst [vmem:[%s6800_s29 + $0x48] sm:$0xf] %v192_v18  ;;  %195 = vst [vmem:[%s6800_s29 + $0x4c] sm:$0xf] %v194_v19  ;;  %v196_v20 = vld [vmem:[%s6793_s28 + $0xa0] sm:$0xf] }
  0x26   : > { %v198_v21 = vld [vmem:[%s6793_s28 + $0xa8] sm:$0xf]  ;;  %v200_v22 = vld [vmem:[%s6793_s28 + $0xb0] sm:$0xf]  ;;  %197 = vst [vmem:[%s6800_s29 + $0x50] sm:$0xf] %v196_v20 }
  0x27   : > { %199 = vst [vmem:[%s6800_s29 + $0x54] sm:$0xf] %v198_v21  ;;  %201 = vst [vmem:[%s6800_s29 + $0x58] sm:$0xf] %v200_v22  ;;  %v202_v23 = vld [vmem:[%s6793_s28 + $0xb8] sm:$0xf] }
  0x28   : > { %v204_v24 = vld [vmem:[%s6793_s28 + $0xc0] sm:$0xf]  ;;  %v206_v25 = vld [vmem:[%s6793_s28 + $0xc8] sm:$0xf]  ;;  %203 = vst [vmem:[%s6800_s29 + $0x5c] sm:$0xf] %v202_v23 }
  0x29   : > { %205 = vst [vmem:[%s6800_s29 + $0x60] sm:$0xf] %v204_v24  ;;  %207 = vst [vmem:[%s6800_s29 + $0x64] sm:$0xf] %v206_v25  ;;  %v208_v26 = vld [vmem:[%s6793_s28 + $0xd0] sm:$0xf] }
  0x2a   : > { %v210_v27 = vld [vmem:[%s6793_s28 + $0xd8] sm:$0xf]  ;;  %v212_v28 = vld [vmem:[%s6793_s28 + $0xe0] sm:$0xf]  ;;  %209 = vst [vmem:[%s6800_s29 + $0x68] sm:$0xf] %v208_v26 }
  0x2b   : > { %211 = vst [vmem:[%s6800_s29 + $0x6c] sm:$0xf] %v210_v27  ;;  %213 = vst [vmem:[%s6800_s29 + $0x70] sm:$0xf] %v212_v28  ;;  %v214_v29 = vld [vmem:[%s6793_s28 + $0xe8] sm:$0xf] }
  0x2c   : > { %v216_v30 = vld [vmem:[%s6793_s28 + $0xf0] sm:$0xf]  ;;  %v218_v31 = vld [vmem:[%s6793_s28 + $0xf8] sm:$0xf]  ;;  %215 = vst [vmem:[%s6800_s29 + $0x74] sm:$0xf] %v214_v29 }
  0x2d   : > { %217 = vst [vmem:[%s6800_s29 + $0x78] sm:$0xf] %v216_v30  ;;  %219 = vst [vmem:[%s6800_s29 + $0x7c] sm:$0xf] %v218_v31  ;;  %v220_v32 = vld [vmem:[%s6793_s28 + $0x100] sm:$0xf] }
  0x2e   : > { %v222_v33 = vld [vmem:[%s6793_s28 + $0x108] sm:$0xf]  ;;  %v224_v34 = vld [vmem:[%s6793_s28 + $0x110] sm:$0xf]  ;;  %221 = vst [vmem:[%s6800_s29 + $0x80] sm:$0xf] %v220_v32 }
  0x2f   : > { %223 = vst [vmem:[%s6800_s29 + $0x84] sm:$0xf] %v222_v33  ;;  %225 = vst [vmem:[%s6800_s29 + $0x88] sm:$0xf] %v224_v34  ;;  %v226_v35 = vld [vmem:[%s6793_s28 + $0x118] sm:$0xf] }
  0x30   : > { %v228_v36 = vld [vmem:[%s6793_s28 + $0x120] sm:$0xf]  ;;  %v230_v37 = vld [vmem:[%s6793_s28 + $0x128] sm:$0xf]  ;;  %227 = vst [vmem:[%s6800_s29 + $0x8c] sm:$0xf] %v226_v35 }
  0x31   : > { %229 = vst [vmem:[%s6800_s29 + $0x90] sm:$0xf] %v228_v36  ;;  %231 = vst [vmem:[%s6800_s29 + $0x94] sm:$0xf] %v230_v37  ;;  %v232_v38 = vld [vmem:[%s6793_s28 + $0x130] sm:$0xf] }
  0x32   : > { %v234_v39 = vld [vmem:[%s6793_s28 + $0x138] sm:$0xf]  ;;  %v236_v40 = vld [vmem:[%s6793_s28 + $0x140] sm:$0xf]  ;;  %233 = vst [vmem:[%s6800_s29 + $0x98] sm:$0xf] %v232_v38 }
  0x33   : > { %235 = vst [vmem:[%s6800_s29 + $0x9c] sm:$0xf] %v234_v39  ;;  %237 = vst [vmem:[%s6800_s29 + $0xa0] sm:$0xf] %v236_v40  ;;  %v238_v41 = vld [vmem:[%s6793_s28 + $0x148] sm:$0xf] }
  0x34   : > { %v240_v42 = vld [vmem:[%s6793_s28 + $0x150] sm:$0xf]  ;;  %v242_v43 = vld [vmem:[%s6793_s28 + $0x158] sm:$0xf]  ;;  %239 = vst [vmem:[%s6800_s29 + $0xa4] sm:$0xf] %v238_v41 }
  0x35   : > { %241 = vst [vmem:[%s6800_s29 + $0xa8] sm:$0xf] %v240_v42  ;;  %243 = vst [vmem:[%s6800_s29 + $0xac] sm:$0xf] %v242_v43  ;;  %v244_v44 = vld [vmem:[%s6793_s28 + $0x160] sm:$0xf] }
  0x36   : > { %v246_v45 = vld [vmem:[%s6793_s28 + $0x168] sm:$0xf]  ;;  %v248_v46 = vld [vmem:[%s6793_s28 + $0x170] sm:$0xf]  ;;  %245 = vst [vmem:[%s6800_s29 + $0xb0] sm:$0xf] %v244_v44 }
  0x37   : > { %247 = vst [vmem:[%s6800_s29 + $0xb4] sm:$0xf] %v246_v45  ;;  %249 = vst [vmem:[%s6800_s29 + $0xb8] sm:$0xf] %v248_v46  ;;  %v250_v47 = vld [vmem:[%s6793_s28 + $0x178] sm:$0xf] }
  0x38   : > { %v252_v48 = vld [vmem:[%s6793_s28 + $0x180] sm:$0xf]  ;;  %v254_v49 = vld [vmem:[%s6793_s28 + $0x188] sm:$0xf]  ;;  %251 = vst [vmem:[%s6800_s29 + $0xbc] sm:$0xf] %v250_v47 }
  0x39   : > { %253 = vst [vmem:[%s6800_s29 + $0xc0] sm:$0xf] %v252_v48  ;;  %255 = vst [vmem:[%s6800_s29 + $0xc4] sm:$0xf] %v254_v49  ;;  %v256_v50 = vld [vmem:[%s6793_s28 + $0x190] sm:$0xf] }
  0x3a   : > { %v258_v51 = vld [vmem:[%s6793_s28 + $0x198] sm:$0xf]  ;;  %v260_v52 = vld [vmem:[%s6793_s28 + $0x1a0] sm:$0xf]  ;;  %257 = vst [vmem:[%s6800_s29 + $0xc8] sm:$0xf] %v256_v50 }
  0x3b   : > { %259 = vst [vmem:[%s6800_s29 + $0xcc] sm:$0xf] %v258_v51  ;;  %261 = vst [vmem:[%s6800_s29 + $0xd0] sm:$0xf] %v260_v52  ;;  %v262_v53 = vld [vmem:[%s6793_s28 + $0x1a8] sm:$0xf] }
  0x3c   : > { %v264_v54 = vld [vmem:[%s6793_s28 + $0x1b0] sm:$0xf]  ;;  %v266_v55 = vld [vmem:[%s6793_s28 + $0x1b8] sm:$0xf]  ;;  %263 = vst [vmem:[%s6800_s29 + $0xd4] sm:$0xf] %v262_v53 }
  0x3d   : > { %265 = vst [vmem:[%s6800_s29 + $0xd8] sm:$0xf] %v264_v54  ;;  %267 = vst [vmem:[%s6800_s29 + $0xdc] sm:$0xf] %v266_v55  ;;  %v268_v56 = vld [vmem:[%s6793_s28 + $0x1c0] sm:$0xf] }
  0x3e   : > { %v270_v57 = vld [vmem:[%s6793_s28 + $0x1c8] sm:$0xf]  ;;  %v272_v58 = vld [vmem:[%s6793_s28 + $0x1d0] sm:$0xf]  ;;  %269 = vst [vmem:[%s6800_s29 + $0xe0] sm:$0xf] %v268_v56 }
  0x3f   : > { %271 = vst [vmem:[%s6800_s29 + $0xe4] sm:$0xf] %v270_v57  ;;  %273 = vst [vmem:[%s6800_s29 + $0xe8] sm:$0xf] %v272_v58  ;;  %v274_v59 = vld [vmem:[%s6793_s28 + $0x1d8] sm:$0xf] }
  0x40   : > { %v276_v60 = vld [vmem:[%s6793_s28 + $0x1e0] sm:$0xf]  ;;  %v278_v61 = vld [vmem:[%s6793_s28 + $0x1e8] sm:$0xf]  ;;  %275 = vst [vmem:[%s6800_s29 + $0xec] sm:$0xf] %v274_v59 }
  0x41   : > { %277 = vst [vmem:[%s6800_s29 + $0xf0] sm:$0xf] %v276_v60  ;;  %279 = vst [vmem:[%s6800_s29 + $0xf4] sm:$0xf] %v278_v61  ;;  %v280_v62 = vld [vmem:[%s6793_s28 + $0x1f0] sm:$0xf] }
  0x42   : > { %v282_v63 = vld [vmem:[%s6793_s28 + $0x1f8] sm:$0xf]  ;;  %v284_v0 = vld [vmem:[%s6793_s28 + $0x200] sm:$0xf]  ;;  %281 = vst [vmem:[%s6800_s29 + $0xf8] sm:$0xf] %v280_v62 }
  0x43   : > { %283 = vst [vmem:[%s6800_s29 + $0xfc] sm:$0xf] %v282_v63  ;;  %285 = vst [vmem:[%s6800_s29 + $0x100] sm:$0xf] %v284_v0  ;;  %v286_v1 = vld [vmem:[%s6793_s28 + $0x208] sm:$0xf] }
  0x44   : > { %v288_v2 = vld [vmem:[%s6793_s28 + $0x210] sm:$0xf]  ;;  %v290_v3 = vld [vmem:[%s6793_s28 + $0x218] sm:$0xf]  ;;  %287 = vst [vmem:[%s6800_s29 + $0x104] sm:$0xf] %v286_v1 }
  0x45   : > { %289 = vst [vmem:[%s6800_s29 + $0x108] sm:$0xf] %v288_v2  ;;  %291 = vst [vmem:[%s6800_s29 + $0x10c] sm:$0xf] %v290_v3  ;;  %v292_v4 = vld [vmem:[%s6793_s28 + $0x220] sm:$0xf] }
  0x46   : > { %v294_v5 = vld [vmem:[%s6793_s28 + $0x228] sm:$0xf]  ;;  %v296_v6 = vld [vmem:[%s6793_s28 + $0x230] sm:$0xf]  ;;  %293 = vst [vmem:[%s6800_s29 + $0x110] sm:$0xf] %v292_v4 }
  0x47   : > { %295 = vst [vmem:[%s6800_s29 + $0x114] sm:$0xf] %v294_v5  ;;  %297 = vst [vmem:[%s6800_s29 + $0x118] sm:$0xf] %v296_v6  ;;  %v298_v7 = vld [vmem:[%s6793_s28 + $0x238] sm:$0xf] }
  0x48   : > { %v300_v8 = vld [vmem:[%s6793_s28 + $0x240] sm:$0xf]  ;;  %v302_v9 = vld [vmem:[%s6793_s28 + $0x248] sm:$0xf]  ;;  %299 = vst [vmem:[%s6800_s29 + $0x11c] sm:$0xf] %v298_v7 }
  0x49   : > { %301 = vst [vmem:[%s6800_s29 + $0x120] sm:$0xf] %v300_v8  ;;  %303 = vst [vmem:[%s6800_s29 + $0x124] sm:$0xf] %v302_v9  ;;  %v304_v10 = vld [vmem:[%s6793_s28 + $0x250] sm:$0xf] }
  0x4a   : > { %v306_v11 = vld [vmem:[%s6793_s28 + $0x258] sm:$0xf]  ;;  %v308_v12 = vld [vmem:[%s6793_s28 + $0x260] sm:$0xf]  ;;  %305 = vst [vmem:[%s6800_s29 + $0x128] sm:$0xf] %v304_v10 }
  0x4b   : > { %307 = vst [vmem:[%s6800_s29 + $0x12c] sm:$0xf] %v306_v11  ;;  %309 = vst [vmem:[%s6800_s29 + $0x130] sm:$0xf] %v308_v12  ;;  %v310_v13 = vld [vmem:[%s6793_s28 + $0x268] sm:$0xf] }
  0x4c   : > { %v312_v14 = vld [vmem:[%s6793_s28 + $0x270] sm:$0xf]  ;;  %v314_v15 = vld [vmem:[%s6793_s28 + $0x278] sm:$0xf]  ;;  %311 = vst [vmem:[%s6800_s29 + $0x134] sm:$0xf] %v310_v13 }
  0x4d   : > { %313 = vst [vmem:[%s6800_s29 + $0x138] sm:$0xf] %v312_v14  ;;  %315 = vst [vmem:[%s6800_s29 + $0x13c] sm:$0xf] %v314_v15  ;;  %v316_v16 = vld [vmem:[%s6793_s28 + $0x280] sm:$0xf] }
  0x4e   : > { %v318_v17 = vld [vmem:[%s6793_s28 + $0x288] sm:$0xf]  ;;  %v320_v18 = vld [vmem:[%s6793_s28 + $0x290] sm:$0xf]  ;;  %317 = vst [vmem:[%s6800_s29 + $0x140] sm:$0xf] %v316_v16 }
  0x4f   : > { %319 = vst [vmem:[%s6800_s29 + $0x144] sm:$0xf] %v318_v17  ;;  %321 = vst [vmem:[%s6800_s29 + $0x148] sm:$0xf] %v320_v18  ;;  %v322_v19 = vld [vmem:[%s6793_s28 + $0x298] sm:$0xf] }
  0x50   : > { %v324_v20 = vld [vmem:[%s6793_s28 + $0x2a0] sm:$0xf]  ;;  %v326_v21 = vld [vmem:[%s6793_s28 + $0x2a8] sm:$0xf]  ;;  %323 = vst [vmem:[%s6800_s29 + $0x14c] sm:$0xf] %v322_v19 }
  0x51   : > { %325 = vst [vmem:[%s6800_s29 + $0x150] sm:$0xf] %v324_v20  ;;  %327 = vst [vmem:[%s6800_s29 + $0x154] sm:$0xf] %v326_v21  ;;  %v328_v22 = vld [vmem:[%s6793_s28 + $0x2b0] sm:$0xf] }
  0x52   : > { %v330_v23 = vld [vmem:[%s6793_s28 + $0x2b8] sm:$0xf]  ;;  %v332_v24 = vld [vmem:[%s6793_s28 + $0x2c0] sm:$0xf]  ;;  %329 = vst [vmem:[%s6800_s29 + $0x158] sm:$0xf] %v328_v22 }
  0x53   : > { %331 = vst [vmem:[%s6800_s29 + $0x15c] sm:$0xf] %v330_v23  ;;  %333 = vst [vmem:[%s6800_s29 + $0x160] sm:$0xf] %v332_v24  ;;  %v334_v25 = vld [vmem:[%s6793_s28 + $0x2c8] sm:$0xf] }
  0x54   : > { %v336_v26 = vld [vmem:[%s6793_s28 + $0x2d0] sm:$0xf]  ;;  %v338_v27 = vld [vmem:[%s6793_s28 + $0x2d8] sm:$0xf]  ;;  %335 = vst [vmem:[%s6800_s29 + $0x164] sm:$0xf] %v334_v25 }
  0x55   : > { %337 = vst [vmem:[%s6800_s29 + $0x168] sm:$0xf] %v336_v26  ;;  %339 = vst [vmem:[%s6800_s29 + $0x16c] sm:$0xf] %v338_v27  ;;  %v340_v28 = vld [vmem:[%s6793_s28 + $0x2e0] sm:$0xf] }
  0x56   : > { %v342_v29 = vld [vmem:[%s6793_s28 + $0x2e8] sm:$0xf]  ;;  %v344_v30 = vld [vmem:[%s6793_s28 + $0x2f0] sm:$0xf]  ;;  %341 = vst [vmem:[%s6800_s29 + $0x170] sm:$0xf] %v340_v28 }
  0x57   : > { %343 = vst [vmem:[%s6800_s29 + $0x174] sm:$0xf] %v342_v29  ;;  %345 = vst [vmem:[%s6800_s29 + $0x178] sm:$0xf] %v344_v30  ;;  %v346_v31 = vld [vmem:[%s6793_s28 + $0x2f8] sm:$0xf] }
  0x58   : > { %v348_v32 = vld [vmem:[%s6793_s28 + $0x300] sm:$0xf]  ;;  %v350_v33 = vld [vmem:[%s6793_s28 + $0x308] sm:$0xf]  ;;  %347 = vst [vmem:[%s6800_s29 + $0x17c] sm:$0xf] %v346_v31 }
  0x59   : > { %349 = vst [vmem:[%s6800_s29 + $0x180] sm:$0xf] %v348_v32  ;;  %351 = vst [vmem:[%s6800_s29 + $0x184] sm:$0xf] %v350_v33  ;;  %v352_v34 = vld [vmem:[%s6793_s28 + $0x310] sm:$0xf] }
  0x5a   : > { %v354_v35 = vld [vmem:[%s6793_s28 + $0x318] sm:$0xf]  ;;  %v356_v36 = vld [vmem:[%s6793_s28 + $0x320] sm:$0xf]  ;;  %353 = vst [vmem:[%s6800_s29 + $0x188] sm:$0xf] %v352_v34 }
  0x5b   : > { %355 = vst [vmem:[%s6800_s29 + $0x18c] sm:$0xf] %v354_v35  ;;  %357 = vst [vmem:[%s6800_s29 + $0x190] sm:$0xf] %v356_v36  ;;  %v358_v37 = vld [vmem:[%s6793_s28 + $0x328] sm:$0xf] }
  0x5c   : > { %v360_v38 = vld [vmem:[%s6793_s28 + $0x330] sm:$0xf]  ;;  %v362_v39 = vld [vmem:[%s6793_s28 + $0x338] sm:$0xf]  ;;  %359 = vst [vmem:[%s6800_s29 + $0x194] sm:$0xf] %v358_v37 }
  0x5d   : > { %361 = vst [vmem:[%s6800_s29 + $0x198] sm:$0xf] %v360_v38  ;;  %363 = vst [vmem:[%s6800_s29 + $0x19c] sm:$0xf] %v362_v39  ;;  %v364_v40 = vld [vmem:[%s6793_s28 + $0x340] sm:$0xf] }
  0x5e   : > { %v366_v41 = vld [vmem:[%s6793_s28 + $0x348] sm:$0xf]  ;;  %v368_v42 = vld [vmem:[%s6793_s28 + $0x350] sm:$0xf]  ;;  %365 = vst [vmem:[%s6800_s29 + $0x1a0] sm:$0xf] %v364_v40 }
  0x5f   : > { %367 = vst [vmem:[%s6800_s29 + $0x1a4] sm:$0xf] %v366_v41  ;;  %369 = vst [vmem:[%s6800_s29 + $0x1a8] sm:$0xf] %v368_v42  ;;  %v370_v43 = vld [vmem:[%s6793_s28 + $0x358] sm:$0xf] }
  0x60   : > { %v372_v44 = vld [vmem:[%s6793_s28 + $0x360] sm:$0xf]  ;;  %v374_v45 = vld [vmem:[%s6793_s28 + $0x368] sm:$0xf]  ;;  %371 = vst [vmem:[%s6800_s29 + $0x1ac] sm:$0xf] %v370_v43 }
  0x61   : > { %373 = vst [vmem:[%s6800_s29 + $0x1b0] sm:$0xf] %v372_v44  ;;  %375 = vst [vmem:[%s6800_s29 + $0x1b4] sm:$0xf] %v374_v45  ;;  %v376_v46 = vld [vmem:[%s6793_s28 + $0x370] sm:$0xf] }
  0x62   : > { %v378_v47 = vld [vmem:[%s6793_s28 + $0x378] sm:$0xf]  ;;  %v380_v48 = vld [vmem:[%s6793_s28 + $0x380] sm:$0xf]  ;;  %377 = vst [vmem:[%s6800_s29 + $0x1b8] sm:$0xf] %v376_v46 }
  0x63   : > { %379 = vst [vmem:[%s6800_s29 + $0x1bc] sm:$0xf] %v378_v47  ;;  %381 = vst [vmem:[%s6800_s29 + $0x1c0] sm:$0xf] %v380_v48  ;;  %v382_v49 = vld [vmem:[%s6793_s28 + $0x388] sm:$0xf] }
  0x64   : > { %v384_v50 = vld [vmem:[%s6793_s28 + $0x390] sm:$0xf]  ;;  %v386_v51 = vld [vmem:[%s6793_s28 + $0x398] sm:$0xf]  ;;  %383 = vst [vmem:[%s6800_s29 + $0x1c4] sm:$0xf] %v382_v49 }
  0x65   : > { %385 = vst [vmem:[%s6800_s29 + $0x1c8] sm:$0xf] %v384_v50  ;;  %387 = vst [vmem:[%s6800_s29 + $0x1cc] sm:$0xf] %v386_v51  ;;  %v388_v52 = vld [vmem:[%s6793_s28 + $0x3a0] sm:$0xf] }
  0x66   : > { %v390_v53 = vld [vmem:[%s6793_s28 + $0x3a8] sm:$0xf]  ;;  %v392_v54 = vld [vmem:[%s6793_s28 + $0x3b0] sm:$0xf]  ;;  %389 = vst [vmem:[%s6800_s29 + $0x1d0] sm:$0xf] %v388_v52 }
  0x67   : > { %391 = vst [vmem:[%s6800_s29 + $0x1d4] sm:$0xf] %v390_v53  ;;  %393 = vst [vmem:[%s6800_s29 + $0x1d8] sm:$0xf] %v392_v54  ;;  %v394_v55 = vld [vmem:[%s6793_s28 + $0x3b8] sm:$0xf] }
  0x68   : > { %v396_v56 = vld [vmem:[%s6793_s28 + $0x3c0] sm:$0xf]  ;;  %v398_v57 = vld [vmem:[%s6793_s28 + $0x3c8] sm:$0xf]  ;;  %395 = vst [vmem:[%s6800_s29 + $0x1dc] sm:$0xf] %v394_v55 }
  0x69   : > { %397 = vst [vmem:[%s6800_s29 + $0x1e0] sm:$0xf] %v396_v56  ;;  %399 = vst [vmem:[%s6800_s29 + $0x1e4] sm:$0xf] %v398_v57  ;;  %v400_v58 = vld [vmem:[%s6793_s28 + $0x3d0] sm:$0xf] }
  0x6a   : > { %v402_v59 = vld [vmem:[%s6793_s28 + $0x3d8] sm:$0xf]  ;;  %v404_v60 = vld [vmem:[%s6793_s28 + $0x3e0] sm:$0xf]  ;;  %401 = vst [vmem:[%s6800_s29 + $0x1e8] sm:$0xf] %v400_v58 }
  0x6b   : > { %403 = vst [vmem:[%s6800_s29 + $0x1ec] sm:$0xf] %v402_v59  ;;  %405 = vst [vmem:[%s6800_s29 + $0x1f0] sm:$0xf] %v404_v60  ;;  %v406_v61 = vld [vmem:[%s6793_s28 + $0x3e8] sm:$0xf] }
  0x6c   : > { %v408_v62 = vld [vmem:[%s6793_s28 + $0x3f0] sm:$0xf]  ;;  %v410_v63 = vld [vmem:[%s6793_s28 + $0x3f8] sm:$0xf]  ;;  %407 = vst [vmem:[%s6800_s29 + $0x1f4] sm:$0xf] %v406_v61 }
  0x6d   : > { %409 = vst [vmem:[%s6800_s29 + $0x1f8] sm:$0xf] %v408_v62  ;;  %411 = vst [vmem:[%s6800_s29 + $0x1fc] sm:$0xf] %v410_v63  ;;  %v412_v0 = vld [vmem:[%s6793_s28 + $0x400] sm:$0xf] }
  0x6e   : > { %v414_v1 = vld [vmem:[%s6793_s28 + $0x408] sm:$0xf]  ;;  %v416_v2 = vld [vmem:[%s6793_s28 + $0x410] sm:$0xf]  ;;  %413 = vst [vmem:[%s6800_s29 + $0x200] sm:$0xf] %v412_v0 }
  0x6f   : > { %415 = vst [vmem:[%s6800_s29 + $0x204] sm:$0xf] %v414_v1  ;;  %417 = vst [vmem:[%s6800_s29 + $0x208] sm:$0xf] %v416_v2  ;;  %v418_v3 = vld [vmem:[%s6793_s28 + $0x418] sm:$0xf] }
  0x70   : > { %v420_v4 = vld [vmem:[%s6793_s28 + $0x420] sm:$0xf]  ;;  %v422_v5 = vld [vmem:[%s6793_s28 + $0x428] sm:$0xf]  ;;  %419 = vst [vmem:[%s6800_s29 + $0x20c] sm:$0xf] %v418_v3 }
  0x71   : > { %421 = vst [vmem:[%s6800_s29 + $0x210] sm:$0xf] %v420_v4  ;;  %423 = vst [vmem:[%s6800_s29 + $0x214] sm:$0xf] %v422_v5  ;;  %v424_v6 = vld [vmem:[%s6793_s28 + $0x430] sm:$0xf] }
  0x72   : > { %v426_v7 = vld [vmem:[%s6793_s28 + $0x438] sm:$0xf]  ;;  %v428_v8 = vld [vmem:[%s6793_s28 + $0x440] sm:$0xf]  ;;  %425 = vst [vmem:[%s6800_s29 + $0x218] sm:$0xf] %v424_v6 }
  0x73   : > { %427 = vst [vmem:[%s6800_s29 + $0x21c] sm:$0xf] %v426_v7  ;;  %429 = vst [vmem:[%s6800_s29 + $0x220] sm:$0xf] %v428_v8  ;;  %v430_v9 = vld [vmem:[%s6793_s28 + $0x448] sm:$0xf] }
  0x74   : > { %v432_v10 = vld [vmem:[%s6793_s28 + $0x450] sm:$0xf]  ;;  %v434_v11 = vld [vmem:[%s6793_s28 + $0x458] sm:$0xf]  ;;  %431 = vst [vmem:[%s6800_s29 + $0x224] sm:$0xf] %v430_v9 }
  0x75   : > { %433 = vst [vmem:[%s6800_s29 + $0x228] sm:$0xf] %v432_v10  ;;  %435 = vst [vmem:[%s6800_s29 + $0x22c] sm:$0xf] %v434_v11  ;;  %v436_v12 = vld [vmem:[%s6793_s28 + $0x460] sm:$0xf] }
  0x76   : > { %v438_v13 = vld [vmem:[%s6793_s28 + $0x468] sm:$0xf]  ;;  %v440_v14 = vld [vmem:[%s6793_s28 + $0x470] sm:$0xf]  ;;  %437 = vst [vmem:[%s6800_s29 + $0x230] sm:$0xf] %v436_v12 }
  0x77   : > { %439 = vst [vmem:[%s6800_s29 + $0x234] sm:$0xf] %v438_v13  ;;  %441 = vst [vmem:[%s6800_s29 + $0x238] sm:$0xf] %v440_v14  ;;  %v442_v15 = vld [vmem:[%s6793_s28 + $0x478] sm:$0xf] }
  0x78   : > { %v444_v16 = vld [vmem:[%s6793_s28 + $0x480] sm:$0xf]  ;;  %v446_v17 = vld [vmem:[%s6793_s28 + $0x488] sm:$0xf]  ;;  %443 = vst [vmem:[%s6800_s29 + $0x23c] sm:$0xf] %v442_v15 }
  0x79   : > { %445 = vst [vmem:[%s6800_s29 + $0x240] sm:$0xf] %v444_v16  ;;  %447 = vst [vmem:[%s6800_s29 + $0x244] sm:$0xf] %v446_v17  ;;  %v448_v18 = vld [vmem:[%s6793_s28 + $0x490] sm:$0xf] }
  0x7a   : > { %v450_v19 = vld [vmem:[%s6793_s28 + $0x498] sm:$0xf]  ;;  %v452_v20 = vld [vmem:[%s6793_s28 + $0x4a0] sm:$0xf]  ;;  %449 = vst [vmem:[%s6800_s29 + $0x248] sm:$0xf] %v448_v18 }
  0x7b   : > { %451 = vst [vmem:[%s6800_s29 + $0x24c] sm:$0xf] %v450_v19  ;;  %453 = vst [vmem:[%s6800_s29 + $0x250] sm:$0xf] %v452_v20  ;;  %v454_v21 = vld [vmem:[%s6793_s28 + $0x4a8] sm:$0xf] }
  0x7c   : > { %v456_v22 = vld [vmem:[%s6793_s28 + $0x4b0] sm:$0xf]  ;;  %v458_v23 = vld [vmem:[%s6793_s28 + $0x4b8] sm:$0xf]  ;;  %455 = vst [vmem:[%s6800_s29 + $0x254] sm:$0xf] %v454_v21 }
  0x7d   : > { %457 = vst [vmem:[%s6800_s29 + $0x258] sm:$0xf] %v456_v22  ;;  %459 = vst [vmem:[%s6800_s29 + $0x25c] sm:$0xf] %v458_v23  ;;  %v460_v24 = vld [vmem:[%s6793_s28 + $0x4c0] sm:$0xf] }
  0x7e   : > { %v462_v25 = vld [vmem:[%s6793_s28 + $0x4c8] sm:$0xf]  ;;  %v464_v26 = vld [vmem:[%s6793_s28 + $0x4d0] sm:$0xf]  ;;  %461 = vst [vmem:[%s6800_s29 + $0x260] sm:$0xf] %v460_v24 }
  0x7f   : > { %463 = vst [vmem:[%s6800_s29 + $0x264] sm:$0xf] %v462_v25  ;;  %465 = vst [vmem:[%s6800_s29 + $0x268] sm:$0xf] %v464_v26  ;;  %v466_v27 = vld [vmem:[%s6793_s28 + $0x4d8] sm:$0xf] }
  0x80   : > { %v468_v28 = vld [vmem:[%s6793_s28 + $0x4e0] sm:$0xf]  ;;  %v470_v29 = vld [vmem:[%s6793_s28 + $0x4e8] sm:$0xf]  ;;  %467 = vst [vmem:[%s6800_s29 + $0x26c] sm:$0xf] %v466_v27 }
  0x81   : > { %469 = vst [vmem:[%s6800_s29 + $0x270] sm:$0xf] %v468_v28  ;;  %471 = vst [vmem:[%s6800_s29 + $0x274] sm:$0xf] %v470_v29  ;;  %v472_v30 = vld [vmem:[%s6793_s28 + $0x4f0] sm:$0xf] }
  0x82   : > { %v474_v31 = vld [vmem:[%s6793_s28 + $0x4f8] sm:$0xf]  ;;  %473 = vst [vmem:[%s6800_s29 + $0x278] sm:$0xf] %v472_v30 }
  0x83   : > { %475 = vst [vmem:[%s6800_s29 + $0x27c] sm:$0xf] %v474_v31 }
  0x84 PF: > { %p5108_p11 = scmp.ge.s32.totalorder %s6709_s14, 1  ;;  %p817_p12 = scmp.lt.s32.totalorder %s6709_s14, 3 }
  0x86   : > { %p818_p13 = pnand %p5108_p11, %p817_p12 }
  0x87   : > { %s7120_s30 = sand.u32 (!%p818_p13), 1, %s6693_s10   ;;  %v6711_v32 = vmov (!%p818_p13), 0   ;;  %v6089_v33 = vld [vmem:[%s8496_s0 + $0x4] ss:$40 sps:$4 sm:$0xff] (!%p818_p13)   ;;  %v6092_v34 = vld [vmem:[%s8496_s0 + $0x14] ss:$40 sps:$4 sm:$0xff] (!%p818_p13)  }
  0x88   : > { %821 = sbr.rel (%p818_p13) target bundleno = 1071 (0x42f), region = 65  ;;  %3420 = vmatprep.subr.bf16.mxu1 (!%p818_p13), %v6711_v32  ;;  %3998 = vmatprep.subr.bf16.mxu0 (!%p818_p13), %v6711_v32  ;;  %v6087_v3 = vld [vmem:[%s8496_s0] ss:$40 sps:$4 sm:$0xff] (!%p818_p13)   ;;  %v6090_v4 = vld [vmem:[%s8496_s0 + $0x10] ss:$40 sps:$4 sm:$0xff] (!%p818_p13)   ;;  %s5109_s27 = sshll.u32 (!%p818_p13), %s7120_s30, 9 }
  0x89   : > { %s5995_s3 = smul.u32 (!%p818_p13), 640, %s7120_s30  ;;  %3452 = vmatprep.mubr.bf16.mxu1 (!%p818_p13), %v6089_v33  ;;  %4030 = vmatprep.mubr.bf16.mxu0 (!%p818_p13), %v6092_v34  ;;  %v6095_v7 = vld [vmem:[%s8496_s0 + $0x54] ss:$40 sps:$4 sm:$0xff] (!%p818_p13)   ;;  %v6097_v8 = vld [vmem:[%s8496_s0 + $0x64] ss:$40 sps:$4 sm:$0xff] (!%p818_p13)   ;;  %s8302_s15 = scalar_lea.vmem (!%p818_p13), [#allocation3], %s5109_s27 }
  0x8a   : > { %v6099_v11 = vld [vmem:[%s8496_s0 + $0x50] ss:$40 sps:$4 sm:$0xff] (!%p818_p13)   ;;  %v6100_v12 = vld [vmem:[%s8496_s0 + $0x60] ss:$40 sps:$4 sm:$0xff] (!%p818_p13)   ;;  %v6102_v13 = vld [vmem:[%s8496_s0 + $0xa4] ss:$40 sps:$4 sm:$0xff] (!%p818_p13)  }
  0x8b   : > { %s7131_s8 = scalar_lea.vmem (!%p818_p13), [#allocation2], %s5995_s3  ;;  %v6104_v14 = vld [vmem:[%s8496_s0 + $0xb4] ss:$40 sps:$4 sm:$0xff] (!%p818_p13)   ;;  %v6106_v18 = vld [vmem:[%s8496_s0 + $0xa0] ss:$40 sps:$4 sm:$0xff] (!%p818_p13)   ;;  %s5511_s5 = sshll.u32 (!%p818_p13), %s6701_s12, 7 }
  0x8c   : > { %v6055_v35 = vld [vmem:[%s7131_s8] sm:$0xff] (!%p818_p13)   ;;  %v6057_v37 = vld [vmem:[%s7131_s8 + $0x8] sm:$0xff] (!%p818_p13)   ;;  %v6059_v39 = vld [vmem:[%s7131_s8 + $0x10] sm:$0xff] (!%p818_p13)   ;;  %s5009_s6 = sshll.u32 (!%p818_p13), %s8302_s15, 4  ;;  %s8443_s16 = scalar_lea.hbm (!%p818_p13), %s8498_s2, %s5511_s5  ;;  %s8445_s6 = int_to_ptr.vmem [resolvable:$true] %s5009_s6 }
  0x8d   : > { %v6056_v36 = vld [vmem:[%s7131_s8 + $0x100] sm:$0xff] (!%p818_p13)   ;;  %3421 = vmatpush1.bf16.msra.mxu1 (!%p818_p13), %v6055_v35  ;;  %v6058_v38 = vld [vmem:[%s7131_s8 + $0x108] sm:$0xff] (!%p818_p13)   ;;  %v6060_v40 = vld [vmem:[%s7131_s8 + $0x110] sm:$0xff] (!%p818_p13)   ;;  %s4994_s12 = scalar_lea.sflag (!%p818_p13), [#allocation4], %s7120_s30  ;;  %s6631_s18 = scalar_lea.vmem (!%p818_p13), %s8445_s6, 8192 }
  0x8e   : > { %3999 = vmatpush1.bf16.msra.mxu0 (!%p818_p13), %v6056_v36  ;;  %3422 = vmatprep.subr.bf16.mxu1 (!%p818_p13), %v6711_v32  ;;  %v6061_v41 = vld [vmem:[%s7131_s8 + $0x18] sm:$0xff] (!%p818_p13)   ;;  %v6063_v43 = vld [vmem:[%s7131_s8 + $0x20] sm:$0xff] (!%p818_p13)   ;;  %v6065_v45 = vld [vmem:[%s7131_s8 + $0x28] sm:$0xff] (!%p818_p13)   ;;  %p6632_p0 = scmp.ne.s32.totalorder (!%p818_p13), %s8445_s6, %s6631_s18  ;;  %s6712_s20 = smov (!%p818_p13), [#allocation3]  }
  0x8f   : > { %4000 = vmatprep.subr.bf16.mxu0 %v6711_v32  ;;  %v6062_v42 = vld [vmem:[%s7131_s8 + $0x118] sm:$0xff]   ;;  %v6064_v44 = vld [vmem:[%s7131_s8 + $0x120] sm:$0xff]   ;;  %v6066_v46 = vld [vmem:[%s7131_s8 + $0x128] sm:$0xff]   ;;  %s6635_s23 = sshll.u32 %s6712_s20, 4  ;;  %s6636_s23 = int_to_ptr.vmem [resolvable:$false] %s6635_s23 }
  0x90   : > { %v6067_v47 = vld [vmem:[%s7131_s8 + $0x30] sm:$0xff]   ;;  %v6069_v49 = vld [vmem:[%s7131_s8 + $0x38] sm:$0xff]   ;;  %v6071_v51 = vld [vmem:[%s7131_s8 + $0x40] sm:$0xff]   ;;  %p6633_p1 = pnand %p6632_p0, %p6770_p5  ;;  %s6637_s24 = scalar_lea.vmem %s6636_s23, 16384 }
  0x91   : > { %3423 = vmatpush1.bf16.msra.mxu1 %v6057_v37  ;;  %v6068_v48 = vld [vmem:[%s7131_s8 + $0x130] sm:$0xff]   ;;  %v6070_v50 = vld [vmem:[%s7131_s8 + $0x138] sm:$0xff]   ;;  %v6072_v52 = vld [vmem:[%s7131_s8 + $0x140] sm:$0xff]   ;;  %p6638_p3 = scmp.lt.s32.totalorder %s8445_s6, %s6636_s23  ;;  %p6639_p4 = scmp.lt.s32.totalorder %s6637_s24, %s6631_s18 }
  0x92   : > { %4001 = vmatpush1.bf16.msra.mxu0 %v6058_v38  ;;  %3424 = vmatprep.subr.bf16.mxu1 %v6711_v32  ;;  %v6073_v53 = vld [vmem:[%s7131_s8 + $0x48] sm:$0xff]   ;;  %v6075_v55 = vld [vmem:[%s7131_s8 + $0x50] sm:$0xff]   ;;  %v6077_v57 = vld [vmem:[%s7131_s8 + $0x58] sm:$0xff]   ;;  %p6634_p2 = pneg %p6633_p1 }
  0x93   : > { %4002 = vmatprep.subr.bf16.mxu0 %v6711_v32  ;;  %v6074_v54 = vld [vmem:[%s7131_s8 + $0x148] sm:$0xff]   ;;  %v6076_v56 = vld [vmem:[%s7131_s8 + $0x150] sm:$0xff]   ;;  %v6078_v58 = vld [vmem:[%s7131_s8 + $0x158] sm:$0xff]   ;;  %p6640_p6 = por %p6639_p4, %p6638_p3 }
  0x94   : > { %v6079_v59 = vld [vmem:[%s7131_s8 + $0x60] sm:$0xff]   ;;  %v6081_v61 = vld [vmem:[%s7131_s8 + $0x68] sm:$0xff]   ;;  %v6083_v63 = vld [vmem:[%s7131_s8 + $0x70] sm:$0xff]  }
  0x95   : > { %3425 = vmatpush1.bf16.msra.mxu1 %v6059_v39  ;;  %v6080_v60 = vld [vmem:[%s7131_s8 + $0x160] sm:$0xff]   ;;  %v6082_v62 = vld [vmem:[%s7131_s8 + $0x168] sm:$0xff]   ;;  %v6084_v0 = vld [vmem:[%s7131_s8 + $0x170] sm:$0xff]   ;;  %p6641_p7 = pnand %p6640_p6, %p6634_p2 }
  0x96   : > { %4003 = vmatpush1.bf16.msra.mxu0 %v6060_v40  ;;  %3426 = vmatprep.subr.bf16.mxu1 %v6711_v32  ;;  %v6085_v1 = vld [vmem:[%s7131_s8 + $0x78] sm:$0xff]   ;;  %v6093_v5 = vld [vmem:[%s7131_s8 + $0x80] sm:$0xff]   ;;  %v6108_v9 = vld [vmem:[%s7131_s8 + $0x88] sm:$0xff]  }
  0x97   : > { %4004 = vmatprep.subr.bf16.mxu0 %v6711_v32  ;;  %v6086_v2 = vld [vmem:[%s7131_s8 + $0x178] sm:$0xff]   ;;  %v6094_v6 = vld [vmem:[%s7131_s8 + $0x180] sm:$0xff]   ;;  %v6101_v10 = vld [vmem:[%s7131_s8 + $0x188] sm:$0xff]  }
  0x98   : > { %v6109_v15 = vld [vmem:[%s7131_s8 + $0x190] sm:$0xff]   ;;  %v6116_v17 = vld [vmem:[%s7131_s8 + $0x198] sm:$0xff]   ;;  %v6112_v22 = vld [vmem:[%s8496_s0 + $0x104] ss:$40 sps:$4 sm:$0xff]  }
  0x99   : > { %3427 = vmatpush1.bf16.msra.mxu1 %v6061_v41  ;;  %v6123_v16 = vld [vmem:[%s7131_s8 + $0x90] sm:$0xff]   ;;  %v6138_v20 = vld [vmem:[%s7131_s8 + $0x98] sm:$0xff]   ;;  %v6124_v23 = vld [vmem:[%s7131_s8 + $0x1a0] sm:$0xff]  }
  0x9a   : > { %4005 = vmatpush1.bf16.msra.mxu0 %v6062_v42  ;;  %3428 = vmatprep.subr.bf16.mxu1 %v6711_v32  ;;  %v6107_v19 = vld [vmem:[%s8496_s0 + $0xb0] ss:$40 sps:$4 sm:$0xff]   ;;  %v6110_v21 = vld [vmem:[%s8496_s0 + $0xf4] ss:$40 sps:$4 sm:$0xff]   ;;  %v6153_v24 = vld [vmem:[%s7131_s8 + $0xa0] sm:$0xff]  }
  0x9b   : > { %4006 = vmatprep.subr.bf16.mxu0 %v6711_v32  ;;  %v6114_v25 = vld [vmem:[%s8496_s0 + $0xf0] ss:$40 sps:$4 sm:$0xff]   ;;  %v6131_v26 = vld [vmem:[%s7131_s8 + $0x1a8] sm:$0xff]   ;;  %v6119_v30 = vld [vmem:[%s8496_s0 + $0x154] ss:$40 sps:$4 sm:$0xff]  }
  0x9c   : > { %v6115_v27 = vld [vmem:[%s8496_s0 + $0x100] ss:$40 sps:$4 sm:$0xff]   ;;  %v6117_v29 = vld [vmem:[%s8496_s0 + $0x144] ss:$40 sps:$4 sm:$0xff]   ;;  %v6139_v31 = vld [vmem:[%s7131_s8 + $0x1b0] sm:$0xff]  }
  0x9d   : > { %3429 = vmatpush1.bf16.msra.mxu1 %v6063_v43  ;;  %v6168_v28 = vld [vmem:[%s7131_s8 + $0xa8] sm:$0xff]   ;;  %v6183_v33 = vld [vmem:[%s7131_s8 + $0xb0] sm:$0xff]   ;;  %v6146_v35 = vld [vmem:[%s7131_s8 + $0x1b8] sm:$0xff]  }
  0x9e   : > { %4007 = vmatpush1.bf16.msra.mxu0 %v6064_v44  ;;  %3430 = vmatprep.subr.bf16.mxu1 %v6711_v32  ;;  %v6121_v34 = vld [vmem:[%s8496_s0 + $0x140] ss:$40 sps:$4 sm:$0xff]   ;;  %v6198_v36 = vld [vmem:[%s7131_s8 + $0xb8] sm:$0xff]   ;;  %v6127_v39 = vld [vmem:[%s8496_s0 + $0x1a4] ss:$40 sps:$4 sm:$0xff]  }
  0x9f   : > { %4008 = vmatprep.subr.bf16.mxu0 %v6711_v32  ;;  %v6122_v37 = vld [vmem:[%s8496_s0 + $0x150] ss:$40 sps:$4 sm:$0xff]   ;;  %v6125_v38 = vld [vmem:[%s8496_s0 + $0x194] ss:$40 sps:$4 sm:$0xff]   ;;  %v6154_v40 = vld [vmem:[%s7131_s8 + $0x1c0] sm:$0xff]  }
  0xa0   : > { %v6213_v41 = vld [vmem:[%s7131_s8 + $0xc0] sm:$0xff]   ;;  %v6161_v42 = vld [vmem:[%s7131_s8 + $0x1c8] sm:$0xff]   ;;  %v6129_v43 = vld [vmem:[%s8496_s0 + $0x190] ss:$40 sps:$4 sm:$0xff]  }
  0xa1   : > { %3431 = vmatpush1.bf16.msra.mxu1 %v6065_v45  ;;  %v6130_v44 = vld [vmem:[%s8496_s0 + $0x1a0] ss:$40 sps:$4 sm:$0xff]   ;;  %v6132_v45 = vld [vmem:[%s8496_s0 + $0x1e4] ss:$40 sps:$4 sm:$0xff]  }
  0xa2   : > { %4009 = vmatpush1.bf16.msra.mxu0 %v6066_v46  ;;  %3432 = vmatprep.subr.bf16.mxu1 %v6711_v32  ;;  %v6134_v46 = vld [vmem:[%s8496_s0 + $0x1f4] ss:$40 sps:$4 sm:$0xff]  }
  0xa3   : > { %4010 = vmatprep.subr.bf16.mxu0 %v6711_v32 }
  0xa5   : > { %3433 = vmatpush1.bf16.msra.mxu1 %v6067_v47  ;;  %v6169_v47 = vld [vmem:[%s7131_s8 + $0x1d0] sm:$0xff]  }
  0xa6   : > { %4011 = vmatpush1.bf16.msra.mxu0 %v6068_v48  ;;  %3434 = vmatprep.subr.bf16.mxu1 %v6711_v32  ;;  %v6227_v48 = vld [vmem:[%s7131_s8 + $0xc8] sm:$0xff]  }
  0xa7   : > { %4012 = vmatprep.subr.bf16.mxu0 %v6711_v32 }
  0xa9   : > { %3435 = vmatpush1.bf16.msra.mxu1 %v6069_v49  ;;  %v6176_v49 = vld [vmem:[%s7131_s8 + $0x1d8] sm:$0xff]  }
  0xaa   : > { %4013 = vmatpush1.bf16.msra.mxu0 %v6070_v50  ;;  %3436 = vmatprep.subr.bf16.mxu1 %v6711_v32  ;;  %v6136_v50 = vld [vmem:[%s8496_s0 + $0x1e0] ss:$40 sps:$4 sm:$0xff]  }
  0xab   : > { %4014 = vmatprep.subr.bf16.mxu0 %v6711_v32 }
  0xad   : > { %3437 = vmatpush1.bf16.msra.mxu1 %v6071_v51  ;;  %v6137_v51 = vld [vmem:[%s8496_s0 + $0x1f0] ss:$40 sps:$4 sm:$0xff]  }
  0xae   : > { %4015 = vmatpush1.bf16.msra.mxu0 %v6072_v52  ;;  %3438 = vmatprep.subr.bf16.mxu1 %v6711_v32  ;;  %v6140_v52 = vld [vmem:[%s8496_s0 + $0x234] ss:$40 sps:$4 sm:$0xff]  }
  0xaf   : > { %4016 = vmatprep.subr.bf16.mxu0 %v6711_v32 }
  0xb1   : > { %3439 = vmatpush1.bf16.msra.mxu1 %v6073_v53  ;;  %v6142_v53 = vld [vmem:[%s8496_s0 + $0x244] ss:$40 sps:$4 sm:$0xff]  }
  0xb2   : > { %4017 = vmatpush1.bf16.msra.mxu0 %v6074_v54  ;;  %3440 = vmatprep.subr.bf16.mxu1 %v6711_v32  ;;  %v6184_v54 = vld [vmem:[%s7131_s8 + $0x1e0] sm:$0xff]  }
  0xb3   : > { %4018 = vmatprep.subr.bf16.mxu0 %v6711_v32 }
  0xb5   : > { %3441 = vmatpush1.bf16.msra.mxu1 %v6075_v55  ;;  %v6241_v55 = vld [vmem:[%s7131_s8 + $0xd0] sm:$0xff]  }
  0xb6   : > { %4019 = vmatpush1.bf16.msra.mxu0 %v6076_v56  ;;  %3442 = vmatprep.subr.bf16.mxu1 %v6711_v32  ;;  %v6191_v56 = vld [vmem:[%s7131_s8 + $0x1e8] sm:$0xff]  }
  0xb7   : > { %4020 = vmatprep.subr.bf16.mxu0 %v6711_v32 }
  0xb9   : > { %3443 = vmatpush1.bf16.msra.mxu1 %v6077_v57  ;;  %v6144_v57 = vld [vmem:[%s8496_s0 + $0x230] ss:$40 sps:$4 sm:$0xff]  }
  0xba   : > { %4021 = vmatpush1.bf16.msra.mxu0 %v6078_v58  ;;  %3444 = vmatprep.subr.bf16.mxu1 %v6711_v32  ;;  %v6145_v58 = vld [vmem:[%s8496_s0 + $0x240] ss:$40 sps:$4 sm:$0xff]  }
  0xbb   : > { %4022 = vmatprep.subr.bf16.mxu0 %v6711_v32 }
  0xbd   : > { %3445 = vmatpush1.bf16.msra.mxu1 %v6079_v59  ;;  %v6147_v59 = vld [vmem:[%s8496_s0 + $0x284] ss:$40 sps:$4 sm:$0xff]  }
  0xbe   : > { %4023 = vmatpush1.bf16.msra.mxu0 %v6080_v60  ;;  %3446 = vmatprep.subr.bf16.mxu1 %v6711_v32  ;;  %v6149_v60 = vld [vmem:[%s8496_s0 + $0x294] ss:$40 sps:$4 sm:$0xff]  }
  0xbf   : > { %4024 = vmatprep.subr.bf16.mxu0 %v6711_v32 }
  0xc1   : > { %3447 = vmatpush1.bf16.msra.mxu1 %v6081_v61  ;;  %v6199_v61 = vld [vmem:[%s7131_s8 + $0x1f0] sm:$0xff]  }
  0xc2   : > { %4025 = vmatpush1.bf16.msra.mxu0 %v6082_v62  ;;  %3448 = vmatprep.subr.bf16.mxu1 %v6711_v32  ;;  %v6255_v62 = vld [vmem:[%s7131_s8 + $0xd8] sm:$0xff]  }
  0xc3   : > { %4026 = vmatprep.subr.bf16.mxu0 %v6711_v32 }
  0xc5   : > { %3449 = vmatpush1.bf16.msra.mxu1 %v6083_v63  ;;  %v6151_v63 = vld [vmem:[%s8496_s0 + $0x280] ss:$40 sps:$4 sm:$0xff]  }
  0xc6   : > { %4027 = vmatpush1.bf16.msra.mxu0 %v6084_v0  ;;  %3450 = vmatprep.subr.bf16.mxu1 %v6711_v32  ;;  %v6206_v0 = vld [vmem:[%s7131_s8 + $0x1f8] sm:$0xff]  }
  0xc7   : > { %4028 = vmatprep.subr.bf16.mxu0 %v6711_v32 }
  0xc9   : > { %3451 = vmatpush1.bf16.msra.mxu1 %v6085_v1  ;;  %v6152_v1 = vld [vmem:[%s8496_s0 + $0x290] ss:$40 sps:$4 sm:$0xff]  }
  0xca   : > { %4029 = vmatpush1.bf16.msra.mxu0 %v6086_v2  ;;  %3709 = vmatprep.subr.bf16.mxu1 %v6711_v32  ;;  %v6155_v2 = vld [vmem:[%s8496_s0 + $0x2d4] ss:$40 sps:$4 sm:$0xff]  }
  0xcb   : > { %4287 = vmatprep.subr.bf16.mxu0 %v6711_v32 }
  0xcc   : > { %3453 = vmatmul.mubr.bf16.vlgmr.msra.gmra.mrb[0].mxu1 %v6087_v3  ;;  %v6157_v3 = vld [vmem:[%s8496_s0 + $0x2e4] ss:$40 sps:$4 sm:$0xff]  }
  0xcd   : > { %4031 = vmatmul.mubr.bf16.vlgmr.msra.gmra.mrb[0].mxu0 %v6090_v4  ;;  %3710 = vmatpush1.bf16.msra.mxu1 %v6093_v5  ;;  %v6269_v4 = vld [vmem:[%s7131_s8 + $0xe0] sm:$0xff]   ;;  %v6159_v5 = vld [vmem:[%s8496_s0 + $0x2d0] ss:$40 sps:$4 sm:$0xff]  }
  0xce   : > { %4288 = vmatpush1.bf16.msra.mxu0 %v6094_v6  ;;  %3460 = vmatprep.mubr.bf16.mxu1 %v6095_v7  ;;  %v6160_v6 = vld [vmem:[%s8496_s0 + $0x2e0] ss:$40 sps:$4 sm:$0xff]   ;;  %v6162_v7 = vld [vmem:[%s8496_s0 + $0x324] ss:$40 sps:$4 sm:$0xff]  }
  0xcf   : > { %4038 = vmatprep.mubr.bf16.mxu0 %v6097_v8  ;;  %4289 = vmatprep.subr.bf16.mxu0 %v6711_v32  ;;  %v6164_v8 = vld [vmem:[%s8496_s0 + $0x334] ss:$40 sps:$4 sm:$0xff]  }
  0xd0   : > { %3711 = vmatprep.subr.bf16.mxu1 %v6711_v32 }
  0xd1   : > { %3712 = vmatpush1.bf16.msra.mxu1 %v6108_v9  ;;  %v6166_v9 = vld [vmem:[%s8496_s0 + $0x320] ss:$40 sps:$4 sm:$0xff]  }
  0xd2   : > { %4290 = vmatpush1.bf16.msra.mxu0 %v6101_v10  ;;  %3713 = vmatprep.subr.bf16.mxu1 %v6711_v32  ;;  %v6167_v10 = vld [vmem:[%s8496_s0 + $0x330] ss:$40 sps:$4 sm:$0xff]  }
  0xd3   : > { %4291 = vmatprep.subr.bf16.mxu0 %v6711_v32 }
  0xd4   : > { %3461 = vmatmul.mubr.bf16.gmra.mrb[4].mxu1 %v6099_v11  ;;  %v6170_v11 = vld [vmem:[%s8496_s0 + $0x374] ss:$40 sps:$4 sm:$0xff]  }
  0xd5   : > { %4039 = vmatmul.mubr.bf16.gmra.mrb[4].mxu0 %v6100_v12  ;;  %3468 = vmatprep.mubr.bf16.mxu1 %v6102_v13  ;;  %v6172_v12 = vld [vmem:[%s8496_s0 + $0x384] ss:$40 sps:$4 sm:$0xff]  }
  0xd6   : > { %4046 = vmatprep.mubr.bf16.mxu0 %v6104_v14  ;;  %4292 = vmatpush1.bf16.msra.mxu0 %v6109_v15  ;;  %v6283_v13 = vld [vmem:[%s7131_s8 + $0xe8] sm:$0xff]   ;;  %v6174_v14 = vld [vmem:[%s8496_s0 + $0x370] ss:$40 sps:$4 sm:$0xff]  }
  0xd7   : > { %4293 = vmatprep.subr.bf16.mxu0 %v6711_v32  ;;  %3714 = vmatpush1.bf16.msra.mxu1 %v6123_v16  ;;  %v6175_v15 = vld [vmem:[%s8496_s0 + $0x380] ss:$40 sps:$4 sm:$0xff]   ;;  %v6177_v16 = vld [vmem:[%s8496_s0 + $0x3c4] ss:$40 sps:$4 sm:$0xff]  }
  0xd8   : > { %3715 = vmatprep.subr.bf16.mxu1 %v6711_v32 }
  0xda   : > { %4294 = vmatpush1.bf16.msra.mxu0 %v6116_v17  ;;  %v6179_v17 = vld [vmem:[%s8496_s0 + $0x3d4] ss:$40 sps:$4 sm:$0xff]  }
  0xdb   : > { %4295 = vmatprep.subr.bf16.mxu0 %v6711_v32  ;;  %3716 = vmatpush1.bf16.msra.mxu1 %v6138_v20  ;;  %v6185_v20 = vld [vmem:[%s8496_s0 + $0x414] ss:$40 sps:$4 sm:$0xff]  }
  0xdc   : > { %3469 = vmatmul.mubr.bf16.gmra.mrb[8].mxu1 %v6106_v18  ;;  %3717 = vmatprep.subr.bf16.mxu1 %v6711_v32  ;;  %v6181_v18 = vld [vmem:[%s8496_s0 + $0x3c0] ss:$40 sps:$4 sm:$0xff]  }
  0xdd   : > { %4047 = vmatmul.mubr.bf16.gmra.mrb[8].mxu0 %v6107_v19  ;;  %3476 = vmatprep.mubr.bf16.mxu1 %v6110_v21  ;;  %v6182_v19 = vld [vmem:[%s8496_s0 + $0x3d0] ss:$40 sps:$4 sm:$0xff]   ;;  %v6187_v21 = vld [vmem:[%s8496_s0 + $0x424] ss:$40 sps:$4 sm:$0xff]  }
  0xde   : > { %4054 = vmatprep.mubr.bf16.mxu0 %v6112_v22  ;;  %4296 = vmatpush1.bf16.msra.mxu0 %v6124_v23  ;;  %v6297_v22 = vld [vmem:[%s7131_s8 + $0xf0] sm:$0xff]  }
  0xdf   : > { %4297 = vmatprep.subr.bf16.mxu0 %v6711_v32  ;;  %3718 = vmatpush1.bf16.msra.mxu1 %v6153_v24  ;;  %v6189_v23 = vld [vmem:[%s8496_s0 + $0x410] ss:$40 sps:$4 sm:$0xff]   ;;  %v6190_v24 = vld [vmem:[%s8496_s0 + $0x420] ss:$40 sps:$4 sm:$0xff]  }
  0xe0   : > { %3719 = vmatprep.subr.bf16.mxu1 %v6711_v32 }
  0xe2   : > { %4298 = vmatpush1.bf16.msra.mxu0 %v6131_v26  ;;  %v6194_v26 = vld [vmem:[%s8496_s0 + $0x474] ss:$40 sps:$4 sm:$0xff]  }
  0xe3   : > { %4299 = vmatprep.subr.bf16.mxu0 %v6711_v32  ;;  %3720 = vmatpush1.bf16.msra.mxu1 %v6168_v28  ;;  %v6197_v28 = vld [vmem:[%s8496_s0 + $0x470] ss:$40 sps:$4 sm:$0xff]  }
  0xe4   : > { %3477 = vmatmul.mubr.bf16.gmra.mrb[12].mxu1 %v6114_v25  ;;  %3721 = vmatprep.subr.bf16.mxu1 %v6711_v32  ;;  %v6192_v25 = vld [vmem:[%s8496_s0 + $0x464] ss:$40 sps:$4 sm:$0xff]  }
  0xe5   : > { %4055 = vmatmul.mubr.bf16.gmra.mrb[12].mxu0 %v6115_v27  ;;  %3484 = vmatprep.mubr.bf16.mxu1 %v6117_v29  ;;  %v6196_v27 = vld [vmem:[%s8496_s0 + $0x460] ss:$40 sps:$4 sm:$0xff]   ;;  %v6200_v29 = vld [vmem:[%s8496_s0 + $0x4b4] ss:$40 sps:$4 sm:$0xff]  }
  0xe6   : > { %4062 = vmatprep.mubr.bf16.mxu0 %v6119_v30  ;;  %4300 = vmatpush1.bf16.msra.mxu0 %v6139_v31  ;;  %v6202_v30 = vld [vmem:[%s8496_s0 + $0x4c4] ss:$40 sps:$4 sm:$0xff]   ;;  %v6311_v31 = vld [vmem:[%s7131_s8 + $0xf8] sm:$0xff]  }
  0xe7   : > { %4301 = vmatprep.subr.bf16.mxu0 %v6711_v32  ;;  %3722 = vmatpush1.bf16.msra.mxu1 %v6183_v33  ;;  %v6204_v33 = vld [vmem:[%s8496_s0 + $0x4b0] ss:$40 sps:$4 sm:$0xff]  }
  0xe8   : > { %3723 = vmatprep.subr.bf16.mxu1 %v6711_v32 }
  0xea   : > { %4302 = vmatpush1.bf16.msra.mxu0 %v6146_v35  ;;  %v6207_v35 = vld [vmem:[%s8496_s0 + $0x504] ss:$40 sps:$4 sm:$0xff]  }
  0xeb   : > { %4303 = vmatprep.subr.bf16.mxu0 %v6711_v32  ;;  %3724 = vmatpush1.bf16.msra.mxu1 %v6198_v36  ;;  %v6211_v36 = vld [vmem:[%s8496_s0 + $0x1c] ss:$40 sps:$4 sm:$0xff]  }
  0xec   : > { %3485 = vmatmul.mubr.bf16.gmra.mrb[16].mxu1 %v6121_v34  ;;  %3725 = vmatprep.subr.bf16.mxu1 %v6711_v32  ;;  %v6205_v34 = vld [vmem:[%s8496_s0 + $0x4c0] ss:$40 sps:$4 sm:$0xff]  }
  0xed   : > { %4063 = vmatmul.mubr.bf16.gmra.mrb[16].mxu0 %v6122_v37  ;;  %3492 = vmatprep.mubr.bf16.mxu1 %v6125_v38  ;;  %v6212_v37 = vld [vmem:[%s8496_s0 + $0x500] ss:$40 sps:$4 sm:$0xff]  }
  0xee   : > { %4070 = vmatprep.mubr.bf16.mxu0 %v6127_v39  ;;  %4304 = vmatpush1.bf16.msra.mxu0 %v6154_v40  ;;  %v6209_v38 = vld [vmem:[%s8496_s0 + $0x18] ss:$40 sps:$4 sm:$0xff]   ;;  %v6215_v39 = vld [vmem:[%s8496_s0 + $0x554] ss:$40 sps:$4 sm:$0xff]  }
  0xef   : > { %4305 = vmatprep.subr.bf16.mxu0 %v6711_v32  ;;  %3726 = vmatpush1.bf16.msra.mxu1 %v6213_v41  ;;  %v6214_v40 = vld [vmem:[%s7131_s8 + $0x200] sm:$0xff]   ;;  %v6217_v41 = vld [vmem:[%s8496_s0 + $0x6c] ss:$40 sps:$4 sm:$0xff]  }
  0xf0   : > { %3727 = vmatprep.subr.bf16.mxu1 %v6711_v32 }
  0xf2   : > { %4306 = vmatpush1.bf16.msra.mxu0 %v6161_v42  ;;  %v6219_v42 = vld [vmem:[%s8496_s0 + $0x550] ss:$40 sps:$4 sm:$0xff]  }
  0xf3   : > { %4307 = vmatprep.subr.bf16.mxu0 %v6711_v32  ;;  %3728 = vmatpush1.bf16.msra.mxu1 %v6227_v48  ;;  %v6225_v48 = vld [vmem:[%s8496_s0 + $0x5a0] ss:$40 sps:$4 sm:$0xff]  }
  0xf4   : > { %3493 = vmatmul.mubr.bf16.gmra.mrb[20].mxu1 %v6129_v43  ;;  %3729 = vmatprep.subr.bf16.mxu1 %v6711_v32  ;;  %v6228_v43 = vld [vmem:[%s7131_s8 + $0x208] sm:$0xff]  }
  0xf5   : > { %4071 = vmatmul.mubr.bf16.gmra.mrb[20].mxu0 %v6130_v44  ;;  %3500 = vmatprep.mubr.bf16.mxu1 %v6132_v45  ;;  %v6220_v44 = vld [vmem:[%s8496_s0 + $0x68] ss:$40 sps:$4 sm:$0xff]   ;;  %v6221_v45 = vld [vmem:[%s8496_s0 + $0x5a4] ss:$40 sps:$4 sm:$0xff]  }
  0xf6   : > { %4078 = vmatprep.mubr.bf16.mxu0 %v6134_v46  ;;  %4308 = vmatpush1.bf16.msra.mxu0 %v6169_v47  ;;  %v6223_v46 = vld [vmem:[%s8496_s0 + $0xbc] ss:$40 sps:$4 sm:$0xff]   ;;  %v6242_v47 = vld [vmem:[%s7131_s8 + $0x210] sm:$0xff]  }
  0xf7   : > { %4309 = vmatprep.subr.bf16.mxu0 %v6711_v32  ;;  %3730 = vmatpush1.bf16.msra.mxu1 %v6241_v55  ;;  %v6284_v55 = vld [vmem:[%s7131_s8 + $0x228] sm:$0xff]  }
  0xf8   : > { %3731 = vmatprep.subr.bf16.mxu1 %v6711_v32 }
  0xfa   : > { %4310 = vmatpush1.bf16.msra.mxu0 %v6176_v49  ;;  %v6256_v49 = vld [vmem:[%s7131_s8 + $0x218] sm:$0xff]  }
  0xfb   : > { %4311 = vmatprep.subr.bf16.mxu0 %v6711_v32  ;;  %3732 = vmatpush1.bf16.msra.mxu1 %v6255_v62  ;;  %v6240_v62 = vld [vmem:[%s8496_s0 + $0x158] ss:$40 sps:$4 sm:$0xff]  }
  0xfc   : > { %3501 = vmatmul.mubr.bf16.gmra.mrb[24].mxu1 %v6136_v50  ;;  %3733 = vmatprep.subr.bf16.mxu1 %v6711_v32  ;;  %v6226_v50 = vld [vmem:[%s8496_s0 + $0xb8] ss:$40 sps:$4 sm:$0xff]  }
  0xfd   : > { %4079 = vmatmul.mubr.bf16.gmra.mrb[24].mxu0 %v6137_v51  ;;  %3508 = vmatprep.mubr.bf16.mxu1 %v6140_v52  ;;  %v6229_v51 = vld [vmem:[%s8496_s0 + $0x5f4] ss:$40 sps:$4 sm:$0xff]  }
  0xfe   : > { %4086 = vmatprep.mubr.bf16.mxu0 %v6142_v53  ;;  %4312 = vmatpush1.bf16.msra.mxu0 %v6184_v54  ;;  %v6231_v52 = vld [vmem:[%s8496_s0 + $0x10c] ss:$40 sps:$4 sm:$0xff]   ;;  %v6270_v53 = vld [vmem:[%s7131_s8 + $0x220] sm:$0xff]   ;;  %v6233_v54 = vld [vmem:[%s8496_s0 + $0x5f0] ss:$40 sps:$4 sm:$0xff]  }
  0xff   : > { %4313 = vmatprep.subr.bf16.mxu0 %v6711_v32  ;;  %3734 = vmatpush1.bf16.msra.mxu1 %v6269_v4  ;;  %v6248_v4 = vld [vmem:[%s8496_s0 + $0x1a8] ss:$40 sps:$4 sm:$0xff]  }
 0x100   : > { %3735 = vmatprep.subr.bf16.mxu1 %v6711_v32 }
 0x102   : > { %4314 = vmatpush1.bf16.msra.mxu0 %v6191_v56  ;;  %v6234_v56 = vld [vmem:[%s8496_s0 + $0x108] ss:$40 sps:$4 sm:$0xff]  }
 0x103   : > { %4315 = vmatprep.subr.bf16.mxu0 %v6711_v32  ;;  %3736 = vmatpush1.bf16.msra.mxu1 %v6283_v13  ;;  %v6261_v13 = vld [vmem:[%s8496_s0 + $0x730] ss:$40 sps:$4 sm:$0xff]  }
 0x104   : > { %3509 = vmatmul.mubr.bf16.gmra.mrb[28].mxu1 %v6144_v57  ;;  %3737 = vmatprep.subr.bf16.mxu1 %v6711_v32  ;;  %v6235_v57 = vld [vmem:[%s8496_s0 + $0x644] ss:$40 sps:$4 sm:$0xff]  }
 0x105   : > { %4087 = vmatmul.mubr.bf16.gmra.mrb[28].mxu0 %v6145_v58  ;;  %3516 = vmatprep.mubr.bf16.mxu1 %v6147_v59  ;;  %v6237_v58 = vld [vmem:[%s8496_s0 + $0x15c] ss:$40 sps:$4 sm:$0xff]   ;;  %v6298_v59 = vld [vmem:[%s7131_s8 + $0x230] sm:$0xff]  }
 0x106   : > { %4094 = vmatprep.mubr.bf16.mxu0 %v6149_v60  ;;  %4316 = vmatpush1.bf16.msra.mxu0 %v6199_v61  ;;  %v6239_v60 = vld [vmem:[%s8496_s0 + $0x640] ss:$40 sps:$4 sm:$0xff]   ;;  %v6312_v61 = vld [vmem:[%s7131_s8 + $0x238] sm:$0xff]  }
 0x107   : > { %4317 = vmatprep.subr.bf16.mxu0 %v6711_v32  ;;  %3738 = vmatpush1.bf16.msra.mxu1 %v6297_v22  ;;  %v6275_v22 = vld [vmem:[%s8496_s0 + $0x7d0] ss:$40 sps:$4 sm:$0xff]  }
 0x108   : > { %3739 = vmatprep.subr.bf16.mxu1 %v6711_v32 }
 0x10a   : > { %4318 = vmatpush1.bf16.msra.mxu0 %v6206_v0  ;;  %v6245_v0 = vld [vmem:[%s8496_s0 + $0x1ac] ss:$40 sps:$4 sm:$0xff]  }
 0x10b   : > { %4576 = vmatprep.subr.bf16.mxu0 %v6711_v32  ;;  %3740 = vmatpush1.bf16.msra.mxu1 %v6311_v31  ;;  %v6289_v31 = vld [vmem:[%s8496_s0 + $0x870] ss:$40 sps:$4 sm:$0xff]  }
 0x10c   : > { %3517 = vmatmul.mubr.bf16.gmra.mrb[32].mxu1 %v6151_v63  ;;  %5514 = vmatprep.subr.bf16.mxu1 %v6711_v32  ;;  %v6243_v63 = vld [vmem:[%s8496_s0 + $0x694] ss:$40 sps:$4 sm:$0xff]  }
 0x10d   : > { %4095 = vmatmul.mubr.bf16.gmra.mrb[32].mxu0 %v6152_v1  ;;  %3524 = vmatprep.mubr.bf16.mxu1 %v6155_v2  ;;  %v6325_v1 = vld [vmem:[%s7131_s8 + $0x240] sm:$0xff]   ;;  %v6247_v2 = vld [vmem:[%s8496_s0 + $0x690] ss:$40 sps:$4 sm:$0xff]  }
 0x10e   : > { %4102 = vmatprep.mubr.bf16.mxu0 %v6157_v3  ;;  %v6338_v3 = vld [vmem:[%s7131_s8 + $0x248] sm:$0xff]  }
 0x114   : > { %3525 = vmatmul.mubr.bf16.gmra.mrb[36].mxu1 %v6159_v5  ;;  %v6249_v5 = vld [vmem:[%s8496_s0 + $0x6e4] ss:$40 sps:$4 sm:$0xff]  }
 0x115   : > { %4103 = vmatmul.mubr.bf16.gmra.mrb[36].mxu0 %v6160_v6  ;;  %3532 = vmatprep.mubr.bf16.mxu1 %v6162_v7  ;;  %v6251_v6 = vld [vmem:[%s8496_s0 + $0x1fc] ss:$40 sps:$4 sm:$0xff]   ;;  %v6351_v7 = vld [vmem:[%s7131_s8 + $0x250] sm:$0xff]  }
 0x116   : > { %4110 = vmatprep.mubr.bf16.mxu0 %v6164_v8  ;;  %v6253_v8 = vld [vmem:[%s8496_s0 + $0x6e0] ss:$40 sps:$4 sm:$0xff]  }
 0x11c   : > { %3533 = vmatmul.mubr.bf16.gmra.mrb[40].mxu1 %v6166_v9  ;;  %v6254_v9 = vld [vmem:[%s8496_s0 + $0x1f8] ss:$40 sps:$4 sm:$0xff]  }
 0x11d   : > { %4111 = vmatmul.mubr.bf16.gmra.mrb[40].mxu0 %v6167_v10  ;;  %3540 = vmatprep.mubr.bf16.mxu1 %v6170_v11  ;;  %v6257_v10 = vld [vmem:[%s8496_s0 + $0x734] ss:$40 sps:$4 sm:$0xff]  }
 0x11e   : > { %4118 = vmatprep.mubr.bf16.mxu0 %v6172_v12  ;;  %v6259_v11 = vld [vmem:[%s8496_s0 + $0x24c] ss:$40 sps:$4 sm:$0xff]   ;;  %v6364_v12 = vld [vmem:[%s7131_s8 + $0x258] sm:$0xff]  }
 0x124   : > { %3541 = vmatmul.mubr.bf16.gmra.mrb[44].mxu1 %v6174_v14  ;;  %v6262_v14 = vld [vmem:[%s8496_s0 + $0x248] ss:$40 sps:$4 sm:$0xff]  }
 0x125   : > { %4119 = vmatmul.mubr.bf16.gmra.mrb[44].mxu0 %v6175_v15  ;;  %3548 = vmatprep.mubr.bf16.mxu1 %v6177_v16  ;;  %v6263_v15 = vld [vmem:[%s8496_s0 + $0x784] ss:$40 sps:$4 sm:$0xff]  }
 0x126   : > { %4126 = vmatprep.mubr.bf16.mxu0 %v6179_v17  ;;  %v6265_v16 = vld [vmem:[%s8496_s0 + $0x29c] ss:$40 sps:$4 sm:$0xff]   ;;  %v6267_v17 = vld [vmem:[%s8496_s0 + $0x780] ss:$40 sps:$4 sm:$0xff]  }
 0x12c   : > { %3549 = vmatmul.mubr.bf16.gmra.mrb[48].mxu1 %v6181_v18  ;;  %v6268_v18 = vld [vmem:[%s8496_s0 + $0x298] ss:$40 sps:$4 sm:$0xff]  }
 0x12d   : > { %4127 = vmatmul.mubr.bf16.gmra.mrb[48].mxu0 %v6182_v19  ;;  %3556 = vmatprep.mubr.bf16.mxu1 %v6185_v20  ;;  %v6271_v19 = vld [vmem:[%s8496_s0 + $0x7d4] ss:$40 sps:$4 sm:$0xff]  }
 0x12e   : > { %4134 = vmatprep.mubr.bf16.mxu0 %v6187_v21  ;;  %v6273_v20 = vld [vmem:[%s8496_s0 + $0x2ec] ss:$40 sps:$4 sm:$0xff]   ;;  %v6377_v21 = vld [vmem:[%s7131_s8 + $0x260] sm:$0xff]  }
 0x134   : > { %3557 = vmatmul.mubr.bf16.gmra.mrb[52].mxu1 %v6189_v23  ;;  %v6276_v23 = vld [vmem:[%s8496_s0 + $0x2e8] ss:$40 sps:$4 sm:$0xff]  }
 0x135   : > { %4135 = vmatmul.mubr.bf16.gmra.mrb[52].mxu0 %v6190_v24  ;;  %3564 = vmatprep.mubr.bf16.mxu1 %v6192_v25  ;;  %v6277_v24 = vld [vmem:[%s8496_s0 + $0x824] ss:$40 sps:$4 sm:$0xff]  }
 0x136   : > { %4142 = vmatprep.mubr.bf16.mxu0 %v6194_v26  ;;  %v6279_v25 = vld [vmem:[%s8496_s0 + $0x33c] ss:$40 sps:$4 sm:$0xff]   ;;  %v6281_v26 = vld [vmem:[%s8496_s0 + $0x820] ss:$40 sps:$4 sm:$0xff]  }
 0x13c   : > { %3565 = vmatmul.mubr.bf16.gmra.mrb[56].mxu1 %v6196_v27  ;;  %v6282_v27 = vld [vmem:[%s8496_s0 + $0x338] ss:$40 sps:$4 sm:$0xff]  }
 0x13d   : > { %4143 = vmatmul.mubr.bf16.gmra.mrb[56].mxu0 %v6197_v28  ;;  %3572 = vmatprep.mubr.bf16.mxu1 %v6200_v29  ;;  %v6285_v28 = vld [vmem:[%s8496_s0 + $0x874] ss:$40 sps:$4 sm:$0xff]  }
 0x13e   : > { %4150 = vmatprep.mubr.bf16.mxu0 %v6202_v30  ;;  %v6287_v29 = vld [vmem:[%s8496_s0 + $0x38c] ss:$40 sps:$4 sm:$0xff]  }
 0x13f   : > { %v6390_v30 = vld [vmem:[%s7131_s8 + $0x268] sm:$0xff]  }
 0x144   : > { %3573 = vmatmul.mubr.bf16.gmra.mrb[60].mxu1 %v6204_v33  ;;  %v6290_v33 = vld [vmem:[%s8496_s0 + $0x388] ss:$40 sps:$4 sm:$0xff]  }
 0x145   : > { %4151 = vmatmul.mubr.bf16.gmra.mrb[60].mxu0 %v6205_v34  ;;  %3580 = vmatprep.mubr.bf16.mxu1 %v6207_v35  ;;  %v6291_v34 = vld [vmem:[%s8496_s0 + $0x8c4] ss:$40 sps:$4 sm:$0xff]  }
 0x146   : > { %4319 = vmatprep.mubr.bf16.mxu0 %v6211_v36  ;;  %v6293_v35 = vld [vmem:[%s8496_s0 + $0x3dc] ss:$40 sps:$4 sm:$0xff]   ;;  %v6295_v36 = vld [vmem:[%s8496_s0 + $0x8c0] ss:$40 sps:$4 sm:$0xff]  }
 0x14c   : > { %3581 = vmatmul.mubr.bf16.gmra.mrb[64].mxu1 %v6212_v37  ;;  %v6296_v37 = vld [vmem:[%s8496_s0 + $0x3d8] ss:$40 sps:$4 sm:$0xff]  }
 0x14d   : > { %4320 = vmatmul.mubr.bf16.vlgmr.msra.gmra.mrb[0].mxu0 %v6209_v38  ;;  %3588 = vmatprep.mubr.bf16.mxu1 %v6215_v39  ;;  %v6299_v38 = vld [vmem:[%s8496_s0 + $0x914] ss:$40 sps:$4 sm:$0xff]  }
 0x14e   : > { %4577 = vmatpush1.bf16.msra.mxu0 %v6214_v40  ;;  %4327 = vmatprep.mubr.bf16.mxu0 %v6217_v41  ;;  %v6301_v39 = vld [vmem:[%s8496_s0 + $0x42c] ss:$40 sps:$4 sm:$0xff]   ;;  %v6303_v41 = vld [vmem:[%s8496_s0 + $0x910] ss:$40 sps:$4 sm:$0xff]  }
 0x14f   : > { %4578 = vmatprep.subr.bf16.mxu0 %v6711_v32  ;;  %v6403_v40 = vld [vmem:[%s7131_s8 + $0x270] sm:$0xff]  }
 0x152   : > { %4579 = vmatpush1.bf16.msra.mxu0 %v6228_v43  ;;  %v6305_v43 = vld [vmem:[%s8496_s0 + $0x964] ss:$40 sps:$4 sm:$0xff]  }
 0x153   : > { %4580 = vmatprep.subr.bf16.mxu0 %v6711_v32 }
 0x154   : > { %3589 = vmatmul.mubr.bf16.gmra.mrb[68].mxu1 %v6219_v42  ;;  %v6304_v42 = vld [vmem:[%s8496_s0 + $0x428] ss:$40 sps:$4 sm:$0xff]  }
 0x155   : > { %4328 = vmatmul.mubr.bf16.gmra.mrb[4].mxu0 %v6220_v44  ;;  %3596 = vmatprep.mubr.bf16.mxu1 %v6221_v45  ;;  %v6307_v44 = vld [vmem:[%s8496_s0 + $0x47c] ss:$40 sps:$4 sm:$0xff]   ;;  %v6309_v45 = vld [vmem:[%s8496_s0 + $0x960] ss:$40 sps:$4 sm:$0xff]  }
 0x156   : > { %4335 = vmatprep.mubr.bf16.mxu0 %v6223_v46  ;;  %4581 = vmatpush1.bf16.msra.mxu0 %v6242_v47  ;;  %v6310_v46 = vld [vmem:[%s8496_s0 + $0x478] ss:$40 sps:$4 sm:$0xff]   ;;  %v6313_v47 = vld [vmem:[%s8496_s0 + $0x9b4] ss:$40 sps:$4 sm:$0xff]  }
 0x157   : > { %4582 = vmatprep.subr.bf16.mxu0 %v6711_v32 }
 0x15a   : > { %4583 = vmatpush1.bf16.msra.mxu0 %v6256_v49  ;;  %v6416_v49 = vld [vmem:[%s7131_s8 + $0x278] sm:$0xff]  }
 0x15b   : > { %4584 = vmatprep.subr.bf16.mxu0 %v6711_v32 }
 0x15c   : > { %3597 = vmatmul.mubr.bf16.gmra.mrb[72].mxu1 %v6225_v48  ;;  %v6315_v48 = vld [vmem:[%s8496_s0 + $0x4cc] ss:$40 sps:$4 sm:$0xff]  }
 0x15d   : > { %4336 = vmatmul.mubr.bf16.gmra.mrb[8].mxu0 %v6226_v50  ;;  %3604 = vmatprep.mubr.bf16.mxu1 %v6229_v51  ;;  %v6317_v50 = vld [vmem:[%s8496_s0 + $0x9b0] ss:$40 sps:$4 sm:$0xff]  }
 0x15e   : > { %4343 = vmatprep.mubr.bf16.mxu0 %v6231_v52  ;;  %4585 = vmatpush1.bf16.msra.mxu0 %v6270_v53  ;;  %v6318_v51 = vld [vmem:[%s8496_s0 + $0x4c8] ss:$40 sps:$4 sm:$0xff]   ;;  %v6321_v52 = vld [vmem:[%s8496_s0 + $0xc] ss:$40 sps:$4 sm:$0xff]   ;;  %v6322_v53 = vld [vmem:[%s8496_s0 + $0x51c] ss:$40 sps:$4 sm:$0xff]  }
 0x15f   : > { %4586 = vmatprep.subr.bf16.mxu0 %v6711_v32 }
 0x162   : > { %4587 = vmatpush1.bf16.msra.mxu0 %v6284_v55  ;;  %v6324_v55 = vld [vmem:[%s8496_s0 + $0x518] ss:$40 sps:$4 sm:$0xff]  }
 0x163   : > { %4588 = vmatprep.subr.bf16.mxu0 %v6711_v32 }
 0x164   : > { %3605 = vmatmul.mubr.bf16.gmra.mrb[76].mxu1 %v6233_v54  ;;  %v6319_v54 = vld [vmem:[%s8496_s0 + $0x8] ss:$40 sps:$4 sm:$0xff]  }
 0x165   : > { %4344 = vmatmul.mubr.bf16.gmra.mrb[12].mxu0 %v6234_v56  ;;  %3612 = vmatprep.mubr.bf16.mxu1 %v6235_v57  ;;  %v6326_v56 = vld [vmem:[%s8496_s0 + $0x5c] ss:$40 sps:$4 sm:$0xff]   ;;  %v6328_v57 = vld [vmem:[%s8496_s0 + $0x56c] ss:$40 sps:$4 sm:$0xff]  }
 0x166   : > { %4351 = vmatprep.mubr.bf16.mxu0 %v6237_v58  ;;  %4589 = vmatpush1.bf16.msra.mxu0 %v6298_v59  ;;  %v6615_v58 = vld [vmem:[%s7131_s8 + $0x100] sm:$0xff]  }
 0x167   : > { %4590 = vmatprep.subr.bf16.mxu0 %v6711_v32  ;;  %v6330_v59 = vld [vmem:[%s8496_s0 + $0x58] ss:$40 sps:$4 sm:$0xff]  }
 0x16a   : > { %4591 = vmatpush1.bf16.msra.mxu0 %v6312_v61  ;;  %v6332_v61 = vld [vmem:[%s8496_s0 + $0xac] ss:$40 sps:$4 sm:$0xff]  }
 0x16b   : > { %4592 = vmatprep.subr.bf16.mxu0 %v6711_v32 }
 0x16c   : > { %3613 = vmatmul.mubr.bf16.gmra.mrb[80].mxu1 %v6239_v60  ;;  %v6331_v60 = vld [vmem:[%s8496_s0 + $0x568] ss:$40 sps:$4 sm:$0xff]  }
 0x16d   : > { %4352 = vmatmul.mubr.bf16.gmra.mrb[16].mxu0 %v6240_v62  ;;  %3620 = vmatprep.mubr.bf16.mxu1 %v6243_v63  ;;  %v6616_v62 = vld [vmem:[%s7131_s8 + $0x108] sm:$0xff]   ;;  %v6334_v63 = vld [vmem:[%s8496_s0 + $0x5bc] ss:$40 sps:$4 sm:$0xff]  }
 0x16e   : > { %4359 = vmatprep.mubr.bf16.mxu0 %v6245_v0  ;;  %4593 = vmatpush1.bf16.msra.mxu0 %v6325_v1  ;;  %v6617_v0 = vld [vmem:[%s7131_s8 + $0x110] sm:$0xff]  }
 0x16f   : > { %4594 = vmatprep.subr.bf16.mxu0 %v6711_v32  ;;  %v6336_v1 = vld [vmem:[%s8496_s0 + $0xa8] ss:$40 sps:$4 sm:$0xff]  }
 0x172   : > { %4595 = vmatpush1.bf16.msra.mxu0 %v6338_v3  ;;  %v6339_v3 = vld [vmem:[%s8496_s0 + $0xfc] ss:$40 sps:$4 sm:$0xff]  }
 0x173   : > { %4596 = vmatprep.subr.bf16.mxu0 %v6711_v32 }
 0x174   : > { %3621 = vmatmul.mubr.bf16.gmra.mrb[84].mxu1 %v6247_v2  ;;  %v6337_v2 = vld [vmem:[%s8496_s0 + $0x5b8] ss:$40 sps:$4 sm:$0xff]  }
 0x175   : > { %4360 = vmatmul.mubr.bf16.gmra.mrb[20].mxu0 %v6248_v4  ;;  %3628 = vmatprep.mubr.bf16.mxu1 %v6249_v5  ;;  %v6341_v4 = vld [vmem:[%s8496_s0 + $0x60c] ss:$40 sps:$4 sm:$0xff]   ;;  %v6618_v5 = vld [vmem:[%s7131_s8 + $0x118] sm:$0xff]  }
 0x176   : > { %4367 = vmatprep.mubr.bf16.mxu0 %v6251_v6  ;;  %4597 = vmatpush1.bf16.msra.mxu0 %v6351_v7  ;;  %v6619_v6 = vld [vmem:[%s7131_s8 + $0x120] sm:$0xff]  }
 0x177   : > { %4598 = vmatprep.subr.bf16.mxu0 %v6711_v32  ;;  %v6343_v7 = vld [vmem:[%s8496_s0 + $0xf8] ss:$40 sps:$4 sm:$0xff]  }
 0x17a   : > { %4599 = vmatpush1.bf16.msra.mxu0 %v6364_v12  ;;  %v6621_v12 = vld [vmem:[%s7131_s8 + $0x130] sm:$0xff]  }
 0x17b   : > { %4600 = vmatprep.subr.bf16.mxu0 %v6711_v32 }
 0x17c   : > { %3629 = vmatmul.mubr.bf16.gmra.mrb[88].mxu1 %v6253_v8  ;;  %v6344_v8 = vld [vmem:[%s8496_s0 + $0x608] ss:$40 sps:$4 sm:$0xff]  }
 0x17d   : > { %4368 = vmatmul.mubr.bf16.gmra.mrb[24].mxu0 %v6254_v9  ;;  %3636 = vmatprep.mubr.bf16.mxu1 %v6257_v10  ;;  %v6345_v9 = vld [vmem:[%s8496_s0 + $0x14c] ss:$40 sps:$4 sm:$0xff]   ;;  %v6347_v10 = vld [vmem:[%s8496_s0 + $0x65c] ss:$40 sps:$4 sm:$0xff]  }
 0x17e   : > { %4375 = vmatprep.mubr.bf16.mxu0 %v6259_v11  ;;  %4601 = vmatpush1.bf16.msra.mxu0 %v6377_v21  ;;  %v6620_v11 = vld [vmem:[%s7131_s8 + $0x128] sm:$0xff]  }
 0x17f   : > { %4602 = vmatprep.subr.bf16.mxu0 %v6711_v32  ;;  %v6358_v21 = vld [vmem:[%s8496_s0 + $0x1ec] ss:$40 sps:$4 sm:$0xff]  }
 0x182   : > { %4603 = vmatpush1.bf16.msra.mxu0 %v6390_v30  ;;  %v6627_v30 = vld [vmem:[%s7131_s8 + $0x160] sm:$0xff]  }
 0x183   : > { %4604 = vmatprep.subr.bf16.mxu0 %v6711_v32 }
 0x184   : > { %3637 = vmatmul.mubr.bf16.gmra.mrb[92].mxu1 %v6261_v13  ;;  %v6349_v13 = vld [vmem:[%s8496_s0 + $0x148] ss:$40 sps:$4 sm:$0xff]  }
 0x185   : > { %4376 = vmatmul.mubr.bf16.gmra.mrb[28].mxu0 %v6262_v14  ;;  %3644 = vmatprep.mubr.bf16.mxu1 %v6263_v15  ;;  %v6350_v14 = vld [vmem:[%s8496_s0 + $0x658] ss:$40 sps:$4 sm:$0xff]   ;;  %v6352_v15 = vld [vmem:[%s8496_s0 + $0x19c] ss:$40 sps:$4 sm:$0xff]  }
 0x186   : > { %4383 = vmatprep.mubr.bf16.mxu0 %v6265_v16  ;;  %4605 = vmatpush1.bf16.msra.mxu0 %v6403_v40  ;;  %v6354_v16 = vld [vmem:[%s8496_s0 + $0x6ac] ss:$40 sps:$4 sm:$0xff]   ;;  %v6378_v40 = vld [vmem:[%s8496_s0 + $0x2dc] ss:$40 sps:$4 sm:$0xff]  }
 0x187   : > { %4606 = vmatprep.subr.bf16.mxu0 %v6711_v32 }
 0x18a   : > { %4607 = vmatpush1.bf16.msra.mxu0 %v6416_v49  ;;  %v6393_v49 = vld [vmem:[%s8496_s0 + $0x88c] ss:$40 sps:$4 sm:$0xff]  }
 0x18c   : > { %3645 = vmatmul.mubr.bf16.gmra.mrb[96].mxu1 %v6267_v17  ;;  %v6622_v17 = vld [vmem:[%s7131_s8 + $0x138] sm:$0xff]  }
 0x18d   : > { %4384 = vmatmul.mubr.bf16.gmra.mrb[32].mxu0 %v6268_v18  ;;  %3652 = vmatprep.mubr.bf16.mxu1 %v6271_v19  ;;  %v6623_v18 = vld [vmem:[%s7131_s8 + $0x140] sm:$0xff]  }
 0x18e   : > { %4391 = vmatprep.mubr.bf16.mxu0 %v6273_v20  ;;  %v6356_v19 = vld [vmem:[%s8496_s0 + $0x198] ss:$40 sps:$4 sm:$0xff]   ;;  %v6357_v20 = vld [vmem:[%s8496_s0 + $0x6a8] ss:$40 sps:$4 sm:$0xff]  }
 0x194   : > { %3653 = vmatmul.mubr.bf16.gmra.mrb[100].mxu1 %v6275_v22  ;;  %v6360_v22 = vld [vmem:[%s8496_s0 + $0x6fc] ss:$40 sps:$4 sm:$0xff]  }
 0x195   : > { %4392 = vmatmul.mubr.bf16.gmra.mrb[36].mxu0 %v6276_v23  ;;  %3660 = vmatprep.mubr.bf16.mxu1 %v6277_v24  ;;  %v6624_v23 = vld [vmem:[%s7131_s8 + $0x148] sm:$0xff]   ;;  %v6625_v24 = vld [vmem:[%s7131_s8 + $0x150] sm:$0xff]  }
 0x196   : > { %4399 = vmatprep.mubr.bf16.mxu0 %v6279_v25  ;;  %v6362_v25 = vld [vmem:[%s8496_s0 + $0x1e8] ss:$40 sps:$4 sm:$0xff]  }
 0x19c   : > { %3661 = vmatmul.mubr.bf16.gmra.mrb[104].mxu1 %v6281_v26  ;;  %v6363_v26 = vld [vmem:[%s8496_s0 + $0x6f8] ss:$40 sps:$4 sm:$0xff]  }
 0x19d   : > { %4400 = vmatmul.mubr.bf16.gmra.mrb[40].mxu0 %v6282_v27  ;;  %3668 = vmatprep.mubr.bf16.mxu1 %v6285_v28  ;;  %v6365_v27 = vld [vmem:[%s8496_s0 + $0x23c] ss:$40 sps:$4 sm:$0xff]   ;;  %v6367_v28 = vld [vmem:[%s8496_s0 + $0x74c] ss:$40 sps:$4 sm:$0xff]  }
 0x19e   : > { %4407 = vmatprep.mubr.bf16.mxu0 %v6287_v29  ;;  %v6626_v29 = vld [vmem:[%s7131_s8 + $0x158] sm:$0xff]  }
 0x1a4   : > { %3669 = vmatmul.mubr.bf16.gmra.mrb[108].mxu1 %v6289_v31  ;;  %v6369_v31 = vld [vmem:[%s8496_s0 + $0x238] ss:$40 sps:$4 sm:$0xff]  }
 0x1a5   : > { %4408 = vmatmul.mubr.bf16.gmra.mrb[44].mxu0 %v6290_v33  ;;  %3676 = vmatprep.mubr.bf16.mxu1 %v6291_v34  ;;  %v6370_v33 = vld [vmem:[%s8496_s0 + $0x748] ss:$40 sps:$4 sm:$0xff]   ;;  %v6371_v34 = vld [vmem:[%s8496_s0 + $0x28c] ss:$40 sps:$4 sm:$0xff]  }
 0x1a6   : > { %4415 = vmatprep.mubr.bf16.mxu0 %v6293_v35  ;;  %v6373_v35 = vld [vmem:[%s8496_s0 + $0x79c] ss:$40 sps:$4 sm:$0xff]  }
 0x1ac   : > { %3677 = vmatmul.mubr.bf16.gmra.mrb[112].mxu1 %v6295_v36  ;;  %v6628_v36 = vld [vmem:[%s7131_s8 + $0x168] sm:$0xff]  }
 0x1ad   : > { %4416 = vmatmul.mubr.bf16.gmra.mrb[48].mxu0 %v6296_v37  ;;  %3684 = vmatprep.mubr.bf16.mxu1 %v6299_v38  ;;  %v6629_v37 = vld [vmem:[%s7131_s8 + $0x170] sm:$0xff]  }
 0x1ae   : > { %4423 = vmatprep.mubr.bf16.mxu0 %v6301_v39  ;;  %v6375_v38 = vld [vmem:[%s8496_s0 + $0x288] ss:$40 sps:$4 sm:$0xff]   ;;  %v6376_v39 = vld [vmem:[%s8496_s0 + $0x798] ss:$40 sps:$4 sm:$0xff]  }
 0x1b4   : > { %3685 = vmatmul.mubr.bf16.gmra.mrb[116].mxu1 %v6303_v41  ;;  %v6380_v41 = vld [vmem:[%s8496_s0 + $0x7ec] ss:$40 sps:$4 sm:$0xff]  }
 0x1b5   : > { %4424 = vmatmul.mubr.bf16.gmra.mrb[52].mxu0 %v6304_v42  ;;  %3692 = vmatprep.mubr.bf16.mxu1 %v6305_v43  ;;  %v6630_v42 = vld [vmem:[%s7131_s8 + $0x178] sm:$0xff]   ;;  %v6383_v43 = vld [vmem:[%s8496_s0 + $0x7e8] ss:$40 sps:$4 sm:$0xff]  }
 0x1b6   : > { %4431 = vmatprep.mubr.bf16.mxu0 %v6307_v44  ;;  %v6384_v44 = vld [vmem:[%s8496_s0 + $0x32c] ss:$40 sps:$4 sm:$0xff]  }
 0x1bc   : > { %3693 = vmatmul.mubr.bf16.gmra.mrb[120].mxu1 %v6309_v45  ;;  %v6386_v45 = vld [vmem:[%s8496_s0 + $0x83c] ss:$40 sps:$4 sm:$0xff]  }
 0x1bd   : > { %4432 = vmatmul.mubr.bf16.gmra.mrb[56].mxu0 %v6310_v46  ;;  %3700 = vmatprep.mubr.bf16.mxu1 %v6313_v47  ;;  %v6388_v46 = vld [vmem:[%s8496_s0 + $0x328] ss:$40 sps:$4 sm:$0xff]   ;;  %v6389_v47 = vld [vmem:[%s8496_s0 + $0x838] ss:$40 sps:$4 sm:$0xff]  }
 0x1be   : > { %4439 = vmatprep.mubr.bf16.mxu0 %v6315_v48  ;;  %v6391_v48 = vld [vmem:[%s8496_s0 + $0x37c] ss:$40 sps:$4 sm:$0xff]  }
 0x1c4   : > { %3701 = vmatmul.mubr.bf16.gmra.mrb[124].mxu1 %v6317_v50  ;;  %v6395_v50 = vld [vmem:[%s8496_s0 + $0x378] ss:$40 sps:$4 sm:$0xff]  }
 0x1c5   : > { %4440 = vmatmul.mubr.bf16.gmra.mrb[60].mxu0 %v6318_v51  ;;  %3741 = vmatprep.mubr.bf16.mxu1 %v6321_v52  ;;  %v6396_v51 = vld [vmem:[%s8496_s0 + $0x888] ss:$40 sps:$4 sm:$0xff]   ;;  %v6397_v52 = vld [vmem:[%s8496_s0 + $0x3cc] ss:$40 sps:$4 sm:$0xff]  }
 0x1c6   : > { %4447 = vmatprep.mubr.bf16.mxu0 %v6322_v53  ;;  %v6399_v53 = vld [vmem:[%s8496_s0 + $0x8dc] ss:$40 sps:$4 sm:$0xff]  }
 0x1cc   : > { %3742 = vmatmul.mubr.bf16.vlgmr.msra.gmra.mrb[0].mxu1 %v6319_v54  ;;  %v6401_v54 = vld [vmem:[%s8496_s0 + $0x3c8] ss:$40 sps:$4 sm:$0xff]  }
 0x1cd   : > { %4448 = vmatmul.mubr.bf16.gmra.mrb[64].mxu0 %v6324_v55  ;;  %5530 = vmatpush1.bf16.msra.mxu1 %v6615_v58  ;;  %v6402_v55 = vld [vmem:[%s8496_s0 + $0x8d8] ss:$40 sps:$4 sm:$0xff]  }
 0x1ce   : > { %3749 = vmatprep.mubr.bf16.mxu1 %v6326_v56  ;;  %4455 = vmatprep.mubr.bf16.mxu0 %v6328_v57  ;;  %v6404_v56 = vld [vmem:[%s8496_s0 + $0x41c] ss:$40 sps:$4 sm:$0xff]   ;;  %v6406_v57 = vld [vmem:[%s8496_s0 + $0x92c] ss:$40 sps:$4 sm:$0xff]   ;;  %v6408_v58 = vld [vmem:[%s8496_s0 + $0x418] ss:$40 sps:$4 sm:$0xff]  }
 0x1cf   : > { %5515 = vmatprep.subr.bf16.mxu1 %v6711_v32 }
 0x1d1   : > { %5531 = vmatpush1.bf16.msra.mxu1 %v6616_v62  ;;  %v6414_v62 = vld [vmem:[%s8496_s0 + $0x468] ss:$40 sps:$4 sm:$0xff]  }
 0x1d2   : > { %5516 = vmatprep.subr.bf16.mxu1 %v6711_v32 }
 0x1d4   : > { %3750 = vmatmul.mubr.bf16.gmra.mrb[4].mxu1 %v6330_v59  ;;  %v6409_v59 = vld [vmem:[%s8496_s0 + $0x928] ss:$40 sps:$4 sm:$0xff]  }
 0x1d5   : > { %4456 = vmatmul.mubr.bf16.gmra.mrb[68].mxu0 %v6331_v60  ;;  %3757 = vmatprep.mubr.bf16.mxu1 %v6332_v61  ;;  %v6410_v60 = vld [vmem:[%s8496_s0 + $0x46c] ss:$40 sps:$4 sm:$0xff]   ;;  %v6412_v61 = vld [vmem:[%s8496_s0 + $0x97c] ss:$40 sps:$4 sm:$0xff]  }
 0x1d6   : > { %4463 = vmatprep.mubr.bf16.mxu0 %v6334_v63  ;;  %5532 = vmatpush1.bf16.msra.mxu1 %v6617_v0  ;;  %v6415_v63 = vld [vmem:[%s8496_s0 + $0x978] ss:$40 sps:$4 sm:$0xff]   ;;  %v6417_v0 = vld [vmem:[%s8496_s0 + $0x4bc] ss:$40 sps:$4 sm:$0xff]  }
 0x1d7   : > { %5517 = vmatprep.subr.bf16.mxu1 %v6711_v32 }
 0x1da   : > { %5533 = vmatpush1.bf16.msra.mxu1 %v6618_v5  ;;  %v6427_v5 = vld [vmem:[%s8496_s0 + $0x24] ss:$40 sps:$4 sm:$0xff]  }
 0x1db   : > { %5518 = vmatprep.subr.bf16.mxu1 %v6711_v32 }
 0x1dc   : > { %3758 = vmatmul.mubr.bf16.gmra.mrb[8].mxu1 %v6336_v1  ;;  %v6419_v1 = vld [vmem:[%s8496_s0 + $0x9cc] ss:$40 sps:$4 sm:$0xff]  }
 0x1dd   : > { %4464 = vmatmul.mubr.bf16.gmra.mrb[72].mxu0 %v6337_v2  ;;  %3765 = vmatprep.mubr.bf16.mxu1 %v6339_v3  ;;  %v6421_v2 = vld [vmem:[%s8496_s0 + $0x4b8] ss:$40 sps:$4 sm:$0xff]   ;;  %v6422_v3 = vld [vmem:[%s8496_s0 + $0x9c8] ss:$40 sps:$4 sm:$0xff]  }
 0x1de   : > { %4471 = vmatprep.mubr.bf16.mxu0 %v6341_v4  ;;  %5534 = vmatpush1.bf16.msra.mxu1 %v6619_v6  ;;  %v6423_v4 = vld [vmem:[%s8496_s0 + $0x50c] ss:$40 sps:$4 sm:$0xff]   ;;  %v6428_v6 = vld [vmem:[%s8496_s0 + $0x508] ss:$40 sps:$4 sm:$0xff]  }
 0x1df   : > { %5519 = vmatprep.subr.bf16.mxu1 %v6711_v32 }
 0x1e2   : > { %5535 = vmatpush1.bf16.msra.mxu1 %v6620_v11  ;;  %v6434_v11 = vld [vmem:[%s8496_s0 + $0x70] ss:$40 sps:$4 sm:$0xff]  }
 0x1e3   : > { %5520 = vmatprep.subr.bf16.mxu1 %v6711_v32 }
 0x1e4   : > { %3766 = vmatmul.mubr.bf16.gmra.mrb[12].mxu1 %v6343_v7  ;;  %v6425_v7 = vld [vmem:[%s8496_s0 + $0x20] ss:$40 sps:$4 sm:$0xff]  }
 0x1e5   : > { %4472 = vmatmul.mubr.bf16.gmra.mrb[76].mxu0 %v6344_v8  ;;  %3773 = vmatprep.mubr.bf16.mxu1 %v6345_v9  ;;  %v6429_v8 = vld [vmem:[%s8496_s0 + $0x55c] ss:$40 sps:$4 sm:$0xff]  }
 0x1e6   : > { %4479 = vmatprep.mubr.bf16.mxu0 %v6347_v10  ;;  %5536 = vmatpush1.bf16.msra.mxu1 %v6621_v12  ;;  %v6431_v9 = vld [vmem:[%s8496_s0 + $0x74] ss:$40 sps:$4 sm:$0xff]   ;;  %v6433_v10 = vld [vmem:[%s8496_s0 + $0x558] ss:$40 sps:$4 sm:$0xff]  }
 0x1e7   : > { %5521 = vmatprep.subr.bf16.mxu1 %v6711_v32  ;;  %v6435_v12 = vld [vmem:[%s8496_s0 + $0x5ac] ss:$40 sps:$4 sm:$0xff]  }
 0x1ea   : > { %5537 = vmatpush1.bf16.msra.mxu1 %v6622_v17  ;;  %v6443_v17 = vld [vmem:[%s8496_s0 + $0x114] ss:$40 sps:$4 sm:$0xff]  }
 0x1eb   : > { %5522 = vmatprep.subr.bf16.mxu1 %v6711_v32 }
 0x1ec   : > { %3774 = vmatmul.mubr.bf16.gmra.mrb[16].mxu1 %v6349_v13  ;;  %v6437_v13 = vld [vmem:[%s8496_s0 + $0xc4] ss:$40 sps:$4 sm:$0xff]  }
 0x1ed   : > { %4480 = vmatmul.mubr.bf16.gmra.mrb[80].mxu0 %v6350_v14  ;;  %3781 = vmatprep.mubr.bf16.mxu1 %v6352_v15  ;;  %v6439_v14 = vld [vmem:[%s8496_s0 + $0x5a8] ss:$40 sps:$4 sm:$0xff]  }
 0x1ee   : > { %4487 = vmatprep.mubr.bf16.mxu0 %v6354_v16  ;;  %5538 = vmatpush1.bf16.msra.mxu1 %v6623_v18  ;;  %v6440_v15 = vld [vmem:[%s8496_s0 + $0xc0] ss:$40 sps:$4 sm:$0xff]   ;;  %v6441_v16 = vld [vmem:[%s8496_s0 + $0x5fc] ss:$40 sps:$4 sm:$0xff]  }
 0x1ef   : > { %5523 = vmatprep.subr.bf16.mxu1 %v6711_v32  ;;  %v6445_v18 = vld [vmem:[%s8496_s0 + $0x5f8] ss:$40 sps:$4 sm:$0xff]  }
 0x1f2   : > { %5539 = vmatpush1.bf16.msra.mxu1 %v6624_v23  ;;  %v6452_v23 = vld [vmem:[%s8496_s0 + $0x160] ss:$40 sps:$4 sm:$0xff]  }
 0x1f3   : > { %5524 = vmatprep.subr.bf16.mxu1 %v6711_v32 }
 0x1f4   : > { %3782 = vmatmul.mubr.bf16.gmra.mrb[20].mxu1 %v6356_v19  ;;  %v6446_v19 = vld [vmem:[%s8496_s0 + $0x110] ss:$40 sps:$4 sm:$0xff]  }
 0x1f5   : > { %4488 = vmatmul.mubr.bf16.gmra.mrb[84].mxu0 %v6357_v20  ;;  %3789 = vmatprep.mubr.bf16.mxu1 %v6358_v21  ;;  %v6447_v20 = vld [vmem:[%s8496_s0 + $0x64c] ss:$40 sps:$4 sm:$0xff]  }
 0x1f6   : > { %4495 = vmatprep.mubr.bf16.mxu0 %v6360_v22  ;;  %5540 = vmatpush1.bf16.msra.mxu1 %v6625_v24  ;;  %v6449_v21 = vld [vmem:[%s8496_s0 + $0x164] ss:$40 sps:$4 sm:$0xff]   ;;  %v6451_v22 = vld [vmem:[%s8496_s0 + $0x648] ss:$40 sps:$4 sm:$0xff]  }
 0x1f7   : > { %5525 = vmatprep.subr.bf16.mxu1 %v6711_v32  ;;  %v6453_v24 = vld [vmem:[%s8496_s0 + $0x69c] ss:$40 sps:$4 sm:$0xff]  }
 0x1fa   : > { %5541 = vmatpush1.bf16.msra.mxu1 %v6626_v29  ;;  %v6461_v29 = vld [vmem:[%s8496_s0 + $0x204] ss:$40 sps:$4 sm:$0xff]  }
 0x1fb   : > { %5526 = vmatprep.subr.bf16.mxu1 %v6711_v32 }
 0x1fc   : > { %3790 = vmatmul.mubr.bf16.gmra.mrb[24].mxu1 %v6362_v25  ;;  %v6455_v25 = vld [vmem:[%s8496_s0 + $0x1b4] ss:$40 sps:$4 sm:$0xff]  }
 0x1fd   : > { %4496 = vmatmul.mubr.bf16.gmra.mrb[88].mxu0 %v6363_v26  ;;  %3797 = vmatprep.mubr.bf16.mxu1 %v6365_v27  ;;  %v6457_v26 = vld [vmem:[%s8496_s0 + $0x698] ss:$40 sps:$4 sm:$0xff]  }
 0x1fe   : > { %4503 = vmatprep.mubr.bf16.mxu0 %v6367_v28  ;;  %5542 = vmatpush1.bf16.msra.mxu1 %v6627_v30  ;;  %v6458_v27 = vld [vmem:[%s8496_s0 + $0x1b0] ss:$40 sps:$4 sm:$0xff]   ;;  %v6459_v28 = vld [vmem:[%s8496_s0 + $0x6ec] ss:$40 sps:$4 sm:$0xff]  }
 0x1ff   : > { %5527 = vmatprep.subr.bf16.mxu1 %v6711_v32  ;;  %v6463_v30 = vld [vmem:[%s8496_s0 + $0x6e8] ss:$40 sps:$4 sm:$0xff]  }
 0x202   : > { %5543 = vmatpush1.bf16.msra.mxu1 %v6628_v36  ;;  %v6470_v36 = vld [vmem:[%s8496_s0 + $0x250] ss:$40 sps:$4 sm:$0xff]  }
 0x203   : > { %5528 = vmatprep.subr.bf16.mxu1 %v6711_v32 }
 0x204   : > { %3798 = vmatmul.mubr.bf16.gmra.mrb[28].mxu1 %v6369_v31  ;;  %v6464_v31 = vld [vmem:[%s8496_s0 + $0x200] ss:$40 sps:$4 sm:$0xff]  }
 0x205   : > { %4504 = vmatmul.mubr.bf16.gmra.mrb[92].mxu0 %v6370_v33  ;;  %3805 = vmatprep.mubr.bf16.mxu1 %v6371_v34  ;;  %v6465_v33 = vld [vmem:[%s8496_s0 + $0x73c] ss:$40 sps:$4 sm:$0xff]  }
 0x206   : > { %4511 = vmatprep.mubr.bf16.mxu0 %v6373_v35  ;;  %5544 = vmatpush1.bf16.msra.mxu1 %v6629_v37  ;;  %v6467_v34 = vld [vmem:[%s8496_s0 + $0x254] ss:$40 sps:$4 sm:$0xff]   ;;  %v6469_v35 = vld [vmem:[%s8496_s0 + $0x738] ss:$40 sps:$4 sm:$0xff]  }
 0x207   : > { %5529 = vmatprep.subr.bf16.mxu1 %v6711_v32  ;;  %v6382_v32 = vld [vmem:[%s8496_s0 + $0x2d8] ss:$40 sps:$4 sm:$0xff]   ;;  %v6471_v37 = vld [vmem:[%s8496_s0 + $0x78c] ss:$40 sps:$4 sm:$0xff]  }
 0x20a   : > { %5545 = vmatpush1.bf16.msra.mxu1 %v6630_v42  ;;  %v6479_v42 = vld [vmem:[%s8496_s0 + $0x2f4] ss:$40 sps:$4 sm:$0xff]  }
 0x20c   : > { %3806 = vmatmul.mubr.bf16.gmra.mrb[32].mxu1 %v6375_v38  ;;  %v6473_v38 = vld [vmem:[%s8496_s0 + $0x2a4] ss:$40 sps:$4 sm:$0xff]  }
 0x20d   : > { %4512 = vmatmul.mubr.bf16.gmra.mrb[96].mxu0 %v6376_v39  ;;  %3813 = vmatprep.mubr.bf16.mxu1 %v6378_v40  ;;  %v6475_v39 = vld [vmem:[%s8496_s0 + $0x788] ss:$40 sps:$4 sm:$0xff]  }
 0x20e   : > { %4519 = vmatprep.mubr.bf16.mxu0 %v6380_v41  ;;  %v6476_v40 = vld [vmem:[%s8496_s0 + $0x2a0] ss:$40 sps:$4 sm:$0xff]   ;;  %v6477_v41 = vld [vmem:[%s8496_s0 + $0x7dc] ss:$40 sps:$4 sm:$0xff]  }
 0x214   : > { %3814 = vmatmul.mubr.bf16.gmra.mrb[36].mxu1 %v6382_v32  ;;  %v6481_v32 = vld [vmem:[%s8496_s0 + $0x7d8] ss:$40 sps:$4 sm:$0xff]  }
 0x215   : > { %4520 = vmatmul.mubr.bf16.gmra.mrb[100].mxu0 %v6383_v43  ;;  %3821 = vmatprep.mubr.bf16.mxu1 %v6384_v44  ;;  %v6482_v43 = vld [vmem:[%s8496_s0 + $0x2f0] ss:$40 sps:$4 sm:$0xff]   ;;  %v6483_v44 = vld [vmem:[%s8496_s0 + $0x82c] ss:$40 sps:$4 sm:$0xff]  }
 0x216   : > { %4527 = vmatprep.mubr.bf16.mxu0 %v6386_v45  ;;  %v6485_v45 = vld [vmem:[%s8496_s0 + $0x344] ss:$40 sps:$4 sm:$0xff]  }
 0x21c   : > { %3822 = vmatmul.mubr.bf16.gmra.mrb[40].mxu1 %v6388_v46  ;;  %v6487_v46 = vld [vmem:[%s8496_s0 + $0x828] ss:$40 sps:$4 sm:$0xff]  }
 0x21d   : > { %4528 = vmatmul.mubr.bf16.gmra.mrb[104].mxu0 %v6389_v47  ;;  %3829 = vmatprep.mubr.bf16.mxu1 %v6391_v48  ;;  %v6488_v47 = vld [vmem:[%s8496_s0 + $0x340] ss:$40 sps:$4 sm:$0xff]   ;;  %v6489_v48 = vld [vmem:[%s8496_s0 + $0x87c] ss:$40 sps:$4 sm:$0xff]  }
 0x21e   : > { %4535 = vmatprep.mubr.bf16.mxu0 %v6393_v49  ;;  %v6491_v49 = vld [vmem:[%s8496_s0 + $0x394] ss:$40 sps:$4 sm:$0xff]  }
 0x224   : > { %3830 = vmatmul.mubr.bf16.gmra.mrb[44].mxu1 %v6395_v50 }
 0x225   : > { %4536 = vmatmul.mubr.bf16.gmra.mrb[108].mxu0 %v6396_v51  ;;  %3837 = vmatprep.mubr.bf16.mxu1 %v6397_v52  ;;  %v6493_v52 = vld [vmem:[%s8496_s0 + $0x878] ss:$40 sps:$4 sm:$0xff]  }
 0x226   : > { %4543 = vmatprep.mubr.bf16.mxu0 %v6399_v53 }
 0x22c   : > { %3838 = vmatmul.mubr.bf16.gmra.mrb[48].mxu1 %v6401_v54  ;;  %v6494_v54 = vld [vmem:[%s8496_s0 + $0x390] ss:$40 sps:$4 sm:$0xff]  }
 0x22d   : > { %4544 = vmatmul.mubr.bf16.gmra.mrb[112].mxu0 %v6402_v55  ;;  %3845 = vmatprep.mubr.bf16.mxu1 %v6404_v56  ;;  %v6495_v55 = vld [vmem:[%s8496_s0 + $0x8cc] ss:$40 sps:$4 sm:$0xff]  }
 0x22e   : > { %4551 = vmatprep.mubr.bf16.mxu0 %v6406_v57  ;;  %v6497_v57 = vld [vmem:[%s8496_s0 + $0x3e4] ss:$40 sps:$4 sm:$0xff]  }
 0x234   : > { %3846 = vmatmul.mubr.bf16.gmra.mrb[52].mxu1 %v6408_v58 }
 0x235   : > { %4552 = vmatmul.mubr.bf16.gmra.mrb[116].mxu0 %v6409_v59  ;;  %3853 = vmatprep.mubr.bf16.mxu1 %v6410_v60  ;;  %v6499_v60 = vld [vmem:[%s8496_s0 + $0x8c8] ss:$40 sps:$4 sm:$0xff]  }
 0x236   : > { %4559 = vmatprep.mubr.bf16.mxu0 %v6412_v61 }
 0x23c   : > { %3854 = vmatmul.mubr.bf16.gmra.mrb[56].mxu1 %v6414_v62  ;;  %v6500_v62 = vld [vmem:[%s8496_s0 + $0x3e0] ss:$40 sps:$4 sm:$0xff]  }
 0x23d   : > { %4560 = vmatmul.mubr.bf16.gmra.mrb[120].mxu0 %v6415_v63  ;;  %3861 = vmatprep.mubr.bf16.mxu1 %v6417_v0  ;;  %v6501_v63 = vld [vmem:[%s8496_s0 + $0x91c] ss:$40 sps:$4 sm:$0xff]  }
 0x23e   : > { %4567 = vmatprep.mubr.bf16.mxu0 %v6419_v1  ;;  %v6503_v1 = vld [vmem:[%s8496_s0 + $0x434] ss:$40 sps:$4 sm:$0xff]  }
 0x244   : > { %3862 = vmatmul.mubr.bf16.gmra.mrb[60].mxu1 %v6421_v2 }
 0x245   : > { %4568 = vmatmul.mubr.bf16.gmra.mrb[124].mxu0 %v6422_v3  ;;  %3869 = vmatprep.mubr.bf16.mxu1 %v6423_v4  ;;  %v6505_v4 = vld [vmem:[%s8496_s0 + $0x918] ss:$40 sps:$4 sm:$0xff]  }
 0x246   : > { %4608 = vmatprep.mubr.bf16.mxu0 %v6427_v5 }
 0x24c   : > { %3870 = vmatmul.mubr.bf16.gmra.mrb[64].mxu1 %v6428_v6  ;;  %v6506_v6 = vld [vmem:[%s8496_s0 + $0x430] ss:$40 sps:$4 sm:$0xff]  }
 0x24d   : > { %4609 = vmatmul.mubr.bf16.vlgmr.msra.gmra.mrb[0].mxu0 %v6425_v7  ;;  %3877 = vmatprep.mubr.bf16.mxu1 %v6429_v8  ;;  %v6507_v7 = vld [vmem:[%s8496_s0 + $0x96c] ss:$40 sps:$4 sm:$0xff]  }
 0x24e   : > { %4616 = vmatprep.mubr.bf16.mxu0 %v6431_v9  ;;  %v6509_v9 = vld [vmem:[%s8496_s0 + $0x484] ss:$40 sps:$4 sm:$0xff]  }
 0x254   : > { %3878 = vmatmul.mubr.bf16.gmra.mrb[68].mxu1 %v6433_v10 }
 0x255   : > { %4617 = vmatmul.mubr.bf16.gmra.mrb[4].mxu0 %v6434_v11  ;;  %3885 = vmatprep.mubr.bf16.mxu1 %v6435_v12  ;;  %v6511_v12 = vld [vmem:[%s8496_s0 + $0x968] ss:$40 sps:$4 sm:$0xff]  }
 0x256   : > { %4624 = vmatprep.mubr.bf16.mxu0 %v6437_v13 }
 0x25c   : > { %3886 = vmatmul.mubr.bf16.gmra.mrb[72].mxu1 %v6439_v14  ;;  %v6512_v14 = vld [vmem:[%s8496_s0 + $0x480] ss:$40 sps:$4 sm:$0xff]  }
 0x25d   : > { %4625 = vmatmul.mubr.bf16.gmra.mrb[8].mxu0 %v6440_v15  ;;  %3893 = vmatprep.mubr.bf16.mxu1 %v6441_v16  ;;  %v6513_v15 = vld [vmem:[%s8496_s0 + $0x9bc] ss:$40 sps:$4 sm:$0xff]  }
 0x25e   : > { %4632 = vmatprep.mubr.bf16.mxu0 %v6443_v17  ;;  %v6515_v17 = vld [vmem:[%s8496_s0 + $0x4d4] ss:$40 sps:$4 sm:$0xff]  }
 0x264   : > { %3894 = vmatmul.mubr.bf16.gmra.mrb[76].mxu1 %v6445_v18 }
 0x265   : > { %4633 = vmatmul.mubr.bf16.gmra.mrb[12].mxu0 %v6446_v19  ;;  %3901 = vmatprep.mubr.bf16.mxu1 %v6447_v20  ;;  %v6517_v20 = vld [vmem:[%s8496_s0 + $0x9b8] ss:$40 sps:$4 sm:$0xff]  }
 0x266   : > { %4640 = vmatprep.mubr.bf16.mxu0 %v6449_v21 }
 0x26c   : > { %3902 = vmatmul.mubr.bf16.gmra.mrb[80].mxu1 %v6451_v22  ;;  %v6518_v22 = vld [vmem:[%s8496_s0 + $0x4d0] ss:$40 sps:$4 sm:$0xff]  }
 0x26d   : > { %4641 = vmatmul.mubr.bf16.gmra.mrb[16].mxu0 %v6452_v23  ;;  %3909 = vmatprep.mubr.bf16.mxu1 %v6453_v24  ;;  %v6521_v23 = vld [vmem:[%s8496_s0 + $0x514] ss:$40 sps:$4 sm:$0xff]  }
 0x26e   : > { %4648 = vmatprep.mubr.bf16.mxu0 %v6455_v25  ;;  %v6522_v25 = vld [vmem:[%s8496_s0 + $0x524] ss:$40 sps:$4 sm:$0xff]  }
 0x274   : > { %3910 = vmatmul.mubr.bf16.gmra.mrb[84].mxu1 %v6457_v26 }
 0x275   : > { %4649 = vmatmul.mubr.bf16.gmra.mrb[20].mxu0 %v6458_v27  ;;  %3917 = vmatprep.mubr.bf16.mxu1 %v6459_v28  ;;  %v6519_v28 = vld [vmem:[%s8496_s0 + $0x510] ss:$40 sps:$4 sm:$0xff]  }
 0x276   : > { %4656 = vmatprep.mubr.bf16.mxu0 %v6461_v29 }
 0x27c   : > { %3918 = vmatmul.mubr.bf16.gmra.mrb[88].mxu1 %v6463_v30  ;;  %v6524_v30 = vld [vmem:[%s8496_s0 + $0x520] ss:$40 sps:$4 sm:$0xff]  }
 0x27d   : > { %4657 = vmatmul.mubr.bf16.gmra.mrb[24].mxu0 %v6464_v31  ;;  %3925 = vmatprep.mubr.bf16.mxu1 %v6465_v33  ;;  %v6525_v31 = vld [vmem:[%s8496_s0 + $0x564] ss:$40 sps:$4 sm:$0xff]  }
 0x27e   : > { %4664 = vmatprep.mubr.bf16.mxu0 %v6467_v34  ;;  %v6527_v34 = vld [vmem:[%s8496_s0 + $0x574] ss:$40 sps:$4 sm:$0xff]  }
 0x284   : > { %3926 = vmatmul.mubr.bf16.gmra.mrb[92].mxu1 %v6469_v35 }
 0x285   : > { %4665 = vmatmul.mubr.bf16.gmra.mrb[28].mxu0 %v6470_v36  ;;  %3933 = vmatprep.mubr.bf16.mxu1 %v6471_v37  ;;  %v6529_v37 = vld [vmem:[%s8496_s0 + $0x560] ss:$40 sps:$4 sm:$0xff]  }
 0x286   : > { %4672 = vmatprep.mubr.bf16.mxu0 %v6473_v38 }
 0x28c   : > { %3934 = vmatmul.mubr.bf16.gmra.mrb[96].mxu1 %v6475_v39  ;;  %v6530_v39 = vld [vmem:[%s8496_s0 + $0x570] ss:$40 sps:$4 sm:$0xff]  }
 0x28d   : > { %4673 = vmatmul.mubr.bf16.gmra.mrb[32].mxu0 %v6476_v40  ;;  %3941 = vmatprep.mubr.bf16.mxu1 %v6477_v41  ;;  %v6531_v40 = vld [vmem:[%s8496_s0 + $0x5b4] ss:$40 sps:$4 sm:$0xff]  }
 0x28e   : > { %4680 = vmatprep.mubr.bf16.mxu0 %v6479_v42  ;;  %v6533_v42 = vld [vmem:[%s8496_s0 + $0x5c4] ss:$40 sps:$4 sm:$0xff]  }
 0x294   : > { %3942 = vmatmul.mubr.bf16.gmra.mrb[100].mxu1 %v6481_v32 }
 0x295   : > { %4681 = vmatmul.mubr.bf16.gmra.mrb[36].mxu0 %v6482_v43  ;;  %3949 = vmatprep.mubr.bf16.mxu1 %v6483_v44  ;;  %v6535_v44 = vld [vmem:[%s8496_s0 + $0x5b0] ss:$40 sps:$4 sm:$0xff]  }
 0x296   : > { %4688 = vmatprep.mubr.bf16.mxu0 %v6485_v45 }
 0x29c   : > { %3950 = vmatmul.mubr.bf16.gmra.mrb[104].mxu1 %v6487_v46  ;;  %v6536_v46 = vld [vmem:[%s8496_s0 + $0x5c0] ss:$40 sps:$4 sm:$0xff]  }
 0x29d   : > { %4689 = vmatmul.mubr.bf16.gmra.mrb[40].mxu0 %v6488_v47  ;;  %3957 = vmatprep.mubr.bf16.mxu1 %v6489_v48  ;;  %v6537_v47 = vld [vmem:[%s8496_s0 + $0x604] ss:$40 sps:$4 sm:$0xff]  }
 0x29e   : > { %4696 = vmatprep.mubr.bf16.mxu0 %v6491_v49  ;;  %v6539_v49 = vld [vmem:[%s8496_s0 + $0x614] ss:$40 sps:$4 sm:$0xff]  }
 0x29f   : > { %v8031_v50 = vpop.f32.mrb[0].mxu1 }
 0x2a0   : > { %v3745_v51 = vpop.f32.mrb[1].mxu1 }
 0x2a1   : > { %v8036_v53 = vpop.f32.mrb[2].mxu1 }
 0x2a2   : > { %v3748_v56 = vpop.f32.mrb[3].mxu1 }
 0x2a3   : > { %v6542_v56 = vld [vmem:[%s8496_s0 + $0x610] ss:$40 sps:$4 sm:$0xff]  }
 0x2a4   : > { %3958 = vmatmul.mubr.bf16.gmra.mrb[108].mxu1 %v6493_v52 }
 0x2a5   : > { %4697 = vmatmul.mubr.bf16.gmra.mrb[44].mxu0 %v6494_v54  ;;  %3965 = vmatprep.mubr.bf16.mxu1 %v6495_v55  ;;  %v6541_v54 = vld [vmem:[%s8496_s0 + $0x600] ss:$40 sps:$4 sm:$0xff]  }
 0x2a6   : > { %4704 = vmatprep.mubr.bf16.mxu0 %v6497_v57  ;;  %v6543_v57 = vld [vmem:[%s8496_s0 + $0x654] ss:$40 sps:$4 sm:$0xff]  }
 0x2a7   : > { %v8047_v58 = vpop.f32.mrb[4].mxu1 }
 0x2a8   : > { %v3753_v59 = vpop.f32.mrb[5].mxu1 }
 0x2a9   : > { %v8052_v61 = vpop.f32.mrb[6].mxu1 }
 0x2aa   : > { %v3756_v0 = vpop.f32.mrb[7].mxu1 }
 0x2ab   : > { %v6547_v0 = vld [vmem:[%s8496_s0 + $0x650] ss:$40 sps:$4 sm:$0xff]  }
 0x2ac   : > { %3966 = vmatmul.mubr.bf16.gmra.mrb[112].mxu1 %v6499_v60  ;;  %v6545_v60 = vld [vmem:[%s8496_s0 + $0x664] ss:$40 sps:$4 sm:$0xff]  }
 0x2ad   : > { %4705 = vmatmul.mubr.bf16.gmra.mrb[48].mxu0 %v6500_v62  ;;  %3973 = vmatprep.mubr.bf16.mxu1 %v6501_v63 }
 0x2ae   : > { %4712 = vmatprep.mubr.bf16.mxu0 %v6503_v1 }
 0x2af   : > { %v8063_v2 = vpop.f32.mrb[8].mxu1 }
 0x2b0   : > { %v3761_v3 = vpop.f32.mrb[9].mxu1 }
 0x2b1   : > { %v8068_v5 = vpop.f32.mrb[10].mxu1  ;;  %v6548_v3 = vld [vmem:[%s8496_s0 + $0x660] ss:$40 sps:$4 sm:$0xff]  }
 0x2b2   : > { %v3764_v8 = vpop.f32.mrb[11].mxu1 }
 0x2b4   : > { %3974 = vmatmul.mubr.bf16.gmra.mrb[116].mxu1 %v6505_v4  ;;  %v6549_v4 = vld [vmem:[%s8496_s0 + $0x6a4] ss:$40 sps:$4 sm:$0xff]  }
 0x2b5   : > { %4713 = vmatmul.mubr.bf16.gmra.mrb[52].mxu0 %v6506_v6  ;;  %3981 = vmatprep.mubr.bf16.mxu1 %v6507_v7  ;;  %v6551_v7 = vld [vmem:[%s8496_s0 + $0x6b4] ss:$40 sps:$4 sm:$0xff]  }
 0x2b6   : > { %4720 = vmatprep.mubr.bf16.mxu0 %v6509_v9 }
 0x2b7   : > { %v8079_v10 = vpop.f32.mrb[12].mxu1 }
 0x2b8   : > { %v3769_v11 = vpop.f32.mrb[13].mxu1 }
 0x2b9   : > { %v8084_v13 = vpop.f32.mrb[14].mxu1  ;;  %v6553_v11 = vld [vmem:[%s8496_s0 + $0x6a0] ss:$40 sps:$4 sm:$0xff]  }
 0x2ba   : > { %v3772_v16 = vpop.f32.mrb[15].mxu1 }
 0x2bc   : > { %3982 = vmatmul.mubr.bf16.gmra.mrb[120].mxu1 %v6511_v12 }
 0x2bd   : > { %4721 = vmatmul.mubr.bf16.gmra.mrb[56].mxu0 %v6512_v14  ;;  %3989 = vmatprep.mubr.bf16.mxu1 %v6513_v15  ;;  %v6554_v14 = vld [vmem:[%s8496_s0 + $0x6b0] ss:$40 sps:$4 sm:$0xff]   ;;  %v6555_v15 = vld [vmem:[%s8496_s0 + $0x6f4] ss:$40 sps:$4 sm:$0xff]  }
 0x2be   : > { %4728 = vmatprep.mubr.bf16.mxu0 %v6515_v17  ;;  %v6557_v17 = vld [vmem:[%s8496_s0 + $0x704] ss:$40 sps:$4 sm:$0xff]  }
 0x2bf   : > { %v8095_v18 = vpop.f32.mrb[16].mxu1 }
 0x2c0   : > { %v3777_v19 = vpop.f32.mrb[17].mxu1 }
 0x2c1   : > { %v8100_v21 = vpop.f32.mrb[18].mxu1 }
 0x2c2   : > { %v3780_v24 = vpop.f32.mrb[19].mxu1 }
 0x2c3   : > { %v6560_v24 = vld [vmem:[%s8496_s0 + $0x700] ss:$40 sps:$4 sm:$0xff]  }
 0x2c4   : > { %3990 = vmatmul.mubr.bf16.gmra.mrb[124].mxu1 %v6517_v20 }
 0x2c5   : > { %4729 = vmatmul.mubr.bf16.gmra.mrb[60].mxu0 %v6518_v22  ;;  %4158 = vmatprep.mubr.bf16.mxu1 %v6521_v23  ;;  %v6559_v22 = vld [vmem:[%s8496_s0 + $0x6f0] ss:$40 sps:$4 sm:$0xff]  }
 0x2c6   : > { %4736 = vmatprep.mubr.bf16.mxu0 %v6522_v25  ;;  %v6561_v25 = vld [vmem:[%s8496_s0 + $0x744] ss:$40 sps:$4 sm:$0xff]  }
 0x2c7   : > { %v8111_v26 = vpop.f32.mrb[20].mxu1 }
 0x2c8   : > { %v3785_v27 = vpop.f32.mrb[21].mxu1 }
 0x2c9   : > { %v8116_v29 = vpop.f32.mrb[22].mxu1 }
 0x2ca   : > { %v3788_v33 = vpop.f32.mrb[23].mxu1 }
 0x2cb   : > { %v6565_v33 = vld [vmem:[%s8496_s0 + $0x740] ss:$40 sps:$4 sm:$0xff]  }
 0x2cc   : > { %4159 = vmatmul.mubr.bf16.vlgmr.msra.gmra.mrb[64].mxu1 %v6519_v28  ;;  %v6563_v28 = vld [vmem:[%s8496_s0 + $0x754] ss:$40 sps:$4 sm:$0xff]  }
 0x2cd   : > { %4737 = vmatmul.mubr.bf16.gmra.mrb[64].mxu0 %v6524_v30  ;;  %4166 = vmatprep.mubr.bf16.mxu1 %v6525_v31 }
 0x2ce   : > { %4744 = vmatprep.mubr.bf16.mxu0 %v6527_v34 }
 0x2cf   : > { %v8127_v35 = vpop.f32.mrb[24].mxu1 }
 0x2d0   : > { %v3793_v36 = vpop.f32.mrb[25].mxu1 }
 0x2d1   : > { %v8132_v38 = vpop.f32.mrb[26].mxu1  ;;  %v6566_v36 = vld [vmem:[%s8496_s0 + $0x750] ss:$40 sps:$4 sm:$0xff]  }
 0x2d2   : > { %v3796_v41 = vpop.f32.mrb[27].mxu1 }
 0x2d4   : > { %4167 = vmatmul.mubr.bf16.gmra.mrb[68].mxu1 %v6529_v37  ;;  %v6567_v37 = vld [vmem:[%s8496_s0 + $0x794] ss:$40 sps:$4 sm:$0xff]  }
 0x2d5   : > { %4745 = vmatmul.mubr.bf16.gmra.mrb[68].mxu0 %v6530_v39  ;;  %4174 = vmatprep.mubr.bf16.mxu1 %v6531_v40  ;;  %v6569_v40 = vld [vmem:[%s8496_s0 + $0x7a4] ss:$40 sps:$4 sm:$0xff]  }
 0x2d6   : > { %4752 = vmatprep.mubr.bf16.mxu0 %v6533_v42 }
 0x2d7   : > { %v8143_v32 = vpop.f32.mrb[28].mxu1 }
 0x2d8   : > { %v3801_v43 = vpop.f32.mrb[29].mxu1 }
 0x2d9   : > { %v8148_v45 = vpop.f32.mrb[30].mxu1  ;;  %v6571_v43 = vld [vmem:[%s8496_s0 + $0x790] ss:$40 sps:$4 sm:$0xff]  }
 0x2da   : > { %v3804_v48 = vpop.f32.mrb[31].mxu1 }
 0x2dc   : > { %4175 = vmatmul.mubr.bf16.gmra.mrb[72].mxu1 %v6535_v44 }
 0x2dd   : > { %4753 = vmatmul.mubr.bf16.gmra.mrb[72].mxu0 %v6536_v46  ;;  %4182 = vmatprep.mubr.bf16.mxu1 %v6537_v47  ;;  %v6572_v46 = vld [vmem:[%s8496_s0 + $0x7a0] ss:$40 sps:$4 sm:$0xff]   ;;  %v6573_v47 = vld [vmem:[%s8496_s0 + $0x7e4] ss:$40 sps:$4 sm:$0xff]  }
 0x2de   : > { %4760 = vmatprep.mubr.bf16.mxu0 %v6539_v49  ;;  %v6575_v49 = vld [vmem:[%s8496_s0 + $0x7f4] ss:$40 sps:$4 sm:$0xff]  }
 0x2df   : > { %v8159_v51 = vpop.f32.mrb[32].mxu1 }
 0x2e0   : > { %v3809_v52 = vpop.f32.mrb[33].mxu1 }
 0x2e1   : > { %v8164_v55 = vpop.f32.mrb[34].mxu1 }
 0x2e2   : > { %v3812_v59 = vpop.f32.mrb[35].mxu1 }
 0x2e3   : > { %v6578_v59 = vld [vmem:[%s8496_s0 + $0x7f0] ss:$40 sps:$4 sm:$0xff]  }
 0x2e4   : > { %4183 = vmatmul.mubr.bf16.gmra.mrb[76].mxu1 %v6541_v54 }
 0x2e5   : > { %4761 = vmatmul.mubr.bf16.gmra.mrb[76].mxu0 %v6542_v56  ;;  %4190 = vmatprep.mubr.bf16.mxu1 %v6543_v57  ;;  %v6577_v56 = vld [vmem:[%s8496_s0 + $0x7e0] ss:$40 sps:$4 sm:$0xff]  }
 0x2e6   : > { %4768 = vmatprep.mubr.bf16.mxu0 %v6545_v60  ;;  %v6579_v60 = vld [vmem:[%s8496_s0 + $0x834] ss:$40 sps:$4 sm:$0xff]  }
 0x2e7   : > { %v8175_v62 = vpop.f32.mrb[36].mxu1 }
 0x2e8   : > { %v3817_v63 = vpop.f32.mrb[37].mxu1 }
 0x2e9   : > { %v8180_v1 = vpop.f32.mrb[38].mxu1 }
 0x2ea   : > { %v3820_v6 = vpop.f32.mrb[39].mxu1 }
 0x2eb   : > { %v6583_v6 = vld [vmem:[%s8496_s0 + $0x830] ss:$40 sps:$4 sm:$0xff]  }
 0x2ec   : > { %4191 = vmatmul.mubr.bf16.gmra.mrb[80].mxu1 %v6547_v0  ;;  %v6581_v0 = vld [vmem:[%s8496_s0 + $0x844] ss:$40 sps:$4 sm:$0xff]  }
 0x2ed   : > { %4769 = vmatmul.mubr.bf16.gmra.mrb[80].mxu0 %v6548_v3  ;;  %4198 = vmatprep.mubr.bf16.mxu1 %v6549_v4 }
 0x2ee   : > { %4776 = vmatprep.mubr.bf16.mxu0 %v6551_v7 }
 0x2ef   : > { %v8191_v8 = vpop.f32.mrb[40].mxu1 }
 0x2f0   : > { %v3825_v9 = vpop.f32.mrb[41].mxu1 }
 0x2f1   : > { %v8196_v12 = vpop.f32.mrb[42].mxu1  ;;  %v6584_v9 = vld [vmem:[%s8496_s0 + $0x840] ss:$40 sps:$4 sm:$0xff]  }
 0x2f2   : > { %v3828_v16 = vpop.f32.mrb[43].mxu1 }
 0x2f4   : > { %4199 = vmatmul.mubr.bf16.gmra.mrb[84].mxu1 %v6553_v11  ;;  %v6585_v11 = vld [vmem:[%s8496_s0 + $0x884] ss:$40 sps:$4 sm:$0xff]  }
 0x2f5   : > { %4777 = vmatmul.mubr.bf16.gmra.mrb[84].mxu0 %v6554_v14  ;;  %4206 = vmatprep.mubr.bf16.mxu1 %v6555_v15  ;;  %v6587_v15 = vld [vmem:[%s8496_s0 + $0x894] ss:$40 sps:$4 sm:$0xff]  }
 0x2f6   : > { %4784 = vmatprep.mubr.bf16.mxu0 %v6557_v17  ;;  %v6589_v17 = vld [vmem:[%s8496_s0 + $0x880] ss:$40 sps:$4 sm:$0xff]  }
 0x2f7   : > { %v8207_v19 = vpop.f32.mrb[44].mxu1 }
 0x2f8   : > { %v3833_v20 = vpop.f32.mrb[45].mxu1 }
 0x2f9   : > { %v8212_v23 = vpop.f32.mrb[46].mxu1 }
 0x2fa   : > { %v3836_v27 = vpop.f32.mrb[47].mxu1 }
 0x2fc   : > { %4207 = vmatmul.mubr.bf16.gmra.mrb[88].mxu1 %v6559_v22 }
 0x2fd   : > { %4785 = vmatmul.mubr.bf16.gmra.mrb[88].mxu0 %v6560_v24  ;;  %4214 = vmatprep.mubr.bf16.mxu1 %v6561_v25  ;;  %v6590_v24 = vld [vmem:[%s8496_s0 + $0x890] ss:$40 sps:$4 sm:$0xff]   ;;  %v6591_v25 = vld [vmem:[%s8496_s0 + $0x8d4] ss:$40 sps:$4 sm:$0xff]  }
 0x2fe   : > { %4792 = vmatprep.mubr.bf16.mxu0 %v6563_v28  ;;  %v6593_v28 = vld [vmem:[%s8496_s0 + $0x8e4] ss:$40 sps:$4 sm:$0xff]  }
 0x2ff   : > { %v8223_v30 = vpop.f32.mrb[48].mxu1 }
 0x300   : > { %v3841_v31 = vpop.f32.mrb[49].mxu1 }
 0x301   : > { %v8228_v34 = vpop.f32.mrb[50].mxu1 }
 0x302   : > { %v3844_v39 = vpop.f32.mrb[51].mxu1 }
 0x303   : > { %v6595_v39 = vld [vmem:[%s8496_s0 + $0x8d0] ss:$40 sps:$4 sm:$0xff]  }
 0x304   : > { %4215 = vmatmul.mubr.bf16.gmra.mrb[92].mxu1 %v6565_v33 }
 0x305   : > { %4793 = vmatmul.mubr.bf16.gmra.mrb[92].mxu0 %v6566_v36  ;;  %4222 = vmatprep.mubr.bf16.mxu1 %v6567_v37 }
 0x306   : > { %4800 = vmatprep.mubr.bf16.mxu0 %v6569_v40 }
 0x307   : > { %v8239_v41 = vpop.f32.mrb[52].mxu1 }
 0x308   : > { %v3849_v42 = vpop.f32.mrb[53].mxu1 }
 0x309   : > { %v8244_v44 = vpop.f32.mrb[54].mxu1  ;;  %v6596_v42 = vld [vmem:[%s8496_s0 + $0x8e0] ss:$40 sps:$4 sm:$0xff]  }
 0x30a   : > { %v3852_v48 = vpop.f32.mrb[55].mxu1 }
 0x30c   : > { %4223 = vmatmul.mubr.bf16.gmra.mrb[96].mxu1 %v6571_v43  ;;  %v6597_v43 = vld [vmem:[%s8496_s0 + $0x924] ss:$40 sps:$4 sm:$0xff]  }
 0x30d   : > { %4801 = vmatmul.mubr.bf16.gmra.mrb[96].mxu0 %v6572_v46  ;;  %4230 = vmatprep.mubr.bf16.mxu1 %v6573_v47  ;;  %v6599_v47 = vld [vmem:[%s8496_s0 + $0x934] ss:$40 sps:$4 sm:$0xff]  }
 0x30e   : > { %4808 = vmatprep.mubr.bf16.mxu0 %v6575_v49 }
 0x30f   : > { %v8255_v52 = vpop.f32.mrb[56].mxu1 }
 0x310   : > { %v3857_v54 = vpop.f32.mrb[57].mxu1 }
 0x311   : > { %v8260_v57 = vpop.f32.mrb[58].mxu1 }
 0x312   : > { %v3860_v63 = vpop.f32.mrb[59].mxu1 }
 0x314   : > { %4231 = vmatmul.mubr.bf16.gmra.mrb[100].mxu1 %v6577_v56 }
 0x315   : > { %4809 = vmatmul.mubr.bf16.gmra.mrb[100].mxu0 %v6578_v59  ;;  %4238 = vmatprep.mubr.bf16.mxu1 %v6579_v60  ;;  %v6601_v59 = vld [vmem:[%s8496_s0 + $0x920] ss:$40 sps:$4 sm:$0xff]  }
 0x316   : > { %4816 = vmatprep.mubr.bf16.mxu0 %v6581_v0  ;;  %v6603_v0 = vld [vmem:[%s8496_s0 + $0x974] ss:$40 sps:$4 sm:$0xff]  }
 0x317   : > { %v8271_v3 = vpop.f32.mrb[60].mxu1 }
 0x318   : > { %v3865_v4 = vpop.f32.mrb[61].mxu1 }
 0x319   : > { %v8276_v7 = vpop.f32.mrb[62].mxu1 }
 0x31a   : > { %v3868_v14 = vpop.f32.mrb[63].mxu1 }
 0x31c   : > { %4239 = vmatmul.mubr.bf16.gmra.mrb[104].mxu1 %v6583_v6  ;;  %v6605_v6 = vld [vmem:[%s8496_s0 + $0x984] ss:$40 sps:$4 sm:$0xff]  }
 0x31d   : > { %4817 = vmatmul.mubr.bf16.gmra.mrb[104].mxu0 %v6584_v9  ;;  %4246 = vmatprep.mubr.bf16.mxu1 %v6585_v11 }
 0x31e   : > { %4824 = vmatprep.mubr.bf16.mxu0 %v6587_v15 }
 0x320   : > { %v4610_v16 = vpop.f32.mrb[0].mxu0 }
 0x321   : > { %v5546_v20 = vadd.f32 %v4610_v16, %v8031_v50  ;;  %v4612_v22 = vpop.f32.mrb[1].mxu0  ;;  %v6607_v16 = vld [vmem:[%s8496_s0 + $0x970] ss:$40 sps:$4 sm:$0xff]  }
 0x322   : > { %v4613_v27 = vpop.f32.mrb[2].mxu0  ;;  %v6609_v22 = vld [vmem:[%s8496_s0 + $0x9c4] ss:$40 sps:$4 sm:$0xff]  }
 0x323   : > { %v4865_v31 = vmax.f32 %v5546_v20, 0.0  ;;  %v5547_v33 = vadd.f32 %v4613_v27, %v8036_v53  ;;  %v4615_v36 = vpop.f32.mrb[3].mxu0 }
 0x324   : > { %4247 = vmatmul.mubr.bf16.gmra.mrb[108].mxu1 %v6589_v17  ;;  %v6613_v36 = vld [vmem:[%s8496_s0 + $0x9c0] ss:$40 sps:$4 sm:$0xff]  }
 0x325   : > { %4929 = vst [vmem:[%s8302_s15] sm:$0xff] %v4865_v31  ;;  %v4866_v50 = vmax.f32 %v5547_v33, 0.0  ;;  %4825 = vmatmul.mubr.bf16.gmra.mrb[108].mxu0 %v6590_v24  ;;  %4254 = vmatprep.mubr.bf16.mxu1 %v6591_v25  ;;  %v6611_v25 = vld [vmem:[%s8496_s0 + $0x9d4] ss:$40 sps:$4 sm:$0xff]  }
 0x326   : > { %4832 = vmatprep.mubr.bf16.mxu0 %v6593_v28 }
 0x327   : > { %4930 = vst [vmem:[%s8302_s15 + $0x8] sm:$0xff] %v4866_v50 }
 0x328   : > { %v4618_v37 = vpop.f32.mrb[4].mxu0 }
 0x329   : > { %v5548_v53 = vadd.f32 %v4618_v37, %v8047_v58  ;;  %v4620_v40 = vpop.f32.mrb[5].mxu0 }
 0x32a   : > { %v4621_v46 = vpop.f32.mrb[6].mxu0 }
 0x32b   : > { %v4867_v48 = vmax.f32 %v5548_v53, 0.0  ;;  %v5549_v49 = vadd.f32 %v4621_v46, %v8052_v61  ;;  %v4623_v54 = vpop.f32.mrb[7].mxu0  ;;  %v6602_v61 = vld [vmem:[%s8496_s0 + $0x930] ss:$40 sps:$4 sm:$0xff]  }
 0x32c   : > { %4255 = vmatmul.mubr.bf16.gmra.mrb[112].mxu1 %v6595_v39 }
 0x32d   : > { %4931 = vst [vmem:[%s8302_s15 + $0x10] sm:$0xff] %v4867_v48  ;;  %v4868_v58 = vmax.f32 %v5549_v49, 0.0  ;;  %4833 = vmatmul.mubr.bf16.gmra.mrb[112].mxu0 %v6596_v42  ;;  %4262 = vmatprep.mubr.bf16.mxu1 %v6597_v43 }
 0x32e   : > { %4840 = vmatprep.mubr.bf16.mxu0 %v6599_v47 }
 0x32f   : > { %4932 = vst [vmem:[%s8302_s15 + $0x18] sm:$0xff] %v4868_v58 }
 0x330   : > { %v4626_v56 = vpop.f32.mrb[8].mxu0 }
 0x331   : > { %v5550_v60 = vadd.f32 %v4626_v56, %v8063_v2  ;;  %v4628_v63 = vpop.f32.mrb[9].mxu0 }
 0x332   : > { %v4629_v4 = vpop.f32.mrb[10].mxu0 }
 0x333   : > { %v4869_v9 = vmax.f32 %v5550_v60, 0.0  ;;  %v5551_v11 = vadd.f32 %v4629_v4, %v8068_v5  ;;  %v4631_v14 = vpop.f32.mrb[11].mxu0  ;;  %v6608_v5 = vld [vmem:[%s8496_s0 + $0x980] ss:$40 sps:$4 sm:$0xff]  }
 0x334   : > { %4263 = vmatmul.mubr.bf16.gmra.mrb[116].mxu1 %v6601_v59 }
 0x335   : > { %4933 = vst [vmem:[%s8302_s15 + $0x20] sm:$0xff] %v4869_v9  ;;  %v4870_v2 = vmax.f32 %v5551_v11, 0.0  ;;  %4841 = vmatmul.mubr.bf16.gmra.mrb[116].mxu0 %v6602_v61  ;;  %4270 = vmatprep.mubr.bf16.mxu1 %v6603_v0 }
 0x336   : > { %4848 = vmatprep.mubr.bf16.mxu0 %v6605_v6 }
 0x337   : > { %4934 = vst [vmem:[%s8302_s15 + $0x28] sm:$0xff] %v4870_v2 }
 0x338   : > { %v4634_v15 = vpop.f32.mrb[12].mxu0 }
 0x339   : > { %v5552_v17 = vadd.f32 %v4634_v15, %v8079_v10  ;;  %v4636_v20 = vpop.f32.mrb[13].mxu0 }
 0x33a   : > { %v4637_v24 = vpop.f32.mrb[14].mxu0 }
 0x33b   : > { %v4871_v27 = vmax.f32 %v5552_v17, 0.0  ;;  %v5553_v28 = vadd.f32 %v4637_v24, %v8084_v13  ;;  %v4639_v31 = vpop.f32.mrb[15].mxu0  ;;  %v6614_v13 = vld [vmem:[%s8496_s0 + $0x9d0] ss:$40 sps:$4 sm:$0xff]  }
 0x33c   : > { %4271 = vmatmul.mubr.bf16.gmra.mrb[120].mxu1 %v6607_v16 }
 0x33d   : > { %4935 = vst [vmem:[%s8302_s15 + $0x30] sm:$0xff] %v4871_v27  ;;  %v4872_v10 = vmax.f32 %v5553_v28, 0.0  ;;  %4849 = vmatmul.mubr.bf16.gmra.mrb[120].mxu0 %v6608_v5  ;;  %4278 = vmatprep.mubr.bf16.mxu1 %v6609_v22 }
 0x33e   : > { %4856 = vmatprep.mubr.bf16.mxu0 %v6611_v25 }
 0x33f   : > { %4936 = vst [vmem:[%s8302_s15 + $0x38] sm:$0xff] %v4872_v10 }
 0x340   : > { %v4642_v33 = vpop.f32.mrb[16].mxu0 }
 0x341   : > { %v5554_v50 = vadd.f32 %v4642_v33, %v8095_v18  ;;  %v4644_v37 = vpop.f32.mrb[17].mxu0 }
 0x342   : > { %v4645_v39 = vpop.f32.mrb[18].mxu0 }
 0x343   : > { %v4873_v53 = vmax.f32 %v5554_v50, 0.0  ;;  %v5555_v40 = vadd.f32 %v4645_v39, %v8100_v21  ;;  %v4647_v42 = vpop.f32.mrb[19].mxu0 }
 0x344   : > { %4279 = vmatmul.mubr.bf16.gmra.mrb[124].mxu1 %v6613_v36 }
 0x345   : > { %4937 = vst [vmem:[%s8302_s15 + $0x40] sm:$0xff] %v4873_v53  ;;  %v4874_v43 = vmax.f32 %v5555_v40, 0.0  ;;  %4857 = vmatmul.mubr.bf16.gmra.mrb[124].mxu0 %v6614_v13 }
 0x347   : > { %4938 = vst [vmem:[%s8302_s15 + $0x48] sm:$0xff] %v4874_v43 }
 0x348   : > { %v4650_v46 = vpop.f32.mrb[20].mxu0 }
 0x349   : > { %v5556_v18 = vadd.f32 %v4650_v46, %v8111_v26  ;;  %v4652_v47 = vpop.f32.mrb[21].mxu0 }
 0x34a   : > { %v4653_v48 = vpop.f32.mrb[22].mxu0 }
 0x34b   : > { %v4875_v49 = vmax.f32 %v5556_v18, 0.0  ;;  %v5557_v54 = vadd.f32 %v4653_v48, %v8116_v29  ;;  %v4655_v58 = vpop.f32.mrb[23].mxu0 }
 0x34d   : > { %4939 = vst [vmem:[%s8302_s15 + $0x50] sm:$0xff] %v4875_v49  ;;  %v4876_v21 = vmax.f32 %v5557_v54, 0.0 }
 0x34f   : > { %4940 = vst [vmem:[%s8302_s15 + $0x58] sm:$0xff] %v4876_v21 }
 0x350   : > { %v4658_v56 = vpop.f32.mrb[24].mxu0 }
 0x351   : > { %v5558_v59 = vadd.f32 %v4658_v56, %v8127_v35  ;;  %v4660_v60 = vpop.f32.mrb[25].mxu0 }
 0x352   : > { %v4661_v63 = vpop.f32.mrb[26].mxu0 }
 0x353   : > { %v4877_v61 = vmax.f32 %v5558_v59, 0.0  ;;  %v5559_v26 = vadd.f32 %v4661_v63, %v8132_v38  ;;  %v4663_v0 = vpop.f32.mrb[27].mxu0 }
 0x355   : > { %4941 = vst [vmem:[%s8302_s15 + $0x60] sm:$0xff] %v4877_v61  ;;  %v4878_v4 = vmax.f32 %v5559_v26, 0.0 }
 0x357   : > { %4942 = vst [vmem:[%s8302_s15 + $0x68] sm:$0xff] %v4878_v4 }
 0x358   : > { %v4666_v6 = vpop.f32.mrb[28].mxu0 }
 0x359   : > { %v5560_v29 = vadd.f32 %v4666_v6, %v8143_v32  ;;  %v4668_v9 = vpop.f32.mrb[29].mxu0 }
 0x35a   : > { %v4669_v11 = vpop.f32.mrb[30].mxu0 }
 0x35b   : > { %v4879_v14 = vmax.f32 %v5560_v29, 0.0  ;;  %v5561_v35 = vadd.f32 %v4669_v11, %v8148_v45  ;;  %v4671_v2 = vpop.f32.mrb[31].mxu0 }
 0x35d   : > { %4943 = vst [vmem:[%s8302_s15 + $0x70] sm:$0xff] %v4879_v14  ;;  %v4880_v15 = vmax.f32 %v5561_v35, 0.0 }
 0x35f   : > { %4944 = vst [vmem:[%s8302_s15 + $0x78] sm:$0xff] %v4880_v15 }
 0x360   : > { %v4674_v16 = vpop.f32.mrb[32].mxu0 }
 0x361   : > { %v5562_v38 = vadd.f32 %v4674_v16, %v8159_v51  ;;  %v4676_v17 = vpop.f32.mrb[33].mxu0 }
 0x362   : > { %v4677_v20 = vpop.f32.mrb[34].mxu0 }
 0x363   : > { %v4881_v5 = vmax.f32 %v5562_v38, 0.0  ;;  %v5563_v32 = vadd.f32 %v4677_v20, %v8164_v55  ;;  %v4679_v22 = vpop.f32.mrb[35].mxu0 }
 0x365   : > { %4945 = vst [vmem:[%s8302_s15 + $0x80] sm:$0xff] %v4881_v5  ;;  %v4882_v24 = vmax.f32 %v5563_v32, 0.0 }
 0x367   : > { %4946 = vst [vmem:[%s8302_s15 + $0x88] sm:$0xff] %v4882_v24 }
 0x368   : > { %v4682_v25 = vpop.f32.mrb[36].mxu0 }
 0x369   : > { %v5564_v45 = vadd.f32 %v4682_v25, %v8175_v62  ;;  %v4684_v27 = vpop.f32.mrb[37].mxu0 }
 0x36a   : > { %v4685_v28 = vpop.f32.mrb[38].mxu0 }
 0x36b   : > { %v4883_v31 = vmax.f32 %v5564_v45, 0.0  ;;  %v5565_v51 = vadd.f32 %v4685_v28, %v8180_v1  ;;  %v4687_v10 = vpop.f32.mrb[39].mxu0 }
 0x36d   : > { %4947 = vst [vmem:[%s8302_s15 + $0x90] sm:$0xff] %v4883_v31  ;;  %v4884_v33 = vmax.f32 %v5565_v51, 0.0 }
 0x36f   : > { %4948 = vst [vmem:[%s8302_s15 + $0x98] sm:$0xff] %v4884_v33 }
 0x370   : > { %v4690_v36 = vpop.f32.mrb[40].mxu0 }
 0x371   : > { %v5566_v55 = vadd.f32 %v4690_v36, %v8191_v8  ;;  %v4692_v50 = vpop.f32.mrb[41].mxu0 }
 0x372   : > { %v4693_v37 = vpop.f32.mrb[42].mxu0 }
 0x373   : > { %v4885_v13 = vmax.f32 %v5566_v55, 0.0  ;;  %v5567_v62 = vadd.f32 %v4693_v37, %v8196_v12  ;;  %v4695_v39 = vpop.f32.mrb[43].mxu0 }
 0x375   : > { %4949 = vst [vmem:[%s8302_s15 + $0xa0] sm:$0xff] %v4885_v13  ;;  %v4886_v53 = vmax.f32 %v5567_v62, 0.0 }
 0x377   : > { %4950 = vst [vmem:[%s8302_s15 + $0xa8] sm:$0xff] %v4886_v53 }
 0x378   : > { %v4698_v40 = vpop.f32.mrb[44].mxu0 }
 0x379   : > { %v5568_v1 = vadd.f32 %v4698_v40, %v8207_v19  ;;  %v4700_v42 = vpop.f32.mrb[45].mxu0 }
 0x37a   : > { %v4701_v43 = vpop.f32.mrb[46].mxu0 }
 0x37b   : > { %v4887_v46 = vmax.f32 %v5568_v1, 0.0  ;;  %v5569_v8 = vadd.f32 %v4701_v43, %v8212_v23  ;;  %v4703_v18 = vpop.f32.mrb[47].mxu0 }
 0x37d   : > { %4951 = vst [vmem:[%s8302_s15 + $0xb0] sm:$0xff] %v4887_v46  ;;  %v4888_v47 = vmax.f32 %v5569_v8, 0.0 }
 0x37f   : > { %4952 = vst [vmem:[%s8302_s15 + $0xb8] sm:$0xff] %v4888_v47 }
 0x380   : > { %v4706_v48 = vpop.f32.mrb[48].mxu0 }
 0x381   : > { %v5570_v12 = vadd.f32 %v4706_v48, %v8223_v30  ;;  %v4708_v49 = vpop.f32.mrb[49].mxu0 }
 0x382   : > { %v4709_v54 = vpop.f32.mrb[50].mxu0 }
 0x383   : > { %v4889_v58 = vmax.f32 %v5570_v12, 0.0  ;;  %v5571_v19 = vadd.f32 %v4709_v54, %v8228_v34  ;;  %v4711_v21 = vpop.f32.mrb[51].mxu0 }
 0x385   : > { %4953 = vst [vmem:[%s8302_s15 + $0xc0] sm:$0xff] %v4889_v58  ;;  %v4890_v56 = vmax.f32 %v5571_v19, 0.0 }
 0x387   : > { %4954 = vst [vmem:[%s8302_s15 + $0xc8] sm:$0xff] %v4890_v56 }
 0x388   : > { %v4714_v59 = vpop.f32.mrb[52].mxu0 }
 0x389   : > { %v5572_v23 = vadd.f32 %v4714_v59, %v8239_v41  ;;  %v4716_v60 = vpop.f32.mrb[53].mxu0 }
 0x38a   : > { %v4717_v63 = vpop.f32.mrb[54].mxu0 }
 0x38b   : > { %v4891_v61 = vmax.f32 %v5572_v23, 0.0  ;;  %v5573_v30 = vadd.f32 %v4717_v63, %v8244_v44  ;;  %v4719_v26 = vpop.f32.mrb[55].mxu0 }
 0x38d   : > { %4955 = vst [vmem:[%s8302_s15 + $0xd0] sm:$0xff] %v4891_v61  ;;  %v4892_v0 = vmax.f32 %v5573_v30, 0.0 }
 0x38f   : > { %4956 = vst [vmem:[%s8302_s15 + $0xd8] sm:$0xff] %v4892_v0 }
 0x390   : > { %v4722_v4 = vpop.f32.mrb[56].mxu0 }
 0x391   : > { %v5574_v34 = vadd.f32 %v4722_v4, %v8255_v52  ;;  %v4724_v6 = vpop.f32.mrb[57].mxu0 }
 0x392   : > { %v4725_v29 = vpop.f32.mrb[58].mxu0 }
 0x393   : > { %v4893_v9 = vmax.f32 %v5574_v34, 0.0  ;;  %v5575_v41 = vadd.f32 %v4725_v29, %v8260_v57  ;;  %v4727_v11 = vpop.f32.mrb[59].mxu0 }
 0x395   : > { %4957 = vst [vmem:[%s8302_s15 + $0xe0] sm:$0xff] %v4893_v9  ;;  %v4894_v14 = vmax.f32 %v5575_v41, 0.0 }
 0x397   : > { %4958 = vst [vmem:[%s8302_s15 + $0xe8] sm:$0xff] %v4894_v14 }
 0x398   : > { %v4730_v35 = vpop.f32.mrb[60].mxu0 }
 0x399   : > { %v5576_v44 = vadd.f32 %v4730_v35, %v8271_v3  ;;  %v4732_v2 = vpop.f32.mrb[61].mxu0 }
 0x39a   : > { %v4733_v15 = vpop.f32.mrb[62].mxu0 }
 0x39b   : > { %v4895_v16 = vmax.f32 %v5576_v44, 0.0  ;;  %v5577_v38 = vadd.f32 %v4733_v15, %v8276_v7  ;;  %v4735_v52 = vpop.f32.mrb[63].mxu0 }
 0x39d   : > { %4959 = vst [vmem:[%s8302_s15 + $0xf0] sm:$0xff] %v4895_v16  ;;  %v4896_v17 = vmax.f32 %v5577_v38, 0.0 }
 0x39f   : > { %4960 = vst [vmem:[%s8302_s15 + $0xf8] sm:$0xff] %v4896_v17  ;;  %v4160_v20 = vpop.f32.mrb[64].mxu1 }
 0x3a0   : > { %v4738_v57 = vpop.f32.mrb[64].mxu0  ;;  %v4162_v5 = vpop.f32.mrb[65].mxu1 }
 0x3a1   : > { %v5578_v32 = vadd.f32 %v4738_v57, %v4160_v20  ;;  %v4740_v22 = vpop.f32.mrb[65].mxu0  ;;  %v4163_v24 = vpop.f32.mrb[66].mxu1 }
 0x3a2   : > { %v4741_v25 = vpop.f32.mrb[66].mxu0  ;;  %v4165_v45 = vpop.f32.mrb[67].mxu1 }
 0x3a3   : > { %v4897_v3 = vmax.f32 %v5578_v32, 0.0  ;;  %v5579_v27 = vadd.f32 %v4741_v25, %v4163_v24  ;;  %v4743_v28 = vpop.f32.mrb[67].mxu0 }
 0x3a5   : > { %4961 = vst [vmem:[%s8302_s15 + $0x100] sm:$0xff] %v4897_v3  ;;  %v4898_v7 = vmax.f32 %v5579_v27, 0.0 }
 0x3a7   : > { %4962 = vst [vmem:[%s8302_s15 + $0x108] sm:$0xff] %v4898_v7  ;;  %v4168_v31 = vpop.f32.mrb[68].mxu1 }
 0x3a8   : > { %v4746_v51 = vpop.f32.mrb[68].mxu0  ;;  %v4170_v10 = vpop.f32.mrb[69].mxu1 }
 0x3a9   : > { %v5580_v33 = vadd.f32 %v4746_v51, %v4168_v31  ;;  %v4748_v36 = vpop.f32.mrb[69].mxu0  ;;  %v4171_v55 = vpop.f32.mrb[70].mxu1 }
 0x3aa   : > { %v4749_v50 = vpop.f32.mrb[70].mxu0  ;;  %v4173_v37 = vpop.f32.mrb[71].mxu1 }
 0x3ab   : > { %v4899_v13 = vmax.f32 %v5580_v33, 0.0  ;;  %v5581_v62 = vadd.f32 %v4749_v50, %v4171_v55  ;;  %v4751_v39 = vpop.f32.mrb[71].mxu0 }
 0x3ad   : > { %4963 = vst [vmem:[%s8302_s15 + $0x110] sm:$0xff] %v4899_v13  ;;  %v4900_v53 = vmax.f32 %v5581_v62, 0.0 }
 0x3af   : > { %4964 = vst [vmem:[%s8302_s15 + $0x118] sm:$0xff] %v4900_v53  ;;  %v4176_v40 = vpop.f32.mrb[72].mxu1 }
 0x3b0   : > { %v4754_v1 = vpop.f32.mrb[72].mxu0  ;;  %v4178_v42 = vpop.f32.mrb[73].mxu1 }
 0x3b1   : > { %v5582_v43 = vadd.f32 %v4754_v1, %v4176_v40  ;;  %v4756_v46 = vpop.f32.mrb[73].mxu0  ;;  %v4179_v8 = vpop.f32.mrb[74].mxu1 }
 0x3b2   : > { %v4757_v18 = vpop.f32.mrb[74].mxu0  ;;  %v4181_v47 = vpop.f32.mrb[75].mxu1 }
 0x3b3   : > { %v4901_v48 = vmax.f32 %v5582_v43, 0.0  ;;  %v5583_v12 = vadd.f32 %v4757_v18, %v4179_v8  ;;  %v4759_v49 = vpop.f32.mrb[75].mxu0 }
 0x3b5   : > { %4965 = vst [vmem:[%s8302_s15 + $0x120] sm:$0xff] %v4901_v48  ;;  %v4902_v54 = vmax.f32 %v5583_v12, 0.0 }
 0x3b7   : > { %4966 = vst [vmem:[%s8302_s15 + $0x128] sm:$0xff] %v4902_v54  ;;  %v4184_v58 = vpop.f32.mrb[76].mxu1 }
 0x3b8   : > { %v4762_v19 = vpop.f32.mrb[76].mxu0  ;;  %v4186_v21 = vpop.f32.mrb[77].mxu1 }
 0x3b9   : > { %v5584_v56 = vadd.f32 %v4762_v19, %v4184_v58  ;;  %v4764_v59 = vpop.f32.mrb[77].mxu0  ;;  %v4187_v23 = vpop.f32.mrb[78].mxu1 }
 0x3ba   : > { %v4765_v60 = vpop.f32.mrb[78].mxu0  ;;  %v4189_v63 = vpop.f32.mrb[79].mxu1 }
 0x3bb   : > { %v4903_v61 = vmax.f32 %v5584_v56, 0.0  ;;  %v5585_v30 = vadd.f32 %v4765_v60, %v4187_v23  ;;  %v4767_v26 = vpop.f32.mrb[79].mxu0 }
 0x3bd   : > { %4967 = vst [vmem:[%s8302_s15 + $0x130] sm:$0xff] %v4903_v61  ;;  %v4904_v0 = vmax.f32 %v5585_v30, 0.0 }
 0x3bf   : > { %4968 = vst [vmem:[%s8302_s15 + $0x138] sm:$0xff] %v4904_v0  ;;  %v4192_v4 = vpop.f32.mrb[80].mxu1 }
 0x3c0   : > { %v4770_v34 = vpop.f32.mrb[80].mxu0  ;;  %v4194_v6 = vpop.f32.mrb[81].mxu1 }
 0x3c1   : > { %v5586_v29 = vadd.f32 %v4770_v34, %v4192_v4  ;;  %v4772_v9 = vpop.f32.mrb[81].mxu0  ;;  %v4195_v41 = vpop.f32.mrb[82].mxu1 }
 0x3c2   : > { %v4773_v11 = vpop.f32.mrb[82].mxu0  ;;  %v4197_v14 = vpop.f32.mrb[83].mxu1 }
 0x3c3   : > { %v4905_v35 = vmax.f32 %v5586_v29, 0.0  ;;  %v5587_v44 = vadd.f32 %v4773_v11, %v4195_v41  ;;  %v4775_v2 = vpop.f32.mrb[83].mxu0 }
 0x3c5   : > { %4969 = vst [vmem:[%s8302_s15 + $0x140] sm:$0xff] %v4905_v35  ;;  %v4906_v15 = vmax.f32 %v5587_v44, 0.0 }
 0x3c7   : > { %4970 = vst [vmem:[%s8302_s15 + $0x148] sm:$0xff] %v4906_v15  ;;  %v4200_v16 = vpop.f32.mrb[84].mxu1 }
 0x3c8   : > { %v4778_v38 = vpop.f32.mrb[84].mxu0  ;;  %v4202_v52 = vpop.f32.mrb[85].mxu1 }
 0x3c9   : > { %v5588_v17 = vadd.f32 %v4778_v38, %v4200_v16  ;;  %v4780_v20 = vpop.f32.mrb[85].mxu0  ;;  %v4203_v57 = vpop.f32.mrb[86].mxu1 }
 0x3ca   : > { %v4781_v5 = vpop.f32.mrb[86].mxu0  ;;  %v4205_v32 = vpop.f32.mrb[87].mxu1 }
 0x3cb   : > { %v4907_v22 = vmax.f32 %v5588_v17, 0.0  ;;  %v5589_v24 = vadd.f32 %v4781_v5, %v4203_v57  ;;  %v4783_v25 = vpop.f32.mrb[87].mxu0 }
 0x3cd   : > { %4971 = vst [vmem:[%s8302_s15 + $0x150] sm:$0xff] %v4907_v22  ;;  %v4908_v45 = vmax.f32 %v5589_v24, 0.0 }
 0x3cf   : > { %4972 = vst [vmem:[%s8302_s15 + $0x158] sm:$0xff] %v4908_v45  ;;  %v4208_v3 = vpop.f32.mrb[88].mxu1 }
 0x3d0   : > { %v4786_v27 = vpop.f32.mrb[88].mxu0  ;;  %v4210_v28 = vpop.f32.mrb[89].mxu1 }
 0x3d1   : > { %v5590_v7 = vadd.f32 %v4786_v27, %v4208_v3  ;;  %v4788_v31 = vpop.f32.mrb[89].mxu0  ;;  %v4211_v51 = vpop.f32.mrb[90].mxu1 }
 0x3d2   : > { %v4789_v10 = vpop.f32.mrb[90].mxu0  ;;  %v4213_v33 = vpop.f32.mrb[91].mxu1 }
 0x3d3   : > { %v4909_v36 = vmax.f32 %v5590_v7, 0.0  ;;  %v5591_v55 = vadd.f32 %v4789_v10, %v4211_v51  ;;  %v4791_v50 = vpop.f32.mrb[91].mxu0 }
 0x3d5   : > { %4973 = vst [vmem:[%s8302_s15 + $0x160] sm:$0xff] %v4909_v36  ;;  %v4910_v37 = vmax.f32 %v5591_v55, 0.0 }
 0x3d7   : > { %4974 = vst [vmem:[%s8302_s15 + $0x168] sm:$0xff] %v4910_v37  ;;  %v4216_v13 = vpop.f32.mrb[92].mxu1 }
 0x3d8   : > { %v4794_v62 = vpop.f32.mrb[92].mxu0  ;;  %v4218_v39 = vpop.f32.mrb[93].mxu1 }
 0x3d9   : > { %v5592_v53 = vadd.f32 %v4794_v62, %v4216_v13  ;;  %v4796_v40 = vpop.f32.mrb[93].mxu0  ;;  %v4219_v1 = vpop.f32.mrb[94].mxu1 }
 0x3da   : > { %v4797_v42 = vpop.f32.mrb[94].mxu0  ;;  %v4221_v43 = vpop.f32.mrb[95].mxu1 }
 0x3db   : > { %v4911_v46 = vmax.f32 %v5592_v53, 0.0  ;;  %v5593_v8 = vadd.f32 %v4797_v42, %v4219_v1  ;;  %v4799_v18 = vpop.f32.mrb[95].mxu0 }
 0x3dd   : > { %4975 = vst [vmem:[%s8302_s15 + $0x170] sm:$0xff] %v4911_v46  ;;  %v4912_v47 = vmax.f32 %v5593_v8, 0.0 }
 0x3df   : > { %4976 = vst [vmem:[%s8302_s15 + $0x178] sm:$0xff] %v4912_v47  ;;  %v4224_v48 = vpop.f32.mrb[96].mxu1 }
 0x3e0   : > { %v4802_v12 = vpop.f32.mrb[96].mxu0  ;;  %v4226_v49 = vpop.f32.mrb[97].mxu1 }
 0x3e1   : > { %v5594_v54 = vadd.f32 %v4802_v12, %v4224_v48  ;;  %v4804_v58 = vpop.f32.mrb[97].mxu0  ;;  %v4227_v19 = vpop.f32.mrb[98].mxu1 }
 0x3e2   : > { %v4805_v21 = vpop.f32.mrb[98].mxu0  ;;  %v4229_v56 = vpop.f32.mrb[99].mxu1 }
 0x3e3   : > { %v4913_v59 = vmax.f32 %v5594_v54, 0.0  ;;  %v5595_v23 = vadd.f32 %v4805_v21, %v4227_v19  ;;  %v4807_v60 = vpop.f32.mrb[99].mxu0 }
 0x3e5   : > { %4977 = vst [vmem:[%s8302_s15 + $0x180] sm:$0xff] %v4913_v59  ;;  %v4914_v63 = vmax.f32 %v5595_v23, 0.0 }
 0x3e7   : > { %4978 = vst [vmem:[%s8302_s15 + $0x188] sm:$0xff] %v4914_v63  ;;  %v4232_v61 = vpop.f32.mrb[100].mxu1 }
 0x3e8   : > { %v4810_v30 = vpop.f32.mrb[100].mxu0  ;;  %v4234_v26 = vpop.f32.mrb[101].mxu1 }
 0x3e9   : > { %v5596_v0 = vadd.f32 %v4810_v30, %v4232_v61  ;;  %v4812_v4 = vpop.f32.mrb[101].mxu0  ;;  %v4235_v34 = vpop.f32.mrb[102].mxu1 }
 0x3ea   : > { %v4813_v6 = vpop.f32.mrb[102].mxu0  ;;  %v4237_v29 = vpop.f32.mrb[103].mxu1 }
 0x3eb   : > { %v4915_v9 = vmax.f32 %v5596_v0, 0.0  ;;  %v5597_v41 = vadd.f32 %v4813_v6, %v4235_v34  ;;  %v4815_v11 = vpop.f32.mrb[103].mxu0 }
 0x3ed   : > { %4979 = vst [vmem:[%s8302_s15 + $0x190] sm:$0xff] %v4915_v9  ;;  %v4916_v14 = vmax.f32 %v5597_v41, 0.0 }
 0x3ef   : > { %4980 = vst [vmem:[%s8302_s15 + $0x198] sm:$0xff] %v4916_v14  ;;  %v4240_v35 = vpop.f32.mrb[104].mxu1 }
 0x3f0   : > { %v4818_v44 = vpop.f32.mrb[104].mxu0  ;;  %v4242_v2 = vpop.f32.mrb[105].mxu1 }
 0x3f1   : > { %v5598_v15 = vadd.f32 %v4818_v44, %v4240_v35  ;;  %v4820_v16 = vpop.f32.mrb[105].mxu0  ;;  %v4243_v38 = vpop.f32.mrb[106].mxu1 }
 0x3f2   : > { %v4821_v52 = vpop.f32.mrb[106].mxu0  ;;  %v4245_v17 = vpop.f32.mrb[107].mxu1 }
 0x3f3   : > { %v4917_v20 = vmax.f32 %v5598_v15, 0.0  ;;  %v5599_v57 = vadd.f32 %v4821_v52, %v4243_v38  ;;  %v4823_v5 = vpop.f32.mrb[107].mxu0 }
 0x3f5   : > { %4981 = vst [vmem:[%s8302_s15 + $0x1a0] sm:$0xff] %v4917_v20  ;;  %v4918_v32 = vmax.f32 %v5599_v57, 0.0 }
 0x3f7   : > { %4982 = vst [vmem:[%s8302_s15 + $0x1a8] sm:$0xff] %v4918_v32  ;;  %v4248_v22 = vpop.f32.mrb[108].mxu1 }
 0x3f8   : > { %v4826_v24 = vpop.f32.mrb[108].mxu0  ;;  %v4250_v25 = vpop.f32.mrb[109].mxu1 }
 0x3f9   : > { %v5600_v45 = vadd.f32 %v4826_v24, %v4248_v22  ;;  %v4828_v3 = vpop.f32.mrb[109].mxu0  ;;  %v4251_v27 = vpop.f32.mrb[110].mxu1 }
 0x3fa   : > { %v4829_v28 = vpop.f32.mrb[110].mxu0  ;;  %v4253_v7 = vpop.f32.mrb[111].mxu1 }
 0x3fb   : > { %v4919_v31 = vmax.f32 %v5600_v45, 0.0  ;;  %v5601_v51 = vadd.f32 %v4829_v28, %v4251_v27  ;;  %v4831_v10 = vpop.f32.mrb[111].mxu0 }
 0x3fd   : > { %4983 = vst [vmem:[%s8302_s15 + $0x1b0] sm:$0xff] %v4919_v31  ;;  %v4920_v33 = vmax.f32 %v5601_v51, 0.0 }
 0x3ff   : > { %4984 = vst [vmem:[%s8302_s15 + $0x1b8] sm:$0xff] %v4920_v33  ;;  %v4256_v36 = vpop.f32.mrb[112].mxu1 }
 0x400   : > { %v4834_v55 = vpop.f32.mrb[112].mxu0  ;;  %v4258_v50 = vpop.f32.mrb[113].mxu1 }
 0x401   : > { %v5602_v37 = vadd.f32 %v4834_v55, %v4256_v36  ;;  %v4836_v13 = vpop.f32.mrb[113].mxu0  ;;  %v4259_v62 = vpop.f32.mrb[114].mxu1 }
 0x402   : > { %v4837_v39 = vpop.f32.mrb[114].mxu0  ;;  %v4261_v53 = vpop.f32.mrb[115].mxu1 }
 0x403   : > { %v4921_v40 = vmax.f32 %v5602_v37, 0.0  ;;  %v5603_v1 = vadd.f32 %v4837_v39, %v4259_v62  ;;  %v4839_v42 = vpop.f32.mrb[115].mxu0 }
 0x405   : > { %4985 = vst [vmem:[%s8302_s15 + $0x1c0] sm:$0xff] %v4921_v40  ;;  %v4922_v43 = vmax.f32 %v5603_v1, 0.0 }
 0x407   : > { %4986 = vst [vmem:[%s8302_s15 + $0x1c8] sm:$0xff] %v4922_v43  ;;  %v4264_v46 = vpop.f32.mrb[116].mxu1 }
 0x408   : > { %v4842_v8 = vpop.f32.mrb[116].mxu0  ;;  %v4266_v18 = vpop.f32.mrb[117].mxu1 }
 0x409   : > { %v5604_v47 = vadd.f32 %v4842_v8, %v4264_v46  ;;  %v4844_v48 = vpop.f32.mrb[117].mxu0  ;;  %v4267_v12 = vpop.f32.mrb[118].mxu1 }
 0x40a   : > { %v4845_v49 = vpop.f32.mrb[118].mxu0  ;;  %v4269_v54 = vpop.f32.mrb[119].mxu1 }
 0x40b   : > { %v4923_v58 = vmax.f32 %v5604_v47, 0.0  ;;  %v5605_v19 = vadd.f32 %v4845_v49, %v4267_v12  ;;  %v4847_v21 = vpop.f32.mrb[119].mxu0 }
 0x40d   : > { %4987 = vst [vmem:[%s8302_s15 + $0x1d0] sm:$0xff] %v4923_v58  ;;  %v4924_v56 = vmax.f32 %v5605_v19, 0.0 }
 0x40f   : > { %4988 = vst [vmem:[%s8302_s15 + $0x1d8] sm:$0xff] %v4924_v56  ;;  %v4272_v59 = vpop.f32.mrb[120].mxu1 }
 0x410   : > { %v4850_v23 = vpop.f32.mrb[120].mxu0  ;;  %v4274_v60 = vpop.f32.mrb[121].mxu1 }
 0x411   : > { %v5606_v63 = vadd.f32 %v4850_v23, %v4272_v59  ;;  %v4852_v61 = vpop.f32.mrb[121].mxu0  ;;  %v4275_v30 = vpop.f32.mrb[122].mxu1 }
 0x412   : > { %v4853_v26 = vpop.f32.mrb[122].mxu0  ;;  %v4277_v0 = vpop.f32.mrb[123].mxu1 }
 0x413   : > { %v4925_v4 = vmax.f32 %v5606_v63, 0.0  ;;  %v5607_v34 = vadd.f32 %v4853_v26, %v4275_v30  ;;  %v4855_v6 = vpop.f32.mrb[123].mxu0 }
 0x415   : > { %4989 = vst [vmem:[%s8302_s15 + $0x1e0] sm:$0xff] %v4925_v4  ;;  %v4926_v29 = vmax.f32 %v5607_v34, 0.0 }
 0x417   : > { %4990 = vst [vmem:[%s8302_s15 + $0x1e8] sm:$0xff] %v4926_v29  ;;  %v4280_v9 = vpop.f32.mrb[124].mxu1 }
 0x418   : > { %v4858_v41 = vpop.f32.mrb[124].mxu0  ;;  %v4282_v11 = vpop.f32.mrb[125].mxu1 }
 0x419   : > { %v5608_v14 = vadd.f32 %v4858_v41, %v4280_v9  ;;  %v4860_v35 = vpop.f32.mrb[125].mxu0  ;;  %v4283_v44 = vpop.f32.mrb[126].mxu1 }
 0x41a   : > { %v4861_v2 = vpop.f32.mrb[126].mxu0  ;;  %v4285_v15 = vpop.f32.mrb[127].mxu1 }
 0x41b   : > { %v4927_v16 = vmax.f32 %v5608_v14, 0.0  ;;  %v5609_v38 = vadd.f32 %v4861_v2, %v4283_v44  ;;  %v4863_v52 = vpop.f32.mrb[127].mxu0 }
 0x41d   : > { %4991 = vst [vmem:[%s8302_s15 + $0x1f0] sm:$0xff] %v4927_v16  ;;  %v4928_v17 = vmax.f32 %v5609_v38, 0.0 }
 0x41f   : > { %4992 = vst [vmem:[%s8302_s15 + $0x1f8] sm:$0xff] %v4928_v17 }
 0x420   : > { %6644 = shalt.err (!%p6641_p7)
}
 0x421   : > { %s6645_s15 = scalar_lea.hbm %s8443_s16, 8192  ;;  %s6649_s27 = scalar_lea.hbm %s8498_s2, 16384 }
 0x422   : > { %p6646_p8 = scmp.ne.s32.totalorder %s8443_s16, %s6645_s15  ;;  %p6650_p13 = scmp.lt.u32.totalorder %s8443_s16, %s8498_s2 }
 0x423   : > { %p6651_p0 = scmp.lt.u32.totalorder %s6649_s27, %s6645_s15  ;;  %p6653_p2 = scmp.lt.u32.totalorder %s6645_s15, %s8443_s16 }
 0x424   : > { %p6647_p11 = pnand %p6646_p8, %p6770_p5 }
 0x425   : > { %p6652_p1 = por %p6651_p0, %p6650_p13 }
 0x426   : > { %p6648_p12 = pneg %p6647_p11 }
 0x427   : > { %p6654_p3 = por %p6653_p2, %p6652_p1 }
 0x429   : > { %p6655_p4 = pnand %p6654_p3, %p6648_p12 }
 0x42b   : > { %6658 = shalt.err (!%p6655_p4)
}
 0x42c   : > { %s6713_s3 = smov 128   ;;  %s6714_s4 = smov 256  }
 0x42d   : > { %s6715_s5 = smov 8  }
 0x42e   : > { %5996 = dma.vmem_to_hbm [thread:$0]  (%p6770_p5), %s8445_s6, 8192, %s8443_s16, %s4994_s12, %s6713_s3, %s6714_s4, %s6715_s5  }
 0x42f PF: > { %s5024_s7 = sand.u32 1, %s6689_s9   ;;  %p5999_p6 = pnand %p5106_p10, %p6781_p9 }
 0x430   : > { %s5025_s8 = scalar_lea.sflag [#allocation4], %s5024_s7 }
 0x431   : > { %6684 = dma.done.wait (!%p5999_p6), %s5025_s8, 8192  }
 0x432   : > { %6686 = vsyncadd (!%p5999_p6), %s5025_s8, 4294959104  ;;  %s15_s14 = sadd.s32 1, %s6709_s14   ;;  %s8501_s9 = smov %s6693_s10 }
 0x433   : > { %p12_p7 = scmp.ge.s32.totalorder %s15_s14, 4   ;;  %s8502_s10 = smov %s6697_s11 }
 0x434   : > { %s8503_s11 = smov %s6779_s21  ;;  %s8504_s12 = smov %s6705_s13 }
 0x435   : > { %s8505_s13 = smov %s8507_s17  ;;  %14 = sbr.rel (!%p12_p7) target bundleno = 4 (0x4), region = 112 }
 0x43c   :  { %5030 = vsyncpa [#allocation4], 1 }
 0x43d   :  { %5032 = vsyncpa [#allocation4 + $0x1], 1 }

</bundles_post_ra>
